<compile_context>
chip_gen: v7x
topology: tpu7x:2x2x1
jax: 0.10.0
libtpu: 0.0.40
codegen_flags: <defaults>
</compile_context>

<pallas_src>
import functools

import jax
import jax.numpy as jnp
from jax import lax
from jax.experimental import pallas as pl
from jax.experimental.pallas import tpu as pltpu


_EPS = 1e-5
_VMEM_LIMIT = 32 * 1024 * 1024        # explicit scoped-VMEM budget (ample headroom)

# bf16 x bf16 -> f32 dots are what we want on the TPU MXU.  The CPU interpret
# path used by the sandbox does not implement that dot thunk, so there the
# (VMEM-resident) operands are upcast to f32 just before the dot.
_UPCAST_DOT = jax.default_backend() != "tpu"


def _maybe_f32(x):
    return x.astype(jnp.float32) if _UPCAST_DOT else x


# ----------------------------------------------------------------------------
# Fused epilogue: grouped train-mode BatchNorm + activation (all f32).
# Column j of `acc` belongs to channel j % (N // groups); statistics are
# reduced over the M rows AND folded over the `groups` column groups, i.e. they
# are exactly per-channel BatchNorm2d batch statistics (biased variance, as
# PyTorch uses for train-mode normalization).
# ----------------------------------------------------------------------------
def _bn_act(acc, gamma, beta, *, groups, act, eps):
    if gamma is not None:
        m, ntot = acc.shape
        c = ntot // groups
        inv_count = 1.0 / float(m * groups)

        def fold(row):                       # (1, ntot) -> (1, c)
            if groups == 1:
                return row
            return sum(row[:, g * c:(g + 1) * c] for g in range(groups))

        def tile(row):                       # (1, c) -> (1, ntot)
            return jnp.tile(row, (1, groups)) if groups > 1 else row

        mean = fold(jnp.sum(acc, axis=0, keepdims=True)) * inv_count
        xc = acc - tile(mean)
        var = fold(jnp.sum(xc * xc, axis=0, keepdims=True)) * inv_count
        scale = gamma * lax.rsqrt(var + eps)                     # EUP rsqrt
        acc = xc * tile(scale) + tile(beta)

    if act == "relu":
        acc = jnp.maximum(acc, 0.0)
    elif act == "tanh":
        acc = jnp.tanh(acc)                                      # EUP
    return acc


# ----------------------------------------------------------------------------
# Kernel 1: plain GEMM + bias + grouped BN + ReLU (layer 1: both 1x1-input
# deconvs, their BatchNorms, the ReLU and the channel concat as ONE GEMM).
# ----------------------------------------------------------------------------
def _gemm_bn_act_kernel(a_ref, b_ref, bias_ref, gamma_ref, beta_ref, o_ref, *,
                        groups, act, eps):
    acc = jnp.dot(_maybe_f32(a_ref[...]), _maybe_f32(b_ref[...]),
                  preferred_element_type=jnp.float32)
    acc = acc + bias_ref[...]
    acc = _bn_act(acc, gamma_ref[...], beta_ref[...],
                  groups=groups, act=act, eps=eps)
    o_ref[...] = acc.astype(o_ref.dtype)


# ----------------------------------------------------------------------------
# Kernel 2: stride-2 ConvTranspose2d(k=4, p=1) via sub-pixel phase
# decomposition with IN-KERNEL tap accumulation:
#   out[n, 2q+ph, 2r+pw, co] = sum_{dh,dw<3} xpad[n, q+dh, r+dw, :] . W[ph,pw,dh,dw]
# with W[ph,pw,dh,dw][ci,co] = w[ci, co, ph+3-2*dh, pw+3-2*dw] (0 if OOR).
# The padded input is read from HBM once (no 9x im2col duplication); the four
# output phases are stacked on the N axis (4*Cout lanes), then BN + act.
# ----------------------------------------------------------------------------
def _deconv_taps_kernel(*refs, bn, act, eps):
    if bn:
        x_ref, b_ref, bias_ref, gamma_ref, beta_ref, o_ref = refs
        gamma, beta = gamma_ref[...], beta_ref[...]
    else:
        x_ref, b_ref, bias_ref, o_ref = refs
        gamma = beta = None

    n, hp, wp, cin = x_ref.shape
    h, w = hp - 2, wp - 2
    m = n * h * w
    nphc = b_ref.shape[1]                       # 4 * cout (phase-major columns)

    acc = jnp.zeros((m, nphc), jnp.float32)
    for dh in range(3):
        for dw in range(3):
            t = dh * 3 + dw
            win = x_ref[:, dh:dh + h, dw:dw + w, :]          # (n, h, w, cin)
            win = _maybe_f32(win).reshape(m, cin)
            wt = _maybe_f32(b_ref[t * cin:(t + 1) * cin, :])  # (cin, 4*cout)
            acc = acc + jnp.dot(win, wt, preferred_element_type=jnp.float32)

    acc = acc + bias_ref[...]
    acc = _bn_act(acc, gamma, beta, groups=4, act=act, eps=eps)
    o_ref[...] = acc.astype(o_ref.dtype)


# ----------------------------------------------------------------------------
# Single-block pallas_call helper (whole layer in one VMEM block; the network
# is launch/HBM-round-trip bound at these sizes).
# ----------------------------------------------------------------------------
def _one_block_call(kernel, operands, out_shape, out_dtype, *, flops,
                    transcendentals=0):
    out_struct = jax.ShapeDtypeStruct(out_shape, out_dtype)
    bytes_accessed = int(sum(o.size * o.dtype.itemsize for o in operands)
                         + out_struct.size * jnp.dtype(out_dtype).itemsize)

    def full_spec(x):
        nd = len(x.shape)
        return pl.BlockSpec(x.shape, lambda i, _nd=nd: (0,) * _nd)

    return pl.pallas_call(
        kernel,
        out_shape=out_struct,
        grid=(1,),
        in_specs=[full_spec(o) for o in operands],
        out_specs=full_spec(out_struct),
        compiler_params=pltpu.CompilerParams(
            dimension_semantics=("arbitrary",),
            vmem_limit_bytes=_VMEM_LIMIT),
        cost_estimate=pl.CostEstimate(flops=int(flops),
                                      transcendentals=int(transcendentals),
                                      bytes_accessed=bytes_accessed),
    )(*operands)


# ----------------------------------------------------------------------------
# One-time weight packing (hoisted out of the forward).
# ----------------------------------------------------------------------------
def _layer1_weight(w1, w2):
    # ConvTranspose(k=4, s=1, p=0) on a 1x1 input is a plain GEMM; both
    # branches + channel concat collapse into one block-diagonal weight with
    # columns ordered (oh, ow, channel[x-branch | y-branch]).
    cin1, cout, k, _ = w1.shape
    cin2 = w2.shape[0]
    z1 = jnp.zeros((cin1, cout), w1.dtype)
    z2 = jnp.zeros((cin2, cout), w2.dtype)
    cols = []
    for oh in range(k):
        for ow in range(k):
            top = jnp.concatenate([w1[:, :, oh, ow], z1], axis=1)
            bot = jnp.concatenate([z2, w2[:, :, oh, ow]], axis=1)
            cols.append(jnp.concatenate([top, bot], axis=0))
    return jnp.concatenate(cols, axis=1)              # (cin1+cin2, k*k*2*cout)


def _phase_weight(w_t):
    cin, cout, k, _ = w_t.shape
    assert k == 4, "phase decomposition assumes kernel=4, stride=2, pad=1"
    zeros = jnp.zeros((cin, cout), w_t.dtype)
    rows = []
    for dh in range(3):
        for dw in range(3):
            phase_cols = []
            for ph in range(2):
                for pw in range(2):
                    th, tw = ph + 3 - 2 * dh, pw + 3 - 2 * dw
                    ok = (0 <= th < k) and (0 <= tw < k)
                    phase_cols.append(w_t[:, :, th, tw] if ok else zeros)
            rows.append(jnp.concatenate(phase_cols, axis=1))   # (cin, 4*cout)
    return jnp.concatenate(rows, axis=0)                       # (9*cin, 4*cout)


def pack_params(params):
    """Precompute packed bf16 weights / bias rows / gamma-beta rows once."""
    k = params["w1_1"].shape[-1]
    assert k == 4
    b1 = _layer1_weight(params["w1_1"], params["w1_2"])        # (110, k*k*2*d2)
    kpad = 128                                                 # pad ragged K 110 -> 128
    b1 = jnp.pad(b1, ((0, kpad - b1.shape[0]), (0, 0)))
    packed = {
        "w1": b1.astype(jnp.bfloat16),
        "bias1": jnp.tile(jnp.concatenate([params["b1_1"], params["b1_2"]])[None, :],
                          (1, k * k)).astype(jnp.float32),
        "gamma1": jnp.concatenate([params["g1_1"], params["g1_2"]]
                                  ).reshape(1, -1).astype(jnp.float32),
        "beta1": jnp.concatenate([params["be1_1"], params["be1_2"]]
                                 ).reshape(1, -1).astype(jnp.float32),
    }
    for i in (2, 3, 4):
        packed[f"w{i}"] = _phase_weight(params[f"w{i}"]).astype(jnp.bfloat16)
        packed[f"bias{i}"] = jnp.tile(params[f"b{i}"][None, :],
                                      (1, 4)).astype(jnp.float32)
    for i in (2, 3):
        packed[f"gamma{i}"] = params[f"g{i}"].reshape(1, -1).astype(jnp.float32)
        packed[f"beta{i}"] = params[f"be{i}"].reshape(1, -1).astype(jnp.float32)
    return packed


# ----------------------------------------------------------------------------
# Forward (training-mode BatchNorm, like the PyTorch module default).
# Activations are NHWC bf16 internally; public I/O is NCHW f32.
# ----------------------------------------------------------------------------
def _deconv_layer(x_nhwc, wmat, bias_row, gamma=None, beta=None, *, act,
                  out_dtype):
    n, h, w, cin = x_nhwc.shape
    cout = wmat.shape[1] // 4
    xpad = jnp.pad(x_nhwc, ((0, 0), (1, 1), (1, 1), (0, 0)))
    bn = gamma is not None
    operands = [xpad, wmat, bias_row] + ([gamma, beta] if bn else [])
    kernel = functools.partial(_deconv_taps_kernel, bn=bn, act=act, eps=_EPS)
    m = n * h * w
    y = _one_block_call(
        kernel, operands, (m, 4 * cout), out_dtype,
        flops=2 * m * (9 * cin) * (4 * cout),
        transcendentals=(m * 4 * cout) if act == "tanh" else 0)
    # phase de-interleave: (n, q, r, ph, pw, co) -> (n, 2q+ph, 2r+pw, co)
    # TODO(synk): fold this transpose into the next layer's indexing / fuse
    # adjacent layers into one pallas_call to drop the HBM round trip.
    y = y.reshape(n, h, w, 2, 2, cout).transpose(0, 1, 3, 2, 4, 5)
    return y.reshape(n, 2 * h, 2 * w, cout)


def generator_forward(packed, inp_nchw, label_nchw):
    n = inp_nchw.shape[0]
    kpad = packed["w1"].shape[0]                 # 128 (padded K)
    n1 = packed["w1"].shape[1]                   # k*k*2*d2
    c1 = packed["gamma1"].shape[1]               # 2*d2 channels after concat
    groups1 = n1 // c1                           # k*k = 16

    # ---- layer 1: both 1x1 deconvs + BN + ReLU + concat as one fused GEMM ----
    a1 = jnp.concatenate([inp_nchw.reshape(n, -1),
                          label_nchw.reshape(n, -1)], axis=1)   # (n, 110)
    a1 = jnp.pad(a1, ((0, 0), (0, kpad - a1.shape[1]))).astype(jnp.bfloat16)
    kernel1 = functools.partial(_gemm_bn_act_kernel, groups=groups1,
                                act="relu", eps=_EPS)
    x = _one_block_call(
        kernel1,
        [a1, packed["w1"], packed["bias1"], packed["gamma1"], packed["beta1"]],
        (n, n1), jnp.bfloat16, flops=2 * n * kpad * n1)
    x = x.reshape(n, 4, 4, c1)                   # NHWC, channels = [x | y]

    # ---- layers 2, 3: stride-2 deconv + BN + ReLU (fused, in-kernel taps) ----
    x = _deconv_layer(x, packed["w2"], packed["bias2"], packed["gamma2"],
                      packed["beta2"], act="relu", out_dtype=jnp.bfloat16)
    x = _deconv_layer(x, packed["w3"], packed["bias3"], packed["gamma3"],
                      packed["beta3"], act="relu", out_dtype=jnp.bfloat16)

    # ---- layer 4: stride-2 deconv + tanh ----
    x = _deconv_layer(x, packed["w4"], packed["bias4"], act="tanh",
                      out_dtype=jnp.float32)     # (n, 32, 32, 1) NHWC
    return jnp.transpose(x, (0, 3, 1, 2))        # -> NCHW


# ----------------------------------------------------------------------------
# Pure-JAX reference (NCHW, f32 HIGHEST) for the correctness smoke check.
# ----------------------------------------------------------------------------
def _conv_transpose_ref(x_nchw, w_t, bias, stride, pad):
    k = w_t.shape[2]
    rhs = jnp.transpose(w_t[:, :, ::-1, ::-1], (1, 0, 2, 3))    # (Cout, Cin, k, k)
    out = lax.conv_general_dilated(
        x_nchw, rhs, window_strides=(1, 1),
        padding=[(k - 1 - pad, k - 1 - pad)] * 2,
        lhs_dilation=(stride, stride),
        dimension_numbers=("NCHW", "OIHW", "NCHW"),
        precision=lax.Precision.HIGHEST)
    return out + bias.reshape(1, -1, 1, 1)


def _bn_relu_ref(x, gamma, beta, eps=_EPS):
    mean = jnp.mean(x, axis=(0, 2, 3), keepdims=True)
    var = jnp.mean(jnp.square(x - mean), axis=(0, 2, 3), keepdims=True)
    xh = (x - mean) * lax.rsqrt(var + eps)
    return jnp.maximum(xh * gamma.reshape(1, -1, 1, 1) + beta.reshape(1, -1, 1, 1), 0.0)


def generator_ref(params, inp, label):
    x = _bn_relu_ref(_conv_transpose_ref(inp, params["w1_1"], params["b1_1"], 1, 0),
                     params["g1_1"], params["be1_1"])
    y = _bn_relu_ref(_conv_transpose_ref(label, params["w1_2"], params["b1_2"], 1, 0),
                     params["g1_2"], params["be1_2"])
    x = jnp.concatenate([x, y], axis=1)
    x = _bn_relu_ref(_conv_transpose_ref(x, params["w2"], params["b2"], 2, 1),
                     params["g2"], params["be2"])
    x = _bn_relu_ref(_conv_transpose_ref(x, params["w3"], params["b3"], 2, 1),
                     params["g3"], params["be3"])
    return jnp.tanh(_conv_transpose_ref(x, params["w4"], params["b4"], 2, 1))


# ----------------------------------------------------------------------------
if __name__ == "__main__":
    d = 32          # small width (PyTorch default is 128); channel topology preserved
    N = 2           # batch

    key = jax.random.PRNGKey(0)
    keys = jax.random.split(key, 24)

    def w_init(k, shape):
        return 0.02 * jax.random.normal(k, shape, jnp.float32)

    def b_init(k, n):
        return 0.01 * jax.random.normal(k, (n,), jnp.float32)

    params = {
        "w1_1": w_init(keys[0], (100, 2 * d, 4, 4)), "b1_1": b_init(keys[1], 2 * d),
        "w1_2": w_init(keys[2], (10, 2 * d, 4, 4)),  "b1_2": b_init(keys[3], 2 * d),
        "w2":   w_init(keys[4], (4 * d, 2 * d, 4, 4)), "b2": b_init(keys[5], 2 * d),
        "w3":   w_init(keys[6], (2 * d, d, 4, 4)),     "b3": b_init(keys[7], d),
        "w4":   w_init(keys[8], (d, 1, 4, 4)),         "b4": b_init(keys[9], 1),
        "g1_1": 1.0 + 0.1 * jax.random.normal(keys[10], (2 * d,), jnp.float32),
        "be1_1": 0.05 * jax.random.normal(keys[11], (2 * d,), jnp.float32),
        "g1_2": 1.0 + 0.1 * jax.random.normal(keys[12], (2 * d,), jnp.float32),
        "be1_2": 0.05 * jax.random.normal(keys[13], (2 * d,), jnp.float32),
        "g2": 1.0 + 0.1 * jax.random.normal(keys[14], (2 * d,), jnp.float32),
        "be2": 0.05 * jax.random.normal(keys[15], (2 * d,), jnp.float32),
        "g3": 1.0 + 0.1 * jax.random.normal(keys[16], (d,), jnp.float32),
        "be3": 0.05 * jax.random.normal(keys[17], (d,), jnp.float32),
    }

    inp = jax.random.normal(keys[18], (N, 100, 1, 1), jnp.float32)      # latent z
    label = jax.nn.one_hot(jnp.array([3, 7]), 10, dtype=jnp.float32)    # one-hot class
    label = label.reshape(N, 10, 1, 1)

    packed = pack_params(params)          # one-time packing + bf16 casts (hoisted)
    out = jax.jit(generator_forward)(packed, inp, label)
    out = jax.block_until_ready(out)

    assert out.shape == (N, 1, 32, 32), out.shape
    ref = generator_ref(params, inp, label)
    # bf16 weights / bf16 inter-layer activations with f32 accumulation and
    # epilogue -> slightly relaxed tolerance vs. the f32 HIGHEST reference.
    if not bool(jnp.allclose(out, ref, atol=4e-2, rtol=4e-2)):
        max_err = float(jnp.max(jnp.abs(out - ref)))
        raise RuntimeError(f"Pallas output mismatch vs reference, max_abs_err={max_err}")

    # TODO(synk): BatchNorm running_mean/running_var side-effect updates are not
    # modeled; normalization uses batch statistics exactly as the PyTorch
    # train-mode forward does.
    print("KERNEL_OK")
</pallas_src>

<mosaic_0001>
module attributes {stable_mosaic.version = 11 : i64} {
  func.func @_gemm_bn_act_kernel(%arg0: i32, %arg1: memref<2x128xbf16, #tpu.memory_space<vmem>>, %arg2: memref<128x2048xbf16, #tpu.memory_space<vmem>>, %arg3: memref<1x2048xf32, #tpu.memory_space<vmem>>, %arg4: memref<1x128xf32, #tpu.memory_space<vmem>>, %arg5: memref<1x128xf32, #tpu.memory_space<vmem>>, %arg6: memref<2x2048xbf16, #tpu.memory_space<vmem>>) attributes {dimension_semantics = [#tpu.dimension_semantics<arbitrary>], iteration_bounds = array<i64: 1>, scalar_prefetch = 0 : i64, scratch_operands = 0 : i64, tpu.core_type = #tpu.core_type<tc>, window_params = [{pipeline_mode = #tpu.pipeline_mode<synchronous>, transform_indices = @transform_0, window_bounds = array<i64: 2, 128>}, {pipeline_mode = #tpu.pipeline_mode<synchronous>, transform_indices = @transform_1, window_bounds = array<i64: 128, 2048>}, {pipeline_mode = #tpu.pipeline_mode<synchronous>, transform_indices = @transform_2, window_bounds = array<i64: 1, 2048>}, {pipeline_mode = #tpu.pipeline_mode<synchronous>, transform_indices = @transform_3, window_bounds = array<i64: 1, 128>}, {pipeline_mode = #tpu.pipeline_mode<synchronous>, transform_indices = @transform_4, window_bounds = array<i64: 1, 128>}, {pipeline_mode = #tpu.pipeline_mode<synchronous>, transform_indices = @transform_5, window_bounds = array<i64: 2, 2048>}]} {
    %c0 = arith.constant 0 : index
    %c0_0 = arith.constant 0 : index
    %0 = vector.load %arg1[%c0, %c0_0] : memref<2x128xbf16, #tpu.memory_space<vmem>>, vector<2x128xbf16>
    %1 = arith.extf %0 : vector<2x128xbf16> to vector<2x128xf32>
    %c0_1 = arith.constant 0 : index
    %c0_2 = arith.constant 0 : index
    %2 = vector.load %arg2[%c0_1, %c0_2] : memref<128x2048xbf16, #tpu.memory_space<vmem>>, vector<128x2048xbf16>
    %3 = arith.extf %2 : vector<128x2048xbf16> to vector<128x2048xf32>
    %cst = arith.constant dense<0.000000e+00> : vector<2x2048xf32>
    %4 = tpu.matmul %1, %3, %cst {dimension_numbers = #tpu.dot_dimension_numbers<[1], [0], [0], [1], [0, 0, 1, 1], [], []>} : vector<2x128xf32>, vector<128x2048xf32>, vector<2x2048xf32> -> vector<2x2048xf32>
    %c0_3 = arith.constant 0 : index
    %c0_4 = arith.constant 0 : index
    %5 = vector.load %arg3[%c0_3, %c0_4] : memref<1x2048xf32, #tpu.memory_space<vmem>>, vector<1x2048xf32>
    %6 = vector.broadcast %5 : vector<1x2048xf32> to vector<2x2048xf32>
    %7 = arith.addf %4, %6 : vector<2x2048xf32>
    %c0_5 = arith.constant 0 : index
    %c0_6 = arith.constant 0 : index
    %8 = vector.load %arg4[%c0_5, %c0_6] : memref<1x128xf32, #tpu.memory_space<vmem>>, vector<1x128xf32>
    %c0_7 = arith.constant 0 : index
    %c0_8 = arith.constant 0 : index
    %9 = vector.load %arg5[%c0_7, %c0_8] : memref<1x128xf32, #tpu.memory_space<vmem>>, vector<1x128xf32>
    %cst_9 = arith.constant dense<0.000000e+00> : vector<2048xf32>
    %10 = vector.multi_reduction <add>, %7, %cst_9 [0] : vector<2x2048xf32> to vector<2048xf32>
    %11 = vector.shape_cast %10 : vector<2048xf32> to vector<1x2048xf32>
    %12 = vector.extract_strided_slice %11 {offsets = [0, 0], sizes = [1, 128], strides = [1, 1]} : vector<1x2048xf32> to vector<1x128xf32>
    %cst_10 = arith.constant 0.000000e+00 : f32
    %13 = vector.broadcast %cst_10 : f32 to vector<1x128xf32>
    %14 = arith.addf %13, %12 : vector<1x128xf32>
    %15 = vector.extract_strided_slice %11 {offsets = [0, 128], sizes = [1, 128], strides = [1, 1]} : vector<1x2048xf32> to vector<1x128xf32>
    %16 = arith.addf %14, %15 : vector<1x128xf32>
    %17 = vector.extract_strided_slice %11 {offsets = [0, 256], sizes = [1, 128], strides = [1, 1]} : vector<1x2048xf32> to vector<1x128xf32>
    %18 = arith.addf %16, %17 : vector<1x128xf32>
    %19 = vector.extract_strided_slice %11 {offsets = [0, 384], sizes = [1, 128], strides = [1, 1]} : vector<1x2048xf32> to vector<1x128xf32>
    %20 = arith.addf %18, %19 : vector<1x128xf32>
    %21 = vector.extract_strided_slice %11 {offsets = [0, 512], sizes = [1, 128], strides = [1, 1]} : vector<1x2048xf32> to vector<1x128xf32>
    %22 = arith.addf %20, %21 : vector<1x128xf32>
    %23 = vector.extract_strided_slice %11 {offsets = [0, 640], sizes = [1, 128], strides = [1, 1]} : vector<1x2048xf32> to vector<1x128xf32>
    %24 = arith.addf %22, %23 : vector<1x128xf32>
    %25 = vector.extract_strided_slice %11 {offsets = [0, 768], sizes = [1, 128], strides = [1, 1]} : vector<1x2048xf32> to vector<1x128xf32>
    %26 = arith.addf %24, %25 : vector<1x128xf32>
    %27 = vector.extract_strided_slice %11 {offsets = [0, 896], sizes = [1, 128], strides = [1, 1]} : vector<1x2048xf32> to vector<1x128xf32>
    %28 = arith.addf %26, %27 : vector<1x128xf32>
    %29 = vector.extract_strided_slice %11 {offsets = [0, 1024], sizes = [1, 128], strides = [1, 1]} : vector<1x2048xf32> to vector<1x128xf32>
    %30 = arith.addf %28, %29 : vector<1x128xf32>
    %31 = vector.extract_strided_slice %11 {offsets = [0, 1152], sizes = [1, 128], strides = [1, 1]} : vector<1x2048xf32> to vector<1x128xf32>
    %32 = arith.addf %30, %31 : vector<1x128xf32>
    %33 = vector.extract_strided_slice %11 {offsets = [0, 1280], sizes = [1, 128], strides = [1, 1]} : vector<1x2048xf32> to vector<1x128xf32>
    %34 = arith.addf %32, %33 : vector<1x128xf32>
    %35 = vector.extract_strided_slice %11 {offsets = [0, 1408], sizes = [1, 128], strides = [1, 1]} : vector<1x2048xf32> to vector<1x128xf32>
    %36 = arith.addf %34, %35 : vector<1x128xf32>
    %37 = vector.extract_strided_slice %11 {offsets = [0, 1536], sizes = [1, 128], strides = [1, 1]} : vector<1x2048xf32> to vector<1x128xf32>
    %38 = arith.addf %36, %37 : vector<1x128xf32>
    %39 = vector.extract_strided_slice %11 {offsets = [0, 1664], sizes = [1, 128], strides = [1, 1]} : vector<1x2048xf32> to vector<1x128xf32>
    %40 = arith.addf %38, %39 : vector<1x128xf32>
    %41 = vector.extract_strided_slice %11 {offsets = [0, 1792], sizes = [1, 128], strides = [1, 1]} : vector<1x2048xf32> to vector<1x128xf32>
    %42 = arith.addf %40, %41 : vector<1x128xf32>
    %43 = vector.extract_strided_slice %11 {offsets = [0, 1920], sizes = [1, 128], strides = [1, 1]} : vector<1x2048xf32> to vector<1x128xf32>
    %44 = arith.addf %42, %43 : vector<1x128xf32>
    %cst_11 = arith.constant 3.125000e-02 : f32
    %45 = vector.broadcast %cst_11 : f32 to vector<1x128xf32>
    %46 = arith.mulf %44, %45 : vector<1x128xf32>
    %47 = tpu.concatenate %46, %46, %46, %46, %46, %46, %46, %46, %46, %46, %46, %46, %46, %46, %46, %46 in 1 : vector<1x128xf32>, vector<1x128xf32>, vector<1x128xf32>, vector<1x128xf32>, vector<1x128xf32>, vector<1x128xf32>, vector<1x128xf32>, vector<1x128xf32>, vector<1x128xf32>, vector<1x128xf32>, vector<1x128xf32>, vector<1x128xf32>, vector<1x128xf32>, vector<1x128xf32>, vector<1x128xf32>, vector<1x128xf32> -> vector<1x2048xf32>
    %48 = vector.broadcast %47 : vector<1x2048xf32> to vector<2x2048xf32>
    %49 = arith.subf %7, %48 : vector<2x2048xf32>
    %50 = arith.mulf %49, %49 : vector<2x2048xf32>
    %cst_12 = arith.constant dense<0.000000e+00> : vector<2048xf32>
    %51 = vector.multi_reduction <add>, %50, %cst_12 [0] : vector<2x2048xf32> to vector<2048xf32>
    %52 = vector.shape_cast %51 : vector<2048xf32> to vector<1x2048xf32>
    %53 = vector.extract_strided_slice %52 {offsets = [0, 0], sizes = [1, 128], strides = [1, 1]} : vector<1x2048xf32> to vector<1x128xf32>
    %cst_13 = arith.constant 0.000000e+00 : f32
    %54 = vector.broadcast %cst_13 : f32 to vector<1x128xf32>
    %55 = arith.addf %54, %53 : vector<1x128xf32>
    %56 = vector.extract_strided_slice %52 {offsets = [0, 128], sizes = [1, 128], strides = [1, 1]} : vector<1x2048xf32> to vector<1x128xf32>
    %57 = arith.addf %55, %56 : vector<1x128xf32>
    %58 = vector.extract_strided_slice %52 {offsets = [0, 256], sizes = [1, 128], strides = [1, 1]} : vector<1x2048xf32> to vector<1x128xf32>
    %59 = arith.addf %57, %58 : vector<1x128xf32>
    %60 = vector.extract_strided_slice %52 {offsets = [0, 384], sizes = [1, 128], strides = [1, 1]} : vector<1x2048xf32> to vector<1x128xf32>
    %61 = arith.addf %59, %60 : vector<1x128xf32>
    %62 = vector.extract_strided_slice %52 {offsets = [0, 512], sizes = [1, 128], strides = [1, 1]} : vector<1x2048xf32> to vector<1x128xf32>
    %63 = arith.addf %61, %62 : vector<1x128xf32>
    %64 = vector.extract_strided_slice %52 {offsets = [0, 640], sizes = [1, 128], strides = [1, 1]} : vector<1x2048xf32> to vector<1x128xf32>
    %65 = arith.addf %63, %64 : vector<1x128xf32>
    %66 = vector.extract_strided_slice %52 {offsets = [0, 768], sizes = [1, 128], strides = [1, 1]} : vector<1x2048xf32> to vector<1x128xf32>
    %67 = arith.addf %65, %66 : vector<1x128xf32>
    %68 = vector.extract_strided_slice %52 {offsets = [0, 896], sizes = [1, 128], strides = [1, 1]} : vector<1x2048xf32> to vector<1x128xf32>
    %69 = arith.addf %67, %68 : vector<1x128xf32>
    %70 = vector.extract_strided_slice %52 {offsets = [0, 1024], sizes = [1, 128], strides = [1, 1]} : vector<1x2048xf32> to vector<1x128xf32>
    %71 = arith.addf %69, %70 : vector<1x128xf32>
    %72 = vector.extract_strided_slice %52 {offsets = [0, 1152], sizes = [1, 128], strides = [1, 1]} : vector<1x2048xf32> to vector<1x128xf32>
    %73 = arith.addf %71, %72 : vector<1x128xf32>
    %74 = vector.extract_strided_slice %52 {offsets = [0, 1280], sizes = [1, 128], strides = [1, 1]} : vector<1x2048xf32> to vector<1x128xf32>
    %75 = arith.addf %73, %74 : vector<1x128xf32>
    %76 = vector.extract_strided_slice %52 {offsets = [0, 1408], sizes = [1, 128], strides = [1, 1]} : vector<1x2048xf32> to vector<1x128xf32>
    %77 = arith.addf %75, %76 : vector<1x128xf32>
    %78 = vector.extract_strided_slice %52 {offsets = [0, 1536], sizes = [1, 128], strides = [1, 1]} : vector<1x2048xf32> to vector<1x128xf32>
    %79 = arith.addf %77, %78 : vector<1x128xf32>
    %80 = vector.extract_strided_slice %52 {offsets = [0, 1664], sizes = [1, 128], strides = [1, 1]} : vector<1x2048xf32> to vector<1x128xf32>
    %81 = arith.addf %79, %80 : vector<1x128xf32>
    %82 = vector.extract_strided_slice %52 {offsets = [0, 1792], sizes = [1, 128], strides = [1, 1]} : vector<1x2048xf32> to vector<1x128xf32>
    %83 = arith.addf %81, %82 : vector<1x128xf32>
    %84 = vector.extract_strided_slice %52 {offsets = [0, 1920], sizes = [1, 128], strides = [1, 1]} : vector<1x2048xf32> to vector<1x128xf32>
    %85 = arith.addf %83, %84 : vector<1x128xf32>
    %cst_14 = arith.constant 3.125000e-02 : f32
    %86 = vector.broadcast %cst_14 : f32 to vector<1x128xf32>
    %87 = arith.mulf %85, %86 : vector<1x128xf32>
    %cst_15 = arith.constant 9.99999974E-6 : f32
    %88 = vector.broadcast %cst_15 : f32 to vector<1x128xf32>
    %89 = arith.addf %87, %88 : vector<1x128xf32>
    %90 = math.rsqrt %89 : vector<1x128xf32>
    %91 = arith.mulf %8, %90 : vector<1x128xf32>
    %92 = tpu.concatenate %91, %91, %91, %91, %91, %91, %91, %91, %91, %91, %91, %91, %91, %91, %91, %91 in 1 : vector<1x128xf32>, vector<1x128xf32>, vector<1x128xf32>, vector<1x128xf32>, vector<1x128xf32>, vector<1x128xf32>, vector<1x128xf32>, vector<1x128xf32>, vector<1x128xf32>, vector<1x128xf32>, vector<1x128xf32>, vector<1x128xf32>, vector<1x128xf32>, vector<1x128xf32>, vector<1x128xf32>, vector<1x128xf32> -> vector<1x2048xf32>
    %93 = vector.broadcast %92 : vector<1x2048xf32> to vector<2x2048xf32>
    %94 = arith.mulf %49, %93 : vector<2x2048xf32>
    %95 = tpu.concatenate %9, %9, %9, %9, %9, %9, %9, %9, %9, %9, %9, %9, %9, %9, %9, %9 in 1 : vector<1x128xf32>, vector<1x128xf32>, vector<1x128xf32>, vector<1x128xf32>, vector<1x128xf32>, vector<1x128xf32>, vector<1x128xf32>, vector<1x128xf32>, vector<1x128xf32>, vector<1x128xf32>, vector<1x128xf32>, vector<1x128xf32>, vector<1x128xf32>, vector<1x128xf32>, vector<1x128xf32>, vector<1x128xf32> -> vector<1x2048xf32>
    %96 = vector.broadcast %95 : vector<1x2048xf32> to vector<2x2048xf32>
    %97 = arith.addf %94, %96 : vector<2x2048xf32>
    %cst_16 = arith.constant 0.000000e+00 : f32
    %98 = vector.broadcast %cst_16 : f32 to vector<2x2048xf32>
    %99 = arith.maximumf %97, %98 : vector<2x2048xf32>
    %100 = arith.truncf %99 : vector<2x2048xf32> to vector<2x2048xbf16>
    %c0_17 = arith.constant 0 : index
    %c0_18 = arith.constant 0 : index
    %101 = vector.load %arg6[%c0_17, %c0_18] : memref<2x2048xbf16, #tpu.memory_space<vmem>>, vector<2x2048xbf16>
    tpu.vector_store %arg6[%c0_17, %c0_18], %100 {strides = array<i32>} : memref<2x2048xbf16, #tpu.memory_space<vmem>>, vector<2x2048xbf16>,
    return
  }
  func.func @transform_0(%arg0: i32) -> (i32, i32) {
    %c0_i32 = arith.constant 0 : i32
    %c0_i32_0 = arith.constant 0 : i32
    %c0_i32_1 = arith.constant 0 : i32
    return %c0_i32, %c0_i32_0 : i32, i32
  }
  func.func @transform_1(%arg0: i32) -> (i32, i32) {
    %c0_i32 = arith.constant 0 : i32
    %c0_i32_0 = arith.constant 0 : i32
    %c0_i32_1 = arith.constant 0 : i32
    return %c0_i32, %c0_i32_0 : i32, i32
  }
  func.func @transform_2(%arg0: i32) -> (i32, i32) {
    %c0_i32 = arith.constant 0 : i32
    %c0_i32_0 = arith.constant 0 : i32
    %c0_i32_1 = arith.constant 0 : i32
    return %c0_i32, %c0_i32_0 : i32, i32
  }
  func.func @transform_3(%arg0: i32) -> (i32, i32) {
    %c0_i32 = arith.constant 0 : i32
    %c0_i32_0 = arith.constant 0 : i32
    %c0_i32_1 = arith.constant 0 : i32
    return %c0_i32, %c0_i32_0 : i32, i32
  }
  func.func @transform_4(%arg0: i32) -> (i32, i32) {
    %c0_i32 = arith.constant 0 : i32
    %c0_i32_0 = arith.constant 0 : i32
    %c0_i32_1 = arith.constant 0 : i32
    return %c0_i32, %c0_i32_0 : i32, i32
  }
  func.func @transform_5(%arg0: i32) -> (i32, i32) {
    %c0_i32 = arith.constant 0 : i32
    %c0_i32_0 = arith.constant 0 : i32
    %c0_i32_1 = arith.constant 0 : i32
    return %c0_i32, %c0_i32_0 : i32, i32
  }
}

module attributes {stable_mosaic.version = 11 : i64} {
  func.func @_deconv_taps_kernel(%arg0: i32, %arg1: memref<2x6x6x128xbf16, #tpu.memory_space<vmem>>, %arg2: memref<1152x256xbf16, #tpu.memory_space<vmem>>, %arg3: memref<1x256xf32, #tpu.memory_space<vmem>>, %arg4: memref<1x64xf32, #tpu.memory_space<vmem>>, %arg5: memref<1x64xf32, #tpu.memory_space<vmem>>, %arg6: memref<32x256xbf16, #tpu.memory_space<vmem>>) attributes {dimension_semantics = [#tpu.dimension_semantics<arbitrary>], iteration_bounds = array<i64: 1>, scalar_prefetch = 0 : i64, scratch_operands = 0 : i64, tpu.core_type = #tpu.core_type<tc>, window_params = [{pipeline_mode = #tpu.pipeline_mode<synchronous>, transform_indices = @transform_0, window_bounds = array<i64: 2, 6, 6, 128>}, {pipeline_mode = #tpu.pipeline_mode<synchronous>, transform_indices = @transform_1, window_bounds = array<i64: 1152, 256>}, {pipeline_mode = #tpu.pipeline_mode<synchronous>, transform_indices = @transform_2, window_bounds = array<i64: 1, 256>}, {pipeline_mode = #tpu.pipeline_mode<synchronous>, transform_indices = @transform_3, window_bounds = array<i64: 1, 64>}, {pipeline_mode = #tpu.pipeline_mode<synchronous>, transform_indices = @transform_4, window_bounds = array<i64: 1, 64>}, {pipeline_mode = #tpu.pipeline_mode<synchronous>, transform_indices = @transform_5, window_bounds = array<i64: 32, 256>}]} {
    %c0 = arith.constant 0 : index
    %c0_0 = arith.constant 0 : index
    %0 = vector.load %arg4[%c0, %c0_0] : memref<1x64xf32, #tpu.memory_space<vmem>>, vector<1x64xf32>
    %c0_1 = arith.constant 0 : index
    %c0_2 = arith.constant 0 : index
    %1 = vector.load %arg5[%c0_1, %c0_2] : memref<1x64xf32, #tpu.memory_space<vmem>>, vector<1x64xf32>
    %cst = arith.constant 0.000000e+00 : f32
    %2 = vector.broadcast %cst : f32 to vector<32x256xf32>
    %c0_3 = arith.constant 0 : index
    %c0_4 = arith.constant 0 : index
    %c0_5 = arith.constant 0 : index
    %c0_6 = arith.constant 0 : index
    %3 = vector.load %arg1[%c0_3, %c0_4, %c0_5, %c0_6] : memref<2x6x6x128xbf16, #tpu.memory_space<vmem>>, vector<2x4x4x128xbf16>
    %4 = arith.extf %3 : vector<2x4x4x128xbf16> to vector<2x4x4x128xf32>
    %5 = vector.shape_cast %4 : vector<2x4x4x128xf32> to vector<32x128xf32>
    %c0_7 = arith.constant 0 : index
    %c0_8 = arith.constant 0 : index
    %6 = vector.load %arg2[%c0_7, %c0_8] : memref<1152x256xbf16, #tpu.memory_space<vmem>>, vector<128x256xbf16>
    %7 = arith.extf %6 : vector<128x256xbf16> to vector<128x256xf32>
    %cst_9 = arith.constant dense<0.000000e+00> : vector<32x256xf32>
    %8 = tpu.matmul %5, %7, %cst_9 {dimension_numbers = #tpu.dot_dimension_numbers<[1], [0], [0], [1], [0, 0, 1, 1], [], []>} : vector<32x128xf32>, vector<128x256xf32>, vector<32x256xf32> -> vector<32x256xf32>
    %9 = arith.addf %2, %8 : vector<32x256xf32>
    %c0_10 = arith.constant 0 : index
    %c0_11 = arith.constant 0 : index
    %c1 = arith.constant 1 : index
    %c0_12 = arith.constant 0 : index
    %10 = vector.load %arg1[%c0_10, %c0_11, %c1, %c0_12] : memref<2x6x6x128xbf16, #tpu.memory_space<vmem>>, vector<2x4x4x128xbf16>
    %11 = arith.extf %10 : vector<2x4x4x128xbf16> to vector<2x4x4x128xf32>
    %12 = vector.shape_cast %11 : vector<2x4x4x128xf32> to vector<32x128xf32>
    %c128 = arith.constant 128 : index
    %c0_13 = arith.constant 0 : index
    %13 = vector.load %arg2[%c128, %c0_13] : memref<1152x256xbf16, #tpu.memory_space<vmem>>, vector<128x256xbf16>
    %14 = arith.extf %13 : vector<128x256xbf16> to vector<128x256xf32>
    %cst_14 = arith.constant dense<0.000000e+00> : vector<32x256xf32>
    %15 = tpu.matmul %12, %14, %cst_14 {dimension_numbers = #tpu.dot_dimension_numbers<[1], [0], [0], [1], [0, 0, 1, 1], [], []>} : vector<32x128xf32>, vector<128x256xf32>, vector<32x256xf32> -> vector<32x256xf32>
    %16 = arith.addf %9, %15 : vector<32x256xf32>
    %c0_15 = arith.constant 0 : index
    %c0_16 = arith.constant 0 : index
    %c2 = arith.constant 2 : index
    %c0_17 = arith.constant 0 : index
    %17 = vector.load %arg1[%c0_15, %c0_16, %c2, %c0_17] : memref<2x6x6x128xbf16, #tpu.memory_space<vmem>>, vector<2x4x4x128xbf16>
    %18 = arith.extf %17 : vector<2x4x4x128xbf16> to vector<2x4x4x128xf32>
    %19 = vector.shape_cast %18 : vector<2x4x4x128xf32> to vector<32x128xf32>
    %c256 = arith.constant 256 : index
    %c0_18 = arith.constant 0 : index
    %20 = vector.load %arg2[%c256, %c0_18] : memref<1152x256xbf16, #tpu.memory_space<vmem>>, vector<128x256xbf16>
    %21 = arith.extf %20 : vector<128x256xbf16> to vector<128x256xf32>
    %cst_19 = arith.constant dense<0.000000e+00> : vector<32x256xf32>
    %22 = tpu.matmul %19, %21, %cst_19 {dimension_numbers = #tpu.dot_dimension_numbers<[1], [0], [0], [1], [0, 0, 1, 1], [], []>} : vector<32x128xf32>, vector<128x256xf32>, vector<32x256xf32> -> vector<32x256xf32>
    %23 = arith.addf %16, %22 : vector<32x256xf32>
    %c0_20 = arith.constant 0 : index
    %c1_21 = arith.constant 1 : index
    %c0_22 = arith.constant 0 : index
    %c0_23 = arith.constant 0 : index
    %24 = vector.load %arg1[%c0_20, %c1_21, %c0_22, %c0_23] : memref<2x6x6x128xbf16, #tpu.memory_space<vmem>>, vector<2x4x4x128xbf16>
    %25 = arith.extf %24 : vector<2x4x4x128xbf16> to vector<2x4x4x128xf32>
    %26 = vector.shape_cast %25 : vector<2x4x4x128xf32> to vector<32x128xf32>
    %c384 = arith.constant 384 : index
    %c0_24 = arith.constant 0 : index
    %27 = vector.load %arg2[%c384, %c0_24] : memref<1152x256xbf16, #tpu.memory_space<vmem>>, vector<128x256xbf16>
    %28 = arith.extf %27 : vector<128x256xbf16> to vector<128x256xf32>
    %cst_25 = arith.constant dense<0.000000e+00> : vector<32x256xf32>
    %29 = tpu.matmul %26, %28, %cst_25 {dimension_numbers = #tpu.dot_dimension_numbers<[1], [0], [0], [1], [0, 0, 1, 1], [], []>} : vector<32x128xf32>, vector<128x256xf32>, vector<32x256xf32> -> vector<32x256xf32>
    %30 = arith.addf %23, %29 : vector<32x256xf32>
    %c0_26 = arith.constant 0 : index
    %c1_27 = arith.constant 1 : index
    %c1_28 = arith.constant 1 : index
    %c0_29 = arith.constant 0 : index
    %31 = vector.load %arg1[%c0_26, %c1_27, %c1_28, %c0_29] : memref<2x6x6x128xbf16, #tpu.memory_space<vmem>>, vector<2x4x4x128xbf16>
    %32 = arith.extf %31 : vector<2x4x4x128xbf16> to vector<2x4x4x128xf32>
    %33 = vector.shape_cast %32 : vector<2x4x4x128xf32> to vector<32x128xf32>
    %c512 = arith.constant 512 : index
    %c0_30 = arith.constant 0 : index
    %34 = vector.load %arg2[%c512, %c0_30] : memref<1152x256xbf16, #tpu.memory_space<vmem>>, vector<128x256xbf16>
    %35 = arith.extf %34 : vector<128x256xbf16> to vector<128x256xf32>
    %cst_31 = arith.constant dense<0.000000e+00> : vector<32x256xf32>
    %36 = tpu.matmul %33, %35, %cst_31 {dimension_numbers = #tpu.dot_dimension_numbers<[1], [0], [0], [1], [0, 0, 1, 1], [], []>} : vector<32x128xf32>, vector<128x256xf32>, vector<32x256xf32> -> vector<32x256xf32>
    %37 = arith.addf %30, %36 : vector<32x256xf32>
    %c0_32 = arith.constant 0 : index
    %c1_33 = arith.constant 1 : index
    %c2_34 = arith.constant 2 : index
    %c0_35 = arith.constant 0 : index
    %38 = vector.load %arg1[%c0_32, %c1_33, %c2_34, %c0_35] : memref<2x6x6x128xbf16, #tpu.memory_space<vmem>>, vector<2x4x4x128xbf16>
    %39 = arith.extf %38 : vector<2x4x4x128xbf16> to vector<2x4x4x128xf32>
    %40 = vector.shape_cast %39 : vector<2x4x4x128xf32> to vector<32x128xf32>
    %c640 = arith.constant 640 : index
    %c0_36 = arith.constant 0 : index
    %41 = vector.load %arg2[%c640, %c0_36] : memref<1152x256xbf16, #tpu.memory_space<vmem>>, vector<128x256xbf16>
    %42 = arith.extf %41 : vector<128x256xbf16> to vector<128x256xf32>
    %cst_37 = arith.constant dense<0.000000e+00> : vector<32x256xf32>
    %43 = tpu.matmul %40, %42, %cst_37 {dimension_numbers = #tpu.dot_dimension_numbers<[1], [0], [0], [1], [0, 0, 1, 1], [], []>} : vector<32x128xf32>, vector<128x256xf32>, vector<32x256xf32> -> vector<32x256xf32>
    %44 = arith.addf %37, %43 : vector<32x256xf32>
    %c0_38 = arith.constant 0 : index
    %c2_39 = arith.constant 2 : index
    %c0_40 = arith.constant 0 : index
    %c0_41 = arith.constant 0 : index
    %45 = vector.load %arg1[%c0_38, %c2_39, %c0_40, %c0_41] : memref<2x6x6x128xbf16, #tpu.memory_space<vmem>>, vector<2x4x4x128xbf16>
    %46 = arith.extf %45 : vector<2x4x4x128xbf16> to vector<2x4x4x128xf32>
    %47 = vector.shape_cast %46 : vector<2x4x4x128xf32> to vector<32x128xf32>
    %c768 = arith.constant 768 : index
    %c0_42 = arith.constant 0 : index
    %48 = vector.load %arg2[%c768, %c0_42] : memref<1152x256xbf16, #tpu.memory_space<vmem>>, vector<128x256xbf16>
    %49 = arith.extf %48 : vector<128x256xbf16> to vector<128x256xf32>
    %cst_43 = arith.constant dense<0.000000e+00> : vector<32x256xf32>
    %50 = tpu.matmul %47, %49, %cst_43 {dimension_numbers = #tpu.dot_dimension_numbers<[1], [0], [0], [1], [0, 0, 1, 1], [], []>} : vector<32x128xf32>, vector<128x256xf32>, vector<32x256xf32> -> vector<32x256xf32>
    %51 = arith.addf %44, %50 : vector<32x256xf32>
    %c0_44 = arith.constant 0 : index
    %c2_45 = arith.constant 2 : index
    %c1_46 = arith.constant 1 : index
    %c0_47 = arith.constant 0 : index
    %52 = vector.load %arg1[%c0_44, %c2_45, %c1_46, %c0_47] : memref<2x6x6x128xbf16, #tpu.memory_space<vmem>>, vector<2x4x4x128xbf16>
    %53 = arith.extf %52 : vector<2x4x4x128xbf16> to vector<2x4x4x128xf32>
    %54 = vector.shape_cast %53 : vector<2x4x4x128xf32> to vector<32x128xf32>
    %c896 = arith.constant 896 : index
    %c0_48 = arith.constant 0 : index
    %55 = vector.load %arg2[%c896, %c0_48] : memref<1152x256xbf16, #tpu.memory_space<vmem>>, vector<128x256xbf16>
    %56 = arith.extf %55 : vector<128x256xbf16> to vector<128x256xf32>
    %cst_49 = arith.constant dense<0.000000e+00> : vector<32x256xf32>
    %57 = tpu.matmul %54, %56, %cst_49 {dimension_numbers = #tpu.dot_dimension_numbers<[1], [0], [0], [1], [0, 0, 1, 1], [], []>} : vector<32x128xf32>, vector<128x256xf32>, vector<32x256xf32> -> vector<32x256xf32>
    %58 = arith.addf %51, %57 : vector<32x256xf32>
    %c0_50 = arith.constant 0 : index
    %c2_51 = arith.constant 2 : index
    %c2_52 = arith.constant 2 : index
    %c0_53 = arith.constant 0 : index
    %59 = vector.load %arg1[%c0_50, %c2_51, %c2_52, %c0_53] : memref<2x6x6x128xbf16, #tpu.memory_space<vmem>>, vector<2x4x4x128xbf16>
    %60 = arith.extf %59 : vector<2x4x4x128xbf16> to vector<2x4x4x128xf32>
    %61 = vector.shape_cast %60 : vector<2x4x4x128xf32> to vector<32x128xf32>
    %c1024 = arith.constant 1024 : index
    %c0_54 = arith.constant 0 : index
    %62 = vector.load %arg2[%c1024, %c0_54] : memref<1152x256xbf16, #tpu.memory_space<vmem>>, vector<128x256xbf16>
    %63 = arith.extf %62 : vector<128x256xbf16> to vector<128x256xf32>
    %cst_55 = arith.constant dense<0.000000e+00> : vector<32x256xf32>
    %64 = tpu.matmul %61, %63, %cst_55 {dimension_numbers = #tpu.dot_dimension_numbers<[1], [0], [0], [1], [0, 0, 1, 1], [], []>} : vector<32x128xf32>, vector<128x256xf32>, vector<32x256xf32> -> vector<32x256xf32>
    %65 = arith.addf %58, %64 : vector<32x256xf32>
    %c0_56 = arith.constant 0 : index
    %c0_57 = arith.constant 0 : index
    %66 = vector.load %arg3[%c0_56, %c0_57] : memref<1x256xf32, #tpu.memory_space<vmem>>, vector<1x256xf32>
    %67 = vector.broadcast %66 : vector<1x256xf32> to vector<32x256xf32>
    %68 = arith.addf %65, %67 : vector<32x256xf32>
    %cst_58 = arith.constant dense<0.000000e+00> : vector<256xf32>
    %69 = vector.multi_reduction <add>, %68, %cst_58 [0] : vector<32x256xf32> to vector<256xf32>
    %70 = vector.shape_cast %69 : vector<256xf32> to vector<1x256xf32>
    %71 = vector.extract_strided_slice %70 {offsets = [0, 0], sizes = [1, 64], strides = [1, 1]} : vector<1x256xf32> to vector<1x64xf32>
    %cst_59 = arith.constant 0.000000e+00 : f32
    %72 = vector.broadcast %cst_59 : f32 to vector<1x64xf32>
    %73 = arith.addf %72, %71 : vector<1x64xf32>
    %74 = vector.extract_strided_slice %70 {offsets = [0, 64], sizes = [1, 64], strides = [1, 1]} : vector<1x256xf32> to vector<1x64xf32>
    %75 = arith.addf %73, %74 : vector<1x64xf32>
    %76 = vector.extract_strided_slice %70 {offsets = [0, 128], sizes = [1, 64], strides = [1, 1]} : vector<1x256xf32> to vector<1x64xf32>
    %77 = arith.addf %75, %76 : vector<1x64xf32>
    %78 = vector.extract_strided_slice %70 {offsets = [0, 192], sizes = [1, 64], strides = [1, 1]} : vector<1x256xf32> to vector<1x64xf32>
    %79 = arith.addf %77, %78 : vector<1x64xf32>
    %cst_60 = arith.constant 7.812500e-03 : f32
    %80 = vector.broadcast %cst_60 : f32 to vector<1x64xf32>
    %81 = arith.mulf %79, %80 : vector<1x64xf32>
    %82 = tpu.concatenate %81, %81, %81, %81 in 1 : vector<1x64xf32>, vector<1x64xf32>, vector<1x64xf32>, vector<1x64xf32> -> vector<1x256xf32>
    %83 = vector.broadcast %82 : vector<1x256xf32> to vector<32x256xf32>
    %84 = arith.subf %68, %83 : vector<32x256xf32>
    %85 = arith.mulf %84, %84 : vector<32x256xf32>
    %cst_61 = arith.constant dense<0.000000e+00> : vector<256xf32>
    %86 = vector.multi_reduction <add>, %85, %cst_61 [0] : vector<32x256xf32> to vector<256xf32>
    %87 = vector.shape_cast %86 : vector<256xf32> to vector<1x256xf32>
    %88 = vector.extract_strided_slice %87 {offsets = [0, 0], sizes = [1, 64], strides = [1, 1]} : vector<1x256xf32> to vector<1x64xf32>
    %cst_62 = arith.constant 0.000000e+00 : f32
    %89 = vector.broadcast %cst_62 : f32 to vector<1x64xf32>
    %90 = arith.addf %89, %88 : vector<1x64xf32>
    %91 = vector.extract_strided_slice %87 {offsets = [0, 64], sizes = [1, 64], strides = [1, 1]} : vector<1x256xf32> to vector<1x64xf32>
    %92 = arith.addf %90, %91 : vector<1x64xf32>
    %93 = vector.extract_strided_slice %87 {offsets = [0, 128], sizes = [1, 64], strides = [1, 1]} : vector<1x256xf32> to vector<1x64xf32>
    %94 = arith.addf %92, %93 : vector<1x64xf32>
    %95 = vector.extract_strided_slice %87 {offsets = [0, 192], sizes = [1, 64], strides = [1, 1]} : vector<1x256xf32> to vector<1x64xf32>
    %96 = arith.addf %94, %95 : vector<1x64xf32>
    %cst_63 = arith.constant 7.812500e-03 : f32
    %97 = vector.broadcast %cst_63 : f32 to vector<1x64xf32>
    %98 = arith.mulf %96, %97 : vector<1x64xf32>
    %cst_64 = arith.constant 9.99999974E-6 : f32
    %99 = vector.broadcast %cst_64 : f32 to vector<1x64xf32>
    %100 = arith.addf %98, %99 : vector<1x64xf32>
    %101 = math.rsqrt %100 : vector<1x64xf32>
    %102 = arith.mulf %0, %101 : vector<1x64xf32>
    %103 = tpu.concatenate %102, %102, %102, %102 in 1 : vector<1x64xf32>, vector<1x64xf32>, vector<1x64xf32>, vector<1x64xf32> -> vector<1x256xf32>
    %104 = vector.broadcast %103 : vector<1x256xf32> to vector<32x256xf32>
    %105 = arith.mulf %84, %104 : vector<32x256xf32>
    %106 = tpu.concatenate %1, %1, %1, %1 in 1 : vector<1x64xf32>, vector<1x64xf32>, vector<1x64xf32>, vector<1x64xf32> -> vector<1x256xf32>
    %107 = vector.broadcast %106 : vector<1x256xf32> to vector<32x256xf32>
    %108 = arith.addf %105, %107 : vector<32x256xf32>
    %cst_65 = arith.constant 0.000000e+00 : f32
    %109 = vector.broadcast %cst_65 : f32 to vector<32x256xf32>
    %110 = arith.maximumf %108, %109 : vector<32x256xf32>
    %111 = arith.truncf %110 : vector<32x256xf32> to vector<32x256xbf16>
    %c0_66 = arith.constant 0 : index
    %c0_67 = arith.constant 0 : index
    %112 = vector.load %arg6[%c0_66, %c0_67] : memref<32x256xbf16, #tpu.memory_space<vmem>>, vector<32x256xbf16>
    tpu.vector_store %arg6[%c0_66, %c0_67], %111 {strides = array<i32>} : memref<32x256xbf16, #tpu.memory_space<vmem>>, vector<32x256xbf16>,
    return
  }
  func.func @transform_0(%arg0: i32) -> (i32, i32, i32, i32) {
    %c0_i32 = arith.constant 0 : i32
    %c0_i32_0 = arith.constant 0 : i32
    %c0_i32_1 = arith.constant 0 : i32
    %c0_i32_2 = arith.constant 0 : i32
    %c0_i32_3 = arith.constant 0 : i32
    return %c0_i32, %c0_i32_0, %c0_i32_1, %c0_i32_2 : i32, i32, i32, i32
  }
  func.func @transform_1(%arg0: i32) -> (i32, i32) {
    %c0_i32 = arith.constant 0 : i32
    %c0_i32_0 = arith.constant 0 : i32
    %c0_i32_1 = arith.constant 0 : i32
    return %c0_i32, %c0_i32_0 : i32, i32
  }
  func.func @transform_2(%arg0: i32) -> (i32, i32) {
    %c0_i32 = arith.constant 0 : i32
    %c0_i32_0 = arith.constant 0 : i32
    %c0_i32_1 = arith.constant 0 : i32
    return %c0_i32, %c0_i32_0 : i32, i32
  }
  func.func @transform_3(%arg0: i32) -> (i32, i32) {
    %c0_i32 = arith.constant 0 : i32
    %c0_i32_0 = arith.constant 0 : i32
    %c0_i32_1 = arith.constant 0 : i32
    return %c0_i32, %c0_i32_0 : i32, i32
  }
  func.func @transform_4(%arg0: i32) -> (i32, i32) {
    %c0_i32 = arith.constant 0 : i32
    %c0_i32_0 = arith.constant 0 : i32
    %c0_i32_1 = arith.constant 0 : i32
    return %c0_i32, %c0_i32_0 : i32, i32
  }
  func.func @transform_5(%arg0: i32) -> (i32, i32) {
    %c0_i32 = arith.constant 0 : i32
    %c0_i32_0 = arith.constant 0 : i32
    %c0_i32_1 = arith.constant 0 : i32
    return %c0_i32, %c0_i32_0 : i32, i32
  }
}

module attributes {stable_mosaic.version = 11 : i64} {
  func.func @_deconv_taps_kernel(%arg0: i32, %arg1: memref<2x10x10x64xbf16, #tpu.memory_space<vmem>>, %arg2: memref<576x128xbf16, #tpu.memory_space<vmem>>, %arg3: memref<1x128xf32, #tpu.memory_space<vmem>>, %arg4: memref<1x32xf32, #tpu.memory_space<vmem>>, %arg5: memref<1x32xf32, #tpu.memory_space<vmem>>, %arg6: memref<128x128xbf16, #tpu.memory_space<vmem>>) attributes {dimension_semantics = [#tpu.dimension_semantics<arbitrary>], iteration_bounds = array<i64: 1>, scalar_prefetch = 0 : i64, scratch_operands = 0 : i64, tpu.core_type = #tpu.core_type<tc>, window_params = [{pipeline_mode = #tpu.pipeline_mode<synchronous>, transform_indices = @transform_0, window_bounds = array<i64: 2, 10, 10, 64>}, {pipeline_mode = #tpu.pipeline_mode<synchronous>, transform_indices = @transform_1, window_bounds = array<i64: 576, 128>}, {pipeline_mode = #tpu.pipeline_mode<synchronous>, transform_indices = @transform_2, window_bounds = array<i64: 1, 128>}, {pipeline_mode = #tpu.pipeline_mode<synchronous>, transform_indices = @transform_3, window_bounds = array<i64: 1, 32>}, {pipeline_mode = #tpu.pipeline_mode<synchronous>, transform_indices = @transform_4, window_bounds = array<i64: 1, 32>}, {pipeline_mode = #tpu.pipeline_mode<synchronous>, transform_indices = @transform_5, window_bounds = array<i64: 128, 128>}]} {
    %c0 = arith.constant 0 : index
    %c0_0 = arith.constant 0 : index
    %0 = vector.load %arg4[%c0, %c0_0] : memref<1x32xf32, #tpu.memory_space<vmem>>, vector<1x32xf32>
    %c0_1 = arith.constant 0 : index
    %c0_2 = arith.constant 0 : index
    %1 = vector.load %arg5[%c0_1, %c0_2] : memref<1x32xf32, #tpu.memory_space<vmem>>, vector<1x32xf32>
    %cst = arith.constant 0.000000e+00 : f32
    %2 = vector.broadcast %cst : f32 to vector<128x128xf32>
    %c0_3 = arith.constant 0 : index
    %c0_4 = arith.constant 0 : index
    %c0_5 = arith.constant 0 : index
    %c0_6 = arith.constant 0 : index
    %3 = vector.load %arg1[%c0_3, %c0_4, %c0_5, %c0_6] : memref<2x10x10x64xbf16, #tpu.memory_space<vmem>>, vector<2x8x8x64xbf16>
    %4 = arith.extf %3 : vector<2x8x8x64xbf16> to vector<2x8x8x64xf32>
    %5 = vector.shape_cast %4 : vector<2x8x8x64xf32> to vector<128x64xf32>
    %c0_7 = arith.constant 0 : index
    %c0_8 = arith.constant 0 : index
    %6 = vector.load %arg2[%c0_7, %c0_8] : memref<576x128xbf16, #tpu.memory_space<vmem>>, vector<64x128xbf16>
    %7 = arith.extf %6 : vector<64x128xbf16> to vector<64x128xf32>
    %cst_9 = arith.constant dense<0.000000e+00> : vector<128x128xf32>
    %8 = tpu.matmul %5, %7, %cst_9 {dimension_numbers = #tpu.dot_dimension_numbers<[1], [0], [0], [1], [0, 0, 1, 1], [], []>} : vector<128x64xf32>, vector<64x128xf32>, vector<128x128xf32> -> vector<128x128xf32>
    %9 = arith.addf %2, %8 : vector<128x128xf32>
    %c0_10 = arith.constant 0 : index
    %c0_11 = arith.constant 0 : index
    %c1 = arith.constant 1 : index
    %c0_12 = arith.constant 0 : index
    %10 = vector.load %arg1[%c0_10, %c0_11, %c1, %c0_12] : memref<2x10x10x64xbf16, #tpu.memory_space<vmem>>, vector<2x8x8x64xbf16>
    %11 = arith.extf %10 : vector<2x8x8x64xbf16> to vector<2x8x8x64xf32>
    %12 = vector.shape_cast %11 : vector<2x8x8x64xf32> to vector<128x64xf32>
    %c64 = arith.constant 64 : index
    %c0_13 = arith.constant 0 : index
    %13 = vector.load %arg2[%c64, %c0_13] : memref<576x128xbf16, #tpu.memory_space<vmem>>, vector<64x128xbf16>
    %14 = arith.extf %13 : vector<64x128xbf16> to vector<64x128xf32>
    %cst_14 = arith.constant dense<0.000000e+00> : vector<128x128xf32>
    %15 = tpu.matmul %12, %14, %cst_14 {dimension_numbers = #tpu.dot_dimension_numbers<[1], [0], [0], [1], [0, 0, 1, 1], [], []>} : vector<128x64xf32>, vector<64x128xf32>, vector<128x128xf32> -> vector<128x128xf32>
    %16 = arith.addf %9, %15 : vector<128x128xf32>
    %c0_15 = arith.constant 0 : index
    %c0_16 = arith.constant 0 : index
    %c2 = arith.constant 2 : index
    %c0_17 = arith.constant 0 : index
    %17 = vector.load %arg1[%c0_15, %c0_16, %c2, %c0_17] : memref<2x10x10x64xbf16, #tpu.memory_space<vmem>>, vector<2x8x8x64xbf16>
    %18 = arith.extf %17 : vector<2x8x8x64xbf16> to vector<2x8x8x64xf32>
    %19 = vector.shape_cast %18 : vector<2x8x8x64xf32> to vector<128x64xf32>
    %c128 = arith.constant 128 : index
    %c0_18 = arith.constant 0 : index
    %20 = vector.load %arg2[%c128, %c0_18] : memref<576x128xbf16, #tpu.memory_space<vmem>>, vector<64x128xbf16>
    %21 = arith.extf %20 : vector<64x128xbf16> to vector<64x128xf32>
    %cst_19 = arith.constant dense<0.000000e+00> : vector<128x128xf32>
    %22 = tpu.matmul %19, %21, %cst_19 {dimension_numbers = #tpu.dot_dimension_numbers<[1], [0], [0], [1], [0, 0, 1, 1], [], []>} : vector<128x64xf32>, vector<64x128xf32>, vector<128x128xf32> -> vector<128x128xf32>
    %23 = arith.addf %16, %22 : vector<128x128xf32>
    %c0_20 = arith.constant 0 : index
    %c1_21 = arith.constant 1 : index
    %c0_22 = arith.constant 0 : index
    %c0_23 = arith.constant 0 : index
    %24 = vector.load %arg1[%c0_20, %c1_21, %c0_22, %c0_23] : memref<2x10x10x64xbf16, #tpu.memory_space<vmem>>, vector<2x8x8x64xbf16>
    %25 = arith.extf %24 : vector<2x8x8x64xbf16> to vector<2x8x8x64xf32>
    %26 = vector.shape_cast %25 : vector<2x8x8x64xf32> to vector<128x64xf32>
    %c192 = arith.constant 192 : index
    %c0_24 = arith.constant 0 : index
    %27 = vector.load %arg2[%c192, %c0_24] : memref<576x128xbf16, #tpu.memory_space<vmem>>, vector<64x128xbf16>
    %28 = arith.extf %27 : vector<64x128xbf16> to vector<64x128xf32>
    %cst_25 = arith.constant dense<0.000000e+00> : vector<128x128xf32>
    %29 = tpu.matmul %26, %28, %cst_25 {dimension_numbers = #tpu.dot_dimension_numbers<[1], [0], [0], [1], [0, 0, 1, 1], [], []>} : vector<128x64xf32>, vector<64x128xf32>, vector<128x128xf32> -> vector<128x128xf32>
    %30 = arith.addf %23, %29 : vector<128x128xf32>
    %c0_26 = arith.constant 0 : index
    %c1_27 = arith.constant 1 : index
    %c1_28 = arith.constant 1 : index
    %c0_29 = arith.constant 0 : index
    %31 = vector.load %arg1[%c0_26, %c1_27, %c1_28, %c0_29] : memref<2x10x10x64xbf16, #tpu.memory_space<vmem>>, vector<2x8x8x64xbf16>
    %32 = arith.extf %31 : vector<2x8x8x64xbf16> to vector<2x8x8x64xf32>
    %33 = vector.shape_cast %32 : vector<2x8x8x64xf32> to vector<128x64xf32>
    %c256 = arith.constant 256 : index
    %c0_30 = arith.constant 0 : index
    %34 = vector.load %arg2[%c256, %c0_30] : memref<576x128xbf16, #tpu.memory_space<vmem>>, vector<64x128xbf16>
    %35 = arith.extf %34 : vector<64x128xbf16> to vector<64x128xf32>
    %cst_31 = arith.constant dense<0.000000e+00> : vector<128x128xf32>
    %36 = tpu.matmul %33, %35, %cst_31 {dimension_numbers = #tpu.dot_dimension_numbers<[1], [0], [0], [1], [0, 0, 1, 1], [], []>} : vector<128x64xf32>, vector<64x128xf32>, vector<128x128xf32> -> vector<128x128xf32>
    %37 = arith.addf %30, %36 : vector<128x128xf32>
    %c0_32 = arith.constant 0 : index
    %c1_33 = arith.constant 1 : index
    %c2_34 = arith.constant 2 : index
    %c0_35 = arith.constant 0 : index
    %38 = vector.load %arg1[%c0_32, %c1_33, %c2_34, %c0_35] : memref<2x10x10x64xbf16, #tpu.memory_space<vmem>>, vector<2x8x8x64xbf16>
    %39 = arith.extf %38 : vector<2x8x8x64xbf16> to vector<2x8x8x64xf32>
    %40 = vector.shape_cast %39 : vector<2x8x8x64xf32> to vector<128x64xf32>
    %c320 = arith.constant 320 : index
    %c0_36 = arith.constant 0 : index
    %41 = vector.load %arg2[%c320, %c0_36] : memref<576x128xbf16, #tpu.memory_space<vmem>>, vector<64x128xbf16>
    %42 = arith.extf %41 : vector<64x128xbf16> to vector<64x128xf32>
    %cst_37 = arith.constant dense<0.000000e+00> : vector<128x128xf32>
    %43 = tpu.matmul %40, %42, %cst_37 {dimension_numbers = #tpu.dot_dimension_numbers<[1], [0], [0], [1], [0, 0, 1, 1], [], []>} : vector<128x64xf32>, vector<64x128xf32>, vector<128x128xf32> -> vector<128x128xf32>
    %44 = arith.addf %37, %43 : vector<128x128xf32>
    %c0_38 = arith.constant 0 : index
    %c2_39 = arith.constant 2 : index
    %c0_40 = arith.constant 0 : index
    %c0_41 = arith.constant 0 : index
    %45 = vector.load %arg1[%c0_38, %c2_39, %c0_40, %c0_41] : memref<2x10x10x64xbf16, #tpu.memory_space<vmem>>, vector<2x8x8x64xbf16>
    %46 = arith.extf %45 : vector<2x8x8x64xbf16> to vector<2x8x8x64xf32>
    %47 = vector.shape_cast %46 : vector<2x8x8x64xf32> to vector<128x64xf32>
    %c384 = arith.constant 384 : index
    %c0_42 = arith.constant 0 : index
    %48 = vector.load %arg2[%c384, %c0_42] : memref<576x128xbf16, #tpu.memory_space<vmem>>, vector<64x128xbf16>
    %49 = arith.extf %48 : vector<64x128xbf16> to vector<64x128xf32>
    %cst_43 = arith.constant dense<0.000000e+00> : vector<128x128xf32>
    %50 = tpu.matmul %47, %49, %cst_43 {dimension_numbers = #tpu.dot_dimension_numbers<[1], [0], [0], [1], [0, 0, 1, 1], [], []>} : vector<128x64xf32>, vector<64x128xf32>, vector<128x128xf32> -> vector<128x128xf32>
    %51 = arith.addf %44, %50 : vector<128x128xf32>
    %c0_44 = arith.constant 0 : index
    %c2_45 = arith.constant 2 : index
    %c1_46 = arith.constant 1 : index
    %c0_47 = arith.constant 0 : index
    %52 = vector.load %arg1[%c0_44, %c2_45, %c1_46, %c0_47] : memref<2x10x10x64xbf16, #tpu.memory_space<vmem>>, vector<2x8x8x64xbf16>
    %53 = arith.extf %52 : vector<2x8x8x64xbf16> to vector<2x8x8x64xf32>
    %54 = vector.shape_cast %53 : vector<2x8x8x64xf32> to vector<128x64xf32>
    %c448 = arith.constant 448 : index
    %c0_48 = arith.constant 0 : index
    %55 = vector.load %arg2[%c448, %c0_48] : memref<576x128xbf16, #tpu.memory_space<vmem>>, vector<64x128xbf16>
    %56 = arith.extf %55 : vector<64x128xbf16> to vector<64x128xf32>
    %cst_49 = arith.constant dense<0.000000e+00> : vector<128x128xf32>
    %57 = tpu.matmul %54, %56, %cst_49 {dimension_numbers = #tpu.dot_dimension_numbers<[1], [0], [0], [1], [0, 0, 1, 1], [], []>} : vector<128x64xf32>, vector<64x128xf32>, vector<128x128xf32> -> vector<128x128xf32>
    %58 = arith.addf %51, %57 : vector<128x128xf32>
    %c0_50 = arith.constant 0 : index
    %c2_51 = arith.constant 2 : index
    %c2_52 = arith.constant 2 : index
    %c0_53 = arith.constant 0 : index
    %59 = vector.load %arg1[%c0_50, %c2_51, %c2_52, %c0_53] : memref<2x10x10x64xbf16, #tpu.memory_space<vmem>>, vector<2x8x8x64xbf16>
    %60 = arith.extf %59 : vector<2x8x8x64xbf16> to vector<2x8x8x64xf32>
    %61 = vector.shape_cast %60 : vector<2x8x8x64xf32> to vector<128x64xf32>
    %c512 = arith.constant 512 : index
    %c0_54 = arith.constant 0 : index
    %62 = vector.load %arg2[%c512, %c0_54] : memref<576x128xbf16, #tpu.memory_space<vmem>>, vector<64x128xbf16>
    %63 = arith.extf %62 : vector<64x128xbf16> to vector<64x128xf32>
    %cst_55 = arith.constant dense<0.000000e+00> : vector<128x128xf32>
    %64 = tpu.matmul %61, %63, %cst_55 {dimension_numbers = #tpu.dot_dimension_numbers<[1], [0], [0], [1], [0, 0, 1, 1], [], []>} : vector<128x64xf32>, vector<64x128xf32>, vector<128x128xf32> -> vector<128x128xf32>
    %65 = arith.addf %58, %64 : vector<128x128xf32>
    %c0_56 = arith.constant 0 : index
    %c0_57 = arith.constant 0 : index
    %66 = vector.load %arg3[%c0_56, %c0_57] : memref<1x128xf32, #tpu.memory_space<vmem>>, vector<1x128xf32>
    %67 = vector.broadcast %66 : vector<1x128xf32> to vector<128x128xf32>
    %68 = arith.addf %65, %67 : vector<128x128xf32>
    %cst_58 = arith.constant dense<0.000000e+00> : vector<128xf32>
    %69 = vector.multi_reduction <add>, %68, %cst_58 [0] : vector<128x128xf32> to vector<128xf32>
    %70 = vector.shape_cast %69 : vector<128xf32> to vector<1x128xf32>
    %71 = vector.extract_strided_slice %70 {offsets = [0, 0], sizes = [1, 32], strides = [1, 1]} : vector<1x128xf32> to vector<1x32xf32>
    %cst_59 = arith.constant 0.000000e+00 : f32
    %72 = vector.broadcast %cst_59 : f32 to vector<1x32xf32>
    %73 = arith.addf %72, %71 : vector<1x32xf32>
    %74 = vector.extract_strided_slice %70 {offsets = [0, 32], sizes = [1, 32], strides = [1, 1]} : vector<1x128xf32> to vector<1x32xf32>
    %75 = arith.addf %73, %74 : vector<1x32xf32>
    %76 = vector.extract_strided_slice %70 {offsets = [0, 64], sizes = [1, 32], strides = [1, 1]} : vector<1x128xf32> to vector<1x32xf32>
    %77 = arith.addf %75, %76 : vector<1x32xf32>
    %78 = vector.extract_strided_slice %70 {offsets = [0, 96], sizes = [1, 32], strides = [1, 1]} : vector<1x128xf32> to vector<1x32xf32>
    %79 = arith.addf %77, %78 : vector<1x32xf32>
    %cst_60 = arith.constant 0.001953125 : f32
    %80 = vector.broadcast %cst_60 : f32 to vector<1x32xf32>
    %81 = arith.mulf %79, %80 : vector<1x32xf32>
    %82 = tpu.concatenate %81, %81, %81, %81 in 1 : vector<1x32xf32>, vector<1x32xf32>, vector<1x32xf32>, vector<1x32xf32> -> vector<1x128xf32>
    %83 = vector.broadcast %82 : vector<1x128xf32> to vector<128x128xf32>
    %84 = arith.subf %68, %83 : vector<128x128xf32>
    %85 = arith.mulf %84, %84 : vector<128x128xf32>
    %cst_61 = arith.constant dense<0.000000e+00> : vector<128xf32>
    %86 = vector.multi_reduction <add>, %85, %cst_61 [0] : vector<128x128xf32> to vector<128xf32>
    %87 = vector.shape_cast %86 : vector<128xf32> to vector<1x128xf32>
    %88 = vector.extract_strided_slice %87 {offsets = [0, 0], sizes = [1, 32], strides = [1, 1]} : vector<1x128xf32> to vector<1x32xf32>
    %cst_62 = arith.constant 0.000000e+00 : f32
    %89 = vector.broadcast %cst_62 : f32 to vector<1x32xf32>
    %90 = arith.addf %89, %88 : vector<1x32xf32>
    %91 = vector.extract_strided_slice %87 {offsets = [0, 32], sizes = [1, 32], strides = [1, 1]} : vector<1x128xf32> to vector<1x32xf32>
    %92 = arith.addf %90, %91 : vector<1x32xf32>
    %93 = vector.extract_strided_slice %87 {offsets = [0, 64], sizes = [1, 32], strides = [1, 1]} : vector<1x128xf32> to vector<1x32xf32>
    %94 = arith.addf %92, %93 : vector<1x32xf32>
    %95 = vector.extract_strided_slice %87 {offsets = [0, 96], sizes = [1, 32], strides = [1, 1]} : vector<1x128xf32> to vector<1x32xf32>
    %96 = arith.addf %94, %95 : vector<1x32xf32>
    %cst_63 = arith.constant 0.001953125 : f32
    %97 = vector.broadcast %cst_63 : f32 to vector<1x32xf32>
    %98 = arith.mulf %96, %97 : vector<1x32xf32>
    %cst_64 = arith.constant 9.99999974E-6 : f32
    %99 = vector.broadcast %cst_64 : f32 to vector<1x32xf32>
    %100 = arith.addf %98, %99 : vector<1x32xf32>
    %101 = math.rsqrt %100 : vector<1x32xf32>
    %102 = arith.mulf %0, %101 : vector<1x32xf32>
    %103 = tpu.concatenate %102, %102, %102, %102 in 1 : vector<1x32xf32>, vector<1x32xf32>, vector<1x32xf32>, vector<1x32xf32> -> vector<1x128xf32>
    %104 = vector.broadcast %103 : vector<1x128xf32> to vector<128x128xf32>
    %105 = arith.mulf %84, %104 : vector<128x128xf32>
    %106 = tpu.concatenate %1, %1, %1, %1 in 1 : vector<1x32xf32>, vector<1x32xf32>, vector<1x32xf32>, vector<1x32xf32> -> vector<1x128xf32>
    %107 = vector.broadcast %106 : vector<1x128xf32> to vector<128x128xf32>
    %108 = arith.addf %105, %107 : vector<128x128xf32>
    %cst_65 = arith.constant 0.000000e+00 : f32
    %109 = vector.broadcast %cst_65 : f32 to vector<128x128xf32>
    %110 = arith.maximumf %108, %109 : vector<128x128xf32>
    %111 = arith.truncf %110 : vector<128x128xf32> to vector<128x128xbf16>
    %c0_66 = arith.constant 0 : index
    %c0_67 = arith.constant 0 : index
    %112 = vector.load %arg6[%c0_66, %c0_67] : memref<128x128xbf16, #tpu.memory_space<vmem>>, vector<128x128xbf16>
    tpu.vector_store %arg6[%c0_66, %c0_67], %111 {strides = array<i32>} : memref<128x128xbf16, #tpu.memory_space<vmem>>, vector<128x128xbf16>,
    return
  }
  func.func @transform_0(%arg0: i32) -> (i32, i32, i32, i32) {
    %c0_i32 = arith.constant 0 : i32
    %c0_i32_0 = arith.constant 0 : i32
    %c0_i32_1 = arith.constant 0 : i32
    %c0_i32_2 = arith.constant 0 : i32
    %c0_i32_3 = arith.constant 0 : i32
    return %c0_i32, %c0_i32_0, %c0_i32_1, %c0_i32_2 : i32, i32, i32, i32
  }
  func.func @transform_1(%arg0: i32) -> (i32, i32) {
    %c0_i32 = arith.constant 0 : i32
    %c0_i32_0 = arith.constant 0 : i32
    %c0_i32_1 = arith.constant 0 : i32
    return %c0_i32, %c0_i32_0 : i32, i32
  }
  func.func @transform_2(%arg0: i32) -> (i32, i32) {
    %c0_i32 = arith.constant 0 : i32
    %c0_i32_0 = arith.constant 0 : i32
    %c0_i32_1 = arith.constant 0 : i32
    return %c0_i32, %c0_i32_0 : i32, i32
  }
  func.func @transform_3(%arg0: i32) -> (i32, i32) {
    %c0_i32 = arith.constant 0 : i32
    %c0_i32_0 = arith.constant 0 : i32
    %c0_i32_1 = arith.constant 0 : i32
    return %c0_i32, %c0_i32_0 : i32, i32
  }
  func.func @transform_4(%arg0: i32) -> (i32, i32) {
    %c0_i32 = arith.constant 0 : i32
    %c0_i32_0 = arith.constant 0 : i32
    %c0_i32_1 = arith.constant 0 : i32
    return %c0_i32, %c0_i32_0 : i32, i32
  }
  func.func @transform_5(%arg0: i32) -> (i32, i32) {
    %c0_i32 = arith.constant 0 : i32
    %c0_i32_0 = arith.constant 0 : i32
    %c0_i32_1 = arith.constant 0 : i32
    return %c0_i32, %c0_i32_0 : i32, i32
  }
}

module attributes {stable_mosaic.version = 11 : i64} {
  func.func @_deconv_taps_kernel(%arg0: i32, %arg1: memref<2x18x18x32xbf16, #tpu.memory_space<vmem>>, %arg2: memref<288x4xbf16, #tpu.memory_space<vmem>>, %arg3: memref<1x4xf32, #tpu.memory_space<vmem>>, %arg4: memref<512x4xf32, #tpu.memory_space<vmem>>) attributes {dimension_semantics = [#tpu.dimension_semantics<arbitrary>], iteration_bounds = array<i64: 1>, scalar_prefetch = 0 : i64, scratch_operands = 0 : i64, tpu.core_type = #tpu.core_type<tc>, window_params = [{pipeline_mode = #tpu.pipeline_mode<synchronous>, transform_indices = @transform_0, window_bounds = array<i64: 2, 18, 18, 32>}, {pipeline_mode = #tpu.pipeline_mode<synchronous>, transform_indices = @transform_1, window_bounds = array<i64: 288, 4>}, {pipeline_mode = #tpu.pipeline_mode<synchronous>, transform_indices = @transform_2, window_bounds = array<i64: 1, 4>}, {pipeline_mode = #tpu.pipeline_mode<synchronous>, transform_indices = @transform_3, window_bounds = array<i64: 512, 4>}]} {
    %cst = arith.constant 0.000000e+00 : f32
    %0 = vector.broadcast %cst : f32 to vector<512x4xf32>
    %c0 = arith.constant 0 : index
    %c0_0 = arith.constant 0 : index
    %c0_1 = arith.constant 0 : index
    %c0_2 = arith.constant 0 : index
    %1 = vector.load %arg1[%c0, %c0_0, %c0_1, %c0_2] : memref<2x18x18x32xbf16, #tpu.memory_space<vmem>>, vector<2x16x16x32xbf16>
    %2 = arith.extf %1 : vector<2x16x16x32xbf16> to vector<2x16x16x32xf32>
    %3 = vector.shape_cast %2 : vector<2x16x16x32xf32> to vector<512x32xf32>
    %c0_3 = arith.constant 0 : index
    %c0_4 = arith.constant 0 : index
    %4 = vector.load %arg2[%c0_3, %c0_4] : memref<288x4xbf16, #tpu.memory_space<vmem>>, vector<32x4xbf16>
    %5 = arith.extf %4 : vector<32x4xbf16> to vector<32x4xf32>
    %cst_5 = arith.constant dense<0.000000e+00> : vector<512x4xf32>
    %6 = tpu.matmul %3, %5, %cst_5 {dimension_numbers = #tpu.dot_dimension_numbers<[1], [0], [0], [1], [0, 0, 1, 1], [], []>} : vector<512x32xf32>, vector<32x4xf32>, vector<512x4xf32> -> vector<512x4xf32>
    %7 = arith.addf %0, %6 : vector<512x4xf32>
    %c0_6 = arith.constant 0 : index
    %c0_7 = arith.constant 0 : index
    %c1 = arith.constant 1 : index
    %c0_8 = arith.constant 0 : index
    %8 = vector.load %arg1[%c0_6, %c0_7, %c1, %c0_8] : memref<2x18x18x32xbf16, #tpu.memory_space<vmem>>, vector<2x16x16x32xbf16>
    %9 = arith.extf %8 : vector<2x16x16x32xbf16> to vector<2x16x16x32xf32>
    %10 = vector.shape_cast %9 : vector<2x16x16x32xf32> to vector<512x32xf32>
    %c32 = arith.constant 32 : index
    %c0_9 = arith.constant 0 : index
    %11 = vector.load %arg2[%c32, %c0_9] : memref<288x4xbf16, #tpu.memory_space<vmem>>, vector<32x4xbf16>
    %12 = arith.extf %11 : vector<32x4xbf16> to vector<32x4xf32>
    %cst_10 = arith.constant dense<0.000000e+00> : vector<512x4xf32>
    %13 = tpu.matmul %10, %12, %cst_10 {dimension_numbers = #tpu.dot_dimension_numbers<[1], [0], [0], [1], [0, 0, 1, 1], [], []>} : vector<512x32xf32>, vector<32x4xf32>, vector<512x4xf32> -> vector<512x4xf32>
    %14 = arith.addf %7, %13 : vector<512x4xf32>
    %c0_11 = arith.constant 0 : index
    %c0_12 = arith.constant 0 : index
    %c2 = arith.constant 2 : index
    %c0_13 = arith.constant 0 : index
    %15 = vector.load %arg1[%c0_11, %c0_12, %c2, %c0_13] : memref<2x18x18x32xbf16, #tpu.memory_space<vmem>>, vector<2x16x16x32xbf16>
    %16 = arith.extf %15 : vector<2x16x16x32xbf16> to vector<2x16x16x32xf32>
    %17 = vector.shape_cast %16 : vector<2x16x16x32xf32> to vector<512x32xf32>
    %c64 = arith.constant 64 : index
    %c0_14 = arith.constant 0 : index
    %18 = vector.load %arg2[%c64, %c0_14] : memref<288x4xbf16, #tpu.memory_space<vmem>>, vector<32x4xbf16>
    %19 = arith.extf %18 : vector<32x4xbf16> to vector<32x4xf32>
    %cst_15 = arith.constant dense<0.000000e+00> : vector<512x4xf32>
    %20 = tpu.matmul %17, %19, %cst_15 {dimension_numbers = #tpu.dot_dimension_numbers<[1], [0], [0], [1], [0, 0, 1, 1], [], []>} : vector<512x32xf32>, vector<32x4xf32>, vector<512x4xf32> -> vector<512x4xf32>
    %21 = arith.addf %14, %20 : vector<512x4xf32>
    %c0_16 = arith.constant 0 : index
    %c1_17 = arith.constant 1 : index
    %c0_18 = arith.constant 0 : index
    %c0_19 = arith.constant 0 : index
    %22 = vector.load %arg1[%c0_16, %c1_17, %c0_18, %c0_19] : memref<2x18x18x32xbf16, #tpu.memory_space<vmem>>, vector<2x16x16x32xbf16>
    %23 = arith.extf %22 : vector<2x16x16x32xbf16> to vector<2x16x16x32xf32>
    %24 = vector.shape_cast %23 : vector<2x16x16x32xf32> to vector<512x32xf32>
    %c96 = arith.constant 96 : index
    %c0_20 = arith.constant 0 : index
    %25 = vector.load %arg2[%c96, %c0_20] : memref<288x4xbf16, #tpu.memory_space<vmem>>, vector<32x4xbf16>
    %26 = arith.extf %25 : vector<32x4xbf16> to vector<32x4xf32>
    %cst_21 = arith.constant dense<0.000000e+00> : vector<512x4xf32>
    %27 = tpu.matmul %24, %26, %cst_21 {dimension_numbers = #tpu.dot_dimension_numbers<[1], [0], [0], [1], [0, 0, 1, 1], [], []>} : vector<512x32xf32>, vector<32x4xf32>, vector<512x4xf32> -> vector<512x4xf32>
    %28 = arith.addf %21, %27 : vector<512x4xf32>
    %c0_22 = arith.constant 0 : index
    %c1_23 = arith.constant 1 : index
    %c1_24 = arith.constant 1 : index
    %c0_25 = arith.constant 0 : index
    %29 = vector.load %arg1[%c0_22, %c1_23, %c1_24, %c0_25] : memref<2x18x18x32xbf16, #tpu.memory_space<vmem>>, vector<2x16x16x32xbf16>
    %30 = arith.extf %29 : vector<2x16x16x32xbf16> to vector<2x16x16x32xf32>
    %31 = vector.shape_cast %30 : vector<2x16x16x32xf32> to vector<512x32xf32>
    %c128 = arith.constant 128 : index
    %c0_26 = arith.constant 0 : index
    %32 = vector.load %arg2[%c128, %c0_26] : memref<288x4xbf16, #tpu.memory_space<vmem>>, vector<32x4xbf16>
    %33 = arith.extf %32 : vector<32x4xbf16> to vector<32x4xf32>
    %cst_27 = arith.constant dense<0.000000e+00> : vector<512x4xf32>
    %34 = tpu.matmul %31, %33, %cst_27 {dimension_numbers = #tpu.dot_dimension_numbers<[1], [0], [0], [1], [0, 0, 1, 1], [], []>} : vector<512x32xf32>, vector<32x4xf32>, vector<512x4xf32> -> vector<512x4xf32>
    %35 = arith.addf %28, %34 : vector<512x4xf32>
    %c0_28 = arith.constant 0 : index
    %c1_29 = arith.constant 1 : index
    %c2_30 = arith.constant 2 : index
    %c0_31 = arith.constant 0 : index
    %36 = vector.load %arg1[%c0_28, %c1_29, %c2_30, %c0_31] : memref<2x18x18x32xbf16, #tpu.memory_space<vmem>>, vector<2x16x16x32xbf16>
    %37 = arith.extf %36 : vector<2x16x16x32xbf16> to vector<2x16x16x32xf32>
    %38 = vector.shape_cast %37 : vector<2x16x16x32xf32> to vector<512x32xf32>
    %c160 = arith.constant 160 : index
    %c0_32 = arith.constant 0 : index
    %39 = vector.load %arg2[%c160, %c0_32] : memref<288x4xbf16, #tpu.memory_space<vmem>>, vector<32x4xbf16>
    %40 = arith.extf %39 : vector<32x4xbf16> to vector<32x4xf32>
    %cst_33 = arith.constant dense<0.000000e+00> : vector<512x4xf32>
    %41 = tpu.matmul %38, %40, %cst_33 {dimension_numbers = #tpu.dot_dimension_numbers<[1], [0], [0], [1], [0, 0, 1, 1], [], []>} : vector<512x32xf32>, vector<32x4xf32>, vector<512x4xf32> -> vector<512x4xf32>
    %42 = arith.addf %35, %41 : vector<512x4xf32>
    %c0_34 = arith.constant 0 : index
    %c2_35 = arith.constant 2 : index
    %c0_36 = arith.constant 0 : index
    %c0_37 = arith.constant 0 : index
    %43 = vector.load %arg1[%c0_34, %c2_35, %c0_36, %c0_37] : memref<2x18x18x32xbf16, #tpu.memory_space<vmem>>, vector<2x16x16x32xbf16>
    %44 = arith.extf %43 : vector<2x16x16x32xbf16> to vector<2x16x16x32xf32>
    %45 = vector.shape_cast %44 : vector<2x16x16x32xf32> to vector<512x32xf32>
    %c192 = arith.constant 192 : index
    %c0_38 = arith.constant 0 : index
    %46 = vector.load %arg2[%c192, %c0_38] : memref<288x4xbf16, #tpu.memory_space<vmem>>, vector<32x4xbf16>
    %47 = arith.extf %46 : vector<32x4xbf16> to vector<32x4xf32>
    %cst_39 = arith.constant dense<0.000000e+00> : vector<512x4xf32>
    %48 = tpu.matmul %45, %47, %cst_39 {dimension_numbers = #tpu.dot_dimension_numbers<[1], [0], [0], [1], [0, 0, 1, 1], [], []>} : vector<512x32xf32>, vector<32x4xf32>, vector<512x4xf32> -> vector<512x4xf32>
    %49 = arith.addf %42, %48 : vector<512x4xf32>
    %c0_40 = arith.constant 0 : index
    %c2_41 = arith.constant 2 : index
    %c1_42 = arith.constant 1 : index
    %c0_43 = arith.constant 0 : index
    %50 = vector.load %arg1[%c0_40, %c2_41, %c1_42, %c0_43] : memref<2x18x18x32xbf16, #tpu.memory_space<vmem>>, vector<2x16x16x32xbf16>
    %51 = arith.extf %50 : vector<2x16x16x32xbf16> to vector<2x16x16x32xf32>
    %52 = vector.shape_cast %51 : vector<2x16x16x32xf32> to vector<512x32xf32>
    %c224 = arith.constant 224 : index
    %c0_44 = arith.constant 0 : index
    %53 = vector.load %arg2[%c224, %c0_44] : memref<288x4xbf16, #tpu.memory_space<vmem>>, vector<32x4xbf16>
    %54 = arith.extf %53 : vector<32x4xbf16> to vector<32x4xf32>
    %cst_45 = arith.constant dense<0.000000e+00> : vector<512x4xf32>
    %55 = tpu.matmul %52, %54, %cst_45 {dimension_numbers = #tpu.dot_dimension_numbers<[1], [0], [0], [1], [0, 0, 1, 1], [], []>} : vector<512x32xf32>, vector<32x4xf32>, vector<512x4xf32> -> vector<512x4xf32>
    %56 = arith.addf %49, %55 : vector<512x4xf32>
    %c0_46 = arith.constant 0 : index
    %c2_47 = arith.constant 2 : index
    %c2_48 = arith.constant 2 : index
    %c0_49 = arith.constant 0 : index
    %57 = vector.load %arg1[%c0_46, %c2_47, %c2_48, %c0_49] : memref<2x18x18x32xbf16, #tpu.memory_space<vmem>>, vector<2x16x16x32xbf16>
    %58 = arith.extf %57 : vector<2x16x16x32xbf16> to vector<2x16x16x32xf32>
    %59 = vector.shape_cast %58 : vector<2x16x16x32xf32> to vector<512x32xf32>
    %c256 = arith.constant 256 : index
    %c0_50 = arith.constant 0 : index
    %60 = vector.load %arg2[%c256, %c0_50] : memref<288x4xbf16, #tpu.memory_space<vmem>>, vector<32x4xbf16>
    %61 = arith.extf %60 : vector<32x4xbf16> to vector<32x4xf32>
    %cst_51 = arith.constant dense<0.000000e+00> : vector<512x4xf32>
    %62 = tpu.matmul %59, %61, %cst_51 {dimension_numbers = #tpu.dot_dimension_numbers<[1], [0], [0], [1], [0, 0, 1, 1], [], []>} : vector<512x32xf32>, vector<32x4xf32>, vector<512x4xf32> -> vector<512x4xf32>
    %63 = arith.addf %56, %62 : vector<512x4xf32>
    %c0_52 = arith.constant 0 : index
    %c0_53 = arith.constant 0 : index
    %64 = vector.load %arg3[%c0_52, %c0_53] : memref<1x4xf32, #tpu.memory_space<vmem>>, vector<1x4xf32>
    %65 = vector.broadcast %64 : vector<1x4xf32> to vector<512x4xf32>
    %66 = arith.addf %63, %65 : vector<512x4xf32>
    %67 = math.tanh %66 : vector<512x4xf32>
    %c0_54 = arith.constant 0 : index
    %c0_55 = arith.constant 0 : index
    %68 = vector.load %arg4[%c0_54, %c0_55] : memref<512x4xf32, #tpu.memory_space<vmem>>, vector<512x4xf32>
    tpu.vector_store %arg4[%c0_54, %c0_55], %67 {strides = array<i32>} : memref<512x4xf32, #tpu.memory_space<vmem>>, vector<512x4xf32>,
    return
  }
  func.func @transform_0(%arg0: i32) -> (i32, i32, i32, i32) {
    %c0_i32 = arith.constant 0 : i32
    %c0_i32_0 = arith.constant 0 : i32
    %c0_i32_1 = arith.constant 0 : i32
    %c0_i32_2 = arith.constant 0 : i32
    %c0_i32_3 = arith.constant 0 : i32
    return %c0_i32, %c0_i32_0, %c0_i32_1, %c0_i32_2 : i32, i32, i32, i32
  }
  func.func @transform_1(%arg0: i32) -> (i32, i32) {
    %c0_i32 = arith.constant 0 : i32
    %c0_i32_0 = arith.constant 0 : i32
    %c0_i32_1 = arith.constant 0 : i32
    return %c0_i32, %c0_i32_0 : i32, i32
  }
  func.func @transform_2(%arg0: i32) -> (i32, i32) {
    %c0_i32 = arith.constant 0 : i32
    %c0_i32_0 = arith.constant 0 : i32
    %c0_i32_1 = arith.constant 0 : i32
    return %c0_i32, %c0_i32_0 : i32, i32
  }
  func.func @transform_3(%arg0: i32) -> (i32, i32) {
    %c0_i32 = arith.constant 0 : i32
    %c0_i32_0 = arith.constant 0 : i32
    %c0_i32_1 = arith.constant 0 : i32
    return %c0_i32, %c0_i32_0 : i32, i32
  }
}

</mosaic_0001>

<bundles_post_ra>
// kernel: generator_forward.4
= control target key start
LH: loop header
LB: loop body
LE: loop exit
PB: predicated region body
PF: predicated region fallthrough
CT: control target
= control target key end

     0   :  { %10 = vsyncpa [#allocation3], 0  ;;  %s2440_s0 = inlined_call_operand.vmem [shape: bf16[2,128], index: 0, kind: input, shape index: {}]   ;;  %s2441_s1 = inlined_call_operand.hbm [shape: bf16[128,2048], index: 1, kind: input, shape index: {}]   ;;  %s2442_s2 = inlined_call_operand.hbm [shape: f32[1,2048], index: 2, kind: input, shape index: {}]   ;;  %s2443_s3 = inlined_call_operand.hbm [shape: f32[1,128], index: 3, kind: input, shape index: {}]   ;;  %s2444_s4 = inlined_call_operand.hbm [shape: f32[1,128], index: 4, kind: input, shape index: {}]   ;;  %s2445_s5 = inlined_call_operand.vmem [shape: bf16[2,2048], index: 5, kind: output, shape index: {}]  }
   0x1   :  { %11 = vsyncpa [#allocation5], 0 }
   0x2   :  { %12 = vsyncpa [#allocation8], 0  ;;  %s2101_s18 = smov [#allocation4]   ;;  %s2102_s20 = smov [#allocation2]  }
   0x3   :  { %s33_s19 = sshll.u32 %s2101_s18, 4  ;;  %s20_s21 = sshll.u32 %s2102_s20, 4  ;;  %s34_s19 = int_to_ptr.vmem [resolvable:$true] %s33_s19  ;;  %s2139_s21 = int_to_ptr.vmem [resolvable:$true] %s20_s21 }
   0x4   :  { %s2007_s24 = scalar_lea.hbm %s2442_s2, 256 }
   0x5   :  { %p2008_p0 = scmp.ne.s32.totalorder %s2442_s2, %s2007_s24  ;;  %p2011_p1 = scmp.lt.u32.totalorder %s2007_s24, %s2442_s2 }
   0x7   :  { %p2013_p2 = pnand %p2011_p1, %p2008_p0 }
   0x9   :  { %2016 = shalt.err (!%p2013_p2)
}
   0xa   :  { %s2017_s29 = scalar_lea.vmem %s34_s19, 256  ;;  %p2022_p4 = scmp.lt.s32.totalorder %s34_s19, %s34_s19 }
   0xb   :  { %p2018_p3 = scmp.ne.s32.totalorder %s34_s19, %s2017_s29  ;;  %p2023_p5 = scmp.lt.s32.totalorder %s2017_s29, %s2017_s29 }
   0xd   :  { %p2024_p6 = por %p2023_p5, %p2022_p4 }
   0xf   :  { %p2025_p7 = pnand %p2024_p6, %p2018_p3 }
  0x11   :  { %2028 = shalt.err (!%p2025_p7)
}
  0x12   :  { %36 = dma.hbm_to_vmem [thread:$0]  %s2442_s2, 256, %s34_s19, [#allocation5]  }
  0x13   :  { %s2029_s9 = scalar_lea.hbm %s2441_s1, 16384 }
  0x14   :  { %p2030_p8 = scmp.ne.s32.totalorder %s2441_s1, %s2029_s9  ;;  %p2033_p9 = scmp.lt.u32.totalorder %s2029_s9, %s2441_s1 }
  0x16   :  { %p2035_p10 = pnand %p2033_p9, %p2030_p8 }
  0x18   :  { %2038 = shalt.err (!%p2035_p10)
}
  0x19   :  { %s2039_s14 = scalar_lea.vmem %s2139_s21, 16384  ;;  %p2044_p12 = scmp.lt.s32.totalorder %s2139_s21, %s2139_s21 }
  0x1a   :  { %p2040_p11 = scmp.ne.s32.totalorder %s2139_s21, %s2039_s14  ;;  %p2045_p13 = scmp.lt.s32.totalorder %s2039_s14, %s2039_s14 }
  0x1c   :  { %p2046_p0 = por %p2045_p13, %p2044_p12 }
  0x1e   :  { %p2047_p1 = pnand %p2046_p0, %p2040_p11 }
  0x20   :  { %2050 = shalt.err (!%p2047_p1)
}
  0x21   :  { %s2103_s2 = smov 1024   ;;  %s2104_s15 = smov 64  }
  0x22   :  { %26 = dma.hbm_to_vmem [thread:$0]  %s2441_s1, 16384, %s2139_s21, [#allocation3], %s2103_s2, %s2103_s2, %s2104_s15  }
  0x23   :  { %s2105_s18 = smov [#allocation6]   ;;  %s2106_s20 = smov [#allocation7]  }
  0x24   :  { %s43_s19 = sshll.u32 %s2105_s18, 4  ;;  %s53_s22 = sshll.u32 %s2106_s20, 4  ;;  %s44_s19 = int_to_ptr.vmem [resolvable:$true] %s43_s19  ;;  %s54_s22 = int_to_ptr.vmem [resolvable:$true] %s53_s22 }
  0x25   :  { %s2051_s25 = scalar_lea.hbm %s2443_s3, 16 }
  0x26   :  { %p2052_p2 = scmp.ne.s32.totalorder %s2443_s3, %s2051_s25  ;;  %p2055_p3 = scmp.lt.u32.totalorder %s2051_s25, %s2443_s3 }
  0x28   :  { %p2057_p4 = pnand %p2055_p3, %p2052_p2 }
  0x2a   :  { %2060 = shalt.err (!%p2057_p4)
}
  0x2b   :  { %s2061_s1 = scalar_lea.vmem %s44_s19, 16  ;;  %s2065_s21 = scalar_lea.vmem %s44_s19, 32 }
  0x2c   :  { %p2062_p5 = scmp.ne.s32.totalorder %s44_s19, %s2061_s1  ;;  %p2066_p6 = scmp.lt.s32.totalorder %s44_s19, %s44_s19 }
  0x2d   :  { %p2067_p7 = scmp.lt.s32.totalorder %s2065_s21, %s2061_s1 }
  0x2f   :  { %p2068_p8 = por %p2067_p7, %p2066_p6 }
  0x31   :  { %p2069_p9 = pnand %p2068_p8, %p2062_p5 }
  0x33   :  { %2072 = shalt.err (!%p2069_p9)
}
  0x34   :  { %46 = dma.hbm_to_vmem [thread:$0]  %s2443_s3, 16, %s44_s19, [#allocation5]  }
  0x35   :  { %s2073_s9 = scalar_lea.hbm %s2444_s4, 16 }
  0x36   :  { %p2074_p10 = scmp.ne.s32.totalorder %s2444_s4, %s2073_s9  ;;  %p2077_p11 = scmp.lt.u32.totalorder %s2073_s9, %s2444_s4 }
  0x38   :  { %p2079_p12 = pnand %p2077_p11, %p2074_p10 }
  0x3a   :  { %2082 = shalt.err (!%p2079_p12)
}
  0x3b   :  { %s2083_s14 = scalar_lea.vmem %s54_s22, 16  ;;  %s2087_s2 = scalar_lea.vmem %s54_s22, 32 }
  0x3c   :  { %p2084_p13 = scmp.ne.s32.totalorder %s54_s22, %s2083_s14  ;;  %p2088_p0 = scmp.lt.s32.totalorder %s54_s22, %s54_s22 }
  0x3d   :  { %p2089_p1 = scmp.lt.s32.totalorder %s2087_s2, %s2083_s14 }
  0x3f   :  { %p2090_p2 = por %p2089_p1, %p2088_p0 }
  0x41   :  { %p2091_p3 = pnand %p2090_p2, %p2084_p13 }
  0x43   :  { %2094 = shalt.err (!%p2091_p3)
}
  0x44   :  { %56 = dma.hbm_to_vmem [thread:$0]  %s2444_s4, 16, %s54_s22, [#allocation8]  }
  0x45   :  { %2095 = dma.done.wait [#allocation3], 16384  }
  0x46   :  { %2096 = vsyncadd [#allocation3], 4294950912 }
  0x47   :  { %2097 = dma.done.wait [#allocation5], 272  }
  0x48   :  { %2098 = vsyncadd [#allocation5], 4294967024 }
  0x49   :  { %2099 = dma.done.wait [#allocation8], 16  }
  0x4a   :  { %2100 = vsyncadd [#allocation8], 4294967280  ;;  %v2107_v0 = vmov 0.0   ;;  %v71_v1 = vld [vmem:[#allocation2] sm:$0xff]  ;;  %v72_v3 = vld [vmem:[#allocation2 + $0x8] sm:$0xff]  ;;  %vm1109_vm0 = vcmask 1041408  }
  0x4b   :  { %603 = vmatprep.mubr.f32.mxu0 %v2107_v0  ;;  %674 = vmatprep.mubr.f32.mxu1 %v2107_v0  ;;  %v79_v2 = vld [vmem:[#allocation2 + $0x40] sm:$0xff]  ;;  %v80_v5 = vld [vmem:[#allocation2 + $0x48] sm:$0xff]  ;;  %v73_v63 = vld [vmem:[#allocation2 + $0x10] sm:$0xff] }
  0x4c   :  { %v1869_v4 = vcombine.high %v71_v1, %v79_v2  ;;  %v1870_v6 = vcombine.low %v71_v1, %v79_v2  ;;  %v87_v7 = vld [vmem:[#allocation2 + $0x80] sm:$0xff]  ;;  %v1885_v9 = vcombine.high %v72_v3, %v80_v5  ;;  %v1886_v10 = vcombine.low %v72_v3, %v80_v5  ;;  %v88_v12 = vld [vmem:[#allocation2 + $0x88] sm:$0xff]  ;;  %v81_v1 = vld [vmem:[#allocation2 + $0x50] sm:$0xff] }
  0x4d   :  { %v95_v8 = vld [vmem:[#allocation2 + $0xc0] sm:$0xff]  ;;  %v96_v13 = vld [vmem:[#allocation2 + $0xc8] sm:$0xff]  ;;  %v74_v2 = vld [vmem:[#allocation2 + $0x18] sm:$0xff] }
  0x4e   :  { %v1871_v11 = vcombine.high %v87_v7, %v95_v8  ;;  %v103_v14 = vld [vmem:[#allocation2 + $0x100] sm:$0xff]  ;;  %1614 = vmatprep.subr.bf16.mxu0 %v1869_v4  ;;  %v1887_v15 = vcombine.high %v88_v12, %v96_v13  ;;  %v104_v17 = vld [vmem:[#allocation2 + $0x108] sm:$0xff]  ;;  %1646 = vmatprep.subr.bf16.mxu1 %v1885_v9  ;;  %v1872_v19 = vcombine.low %v87_v7, %v95_v8  ;;  %v82_v3 = vld [vmem:[#allocation2 + $0x58] sm:$0xff] }
  0x4f   :  { %v111_v16 = vld [vmem:[#allocation2 + $0x140] sm:$0xff]  ;;  %v112_v18 = vld [vmem:[#allocation2 + $0x148] sm:$0xff]  ;;  %1616 = vmatpush1.bf16.msra.mxu0 %v1870_v6  ;;  %1648 = vmatpush1.bf16.msra.mxu1 %v1886_v10  ;;  %v1888_v20 = vcombine.low %v88_v12, %v96_v13  ;;  %v1901_v7 = vcombine.high %v73_v63, %v81_v1  ;;  %v1917_v8 = vcombine.high %v74_v2, %v82_v3  ;;  %v89_v9 = vld [vmem:[#allocation2 + $0x90] sm:$0xff] }
  0x50   :  { %1618 = vmatprep.subr.bf16.mxu0 %v1871_v11  ;;  %v1873_v21 = vcombine.high %v103_v14, %v111_v16  ;;  %1650 = vmatprep.subr.bf16.mxu1 %v1887_v15  ;;  %v1889_v22 = vcombine.high %v104_v17, %v112_v18  ;;  %v119_v23 = vld [vmem:[#allocation2 + $0x180] sm:$0xff]  ;;  %v120_v25 = vld [vmem:[#allocation2 + $0x188] sm:$0xff]  ;;  %v1874_v27 = vcombine.low %v103_v14, %v111_v16  ;;  %v97_v10 = vld [vmem:[#allocation2 + $0xd0] sm:$0xff] }
  0x51   :  { %v127_v24 = vld [vmem:[#allocation2 + $0x1c0] sm:$0xff]  ;;  %v128_v26 = vld [vmem:[#allocation2 + $0x1c8] sm:$0xff]  ;;  %v1890_v28 = vcombine.low %v104_v17, %v112_v18  ;;  %v90_v12 = vld [vmem:[#allocation2 + $0x98] sm:$0xff]  ;;  %v1902_v14 = vcombine.low %v73_v63, %v81_v1  ;;  %v1918_v15 = vcombine.low %v74_v2, %v82_v3  ;;  %v1903_v16 = vcombine.high %v89_v9, %v97_v10 }
  0x52   :  { %v1875_v29 = vcombine.high %v119_v23, %v127_v24  ;;  %v1891_v30 = vcombine.high %v120_v25, %v128_v26  ;;  %v135_v31 = vld [vmem:[#allocation2 + $0x200] sm:$0xff]  ;;  %v136_v33 = vld [vmem:[#allocation2 + $0x208] sm:$0xff]  ;;  %v1876_v35 = vcombine.low %v119_v23, %v127_v24  ;;  %v1892_v36 = vcombine.low %v120_v25, %v128_v26  ;;  %v98_v13 = vld [vmem:[#allocation2 + $0xd8] sm:$0xff] }
  0x53   :  { %1620 = vmatpush1.bf16.msra.mxu0 %v1872_v19  ;;  %1652 = vmatpush1.bf16.msra.mxu1 %v1888_v20  ;;  %v143_v32 = vld [vmem:[#allocation2 + $0x240] sm:$0xff]  ;;  %v144_v34 = vld [vmem:[#allocation2 + $0x248] sm:$0xff]  ;;  %v1919_v17 = vcombine.high %v90_v12, %v98_v13  ;;  %v105_v18 = vld [vmem:[#allocation2 + $0x110] sm:$0xff]  ;;  %v1920_v23 = vcombine.low %v90_v12, %v98_v13 }
  0x54   :  { %1622 = vmatprep.subr.bf16.mxu0 %v1873_v21  ;;  %1654 = vmatprep.subr.bf16.mxu1 %v1889_v22  ;;  %v1877_v37 = vcombine.high %v135_v31, %v143_v32  ;;  %v1893_v38 = vcombine.high %v136_v33, %v144_v34  ;;  %v151_v39 = vld [vmem:[#allocation2 + $0x280] sm:$0xff]  ;;  %v152_v41 = vld [vmem:[#allocation2 + $0x288] sm:$0xff]  ;;  %v1878_v43 = vcombine.low %v135_v31, %v143_v32  ;;  %v113_v19 = vld [vmem:[#allocation2 + $0x150] sm:$0xff] }
  0x55   :  { %v159_v40 = vld [vmem:[#allocation2 + $0x2c0] sm:$0xff]  ;;  %v160_v42 = vld [vmem:[#allocation2 + $0x2c8] sm:$0xff]  ;;  %v1894_v44 = vcombine.low %v136_v33, %v144_v34  ;;  %v106_v20 = vld [vmem:[#allocation2 + $0x118] sm:$0xff]  ;;  %v1904_v22 = vcombine.low %v89_v9, %v97_v10  ;;  %v1905_v24 = vcombine.high %v105_v18, %v113_v19 }
  0x56   :  { %v1879_v45 = vcombine.high %v151_v39, %v159_v40  ;;  %v1895_v46 = vcombine.high %v152_v41, %v160_v42  ;;  %v167_v47 = vld [vmem:[#allocation2 + $0x300] sm:$0xff]  ;;  %v168_v49 = vld [vmem:[#allocation2 + $0x308] sm:$0xff]  ;;  %v1880_v51 = vcombine.low %v151_v39, %v159_v40  ;;  %v1896_v52 = vcombine.low %v152_v41, %v160_v42  ;;  %v114_v21 = vld [vmem:[#allocation2 + $0x158] sm:$0xff] }
  0x57   :  { %1624 = vmatpush1.bf16.msra.mxu0 %v1874_v27  ;;  %1656 = vmatpush1.bf16.msra.mxu1 %v1890_v28  ;;  %v175_v48 = vld [vmem:[#allocation2 + $0x340] sm:$0xff]  ;;  %v176_v50 = vld [vmem:[#allocation2 + $0x348] sm:$0xff]  ;;  %v1921_v25 = vcombine.high %v106_v20, %v114_v21  ;;  %v121_v26 = vld [vmem:[#allocation2 + $0x190] sm:$0xff]  ;;  %v1922_v31 = vcombine.low %v106_v20, %v114_v21 }
  0x58   :  { %1626 = vmatprep.subr.bf16.mxu0 %v1875_v29  ;;  %1658 = vmatprep.subr.bf16.mxu1 %v1891_v30  ;;  %v1881_v53 = vcombine.high %v167_v47, %v175_v48  ;;  %v1897_v54 = vcombine.high %v168_v49, %v176_v50  ;;  %v183_v55 = vld [vmem:[#allocation2 + $0x380] sm:$0xff]  ;;  %v184_v57 = vld [vmem:[#allocation2 + $0x388] sm:$0xff]  ;;  %v1882_v59 = vcombine.low %v167_v47, %v175_v48  ;;  %v129_v27 = vld [vmem:[#allocation2 + $0x1d0] sm:$0xff] }
  0x59   :  { %v191_v56 = vld [vmem:[#allocation2 + $0x3c0] sm:$0xff]  ;;  %v192_v58 = vld [vmem:[#allocation2 + $0x3c8] sm:$0xff]  ;;  %v1898_v60 = vcombine.low %v168_v49, %v176_v50  ;;  %v122_v28 = vld [vmem:[#allocation2 + $0x198] sm:$0xff]  ;;  %v1906_v30 = vcombine.low %v105_v18, %v113_v19  ;;  %v1907_v32 = vcombine.high %v121_v26, %v129_v27 }
  0x5a   :  { %v1883_v61 = vcombine.high %v183_v55, %v191_v56  ;;  %v1899_v62 = vcombine.high %v184_v57, %v192_v58  ;;  %v1884_v4 = vcombine.low %v183_v55, %v191_v56  ;;  %v69_v5 = vld [vmem:[%s2440_s0] sm:$0x1]  ;;  %v1900_v6 = vcombine.low %v184_v57, %v192_v58  ;;  %v130_v29 = vld [vmem:[#allocation2 + $0x1d8] sm:$0xff]  ;;  %v137_v34 = vld [vmem:[#allocation2 + $0x210] sm:$0xff] }
  0x5b   :  { %1628 = vmatpush1.bf16.msra.mxu0 %v1876_v35  ;;  %1660 = vmatpush1.bf16.msra.mxu1 %v1892_v36  ;;  %v2199_v11 = vunpack.c.l.bf16 %v69_v5  ;;  %v1923_v33 = vcombine.high %v122_v28, %v130_v29  ;;  %v145_v35 = vld [vmem:[#allocation2 + $0x250] sm:$0xff]  ;;  %v138_v36 = vld [vmem:[#allocation2 + $0x218] sm:$0xff]  ;;  %v1924_v39 = vcombine.low %v122_v28, %v130_v29  ;;  %v75_v3 = vld [vmem:[#allocation2 + $0x20] sm:$0xff] }
  0x5c   :  { %1630 = vmatprep.subr.bf16.mxu0 %v1877_v37  ;;  %1662 = vmatprep.subr.bf16.mxu1 %v1893_v38  ;;  %v146_v37 = vld [vmem:[#allocation2 + $0x258] sm:$0xff]  ;;  %v1908_v38 = vcombine.low %v121_v26, %v129_v27  ;;  %v1909_v40 = vcombine.high %v137_v34, %v145_v35  ;;  %v153_v42 = vld [vmem:[#allocation2 + $0x290] sm:$0xff]  ;;  %v76_v5 = vld [vmem:[#allocation2 + $0x28] sm:$0xff] }
  0x5d   :  { %v1925_v41 = vcombine.high %v138_v36, %v146_v37  ;;  %v1926_v47 = vcombine.low %v138_v36, %v146_v37  ;;  %v169_v50 = vld [vmem:[#allocation2 + $0x310] sm:$0xff]  ;;  %v91_v12 = vld [vmem:[#allocation2 + $0xa0] sm:$0xff] }
  0x5e   :  { %v185_v58 = vld [vmem:[#allocation2 + $0x390] sm:$0xff]  ;;  %v99_v13 = vld [vmem:[#allocation2 + $0xe0] sm:$0xff] }
  0x5f   :  { %1632 = vmatpush1.bf16.msra.mxu0 %v1878_v43  ;;  %1664 = vmatpush1.bf16.msra.mxu1 %v1894_v44  ;;  %v161_v43 = vld [vmem:[#allocation2 + $0x2d0] sm:$0xff]  ;;  %v154_v44 = vld [vmem:[#allocation2 + $0x298] sm:$0xff]  ;;  %v1935_v18 = vcombine.high %v91_v12, %v99_v13  ;;  %v107_v20 = vld [vmem:[#allocation2 + $0x120] sm:$0xff] }
  0x60   :  { %1634 = vmatprep.subr.bf16.mxu0 %v1879_v45  ;;  %1666 = vmatprep.subr.bf16.mxu1 %v1895_v46  ;;  %v162_v45 = vld [vmem:[#allocation2 + $0x2d8] sm:$0xff]  ;;  %v1910_v46 = vcombine.low %v137_v34, %v145_v35  ;;  %v1911_v48 = vcombine.high %v153_v42, %v161_v43  ;;  %v115_v21 = vld [vmem:[#allocation2 + $0x160] sm:$0xff] }
  0x61   :  { %v1927_v49 = vcombine.high %v154_v44, %v162_v45  ;;  %v1928_v55 = vcombine.low %v154_v44, %v162_v45  ;;  %v1937_v26 = vcombine.high %v107_v20, %v115_v21  ;;  %v123_v28 = vld [vmem:[#allocation2 + $0x1a0] sm:$0xff] }
  0x62   :  { %v131_v29 = vld [vmem:[#allocation2 + $0x1e0] sm:$0xff] }
  0x63   :  { %1636 = vmatpush1.bf16.msra.mxu0 %v1880_v51  ;;  %1668 = vmatpush1.bf16.msra.mxu1 %v1896_v52  ;;  %v177_v51 = vld [vmem:[#allocation2 + $0x350] sm:$0xff]  ;;  %v170_v52 = vld [vmem:[#allocation2 + $0x318] sm:$0xff]  ;;  %v1939_v34 = vcombine.high %v123_v28, %v131_v29  ;;  %v139_v36 = vld [vmem:[#allocation2 + $0x220] sm:$0xff] }
  0x64   :  { %1638 = vmatprep.subr.bf16.mxu0 %v1881_v53  ;;  %1670 = vmatprep.subr.bf16.mxu1 %v1897_v54  ;;  %v178_v53 = vld [vmem:[#allocation2 + $0x358] sm:$0xff]  ;;  %v1912_v54 = vcombine.low %v153_v42, %v161_v43  ;;  %v1913_v56 = vcombine.high %v169_v50, %v177_v51  ;;  %v147_v37 = vld [vmem:[#allocation2 + $0x260] sm:$0xff] }
  0x65   :  { %v1929_v57 = vcombine.high %v170_v52, %v178_v53  ;;  %v1930_v63 = vcombine.low %v170_v52, %v178_v53  ;;  %v1941_v42 = vcombine.high %v139_v36, %v147_v37  ;;  %v155_v44 = vld [vmem:[#allocation2 + $0x2a0] sm:$0xff] }
  0x66   :  { %v163_v45 = vld [vmem:[#allocation2 + $0x2e0] sm:$0xff] }
  0x67   :  { %1640 = vmatpush1.bf16.msra.mxu0 %v1882_v59  ;;  %1672 = vmatpush1.bf16.msra.mxu1 %v1898_v60  ;;  %v193_v59 = vld [vmem:[#allocation2 + $0x3d0] sm:$0xff]  ;;  %v186_v60 = vld [vmem:[#allocation2 + $0x398] sm:$0xff]  ;;  %v171_v52 = vld [vmem:[#allocation2 + $0x320] sm:$0xff] }
  0x68   :  { %1642 = vmatprep.subr.bf16.mxu0 %v1883_v61  ;;  %1674 = vmatprep.subr.bf16.mxu1 %v1899_v62  ;;  %v194_v61 = vld [vmem:[#allocation2 + $0x3d8] sm:$0xff]  ;;  %v1914_v62 = vcombine.low %v169_v50, %v177_v51  ;;  %v1915_v1 = vcombine.high %v185_v58, %v193_v59  ;;  %v1943_v50 = vcombine.high %v155_v44, %v163_v45  ;;  %v179_v53 = vld [vmem:[#allocation2 + $0x360] sm:$0xff] }
  0x69   :  { %v1931_v2 = vcombine.high %v186_v60, %v194_v61 }
  0x6b   :  { %1644 = vmatpush1.bf16.msra.mxu0 %v1884_v4  ;;  %1676 = vmatpush1.bf16.msra.mxu1 %v1900_v6  ;;  %v83_v4 = vld [vmem:[#allocation2 + $0x60] sm:$0xff]  ;;  %v84_v6 = vld [vmem:[#allocation2 + $0x68] sm:$0xff] }
  0x6c   :  { %1678 = vmatprep.subr.bf16.mxu0 %v1901_v7  ;;  %1710 = vmatprep.subr.bf16.mxu1 %v1917_v8  ;;  %v1916_v7 = vcombine.low %v185_v58, %v193_v59  ;;  %v1932_v8 = vcombine.low %v186_v60, %v194_v61  ;;  %v1933_v9 = vcombine.high %v75_v3, %v83_v4  ;;  %v187_v60 = vld [vmem:[#allocation2 + $0x3a0] sm:$0xff] }
  0x6d   :  { %v1949_v10 = vcombine.high %v76_v5, %v84_v6  ;;  %v1945_v58 = vcombine.high %v171_v52, %v179_v53  ;;  %v195_v61 = vld [vmem:[#allocation2 + $0x3e0] sm:$0xff] }
  0x6e   :  { %604 = vmatmul.mubr.f32.vlgmr.msra.gmra.mrb[0].mxu0 %v2199_v11  ;;  %675 = vmatmul.mubr.f32.vlgmr.msra.gmra.mrb[0].mxu1 %v2199_v11 }
  0x6f   :  { %1680 = vmatpush1.bf16.msra.mxu0 %v1902_v14  ;;  %1712 = vmatpush1.bf16.msra.mxu1 %v1918_v15  ;;  %v92_v14 = vld [vmem:[#allocation2 + $0xa8] sm:$0xff] }
  0x70   :  { %1682 = vmatprep.subr.bf16.mxu0 %v1903_v16  ;;  %1714 = vmatprep.subr.bf16.mxu1 %v1919_v17  ;;  %v100_v15 = vld [vmem:[#allocation2 + $0xe8] sm:$0xff]  ;;  %v1934_v16 = vcombine.low %v75_v3, %v83_v4  ;;  %v1950_v17 = vcombine.low %v76_v5, %v84_v6  ;;  %v1947_v3 = vcombine.high %v187_v60, %v195_v61  ;;  %v77_v5 = vld [vmem:[#allocation2 + $0x30] sm:$0xff] }
  0x71   :  { %745 = vmatprep.mubr.f32.mxu0 %v2107_v0  ;;  %816 = vmatprep.mubr.f32.mxu1 %v2107_v0  ;;  %v1951_v19 = vcombine.high %v92_v14, %v100_v15  ;;  %v85_v6 = vld [vmem:[#allocation2 + $0x70] sm:$0xff] }
  0x73   :  { %1684 = vmatpush1.bf16.msra.mxu0 %v1904_v22  ;;  %1716 = vmatpush1.bf16.msra.mxu1 %v1920_v23  ;;  %v108_v22 = vld [vmem:[#allocation2 + $0x128] sm:$0xff] }
  0x74   :  { %1686 = vmatprep.subr.bf16.mxu0 %v1905_v24  ;;  %1718 = vmatprep.subr.bf16.mxu1 %v1921_v25  ;;  %v116_v23 = vld [vmem:[#allocation2 + $0x168] sm:$0xff]  ;;  %v1936_v24 = vcombine.low %v91_v12, %v99_v13  ;;  %v1952_v25 = vcombine.low %v92_v14, %v100_v15  ;;  %v1965_v12 = vcombine.high %v77_v5, %v85_v6  ;;  %v93_v14 = vld [vmem:[#allocation2 + $0xb0] sm:$0xff] }
  0x75   :  { %v1953_v27 = vcombine.high %v108_v22, %v116_v23  ;;  %v101_v15 = vld [vmem:[#allocation2 + $0xf0] sm:$0xff] }
  0x77   :  { %1688 = vmatpush1.bf16.msra.mxu0 %v1906_v30  ;;  %1720 = vmatpush1.bf16.msra.mxu1 %v1922_v31  ;;  %v124_v30 = vld [vmem:[#allocation2 + $0x1a8] sm:$0xff] }
  0x78   :  { %1690 = vmatprep.subr.bf16.mxu0 %v1907_v32  ;;  %1722 = vmatprep.subr.bf16.mxu1 %v1923_v33  ;;  %v132_v31 = vld [vmem:[#allocation2 + $0x1e8] sm:$0xff]  ;;  %v1938_v32 = vcombine.low %v107_v20, %v115_v21  ;;  %v1954_v33 = vcombine.low %v108_v22, %v116_v23  ;;  %v1967_v20 = vcombine.high %v93_v14, %v101_v15  ;;  %v109_v22 = vld [vmem:[#allocation2 + $0x130] sm:$0xff] }
  0x79   :  { %v1955_v35 = vcombine.high %v124_v30, %v132_v31  ;;  %v117_v23 = vld [vmem:[#allocation2 + $0x170] sm:$0xff] }
  0x7b   :  { %1692 = vmatpush1.bf16.msra.mxu0 %v1908_v38  ;;  %1724 = vmatpush1.bf16.msra.mxu1 %v1924_v39  ;;  %v140_v38 = vld [vmem:[#allocation2 + $0x228] sm:$0xff] }
  0x7c   :  { %1694 = vmatprep.subr.bf16.mxu0 %v1909_v40  ;;  %1726 = vmatprep.subr.bf16.mxu1 %v1925_v41  ;;  %v148_v39 = vld [vmem:[#allocation2 + $0x268] sm:$0xff]  ;;  %v1940_v40 = vcombine.low %v123_v28, %v131_v29  ;;  %v1956_v41 = vcombine.low %v124_v30, %v132_v31  ;;  %v1969_v28 = vcombine.high %v109_v22, %v117_v23  ;;  %v125_v30 = vld [vmem:[#allocation2 + $0x1b0] sm:$0xff] }
  0x7d   :  { %v1957_v43 = vcombine.high %v140_v38, %v148_v39  ;;  %v133_v31 = vld [vmem:[#allocation2 + $0x1f0] sm:$0xff] }
  0x7f   :  { %1696 = vmatpush1.bf16.msra.mxu0 %v1910_v46  ;;  %1728 = vmatpush1.bf16.msra.mxu1 %v1926_v47  ;;  %v156_v46 = vld [vmem:[#allocation2 + $0x2a8] sm:$0xff] }
  0x80   :  { %1698 = vmatprep.subr.bf16.mxu0 %v1911_v48  ;;  %1730 = vmatprep.subr.bf16.mxu1 %v1927_v49  ;;  %v164_v47 = vld [vmem:[#allocation2 + $0x2e8] sm:$0xff]  ;;  %v1942_v48 = vcombine.low %v139_v36, %v147_v37  ;;  %v1958_v49 = vcombine.low %v140_v38, %v148_v39  ;;  %v1971_v36 = vcombine.high %v125_v30, %v133_v31  ;;  %v141_v38 = vld [vmem:[#allocation2 + $0x230] sm:$0xff] }
  0x81   :  { %v1959_v51 = vcombine.high %v156_v46, %v164_v47  ;;  %v149_v39 = vld [vmem:[#allocation2 + $0x270] sm:$0xff] }
  0x83   :  { %1700 = vmatpush1.bf16.msra.mxu0 %v1912_v54  ;;  %1732 = vmatpush1.bf16.msra.mxu1 %v1928_v55  ;;  %v172_v54 = vld [vmem:[#allocation2 + $0x328] sm:$0xff] }
  0x84   :  { %1702 = vmatprep.subr.bf16.mxu0 %v1913_v56  ;;  %1734 = vmatprep.subr.bf16.mxu1 %v1929_v57  ;;  %v180_v55 = vld [vmem:[#allocation2 + $0x368] sm:$0xff]  ;;  %v1944_v56 = vcombine.low %v155_v44, %v163_v45  ;;  %v1960_v57 = vcombine.low %v156_v46, %v164_v47  ;;  %v1973_v44 = vcombine.high %v141_v38, %v149_v39  ;;  %v157_v45 = vld [vmem:[#allocation2 + $0x2b0] sm:$0xff]  ;;  %v158_v47 = vld [vmem:[#allocation2 + $0x2b8] sm:$0xff] }
  0x85   :  { %v1961_v59 = vcombine.high %v172_v54, %v180_v55  ;;  %v165_v46 = vld [vmem:[#allocation2 + $0x2f0] sm:$0xff] }
  0x87   :  { %1704 = vmatpush1.bf16.msra.mxu0 %v1914_v62  ;;  %1736 = vmatpush1.bf16.msra.mxu1 %v1930_v63  ;;  %v188_v62 = vld [vmem:[#allocation2 + $0x3a8] sm:$0xff] }
  0x88   :  { %1706 = vmatprep.subr.bf16.mxu0 %v1915_v1  ;;  %1738 = vmatprep.subr.bf16.mxu1 %v1931_v2  ;;  %v196_v63 = vld [vmem:[#allocation2 + $0x3e8] sm:$0xff]  ;;  %v1946_v1 = vcombine.low %v171_v52, %v179_v53  ;;  %v1962_v2 = vcombine.low %v172_v54, %v180_v55  ;;  %v173_v53 = vld [vmem:[#allocation2 + $0x330] sm:$0xff]  ;;  %v174_v55 = vld [vmem:[#allocation2 + $0x338] sm:$0xff] }
  0x89   :  { %v1963_v4 = vcombine.high %v188_v62, %v196_v63  ;;  %v181_v54 = vld [vmem:[#allocation2 + $0x370] sm:$0xff] }
  0x8b   :  { %1708 = vmatpush1.bf16.msra.mxu0 %v1916_v7  ;;  %1740 = vmatpush1.bf16.msra.mxu1 %v1932_v8  ;;  %v78_v7 = vld [vmem:[#allocation2 + $0x38] sm:$0xff] }
  0x8c   :  { %1742 = vmatprep.subr.bf16.mxu0 %v1933_v9  ;;  %1774 = vmatprep.subr.bf16.mxu1 %v1949_v10  ;;  %v86_v8 = vld [vmem:[#allocation2 + $0x78] sm:$0xff]  ;;  %v1948_v9 = vcombine.low %v187_v60, %v195_v61  ;;  %v1964_v10 = vcombine.low %v188_v62, %v196_v63  ;;  %v189_v61 = vld [vmem:[#allocation2 + $0x3b0] sm:$0xff] }
  0x8d   :  { %v1981_v13 = vcombine.high %v78_v7, %v86_v8  ;;  %v197_v62 = vld [vmem:[#allocation2 + $0x3f0] sm:$0xff]  ;;  %v190_v63 = vld [vmem:[#allocation2 + $0x3b8] sm:$0xff] }
  0x8e   :  { %746 = vmatmul.mubr.f32.vlgmr.msra.gmra.mrb[2].mxu0 %v2199_v11  ;;  %817 = vmatmul.mubr.f32.vlgmr.msra.gmra.mrb[2].mxu1 %v2199_v11 }
  0x8f   :  { %1744 = vmatpush1.bf16.msra.mxu0 %v1934_v16  ;;  %1776 = vmatpush1.bf16.msra.mxu1 %v1950_v17  ;;  %v94_v16 = vld [vmem:[#allocation2 + $0xb8] sm:$0xff] }
  0x90   :  { %1746 = vmatprep.subr.bf16.mxu0 %v1935_v18  ;;  %1778 = vmatprep.subr.bf16.mxu1 %v1951_v19  ;;  %v102_v17 = vld [vmem:[#allocation2 + $0xf8] sm:$0xff]  ;;  %v1966_v18 = vcombine.low %v77_v5, %v85_v6  ;;  %v1982_v19 = vcombine.low %v78_v7, %v86_v8  ;;  %v1980_v6 = vcombine.low %v189_v61, %v197_v62  ;;  %v459_v8 = vlaneseq }
  0x91   :  { %887 = vmatprep.mubr.f32.mxu0 %v2107_v0  ;;  %958 = vmatprep.mubr.f32.mxu1 %v2107_v0  ;;  %v1983_v21 = vcombine.high %v94_v16, %v102_v17 }
  0x93   :  { %1748 = vmatpush1.bf16.msra.mxu0 %v1936_v24  ;;  %1780 = vmatpush1.bf16.msra.mxu1 %v1952_v25  ;;  %v110_v24 = vld [vmem:[#allocation2 + $0x138] sm:$0xff] }
  0x94   :  { %1750 = vmatprep.subr.bf16.mxu0 %v1937_v26  ;;  %1782 = vmatprep.subr.bf16.mxu1 %v1953_v27  ;;  %v118_v25 = vld [vmem:[#allocation2 + $0x178] sm:$0xff]  ;;  %v1968_v26 = vcombine.low %v93_v14, %v101_v15  ;;  %v1984_v27 = vcombine.low %v94_v16, %v102_v17 }
  0x95   :  { %v1985_v29 = vcombine.high %v110_v24, %v118_v25 }
  0x97   :  { %1752 = vmatpush1.bf16.msra.mxu0 %v1938_v32  ;;  %1784 = vmatpush1.bf16.msra.mxu1 %v1954_v33  ;;  %v126_v32 = vld [vmem:[#allocation2 + $0x1b8] sm:$0xff] }
  0x98   :  { %1754 = vmatprep.subr.bf16.mxu0 %v1939_v34  ;;  %1786 = vmatprep.subr.bf16.mxu1 %v1955_v35  ;;  %v134_v33 = vld [vmem:[#allocation2 + $0x1f8] sm:$0xff]  ;;  %v1970_v34 = vcombine.low %v109_v22, %v117_v23  ;;  %v1986_v35 = vcombine.low %v110_v24, %v118_v25 }
  0x99   :  { %v1987_v37 = vcombine.high %v126_v32, %v134_v33 }
  0x9b   :  { %1756 = vmatpush1.bf16.msra.mxu0 %v1940_v40  ;;  %1788 = vmatpush1.bf16.msra.mxu1 %v1956_v41  ;;  %v142_v40 = vld [vmem:[#allocation2 + $0x238] sm:$0xff] }
  0x9c   :  { %1758 = vmatprep.subr.bf16.mxu0 %v1941_v42  ;;  %1790 = vmatprep.subr.bf16.mxu1 %v1957_v43  ;;  %v150_v41 = vld [vmem:[#allocation2 + $0x278] sm:$0xff]  ;;  %v1972_v42 = vcombine.low %v125_v30, %v133_v31  ;;  %v1988_v43 = vcombine.low %v126_v32, %v134_v33 }
  0x9f   :  { %1760 = vmatpush1.bf16.msra.mxu0 %v1942_v48  ;;  %1792 = vmatpush1.bf16.msra.mxu1 %v1958_v49  ;;  %v166_v48 = vld [vmem:[#allocation2 + $0x2f8] sm:$0xff]  ;;  %v1974_v49 = vcombine.low %v141_v38, %v149_v39 }
  0xa0   :  { %1762 = vmatprep.subr.bf16.mxu0 %v1943_v50  ;;  %1794 = vmatprep.subr.bf16.mxu1 %v1959_v51  ;;  %v1990_v50 = vcombine.low %v142_v40, %v150_v41  ;;  %v1975_v51 = vcombine.high %v157_v45, %v165_v46  ;;  %v1991_v52 = vcombine.high %v158_v47, %v166_v48 }
  0xa3   :  { %1764 = vmatpush1.bf16.msra.mxu0 %v1944_v56  ;;  %1796 = vmatpush1.bf16.msra.mxu1 %v1960_v57  ;;  %v182_v56 = vld [vmem:[#allocation2 + $0x378] sm:$0xff]  ;;  %v1976_v57 = vcombine.low %v157_v45, %v165_v46 }
  0xa4   :  { %1766 = vmatprep.subr.bf16.mxu0 %v1945_v58  ;;  %1798 = vmatprep.subr.bf16.mxu1 %v1961_v59  ;;  %v1992_v58 = vcombine.low %v158_v47, %v166_v48  ;;  %v1977_v59 = vcombine.high %v173_v53, %v181_v54  ;;  %v1993_v60 = vcombine.high %v174_v55, %v182_v56 }
  0xa7   :  { %1768 = vmatpush1.bf16.msra.mxu0 %v1946_v1  ;;  %1800 = vmatpush1.bf16.msra.mxu1 %v1962_v2  ;;  %v198_v1 = vld [vmem:[#allocation2 + $0x3f8] sm:$0xff]  ;;  %v1978_v2 = vcombine.low %v173_v53, %v181_v54 }
  0xa8   :  { %1770 = vmatprep.subr.bf16.mxu0 %v1947_v3  ;;  %1802 = vmatprep.subr.bf16.mxu1 %v1963_v4  ;;  %v1994_v3 = vcombine.low %v174_v55, %v182_v56  ;;  %v1979_v4 = vcombine.high %v189_v61, %v197_v62  ;;  %v1995_v5 = vcombine.high %v190_v63, %v198_v1 }
  0xa9   :  { %v1996_v7 = vcombine.low %v190_v63, %v198_v1 }
  0xab   :  { %1772 = vmatpush1.bf16.msra.mxu0 %v1948_v9  ;;  %1804 = vmatpush1.bf16.msra.mxu1 %v1964_v10  ;;  %v2215_v9 = vshrl.u32 %v459_v8, 7 }
  0xac   :  { %1806 = vmatprep.subr.bf16.mxu0 %v1965_v12  ;;  %1838 = vmatprep.subr.bf16.mxu1 %v1981_v13  ;;  %v455_v12 = vld [vmem:[#allocation4] sm:$0xff] }
  0xad   :  { %v2218_v10 = vsub.s32 0, %v2215_v9  ;;  %v469_v13 = vsub.s32 2, %v2215_v9  ;;  %v465_v14 = vsub.s32 1, %v2215_v9  ;;  %v473_v15 = vsub.s32 3, %v2215_v9 }
  0xae   :  { %888 = vmatmul.mubr.f32.vlgmr.msra.gmra.mrb[4].mxu0 %v2199_v11  ;;  %959 = vmatmul.mubr.f32.vlgmr.msra.gmra.mrb[4].mxu1 %v2199_v11 }
  0xaf   :  { %1808 = vmatpush1.bf16.msra.mxu0 %v1966_v18  ;;  %1840 = vmatpush1.bf16.msra.mxu1 %v1982_v19  ;;  %v462_v16 = vrot.slane %v455_v12, %v2218_v10  ;;  %v470_v17 = vrot.slane %v455_v12, %v469_v13  ;;  %v474_v18 = vrot.slane %v455_v12, %v473_v15 }
  0xb0   :  { %1810 = vmatprep.subr.bf16.mxu0 %v1967_v20  ;;  %1842 = vmatprep.subr.bf16.mxu1 %v1983_v21 }
  0xb1   :  { %1029 = vmatprep.mubr.f32.mxu0 %v2107_v0  ;;  %1100 = vmatprep.mubr.f32.mxu1 %v2107_v0  ;;  %v1989_v0 = vcombine.high %v142_v40, %v150_v41 }
  0xb3   :  { %1812 = vmatpush1.bf16.msra.mxu0 %v1968_v26  ;;  %1844 = vmatpush1.bf16.msra.mxu1 %v1984_v27 }
  0xb4   :  { %1814 = vmatprep.subr.bf16.mxu0 %v1969_v28  ;;  %1846 = vmatprep.subr.bf16.mxu1 %v1985_v29 }
  0xb7   :  { %1816 = vmatpush1.bf16.msra.mxu0 %v1970_v34  ;;  %1848 = vmatpush1.bf16.msra.mxu1 %v1986_v35 }
  0xb8   :  { %1818 = vmatprep.subr.bf16.mxu0 %v1971_v36  ;;  %1850 = vmatprep.subr.bf16.mxu1 %v1987_v37 }
  0xbb   :  { %1820 = vmatpush1.bf16.msra.mxu0 %v1972_v42  ;;  %1852 = vmatpush1.bf16.msra.mxu1 %v1988_v43 }
  0xbc   :  { %1822 = vmatprep.subr.bf16.mxu0 %v1973_v44  ;;  %1854 = vmatprep.subr.bf16.mxu1 %v1989_v0 }
  0xbf   :  { %1824 = vmatpush1.bf16.msra.mxu0 %v1974_v49  ;;  %1856 = vmatpush1.bf16.msra.mxu1 %v1990_v50 }
  0xc0   :  { %1826 = vmatprep.subr.bf16.mxu0 %v1975_v51  ;;  %1858 = vmatprep.subr.bf16.mxu1 %v1991_v52 }
  0xc3   :  { %1828 = vmatpush1.bf16.msra.mxu0 %v1976_v57  ;;  %1860 = vmatpush1.bf16.msra.mxu1 %v1992_v58  ;;  %v477_v57 = vsub.s32 4, %v2215_v9  ;;  %v485_v58 = vsub.s32 6, %v2215_v9 }
  0xc4   :  { %1830 = vmatprep.subr.bf16.mxu0 %v1977_v59  ;;  %1862 = vmatprep.subr.bf16.mxu1 %v1993_v60  ;;  %v481_v59 = vsub.s32 5, %v2215_v9  ;;  %v489_v60 = vsub.s32 7, %v2215_v9 }
  0xc5   :  { %v478_v61 = vrot.slane %v455_v12, %v477_v57  ;;  %v486_v62 = vrot.slane %v455_v12, %v485_v58 }
  0xc6   :  { %v482_v63 = vrot.slane %v455_v12, %v481_v59  ;;  %v490_v1 = vrot.slane %v455_v12, %v489_v60 }
  0xc7   :  { %1832 = vmatpush1.bf16.msra.mxu0 %v1978_v2  ;;  %1864 = vmatpush1.bf16.msra.mxu1 %v1994_v3 }
  0xc8   :  { %1834 = vmatprep.subr.bf16.mxu0 %v1979_v4  ;;  %1866 = vmatprep.subr.bf16.mxu1 %v1995_v5 }
  0xcb   :  { %1836 = vmatpush1.bf16.msra.mxu0 %v1980_v6  ;;  %1868 = vmatpush1.bf16.msra.mxu1 %v1996_v7 }
  0xce   :  { %1030 = vmatmul.mubr.f32.vlgmr.msra.gmra.mrb[6].mxu0 %v2199_v11  ;;  %1101 = vmatmul.mubr.f32.vlgmr.msra.gmra.mrb[6].mxu1 %v2199_v11  ;;  %v466_v11 = vrot.slane %v455_v12, %v465_v14 }
 0x141   :  { %v605_v19 = vpop.f32.mrb[0].mxu0  ;;  %v676_v21 = vpop.f32.mrb[0].mxu1 }
 0x142   :  { %v2230_v20 = vadd.f32 %v605_v19, %v462_v16  ;;  %v607_v22 = vpop.f32.mrb[1].mxu0  ;;  %v2232_v23 = vadd.f32 %v676_v21, %v470_v17  ;;  %v678_v25 = vpop.f32.mrb[1].mxu1 }
 0x143   :  { %v2234_v24 = vadd.f32 %v607_v22, %v466_v11  ;;  %v2238_v27 = vadd.f32 %v678_v25, %v474_v18 }
 0x144   :  { %v1110_v26 = vsel %vm1109_vm0, %v2230_v20, 0.0  ;;  %v1124_v29 = vsel %vm1109_vm0, %v2232_v23, 0.0 }
 0x145   :  { %v1111_v28 = vrot.slane %v1110_v26, 4  ;;  %v1117_v30 = vsel %vm1109_vm0, %v2234_v24, 0.0  ;;  %v1125_v31 = vrot.slane %v1124_v29, 4  ;;  %v1131_v33 = vsel %vm1109_vm0, %v2238_v27, 0.0 }
 0x146   :  { %v1118_v32 = vrot.slane %v1117_v30, 4  ;;  %v1132_v35 = vrot.slane %v1131_v33, 4 }
 0x147   :  { %v1112_v34 = vadd.f32 %v1111_v28, %v1110_v26  ;;  %v1126_v36 = vadd.f32 %v1125_v31, %v1124_v29 }
 0x148   :  { %v1119_v37 = vadd.f32 %v1118_v32, %v1117_v30  ;;  %v1133_v39 = vadd.f32 %v1132_v35, %v1131_v33 }
 0x149   :  { %v1113_v38 = vrot.slane %v1112_v34, 2  ;;  %v1127_v40 = vrot.slane %v1126_v36, 2 }
 0x14a   :  { %v1120_v41 = vrot.slane %v1119_v37, 2  ;;  %v1134_v43 = vrot.slane %v1133_v39, 2 }
 0x14b   :  { %v1114_v42 = vadd.f32 %v1113_v38, %v1112_v34  ;;  %v1128_v44 = vadd.f32 %v1127_v40, %v1126_v36 }
 0x14c   :  { %v1121_v0 = vadd.f32 %v1120_v41, %v1119_v37  ;;  %v1135_v46 = vadd.f32 %v1134_v43, %v1133_v39 }
 0x14d   :  { %v1115_v45 = vrot.slane %v1114_v42, 1  ;;  %v1129_v47 = vrot.slane %v1128_v44, 1 }
 0x14e   :  { %v1122_v48 = vrot.slane %v1121_v0, 1  ;;  %v1136_v51 = vrot.slane %v1135_v46, 1 }
 0x14f   :  { %v1116_v49 = vadd.f32 %v1115_v45, %v1114_v42  ;;  %v1130_v52 = vadd.f32 %v1129_v47, %v1128_v44 }
 0x150   :  { %v1123_v50 = vadd.f32 %v1122_v48, %v1121_v0  ;;  %v1137_v54 = vadd.f32 %v1136_v51, %v1135_v46 }
 0x152   :  { %v1223_v53 = vadd.f32 %v1123_v50, %v1116_v49  ;;  %v456_v50 = vld [vmem:[#allocation4 + $0x8] sm:$0xff] }
 0x153   :  { %v494_v51 = vrot.slane %v456_v50, %v2218_v10 }
 0x154   :  { %v1224_v55 = vadd.f32 %v1223_v53, %v1130_v52  ;;  %v502_v52 = vrot.slane %v456_v50, %v469_v13  ;;  %v498_v53 = vrot.slane %v456_v50, %v465_v14 }
 0x156   :  { %v1225_v56 = vadd.f32 %v1224_v55, %v1137_v54  ;;  %v506_v54 = vrot.slane %v456_v50, %v473_v15 }
 0x161   :  { %v747_v2 = vpop.f32.mrb[2].mxu0  ;;  %v818_v4 = vpop.f32.mrb[2].mxu1 }
 0x162   :  { %v2258_v3 = vadd.f32 %v747_v2, %v478_v61  ;;  %v749_v5 = vpop.f32.mrb[3].mxu0  ;;  %v2260_v6 = vadd.f32 %v818_v4, %v486_v62  ;;  %v820_v8 = vpop.f32.mrb[3].mxu1 }
 0x163   :  { %v2262_v7 = vadd.f32 %v749_v5, %v482_v63  ;;  %v2266_v17 = vadd.f32 %v820_v8, %v490_v1 }
 0x164   :  { %v1138_v16 = vsel %vm1109_vm0, %v2258_v3, 0.0  ;;  %v1152_v18 = vsel %vm1109_vm0, %v2260_v6, 0.0 }
 0x165   :  { %v1139_v11 = vrot.slane %v1138_v16, 4  ;;  %v1145_v12 = vsel %vm1109_vm0, %v2262_v7, 0.0  ;;  %v1153_v19 = vrot.slane %v1152_v18, 4  ;;  %v1159_v22 = vsel %vm1109_vm0, %v2266_v17, 0.0 }
 0x166   :  { %v1146_v21 = vrot.slane %v1145_v12, 4  ;;  %v1160_v26 = vrot.slane %v1159_v22, 4 }
 0x167   :  { %v1140_v25 = vadd.f32 %v1139_v11, %v1138_v16  ;;  %v1154_v28 = vadd.f32 %v1153_v19, %v1152_v18 }
 0x168   :  { %v1147_v29 = vadd.f32 %v1146_v21, %v1145_v12  ;;  %v1161_v31 = vadd.f32 %v1160_v26, %v1159_v22 }
 0x169   :  { %v1141_v30 = vrot.slane %v1140_v25, 2  ;;  %v1155_v32 = vrot.slane %v1154_v28, 2 }
 0x16a   :  { %v1148_v33 = vrot.slane %v1147_v29, 2  ;;  %v1162_v35 = vrot.slane %v1161_v31, 2 }
 0x16b   :  { %v1142_v34 = vadd.f32 %v1141_v30, %v1140_v25  ;;  %v1156_v36 = vadd.f32 %v1155_v32, %v1154_v28 }
 0x16c   :  { %v1149_v37 = vadd.f32 %v1148_v33, %v1147_v29  ;;  %v1163_v39 = vadd.f32 %v1162_v35, %v1161_v31 }
 0x16d   :  { %v1143_v38 = vrot.slane %v1142_v34, 1  ;;  %v1157_v42 = vrot.slane %v1156_v36, 1 }
 0x16e   :  { %v1150_v40 = vrot.slane %v1149_v37, 1  ;;  %v1164_v0 = vrot.slane %v1163_v39, 1 }
 0x16f   :  { %v1144_v41 = vadd.f32 %v1143_v38, %v1142_v34  ;;  %v1158_v45 = vadd.f32 %v1157_v42, %v1156_v36 }
 0x170   :  { %v1151_v43 = vadd.f32 %v1150_v40, %v1149_v37  ;;  %v1165_v47 = vadd.f32 %v1164_v0, %v1163_v39 }
 0x171   :  { %v1226_v44 = vadd.f32 %v1225_v56, %v1144_v41 }
 0x173   :  { %v1227_v46 = vadd.f32 %v1226_v44, %v1151_v43 }
 0x175   :  { %v1228_v48 = vadd.f32 %v1227_v46, %v1158_v45  ;;  %v510_v45 = vrot.slane %v456_v50, %v477_v57  ;;  %v518_v46 = vrot.slane %v456_v50, %v485_v58 }
 0x177   :  { %v1229_v49 = vadd.f32 %v1228_v48, %v1165_v47  ;;  %v514_v47 = vrot.slane %v456_v50, %v481_v59  ;;  %v522_v48 = vrot.slane %v456_v50, %v489_v60 }
 0x181   :  { %v889_v55 = vpop.f32.mrb[4].mxu0  ;;  %v960_v61 = vpop.f32.mrb[4].mxu1 }
 0x182   :  { %v2281_v56 = vadd.f32 %v889_v55, %v494_v51  ;;  %v891_v62 = vpop.f32.mrb[5].mxu0  ;;  %v2283_v63 = vadd.f32 %v960_v61, %v502_v52  ;;  %v962_v2 = vpop.f32.mrb[5].mxu1 }
 0x183   :  { %v2285_v1 = vadd.f32 %v891_v62, %v498_v53  ;;  %v2289_v13 = vadd.f32 %v962_v2, %v506_v54 }
 0x184   :  { %v1166_v4 = vsel %vm1109_vm0, %v2281_v56, 0.0  ;;  %v1180_v14 = vsel %vm1109_vm0, %v2283_v63, 0.0 }
 0x185   :  { %v1167_v5 = vrot.slane %v1166_v4, 4  ;;  %v1173_v15 = vsel %vm1109_vm0, %v2285_v1, 0.0  ;;  %v1181_v8 = vrot.slane %v1180_v14, 4  ;;  %v1187_v11 = vsel %vm1109_vm0, %v2289_v13, 0.0 }
 0x186   :  { %v1174_v16 = vrot.slane %v1173_v15, 4  ;;  %v1188_v12 = vrot.slane %v1187_v11, 4 }
 0x187   :  { %v1168_v18 = vadd.f32 %v1167_v5, %v1166_v4  ;;  %v1182_v19 = vadd.f32 %v1181_v8, %v1180_v14 }
 0x188   :  { %v1175_v21 = vadd.f32 %v1174_v16, %v1173_v15  ;;  %v1189_v25 = vadd.f32 %v1188_v12, %v1187_v11 }
 0x189   :  { %v1169_v22 = vrot.slane %v1168_v18, 2  ;;  %v1183_v26 = vrot.slane %v1182_v19, 2 }
 0x18a   :  { %v1176_v28 = vrot.slane %v1175_v21, 2  ;;  %v1190_v30 = vrot.slane %v1189_v25, 2 }
 0x18b   :  { %v1170_v29 = vadd.f32 %v1169_v22, %v1168_v18  ;;  %v1184_v31 = vadd.f32 %v1183_v26, %v1182_v19 }
 0x18c   :  { %v1177_v32 = vadd.f32 %v1176_v28, %v1175_v21  ;;  %v1191_v34 = vadd.f32 %v1190_v30, %v1189_v25 }
 0x18d   :  { %v1171_v33 = vrot.slane %v1170_v29, 1  ;;  %v1185_v37 = vrot.slane %v1184_v31, 1 }
 0x18e   :  { %v1178_v35 = vrot.slane %v1177_v32, 1  ;;  %v1192_v40 = vrot.slane %v1191_v34, 1 }
 0x18f   :  { %v1172_v36 = vadd.f32 %v1171_v33, %v1170_v29  ;;  %v1186_v41 = vadd.f32 %v1185_v37, %v1184_v31 }
 0x190   :  { %v1179_v38 = vadd.f32 %v1178_v35, %v1177_v32  ;;  %v1193_v43 = vadd.f32 %v1192_v40, %v1191_v34 }
 0x191   :  { %v1230_v39 = vadd.f32 %v1229_v49, %v1172_v36 }
 0x193   :  { %v1231_v42 = vadd.f32 %v1230_v39, %v1179_v38 }
 0x195   :  { %v1232_v44 = vadd.f32 %v1231_v42, %v1186_v41 }
 0x197   :  { %v1233_v0 = vadd.f32 %v1232_v44, %v1193_v43 }
 0x1a1   :  { %v1031_v51 = vpop.f32.mrb[6].mxu0  ;;  %v1102_v52 = vpop.f32.mrb[6].mxu1 }
 0x1a2   :  { %v1032_v49 = vadd.f32 %v1031_v51, %v510_v45  ;;  %v1033_v53 = vpop.f32.mrb[7].mxu0  ;;  %v1103_v54 = vadd.f32 %v1102_v52, %v518_v46  ;;  %v1104_v61 = vpop.f32.mrb[7].mxu1 }
 0x1a3   :  { %v1034_v55 = vadd.f32 %v1033_v53, %v514_v47  ;;  %v1105_v2 = vadd.f32 %v1104_v61, %v522_v48 }
 0x1a4   :  { %v1194_v62 = vsel %vm1109_vm0, %v1032_v49, 0.0  ;;  %v1208_v4 = vsel %vm1109_vm0, %v1103_v54, 0.0 }
 0x1a5   :  { %v1195_v57 = vrot.slane %v1194_v62, 4  ;;  %v1201_v58 = vsel %vm1109_vm0, %v1034_v55, 0.0  ;;  %v1209_v5 = vrot.slane %v1208_v4, 4  ;;  %v1215_v14 = vsel %vm1109_vm0, %v1105_v2, 0.0 }
 0x1a6   :  { %v1202_v59 = vrot.slane %v1201_v58, 4  ;;  %v1216_v50 = vrot.slane %v1215_v14, 4 }
 0x1a7   :  { %v1196_v60 = vadd.f32 %v1195_v57, %v1194_v62  ;;  %v1210_v15 = vadd.f32 %v1209_v5, %v1208_v4 }
 0x1a8   :  { %v1203_v8 = vadd.f32 %v1202_v59, %v1201_v58  ;;  %v1217_v11 = vadd.f32 %v1216_v50, %v1215_v14 }
 0x1a9   :  { %v1197_v16 = vrot.slane %v1196_v60, 2  ;;  %v1211_v18 = vrot.slane %v1210_v15, 2 }
 0x1aa   :  { %v1204_v12 = vrot.slane %v1203_v8, 2  ;;  %v1218_v21 = vrot.slane %v1217_v11, 2 }
 0x1ab   :  { %v1198_v19 = vadd.f32 %v1197_v16, %v1196_v60  ;;  %v1212_v22 = vadd.f32 %v1211_v18, %v1210_v15 }
 0x1ac   :  { %v1205_v25 = vadd.f32 %v1204_v12, %v1203_v8  ;;  %v1219_v28 = vadd.f32 %v1218_v21, %v1217_v11 }
 0x1ad   :  { %v1199_v26 = vrot.slane %v1198_v19, 1  ;;  %v1213_v31 = vrot.slane %v1212_v22, 1 }
 0x1ae   :  { %v1206_v29 = vrot.slane %v1205_v25, 1  ;;  %v1220_v34 = vrot.slane %v1219_v28, 1 }
 0x1af   :  { %v1200_v30 = vadd.f32 %v1199_v26, %v1198_v19  ;;  %v1214_v35 = vadd.f32 %v1213_v31, %v1212_v22 }
 0x1b0   :  { %v1207_v32 = vadd.f32 %v1206_v29, %v1205_v25  ;;  %v1221_v37 = vadd.f32 %v1220_v34, %v1219_v28 }
 0x1b1   :  { %v1234_v33 = vadd.f32 %v1233_v0, %v1200_v30 }
 0x1b3   :  { %v1235_v36 = vadd.f32 %v1234_v33, %v1207_v32 }
 0x1b5   :  { %v1236_v38 = vadd.f32 %v1235_v36, %v1214_v35 }
 0x1b7   :  { %v1237_v39 = vadd.f32 %v1236_v38, %v1221_v37 }
 0x1b9   :  { %v1238_v40 = vmul.f32 0.03125, %v1237_v39 }
 0x1bb   :  { %v1242_v41 = vrot.slane %v1238_v40, %v2218_v10 }
 0x1bd   :  { %v2311_v42 = vsub.f32 %v2230_v20, %v1242_v41  ;;  %v2314_v43 = vsub.f32 %v2234_v24, %v1242_v41  ;;  %v2317_v44 = vsub.f32 %v2232_v23, %v1242_v41  ;;  %v2320_v0 = vsub.f32 %v2238_v27, %v1242_v41 }
 0x1be   :  { %v2323_v45 = vsub.f32 %v2258_v3, %v1242_v41  ;;  %v2326_v46 = vsub.f32 %v2262_v7, %v1242_v41  ;;  %v2329_v47 = vsub.f32 %v2260_v6, %v1242_v41  ;;  %v2332_v20 = vsub.f32 %v2266_v17, %v1242_v41 }
 0x1bf   :  { %v2335_v24 = vsub.f32 %v2281_v56, %v1242_v41  ;;  %v2338_v23 = vsub.f32 %v2285_v1, %v1242_v41  ;;  %v2341_v27 = vsub.f32 %v2283_v63, %v1242_v41  ;;  %v2344_v3 = vsub.f32 %v2289_v13, %v1242_v41 }
 0x1c0   :  { %v2346_v7 = vsub.f32 %v1032_v49, %v1242_v41  ;;  %v2348_v48 = vsub.f32 %v1034_v55, %v1242_v41  ;;  %v2350_v6 = vsub.f32 %v1103_v54, %v1242_v41  ;;  %v2352_v17 = vsub.f32 %v1105_v2, %v1242_v41 }
 0x1c1   :  { %v1259_v56 = vmul.f32 %v2311_v42, %v2311_v42  ;;  %v1260_v1 = vmul.f32 %v2314_v43, %v2314_v43  ;;  %v1261_v63 = vmul.f32 %v2317_v44, %v2317_v44  ;;  %v1262_v49 = vmul.f32 %v2320_v0, %v2320_v0 }
 0x1c2   :  { %v1263_v52 = vmul.f32 %v2323_v45, %v2323_v45  ;;  %v1264_v61 = vmul.f32 %v2326_v46, %v2326_v46  ;;  %v1265_v2 = vmul.f32 %v2329_v47, %v2329_v47  ;;  %v1266_v14 = vmul.f32 %v2332_v20, %v2332_v20 }
 0x1c3   :  { %v1275_v13 = vsel %vm1109_vm0, %v1259_v56, 0.0  ;;  %v1282_v51 = vsel %vm1109_vm0, %v1260_v1, 0.0  ;;  %v1289_v55 = vsel %vm1109_vm0, %v1261_v63, 0.0  ;;  %v1296_v62 = vsel %vm1109_vm0, %v1262_v49, 0.0 }
 0x1c4   :  { %v1276_v53 = vrot.slane %v1275_v13, 4  ;;  %v1283_v54 = vrot.slane %v1282_v51, 4  ;;  %v1290_v57 = vrot.slane %v1289_v55, 4  ;;  %v1303_v5 = vsel %vm1109_vm0, %v1263_v52, 0.0 }
 0x1c5   :  { %v1297_v59 = vrot.slane %v1296_v62, 4  ;;  %v1310_v60 = vsel %vm1109_vm0, %v1264_v61, 0.0  ;;  %v1304_v15 = vrot.slane %v1303_v5, 4  ;;  %v1317_v8 = vsel %vm1109_vm0, %v1265_v2, 0.0 }
 0x1c6   :  { %v1277_v4 = vadd.f32 %v1276_v53, %v1275_v13  ;;  %v1284_v58 = vadd.f32 %v1283_v54, %v1282_v51  ;;  %v1291_v50 = vadd.f32 %v1290_v57, %v1289_v55  ;;  %v1267_v18 = vmul.f32 %v2335_v24, %v2335_v24 }
 0x1c7   :  { %v1298_v12 = vadd.f32 %v1297_v59, %v1296_v62  ;;  %v1311_v19 = vrot.slane %v1310_v60, 4  ;;  %v1318_v21 = vrot.slane %v1317_v8, 4  ;;  %v1324_v22 = vsel %vm1109_vm0, %v1266_v14, 0.0 }
 0x1c8   :  { %v1278_v16 = vrot.slane %v1277_v4, 2  ;;  %v1285_v11 = vrot.slane %v1284_v58, 2  ;;  %v1268_v25 = vmul.f32 %v2338_v23, %v2338_v23  ;;  %v1292_v26 = vrot.slane %v1291_v50, 2 }
 0x1c9   :  { %v1305_v28 = vadd.f32 %v1304_v15, %v1303_v5  ;;  %v1269_v29 = vmul.f32 %v2341_v27, %v2341_v27  ;;  %v1299_v32 = vrot.slane %v1298_v12, 2  ;;  %v1312_v33 = vadd.f32 %v1311_v19, %v1310_v60 }
 0x1ca   :  { %v1279_v30 = vadd.f32 %v1278_v16, %v1277_v4  ;;  %v1286_v31 = vadd.f32 %v1285_v11, %v1284_v58  ;;  %v1325_v34 = vrot.slane %v1324_v22, 4  ;;  %v1331_v35 = vsel %vm1109_vm0, %v1267_v18, 0.0 }
 0x1cb   :  { %v1319_v36 = vadd.f32 %v1318_v21, %v1317_v8  ;;  %v1270_v37 = vmul.f32 %v2344_v3, %v2344_v3  ;;  %v1293_v38 = vadd.f32 %v1292_v26, %v1291_v50  ;;  %v1306_v39 = vrot.slane %v1305_v28, 2 }
 0x1cc   :  { %v1338_v40 = vsel %vm1109_vm0, %v1268_v25, 0.0  ;;  %v1271_v41 = vmul.f32 %v2346_v7, %v2346_v7  ;;  %v1280_v56 = vrot.slane %v1279_v30, 1  ;;  %v1287_v1 = vrot.slane %v1286_v31, 1 }
 0x1cd   :  { %v1332_v63 = vrot.slane %v1331_v35, 4  ;;  %v1300_v13 = vadd.f32 %v1299_v32, %v1298_v12  ;;  %v1313_v51 = vrot.slane %v1312_v33, 2  ;;  %v1326_v49 = vadd.f32 %v1325_v34, %v1324_v22 }
 0x1ce   :  { %v1345_v52 = vsel %vm1109_vm0, %v1269_v29, 0.0  ;;  %v1272_v53 = vmul.f32 %v2348_v48, %v2348_v48  ;;  %v1273_v54 = vmul.f32 %v2350_v6, %v2350_v6  ;;  %v1320_v55 = vrot.slane %v1319_v36, 2 }
 0x1cf   :  { %v1339_v61 = vrot.slane %v1338_v40, 4  ;;  %v1274_v62 = vmul.f32 %v2352_v17, %v2352_v17  ;;  %v1294_v2 = vrot.slane %v1293_v38, 1  ;;  %v1307_v57 = vadd.f32 %v1306_v39, %v1305_v28 }
 0x1d0   :  { %v1352_v4 = vsel %vm1109_vm0, %v1270_v37, 0.0  ;;  %v1281_v58 = vadd.f32 %v1280_v56, %v1279_v30  ;;  %v1288_v5 = vadd.f32 %v1287_v1, %v1286_v31  ;;  %v1333_v59 = vadd.f32 %v1332_v63, %v1331_v35 }
 0x1d1   :  { %v1346_v14 = vrot.slane %v1345_v52, 4  ;;  %v1301_v60 = vrot.slane %v1300_v13, 1  ;;  %v1314_v50 = vadd.f32 %v1313_v51, %v1312_v33  ;;  %v1327_v15 = vrot.slane %v1326_v49, 2 }
 0x1d2   :  { %v1359_v8 = vsel %vm1109_vm0, %v1271_v41, 0.0  ;;  %v1321_v16 = vadd.f32 %v1320_v55, %v1319_v36  ;;  %v1340_v11 = vadd.f32 %v1339_v61, %v1338_v40  ;;  %v1353_v18 = vrot.slane %v1352_v4, 4 }
 0x1d3   :  { %v1295_v12 = vadd.f32 %v1294_v2, %v1293_v38  ;;  %v1308_v19 = vrot.slane %v1307_v57, 1  ;;  %v1366_v21 = vsel %vm1109_vm0, %v1272_v53, 0.0  ;;  %v1373_v22 = vsel %vm1109_vm0, %v1273_v54, 0.0 }
 0x1d4   :  { %v1334_v25 = vrot.slane %v1333_v59, 2  ;;  %v1347_v26 = vadd.f32 %v1346_v14, %v1345_v52  ;;  %v1360_v28 = vrot.slane %v1359_v8, 4  ;;  %v1388_v29 = vadd.f32 %v1288_v5, %v1281_v58 }
 0x1d5   :  { %v1302_v30 = vadd.f32 %v1301_v60, %v1300_v13  ;;  %v1315_v31 = vrot.slane %v1314_v50, 1  ;;  %v1328_v32 = vadd.f32 %v1327_v15, %v1326_v49  ;;  %v1380_v33 = vsel %vm1109_vm0, %v1274_v62, 0.0 }
 0x1d6   :  { %v1341_v34 = vrot.slane %v1340_v11, 2  ;;  %v1354_v35 = vadd.f32 %v1353_v18, %v1352_v4  ;;  %v1367_v36 = vrot.slane %v1366_v21, 4  ;;  %v1389_v37 = vadd.f32 %v1388_v29, %v1295_v12 }
 0x1d7   :  { %v1309_v39 = vadd.f32 %v1308_v19, %v1307_v57  ;;  %v1322_v38 = vrot.slane %v1321_v16, 1  ;;  %v1374_v40 = vrot.slane %v1373_v22, 4  ;;  %v1335_v41 = vadd.f32 %v1334_v25, %v1333_v59 }
 0x1d8   :  { %v1348_v56 = vrot.slane %v1347_v26, 2  ;;  %v1361_v1 = vadd.f32 %v1360_v28, %v1359_v8  ;;  %v1390_v63 = vadd.f32 %v1389_v37, %v1302_v30  ;;  %v1316_v51 = vadd.f32 %v1315_v31, %v1314_v50 }
 0x1d9   :  { %v1329_v52 = vrot.slane %v1328_v32, 1  ;;  %v1381_v53 = vrot.slane %v1380_v33, 4  ;;  %v1342_v54 = vadd.f32 %v1341_v34, %v1340_v11  ;;  %v1355_v13 = vrot.slane %v1354_v35, 2 }
 0x1da   :  { %v1368_v55 = vadd.f32 %v1367_v36, %v1366_v21  ;;  %v1391_v49 = vadd.f32 %v1390_v63, %v1309_v39  ;;  %v1323_v61 = vadd.f32 %v1322_v38, %v1321_v16  ;;  %v1375_v62 = vadd.f32 %v1374_v40, %v1373_v22 }
 0x1db   :  { %v1336_v2 = vrot.slane %v1335_v41, 1  ;;  %v1349_v4 = vadd.f32 %v1348_v56, %v1347_v26  ;;  %v1362_v58 = vrot.slane %v1361_v1, 2  ;;  %v1330_v57 = vadd.f32 %v1329_v52, %v1328_v32 }
 0x1dc   :  { %v1392_v5 = vadd.f32 %v1391_v49, %v1316_v51  ;;  %v1382_v14 = vadd.f32 %v1381_v53, %v1380_v33  ;;  %v1343_v60 = vrot.slane %v1342_v54, 1  ;;  %v1356_v59 = vadd.f32 %v1355_v13, %v1354_v35  ;;  %v1107_v49 = vld [vmem:[#allocation6] sm:$0x1] }
 0x1dd   :  { %v1369_v15 = vrot.slane %v1368_v55, 2  ;;  %v1376_v18 = vrot.slane %v1375_v62, 2  ;;  %v1337_v50 = vadd.f32 %v1336_v2, %v1335_v41  ;;  %v1350_v12 = vrot.slane %v1349_v4, 1 }
 0x1de   :  { %v1393_v8 = vadd.f32 %v1392_v5, %v1323_v61  ;;  %v1363_v19 = vadd.f32 %v1362_v58, %v1361_v1  ;;  %v1383_v25 = vrot.slane %v1382_v14, 2  ;;  %v1344_v21 = vadd.f32 %v1343_v60, %v1342_v54 }
 0x1df   :  { %v1357_v28 = vrot.slane %v1356_v59, 1  ;;  %v1370_v16 = vadd.f32 %v1369_v15, %v1368_v55  ;;  %v1351_v29 = vadd.f32 %v1350_v12, %v1349_v4  ;;  %v1377_v30 = vadd.f32 %v1376_v18, %v1375_v62 }
 0x1e0   :  { %v1394_v11 = vadd.f32 %v1393_v8, %v1330_v57  ;;  %v1364_v26 = vrot.slane %v1363_v19, 1  ;;  %v1384_v34 = vadd.f32 %v1383_v25, %v1382_v14  ;;  %v2108_v13 = vmov 1966171168  }
 0x1e1   :  { %v1358_v32 = vadd.f32 %v1357_v28, %v1356_v59  ;;  %v1371_v33 = vrot.slane %v1370_v16, 1  ;;  %v1378_v37 = vrot.slane %v1377_v30, 1  ;;  %v1500_v55 = vunpack.c.l.s4 %v2108_v13  ;;  %v1604_v59 = vld [vmem:[#allocation7] ss:$0 sm:$0xff] }
 0x1e2   :  { %v1395_v22 = vadd.f32 %v1394_v11, %v1337_v50  ;;  %v1365_v36 = vadd.f32 %v1364_v26, %v1363_v19  ;;  %v1385_v40 = vrot.slane %v1384_v34, 1 }
 0x1e3   :  { %v1372_v38 = vadd.f32 %v1371_v33, %v1370_v16  ;;  %v1379_v56 = vadd.f32 %v1378_v37, %v1377_v30  ;;  %v1501_v62 = vunpack.c.0.s8 %v1500_v55 }
 0x1e4   :  { %v1396_v31 = vadd.f32 %v1395_v22, %v1344_v21  ;;  %v1386_v63 = vadd.f32 %v1385_v40, %v1384_v34 }
 0x1e5   :  { %v2404_v58 = vsub.s32 %v1501_v62, %v2215_v9 }
 0x1e6   :  { %v1397_v35 = vadd.f32 %v1396_v31, %v1351_v29 }
 0x1e8   :  { %v1398_v39 = vadd.f32 %v1397_v35, %v1358_v32 }
 0x1ea   :  { %v1399_v41 = vadd.f32 %v1398_v39, %v1365_v36 }
 0x1ec   :  { %v1400_v1 = vadd.f32 %v1399_v41, %v1372_v38 }
 0x1ee   :  { %v1401_v51 = vadd.f32 %v1400_v1, %v1379_v56 }
 0x1f0   :  { %v1402_v52 = vadd.f32 %v1401_v51, %v1386_v63 }
 0x1f2   :  { %v1403_v53 = vmul.f32 0.03125, %v1402_v52 }
 0x1f4   :  { %v1404_v54 = vadd.f32 1e-05, %v1403_v53 }
 0x1f6   :  { %2005 = vrsqrt.f32 %v1404_v54 }
 0x200   :  { %v2006_v61 = vpop.eup %2005 }
 0x201   :  { %v1406_v2 = vmul.f32 %v2006_v61, %v1107_v49 }
 0x203   :  { %v1410_v4 = vrot.slane %v1406_v2, %v2218_v10 }
 0x205   :  { %v1411_v5 = vmul.f32 %v1410_v4, %v2311_v42  ;;  %v1412_v57 = vmul.f32 %v1410_v4, %v2314_v43  ;;  %v1413_v14 = vmul.f32 %v1410_v4, %v2317_v44  ;;  %v1414_v60 = vmul.f32 %v1410_v4, %v2320_v0 }
 0x206   :  { %v1415_v15 = vmul.f32 %v1410_v4, %v2323_v45  ;;  %v1416_v8 = vmul.f32 %v1410_v4, %v2326_v46  ;;  %v1417_v18 = vmul.f32 %v1410_v4, %v2329_v47  ;;  %v1418_v10 = vmul.f32 %v1410_v4, %v2332_v20 }
 0x207   :  { %v1419_v9 = vmul.f32 %v1410_v4, %v2335_v24  ;;  %v1420_v50 = vmul.f32 %v1410_v4, %v2338_v23  ;;  %v1421_v42 = vmul.f32 %v1410_v4, %v2341_v27  ;;  %v1422_v43 = vmul.f32 %v1410_v4, %v2344_v3 }
 0x208   :  { %v1423_v44 = vmul.f32 %v1410_v4, %v2346_v7  ;;  %v1424_v0 = vmul.f32 %v1410_v4, %v2348_v48  ;;  %v1425_v45 = vmul.f32 %v1410_v4, %v2350_v6  ;;  %v1426_v46 = vmul.f32 %v1410_v4, %v2352_v17 }
 0x209   :  { %v1431_v12 = vadd.f32 %v1604_v59, %v1411_v5  ;;  %v1432_v47 = vadd.f32 %v1604_v59, %v1412_v57  ;;  %v1433_v19 = vadd.f32 %v1604_v59, %v1413_v14  ;;  %v1434_v20 = vadd.f32 %v1604_v59, %v1414_v60 }
 0x20a   :  { %v1435_v11 = vadd.f32 %v1604_v59, %v1415_v15  ;;  %v1436_v24 = vadd.f32 %v1604_v59, %v1416_v8  ;;  %v1437_v25 = vadd.f32 %v1604_v59, %v1417_v18  ;;  %v1438_v23 = vadd.f32 %v1604_v59, %v1418_v10 }
 0x20b   :  { %v1439_v21 = vadd.f32 %v1604_v59, %v1419_v9  ;;  %v1440_v27 = vadd.f32 %v1604_v59, %v1420_v50  ;;  %v1441_v28 = vadd.f32 %v1604_v59, %v1421_v42  ;;  %v1442_v3 = vadd.f32 %v1604_v59, %v1422_v43 }
 0x20c   :  { %v1443_v16 = vadd.f32 %v1604_v59, %v1423_v44  ;;  %v1444_v7 = vadd.f32 %v1604_v59, %v1424_v0  ;;  %v1445_v22 = vadd.f32 %v1604_v59, %v1425_v45  ;;  %v1446_v48 = vadd.f32 %v1604_v59, %v1426_v46 }
 0x20d   :  { %v1447_v29 = vmax.f32 %v1431_v12, 0.0  ;;  %v1448_v6 = vmax.f32 %v1432_v47, 0.0  ;;  %v1449_v26 = vmax.f32 %v1433_v19, 0.0  ;;  %v1450_v17 = vmax.f32 %v1434_v20, 0.0 }
 0x20e   :  { %v1451_v30 = vmax.f32 %v1435_v11, 0.0  ;;  %v1452_v31 = vmax.f32 %v1436_v24, 0.0  ;;  %v1453_v32 = vmax.f32 %v1437_v25, 0.0  ;;  %v1454_v33 = vmax.f32 %v1438_v23, 0.0 }
 0x20f   :  { %v1455_v34 = vmax.f32 %v1439_v21, 0.0  ;;  %v1456_v35 = vmax.f32 %v1440_v27, 0.0  ;;  %v1457_v36 = vmax.f32 %v1441_v28, 0.0  ;;  %v1458_v37 = vmax.f32 %v1442_v3, 0.0 }
 0x210   :  { %v1459_v39 = vmax.f32 %v1443_v16, 0.0  ;;  %v1460_v38 = vmax.f32 %v1444_v7, 0.0  ;;  %v1461_v40 = vmax.f32 %v1445_v22, 0.0  ;;  %v1462_v41 = vmax.f32 %v1446_v48, 0.0 }
 0x211   :  { %v1605_v56 = vpack.c.bf16 %v1448_v6, %v1447_v29  ;;  %v1606_v1 = vpack.c.bf16 %v1450_v17, %v1449_v26  ;;  %v1607_v63 = vpack.c.bf16 %v1452_v31, %v1451_v30  ;;  %v1608_v51 = vpack.c.bf16 %v1454_v33, %v1453_v32 }
 0x212   :  { %v1609_v52 = vpack.c.bf16 %v1456_v35, %v1455_v34  ;;  %v1610_v53 = vpack.c.bf16 %v1458_v37, %v1457_v36  ;;  %v1611_v54 = vpack.c.bf16 %v1460_v38, %v1459_v39  ;;  %v1612_v13 = vpack.c.bf16 %v1462_v41, %v1461_v40 }
 0x213   :  { %v1505_v55 = vrot.slane %v1605_v56, %v2404_v58  ;;  %v1512_v49 = vrot.slane %v1606_v1, %v2404_v58  ;;  %v1519_v61 = vrot.slane %v1607_v63, %v2404_v58  ;;  %v1526_v62 = vrot.slane %v1608_v51, %v2404_v58 }
 0x214   :  { %v1554_v2 = vrot.slane %v1609_v52, %v2404_v58  ;;  %v1561_v4 = vrot.slane %v1610_v53, %v2404_v58  ;;  %v1568_v5 = vrot.slane %v1611_v54, %v2404_v58  ;;  %v1575_v57 = vrot.slane %v1612_v13, %v2404_v58 }
 0x215   :  { %v1527_v14 = vcombine.low %v1505_v55, %v1512_v49  ;;  %v1528_v60 = vcombine.low %v1519_v61, %v1526_v62 }
 0x216   :  { %v1576_v59 = vcombine.low %v1554_v2, %v1561_v4  ;;  %v1577_v15 = vcombine.low %v1568_v5, %v1575_v57 }
 0x217   :  { %v1535_v8 = vrot.slane %v1527_v14, %v2404_v58  ;;  %v1542_v18 = vrot.slane %v1528_v60, %v2404_v58 }
 0x218   :  { %v1584_v10 = vrot.slane %v1576_v59, %v2404_v58  ;;  %v1591_v9 = vrot.slane %v1577_v15, %v2404_v58 }
 0x219   :  { %v1543_v50 = vcombine.low %v1535_v8, %v1542_v18 }
 0x21a   :  { %v1592_v42 = vcombine.low %v1584_v10, %v1591_v9 }
 0x21b   :  { %1595 = vst [vmem:[%s2445_s5] sm:$0xff] %v1543_v50 }
 0x21c   :  { %1596 = vst [vmem:[%s2445_s5 + $0x8] sm:$0xff] %v1592_v42 }
 0x21d   :  { %1601 = vsyncpa [#allocation3], 1 }
 0x21e   :  { %1602 = vsyncpa [#allocation5], 1 }
 0x21f   :  { %1603 = vsyncpa [#allocation8], 1 }

// kernel: generator_forward.5
= control target key start
LH: loop header
LB: loop body
LE: loop exit
PB: predicated region body
PF: predicated region fallthrough
CT: control target
= control target key end

     0   :  { %v2876_v1 = vmov 0.0   ;;  %vm118_vm0 = vcmask 1042432   ;;  %vm119_vm1 = vcmask 1046532   ;;  %vm435_vm3 = vcmask 1041408   ;;  %s3743_s1 = inlined_call_operand.vmem [shape: bf16[1152,256], index: 1, kind: input, shape index: {}]   ;;  %s3744_s0 = inlined_call_operand.vmem [shape: bf16[2,6,6,128], index: 0, kind: input, shape index: {}]   ;;  %s3745_s2 = inlined_call_operand.vmem [shape: f32[1,256], index: 2, kind: input, shape index: {}]   ;;  %s3746_s4 = inlined_call_operand.vmem [shape: f32[1,64], index: 4, kind: input, shape index: {}]   ;;  %s3747_s3 = inlined_call_operand.vmem [shape: f32[1,64], index: 3, kind: input, shape index: {}]   ;;  %s3748_s5 = inlined_call_operand.vmem [shape: bf16[32,256], index: 5, kind: output, shape index: {}]  }
   0x1   :  { %v2658_v0 = vld [vmem:[%s3743_s1 + $0x84] ss:$8 sps:$4 sm:$0xff]   ;;  %273 = vmatprep.mubr.f32.mxu1 %v2876_v1  ;;  %985 = vmatprep.mubr.f32.mxu0 %v2876_v1  ;;  %v2662_v3 = vld [vmem:[%s3743_s1 + $0x80] ss:$8 sps:$4 sm:$0xff]   ;;  %v2664_v5 = vld [vmem:[%s3743_s1 + $0x94] ss:$8 sps:$4 sm:$0xff]  }
   0x2   :  { %v2660_v2 = vld [vmem:[%s3743_s1 + $0x204] ss:$8 sps:$4 sm:$0xff]   ;;  %2145 = vmatprep.subr.bf16.mxu1 %v2658_v0  ;;  %v2663_v4 = vld [vmem:[%s3743_s1 + $0x200] ss:$8 sps:$4 sm:$0xff]   ;;  %v2666_v6 = vld [vmem:[%s3743_s1 + $0x214] ss:$8 sps:$4 sm:$0xff]  }
   0x3   :  { %2273 = vmatprep.subr.bf16.mxu0 %v2660_v2  ;;  %2147 = vmatpush1.bf16.msra.mxu1 %v2662_v3  ;;  %v2668_v7 = vld [vmem:[%s3743_s1 + $0x90] ss:$8 sps:$4 sm:$0xff]   ;;  %v2670_v9 = vld [vmem:[%s3743_s1 + $0xa4] ss:$8 sps:$4 sm:$0xff]   ;;  %v2674_v11 = vld [vmem:[%s3743_s1 + $0xa0] ss:$8 sps:$4 sm:$0xff]  }
   0x4   :  { %2275 = vmatpush1.bf16.msra.mxu0 %v2663_v4  ;;  %2149 = vmatprep.subr.bf16.mxu1 %v2664_v5  ;;  %v2669_v8 = vld [vmem:[%s3743_s1 + $0x210] ss:$8 sps:$4 sm:$0xff]   ;;  %v2672_v10 = vld [vmem:[%s3743_s1 + $0x224] ss:$8 sps:$4 sm:$0xff]   ;;  %v2675_v12 = vld [vmem:[%s3743_s1 + $0x220] ss:$8 sps:$4 sm:$0xff]  }
   0x5   :  { %2277 = vmatprep.subr.bf16.mxu0 %v2666_v6  ;;  %v2676_v13 = vld [vmem:[%s3743_s1 + $0xb4] ss:$8 sps:$4 sm:$0xff]   ;;  %v2680_v15 = vld [vmem:[%s3743_s1 + $0xb0] ss:$8 sps:$4 sm:$0xff]   ;;  %v2682_v17 = vld [vmem:[%s3743_s1 + $0xc4] ss:$8 sps:$4 sm:$0xff]  }
   0x6   :  { %v2678_v14 = vld [vmem:[%s3743_s1 + $0x234] ss:$8 sps:$4 sm:$0xff]   ;;  %v2681_v16 = vld [vmem:[%s3743_s1 + $0x230] ss:$8 sps:$4 sm:$0xff]   ;;  %v2684_v18 = vld [vmem:[%s3743_s1 + $0x244] ss:$8 sps:$4 sm:$0xff]  }
   0x7   :  { %2151 = vmatpush1.bf16.msra.mxu1 %v2668_v7  ;;  %v2686_v19 = vld [vmem:[%s3743_s1 + $0xc0] ss:$8 sps:$4 sm:$0xff]   ;;  %v2688_v21 = vld [vmem:[%s3743_s1 + $0xd4] ss:$8 sps:$4 sm:$0xff]   ;;  %v2692_v23 = vld [vmem:[%s3743_s1 + $0xd0] ss:$8 sps:$4 sm:$0xff]  }
   0x8   :  { %2279 = vmatpush1.bf16.msra.mxu0 %v2669_v8  ;;  %2153 = vmatprep.subr.bf16.mxu1 %v2670_v9  ;;  %v2687_v20 = vld [vmem:[%s3743_s1 + $0x240] ss:$8 sps:$4 sm:$0xff]   ;;  %v2690_v22 = vld [vmem:[%s3743_s1 + $0x254] ss:$8 sps:$4 sm:$0xff]   ;;  %v2693_v24 = vld [vmem:[%s3743_s1 + $0x250] ss:$8 sps:$4 sm:$0xff]  }
   0x9   :  { %2281 = vmatprep.subr.bf16.mxu0 %v2672_v10  ;;  %v2694_v25 = vld [vmem:[%s3743_s1 + $0xe4] ss:$8 sps:$4 sm:$0xff]   ;;  %v2698_v27 = vld [vmem:[%s3743_s1 + $0xe0] ss:$8 sps:$4 sm:$0xff]   ;;  %v2700_v29 = vld [vmem:[%s3743_s1 + $0xf4] ss:$8 sps:$4 sm:$0xff]  }
   0xa   :  { %v2696_v26 = vld [vmem:[%s3743_s1 + $0x264] ss:$8 sps:$4 sm:$0xff]   ;;  %v2699_v28 = vld [vmem:[%s3743_s1 + $0x260] ss:$8 sps:$4 sm:$0xff]   ;;  %v2702_v30 = vld [vmem:[%s3743_s1 + $0x274] ss:$8 sps:$4 sm:$0xff]  }
   0xb   :  { %2155 = vmatpush1.bf16.msra.mxu1 %v2674_v11  ;;  %v86_v31 = vld [vmem:[%s3744_s0] sm:$0x7]  ;;  %v87_v32 = vld [vmem:[%s3744_s0 + $0x4] sm:$0x7]  ;;  %v2065_v36 = vld [vmem:[%s3744_s0 + $0x8] sm:$0x7] }
   0xc   :  { %2283 = vmatpush1.bf16.msra.mxu0 %v2675_v12  ;;  %2157 = vmatprep.subr.bf16.mxu1 %v2676_v13  ;;  %v94_v33 = vunpack.c.l.bf16 %v86_v31  ;;  %v95_v34 = vunpack.c.l.bf16 %v87_v32  ;;  %v2064_v35 = vld [vmem:[%s3744_s0 + $0x4] sm:$0x7]  ;;  %v2704_v37 = vld [vmem:[%s3743_s1 + $0xf0] ss:$8 sps:$4 sm:$0xff]   ;;  %v810_v39 = vunpack.c.l.bf16 %v2065_v36  ;;  %vm3019_vm2 = vmor %vm118_vm0, %vm119_vm1  ;;  %vm436_vm4 = vcmask 1045508  }
   0xd   :  { %2285 = vmatprep.subr.bf16.mxu0 %v2678_v14  ;;  %v809_v38 = vunpack.c.l.bf16 %v2064_v35  ;;  %v2705_v40 = vld [vmem:[%s3743_s1 + $0x270] ss:$8 sps:$4 sm:$0xff]   ;;  %v2706_v50 = vld [vmem:[%s3743_s1 + $0x4] ss:$8 sps:$4 sm:$0xff]   ;;  %v2708_v58 = vld [vmem:[%s3743_s1] ss:$8 sps:$4 sm:$0xff]  }
   0xe   :  { %v110_v41 = vcombine.high %v94_v33, %v94_v33  ;;  %v111_v42 = vcombine.high %v95_v34, %v95_v34  ;;  %v2040_v43 = vrot.slane %v94_v33, 9  ;;  %v2041_v44 = vrot.slane %v95_v34, 9  ;;  %v2709_v51 = vld [vmem:[%s3743_s1 + $0x284] ss:$8 sps:$4 sm:$0xff]   ;;  %v2711_v59 = vld [vmem:[%s3743_s1 + $0x280] ss:$8 sps:$4 sm:$0xff]   ;;  %vm3204_vm5 = vmor %vm435_vm3, %vm436_vm4 }
   0xf   :  { %2159 = vmatpush1.bf16.msra.mxu1 %v2680_v15  ;;  %v825_v46 = vcombine.high %v809_v38, %v809_v38  ;;  %v826_v47 = vcombine.high %v810_v39, %v810_v39  ;;  %v2072_v48 = vrot.slane %v809_v38, 9  ;;  %v2073_v49 = vrot.slane %v810_v39, 9  ;;  %v2712_v0 = vld [vmem:[%s3743_s1 + $0x14] ss:$8 sps:$4 sm:$0xff]   ;;  %v2714_v3 = vld [vmem:[%s3743_s1 + $0x10] ss:$8 sps:$4 sm:$0xff]  }
  0x10   :  { %2287 = vmatpush1.bf16.msra.mxu0 %v2681_v16  ;;  %2161 = vmatprep.subr.bf16.mxu1 %v2682_v17  ;;  %v123_v52 = vrot.slane %v110_v41, 5  ;;  %v127_v53 = vrot.slane %v111_v42, 5  ;;  %v2715_v2 = vld [vmem:[%s3743_s1 + $0x294] ss:$8 sps:$4 sm:$0xff]   ;;  %v2717_v4 = vld [vmem:[%s3743_s1 + $0x290] ss:$8 sps:$4 sm:$0xff]  }
  0x11   :  { %2289 = vmatprep.subr.bf16.mxu0 %v2684_v18  ;;  %v835_v54 = vrot.slane %v825_v46, 5  ;;  %v839_v55 = vrot.slane %v826_v47, 5  ;;  %v2718_v5 = vld [vmem:[%s3743_s1 + $0x24] ss:$8 sps:$4 sm:$0xff]   ;;  %v2720_v7 = vld [vmem:[%s3743_s1 + $0x20] ss:$8 sps:$4 sm:$0xff]  }
  0x12   :  { %v124_v56 = vsel %vm3019_vm2, %v2040_v43, %v123_v52  ;;  %v128_v57 = vsel %vm3019_vm2, %v2041_v44, %v127_v53  ;;  %v2721_v6 = vld [vmem:[%s3743_s1 + $0x2a4] ss:$8 sps:$4 sm:$0xff]   ;;  %v2723_v8 = vld [vmem:[%s3743_s1 + $0x2a0] ss:$8 sps:$4 sm:$0xff]   ;;  %v2067_v14 = vld [vmem:[%s3744_s0 + $0x10] sm:$0x7] }
  0x13   :  { %2163 = vmatpush1.bf16.msra.mxu1 %v2686_v19  ;;  %v201_v60 = vcombine.low %v124_v56, %v128_v57  ;;  %v836_v61 = vsel %vm3019_vm2, %v2072_v48, %v835_v54  ;;  %v840_v62 = vsel %vm3019_vm2, %v2073_v49, %v839_v55  ;;  %v88_v9 = vld [vmem:[%s3744_s0 + $0x8] sm:$0x7]  ;;  %v89_v10 = vld [vmem:[%s3744_s0 + $0xc] sm:$0x7]  ;;  %v2724_v15 = vld [vmem:[%s3743_s1 + $0x34] ss:$8 sps:$4 sm:$0xff]   ;;  %v812_v18 = vunpack.c.l.bf16 %v2067_v14 }
  0x14   :  { %2291 = vmatpush1.bf16.msra.mxu0 %v2687_v20  ;;  %2165 = vmatprep.subr.bf16.mxu1 %v2688_v21  ;;  %v913_v63 = vcombine.low %v836_v61, %v840_v62  ;;  %v96_v11 = vunpack.c.l.bf16 %v88_v9  ;;  %v97_v12 = vunpack.c.l.bf16 %v89_v10  ;;  %v2066_v13 = vld [vmem:[%s3744_s0 + $0xc] sm:$0x7]  ;;  %v2727_v16 = vld [vmem:[%s3743_s1 + $0x2b4] ss:$8 sps:$4 sm:$0xff]   ;;  %v2726_v19 = vld [vmem:[%s3743_s1 + $0x30] ss:$8 sps:$4 sm:$0xff]  }
  0x15   :  { %2293 = vmatprep.subr.bf16.mxu0 %v2690_v22  ;;  %v811_v17 = vunpack.c.l.bf16 %v2066_v13  ;;  %v2729_v20 = vld [vmem:[%s3743_s1 + $0x2b0] ss:$8 sps:$4 sm:$0xff]   ;;  %v91_v34 = vld [vmem:[%s3744_s0 + $0x1c] sm:$0x7]  ;;  %v2732_v42 = vld [vmem:[%s3743_s1 + $0x40] ss:$8 sps:$4 sm:$0xff]  }
  0x16   :  { %v112_v21 = vcombine.high %v96_v11, %v96_v11  ;;  %v113_v22 = vcombine.high %v97_v12, %v97_v12  ;;  %v90_v31 = vld [vmem:[%s3744_s0 + $0x18] sm:$0x7]  ;;  %v2068_v36 = vld [vmem:[%s3744_s0 + $0x1c] sm:$0x7]  ;;  %v99_v39 = vunpack.c.l.bf16 %v91_v34  ;;  %v2735_v48 = vld [vmem:[%s3743_s1 + $0x2c0] ss:$8 sps:$4 sm:$0xff]  }
  0x17   :  { %2167 = vmatpush1.bf16.msra.mxu1 %v2692_v23  ;;  %v2042_v23 = vrot.slane %v96_v11, 9  ;;  %v98_v35 = vunpack.c.l.bf16 %v90_v31  ;;  %v813_v41 = vunpack.c.l.bf16 %v2068_v36  ;;  %v2736_v49 = vld [vmem:[%s3743_s1 + $0x54] ss:$8 sps:$4 sm:$0xff]   ;;  %v2741_v13 = vld [vmem:[%s3743_s1 + $0x2d0] ss:$8 sps:$4 sm:$0xff]   ;;  %vm1902_vm6 = vcmask 523264  }
  0x18   :  { %2295 = vmatpush1.bf16.msra.mxu0 %v2693_v24  ;;  %2169 = vmatprep.subr.bf16.mxu1 %v2694_v25  ;;  %v2043_v24 = vrot.slane %v97_v12, 9  ;;  %v2730_v25 = vld [vmem:[%s3743_s1 + $0x44] ss:$8 sps:$4 sm:$0xff]   ;;  %v131_v32 = vrot.slane %v112_v21, 5  ;;  %v135_v33 = vrot.slane %v113_v22, 5  ;;  %v115_v53 = vcombine.high %v99_v39, %v99_v39 }
  0x19   :  { %2297 = vmatprep.subr.bf16.mxu0 %v2696_v26  ;;  %v2733_v26 = vld [vmem:[%s3743_s1 + $0x2c4] ss:$8 sps:$4 sm:$0xff]   ;;  %v114_v46 = vcombine.high %v98_v35, %v98_v35  ;;  %v2044_v47 = vrot.slane %v98_v35, 9  ;;  %v2045_v56 = vrot.slane %v99_v39, 9  ;;  %v829_v62 = vcombine.high %v813_v41, %v813_v41  ;;  %v2738_v12 = vld [vmem:[%s3743_s1 + $0x50] ss:$8 sps:$4 sm:$0xff]  }
  0x1a   :  { %v132_v43 = vsel %vm3019_vm2, %v2042_v23, %v131_v32  ;;  %v136_v44 = vsel %vm3019_vm2, %v2043_v24, %v135_v33  ;;  %v143_v61 = vrot.slane %v115_v53, 5  ;;  %v2744_v24 = vld [vmem:[%s3743_s1 + $0x60] ss:$8 sps:$4 sm:$0xff]   ;;  %v23_v34 = vld [vmem:[%s3744_s0 + $0x4] sm:$0x3] }
  0x1b   :  { %2171 = vmatpush1.bf16.msra.mxu1 %v2698_v27  ;;  %v827_v27 = vcombine.high %v811_v17, %v811_v17  ;;  %v139_v55 = vrot.slane %v114_v46, 5  ;;  %v851_v9 = vrot.slane %v829_v62, 5  ;;  %v2081_v35 = vld [vmem:[%s3744_s0 + $0x8] sm:$0x6]  ;;  %v2748_v36 = vld [vmem:[%s3743_s1 + $0x74] ss:$8 sps:$4 sm:$0xff]  }
  0x1c   :  { %2299 = vmatpush1.bf16.msra.mxu0 %v2699_v28  ;;  %2173 = vmatprep.subr.bf16.mxu1 %v2700_v29  ;;  %v828_v28 = vcombine.high %v812_v18, %v812_v18  ;;  %v2074_v29 = vrot.slane %v811_v17, 9  ;;  %v2121_v45 = vld [vmem:[%s3744_s0 + $0xc] sm:$0x6] }
  0x1d   :  { %2301 = vmatprep.subr.bf16.mxu0 %v2702_v30  ;;  %v2075_v30 = vrot.slane %v812_v18, 9  ;;  %v2742_v18 = vld [vmem:[%s3743_s1 + $0x64] ss:$8 sps:$4 sm:$0xff]  }
  0x1e   :  { %v847_v38 = vrot.slane %v828_v28, 5  ;;  %v22_v28 = vld [vmem:[%s3744_s0] sm:$0x3] }
  0x1f   :  { %2175 = vmatpush1.bf16.msra.mxu1 %v2704_v37  ;;  %v843_v37 = vrot.slane %v827_v27, 5  ;;  %v30_v46 = vunpack.c.l.bf16 %v22_v28 }
  0x20   :  { %2303 = vmatpush1.bf16.msra.mxu0 %v2705_v40  ;;  %2177 = vmatprep.subr.bf16.mxu1 %v2706_v50  ;;  %v2069_v40 = vld [vmem:[%s3744_s0 + $0x20] sm:$0x7]  ;;  %v202_v50 = vcombine.low %v132_v43, %v136_v44  ;;  %v848_v52 = vsel %vm3019_vm2, %v2075_v30, %v847_v38 }
  0x21   :  { %2305 = vmatprep.subr.bf16.mxu0 %v2709_v51  ;;  %v844_v51 = vsel %vm3019_vm2, %v2074_v29, %v843_v37  ;;  %v814_v57 = vunpack.c.l.bf16 %v2069_v40  ;;  %v2080_v29 = vld [vmem:[%s3744_s0 + $0x4] sm:$0x6]  ;;  %v2751_v40 = vld [vmem:[%s3743_s1 + $0x2f4] ss:$8 sps:$4 sm:$0xff]  }
  0x22   :  { %274 = vmatmul.mubr.f32.vlgmr.msra.gmra.mrb[0].mxu1 %v201_v60  ;;  %v914_v54 = vcombine.low %v844_v51, %v848_v52  ;;  %v2739_v60 = vld [vmem:[%s3743_s1 + $0x2d4] ss:$8 sps:$4 sm:$0xff]   ;;  %v1026_v44 = vunpack.c.l.bf16 %v2080_v29  ;;  %v26_v29 = vld [vmem:[%s3744_s0 + $0x18] sm:$0x3] }
  0x23   :  { %986 = vmatmul.mubr.f32.vlgmr.msra.gmra.mrb[0].mxu0 %v913_v63  ;;  %2179 = vmatpush1.bf16.msra.mxu1 %v2708_v58  ;;  %v92_v58 = vld [vmem:[%s3744_s0 + $0x20] sm:$0x7]  ;;  %v2076_v63 = vrot.slane %v813_v41, 9 }
  0x24   :  { %2307 = vmatpush1.bf16.msra.mxu0 %v2711_v59  ;;  %2181 = vmatprep.subr.bf16.mxu1 %v2712_v0  ;;  %v93_v59 = vld [vmem:[%s3744_s0 + $0x24] sm:$0x7]  ;;  %v100_v0 = vunpack.c.l.bf16 %v92_v58  ;;  %v1042_v53 = vcombine.high %v1026_v44, %v1026_v44 }
  0x25   :  { %2309 = vmatprep.subr.bf16.mxu0 %v2715_v2  ;;  %279 = vmatprep.mubr.f32.mxu1 %v2876_v1  ;;  %v2070_v2 = vld [vmem:[%s3744_s0 + $0x24] sm:$0x7] }
  0x26   :  { %991 = vmatprep.mubr.f32.mxu0 %v2876_v1  ;;  %280 = vmatmul.mubr.f32.gmra.mrb[2].mxu1 %v202_v50  ;;  %v116_v10 = vcombine.high %v100_v0, %v100_v0  ;;  %v2046_v11 = vrot.slane %v100_v0, 9  ;;  %v815_v22 = vunpack.c.l.bf16 %v2070_v2 }
  0x27   :  { %2183 = vmatpush1.bf16.msra.mxu1 %v2714_v3  ;;  %992 = vmatmul.mubr.f32.gmra.mrb[2].mxu0 %v914_v54  ;;  %v140_v3 = vsel %vm3019_vm2, %v2044_v47, %v139_v55  ;;  %v31_v47 = vunpack.c.l.bf16 %v23_v34  ;;  %v2088_v54 = vrot.slane %v1026_v44, 10  ;;  %v2753_v55 = vld [vmem:[%s3743_s1 + $0x2f0] ss:$8 sps:$4 sm:$0xff]  }
  0x28   :  { %2311 = vmatpush1.bf16.msra.mxu0 %v2717_v4  ;;  %2185 = vmatprep.subr.bf16.mxu1 %v2718_v5  ;;  %v830_v4 = vcombine.high %v814_v57, %v814_v57  ;;  %v2077_v5 = vrot.slane %v814_v57, 9  ;;  %v147_v21 = vrot.slane %v116_v10, 5  ;;  %v831_v32 = vcombine.high %v815_v22, %v815_v22  ;;  %v2754_v57 = vld [vmem:[%s3743_s1 + $0x104] ss:$8 sps:$4 sm:$0xff]  }
  0x29   :  { %2313 = vmatprep.subr.bf16.mxu0 %v2721_v6  ;;  %v101_v6 = vunpack.c.l.bf16 %v93_v59  ;;  %285 = vmatprep.mubr.f32.mxu1 %v2876_v1  ;;  %v2078_v38 = vrot.slane %v815_v22, 9  ;;  %v306_v0 = vcombine.low %v30_v46, %v31_v47  ;;  %v2766_v10 = vld [vmem:[%s3743_s1 + $0x124] ss:$8 sps:$4 sm:$0xff]   ;;  %v2772_v22 = vld [vmem:[%s3743_s1 + $0x134] ss:$8 sps:$4 sm:$0xff]  }
  0x2a   :  { %997 = vmatprep.mubr.f32.mxu0 %v2876_v1  ;;  %v148_v31 = vsel %vm3019_vm2, %v2046_v11, %v147_v21  ;;  %v24_v11 = vld [vmem:[%s3744_s0 + $0x8] sm:$0x3] }
  0x2b   :  { %2187 = vmatpush1.bf16.msra.mxu1 %v2720_v7  ;;  %v2071_v7 = vld [vmem:[%s3744_s0 + $0x28] sm:$0x7]  ;;  %v2047_v17 = vrot.slane %v101_v6, 9 }
  0x2c   :  { %2315 = vmatpush1.bf16.msra.mxu0 %v2723_v8  ;;  %2189 = vmatprep.subr.bf16.mxu1 %v2724_v15  ;;  %v144_v8 = vsel %vm3019_vm2, %v2045_v56, %v143_v61  ;;  %v855_v15 = vrot.slane %v830_v4, 5  ;;  %v816_v23 = vunpack.c.l.bf16 %v2071_v7  ;;  %v1052_v61 = vrot.slane %v1042_v53, 6  ;;  %v2763_v7 = vld [vmem:[%s3743_s1 + $0x314] ss:$8 sps:$4 sm:$0xff]   ;;  %v2771_v21 = vld [vmem:[%s3743_s1 + $0x320] ss:$8 sps:$4 sm:$0xff]  }
  0x2d   :  { %2317 = vmatprep.subr.bf16.mxu0 %v2727_v16  ;;  %v203_v14 = vcombine.low %v140_v3, %v144_v8  ;;  %v117_v16 = vcombine.high %v101_v6, %v101_v6  ;;  %v2759_v3 = vld [vmem:[%s3743_s1 + $0x300] ss:$8 sps:$4 sm:$0xff]   ;;  %v2762_v8 = vld [vmem:[%s3743_s1 + $0x110] ss:$8 sps:$4 sm:$0xff]   ;;  %v29_v53 = vld [vmem:[%s3744_s0 + $0x24] sm:$0x3] }
  0x2e   :  { %v832_v33 = vcombine.high %v816_v23, %v816_v23  ;;  %v2079_v39 = vrot.slane %v816_v23, 9  ;;  %v1053_v2 = vsel %vm3204_vm5, %v2088_v54, %v1052_v61  ;;  %v2775_v23 = vld [vmem:[%s3743_s1 + $0x334] ss:$8 sps:$4 sm:$0xff]  }
  0x2f   :  { %2191 = vmatpush1.bf16.msra.mxu1 %v2726_v19  ;;  %v2745_v19 = vld [vmem:[%s3743_s1 + $0x2e4] ss:$8 sps:$4 sm:$0xff]   ;;  %v151_v27 = vrot.slane %v117_v16, 5 }
  0x30   :  { %2319 = vmatpush1.bf16.msra.mxu0 %v2729_v20  ;;  %2193 = vmatprep.subr.bf16.mxu1 %v2730_v25  ;;  %v852_v20 = vsel %vm3019_vm2, %v2076_v63, %v851_v9  ;;  %v2747_v25 = vld [vmem:[%s3743_s1 + $0x2e0] ss:$8 sps:$4 sm:$0xff]   ;;  %v863_v43 = vrot.slane %v832_v33, 5  ;;  %v2765_v9 = vld [vmem:[%s3743_s1 + $0x310] ss:$8 sps:$4 sm:$0xff]   ;;  %v34_v33 = vunpack.c.l.bf16 %v26_v29 }
  0x31   :  { %2321 = vmatprep.subr.bf16.mxu0 %v2733_v26  ;;  %286 = vmatmul.mubr.f32.gmra.mrb[4].mxu1 %v203_v14  ;;  %v856_v26 = vsel %vm3019_vm2, %v2077_v5, %v855_v15  ;;  %v152_v37 = vsel %vm3019_vm2, %v2047_v17, %v151_v27  ;;  %v2756_v63 = vld [vmem:[%s3743_s1 + $0x100] ss:$8 sps:$4 sm:$0xff]   ;;  %v2760_v5 = vld [vmem:[%s3743_s1 + $0x114] ss:$8 sps:$4 sm:$0xff]   ;;  %v2082_v14 = vld [vmem:[%s3744_s0 + $0xc] sm:$0x6] }
  0x32   :  { %v915_v30 = vcombine.low %v852_v20, %v856_v26  ;;  %291 = vmatprep.mubr.f32.mxu1 %v2876_v1  ;;  %v204_v41 = vcombine.low %v148_v31, %v152_v37  ;;  %v864_v51 = vsel %vm3019_vm2, %v2079_v39, %v863_v43  ;;  %v2083_v15 = vld [vmem:[%s3744_s0 + $0x10] sm:$0x6]  ;;  %v2769_v16 = vld [vmem:[%s3743_s1 + $0x324] ss:$8 sps:$4 sm:$0xff]   ;;  %v2768_v20 = vld [vmem:[%s3743_s1 + $0x120] ss:$8 sps:$4 sm:$0xff]  }
  0x33   :  { %2195 = vmatpush1.bf16.msra.mxu1 %v2732_v42  ;;  %v859_v42 = vrot.slane %v831_v32, 5  ;;  %v2774_v37 = vld [vmem:[%s3743_s1 + $0x130] ss:$8 sps:$4 sm:$0xff]   ;;  %v2097_v29 = vld [vmem:[%s3744_s0 + $0xc] sm:$0x3] }
  0x34   :  { %2323 = vmatpush1.bf16.msra.mxu0 %v2735_v48  ;;  %2197 = vmatprep.subr.bf16.mxu1 %v2736_v49  ;;  %v1027_v48 = vunpack.c.l.bf16 %v2081_v35  ;;  %v2750_v49 = vld [vmem:[%s3743_s1 + $0x70] ss:$8 sps:$4 sm:$0xff]   ;;  %v2084_v35 = vld [vmem:[%s3744_s0 + $0x1c] sm:$0x6] }
  0x35   :  { %2325 = vmatprep.subr.bf16.mxu0 %v2739_v60  ;;  %998 = vmatmul.mubr.f32.gmra.mrb[4].mxu0 %v915_v30  ;;  %v860_v50 = vsel %vm3019_vm2, %v2078_v38, %v859_v42  ;;  %v2757_v60 = vld [vmem:[%s3743_s1 + $0x304] ss:$8 sps:$4 sm:$0xff]   ;;  %v27_v30 = vld [vmem:[%s3744_s0 + $0x1c] sm:$0x3]  ;;  %v2777_v38 = vld [vmem:[%s3743_s1 + $0x330] ss:$8 sps:$4 sm:$0xff]   ;;  %v1030_v39 = vunpack.c.l.bf16 %v2084_v35 }
  0x36   :  { %1003 = vmatprep.mubr.f32.mxu0 %v2876_v1  ;;  %292 = vmatmul.mubr.f32.gmra.mrb[6].mxu1 %v204_v41  ;;  %v916_v56 = vcombine.low %v860_v50, %v864_v51  ;;  %v1043_v58 = vcombine.high %v1027_v48, %v1027_v48  ;;  %v2089_v59 = vrot.slane %v1027_v48, 10  ;;  %v35_v34 = vunpack.c.l.bf16 %v27_v30  ;;  %v2778_v41 = vld [vmem:[%s3743_s1 + $0x144] ss:$8 sps:$4 sm:$0xff]   ;;  %v28_v51 = vld [vmem:[%s3744_s0 + $0x20] sm:$0x3] }
  0x37   :  { %2199 = vmatpush1.bf16.msra.mxu1 %v2738_v12  ;;  %378 = vmatprep.mubr.f32.mxu1 %v2876_v1  ;;  %v25_v12 = vld [vmem:[%s3744_s0 + $0xc] sm:$0x3]  ;;  %v1046_v48 = vcombine.high %v1030_v39, %v1030_v39  ;;  %v2092_v50 = vrot.slane %v1030_v39, 10  ;;  %v2796_v35 = vld [vmem:[%s3743_s1 + $0x174] ss:$8 sps:$4 sm:$0xff]   ;;  %v1245_v39 = vunpack.c.l.bf16 %v2097_v29 }
  0x38   :  { %2327 = vmatpush1.bf16.msra.mxu0 %v2741_v13  ;;  %2201 = vmatprep.subr.bf16.mxu1 %v2742_v18  ;;  %v1056_v62 = vrot.slane %v1043_v58, 6  ;;  %v32_v13 = vunpack.c.l.bf16 %v24_v11  ;;  %v33_v17 = vunpack.c.l.bf16 %v25_v12  ;;  %v1028_v18 = vunpack.c.l.bf16 %v2082_v14  ;;  %v2781_v42 = vld [vmem:[%s3743_s1 + $0x344] ss:$8 sps:$4 sm:$0xff]   ;;  %v2087_v58 = vld [vmem:[%s3744_s0 + $0x28] sm:$0x6] }
  0x39   :  { %2329 = vmatprep.subr.bf16.mxu0 %v2745_v19  ;;  %1004 = vmatmul.mubr.f32.gmra.mrb[6].mxu0 %v916_v56  ;;  %v1029_v19 = vunpack.c.l.bf16 %v2083_v15  ;;  %v308_v46 = vcombine.low %v34_v33, %v35_v34  ;;  %v37_v56 = vunpack.c.l.bf16 %v29_v53  ;;  %v2795_v34 = vld [vmem:[%s3743_s1 + $0x360] ss:$8 sps:$4 sm:$0xff]  }
  0x3a   :  { %1202 = vmatprep.mubr.f32.mxu0 %v2876_v1  ;;  %v1057_v4 = vsel %vm3204_vm5, %v2089_v59, %v1056_v62  ;;  %v2090_v27 = vrot.slane %v1028_v18, 10  ;;  %v2780_v59 = vld [vmem:[%s3743_s1 + $0x140] ss:$8 sps:$4 sm:$0xff]  }
  0x3b   :  { %2203 = vmatpush1.bf16.msra.mxu1 %v2744_v24  ;;  %v1130_v6 = vcombine.low %v1053_v2, %v1057_v4  ;;  %v307_v24 = vcombine.low %v32_v13, %v33_v17  ;;  %v1045_v26 = vcombine.high %v1029_v19, %v1029_v19  ;;  %v2091_v28 = vrot.slane %v1029_v19, 10  ;;  %v404_v13 = vld [vmem:[%s3744_s0 + $0x4] sm:$0x6]  ;;  %v2786_v19 = vld [vmem:[%s3743_s1 + $0x150] ss:$8 sps:$4 sm:$0xff]  }
  0x3c   :  { %2331 = vmatpush1.bf16.msra.mxu0 %v2747_v25  ;;  %2205 = vmatprep.subr.bf16.mxu1 %v2748_v36  ;;  %v1044_v25 = vcombine.high %v1028_v18, %v1028_v18  ;;  %v2085_v36 = vld [vmem:[%s3744_s0 + $0x20] sm:$0x6] }
  0x3d   :  { %2333 = vmatprep.subr.bf16.mxu0 %v2751_v40  ;;  %v1064_v32 = vrot.slane %v1045_v26, 6  ;;  %v1031_v40 = vunpack.c.l.bf16 %v2085_v36  ;;  %v2792_v26 = vld [vmem:[%s3743_s1 + $0x160] ss:$8 sps:$4 sm:$0xff]   ;;  %v2799_v36 = vld [vmem:[%s3743_s1 + $0x374] ss:$8 sps:$4 sm:$0xff]  }
  0x3e   :  { %v1060_v31 = vrot.slane %v1044_v25, 6 }
  0x3f   :  { %2207 = vmatpush1.bf16.msra.mxu1 %v2750_v49  ;;  %v1065_v44 = vsel %vm3204_vm5, %v2091_v28, %v1064_v32  ;;  %v1047_v49 = vcombine.high %v1031_v40, %v1031_v40  ;;  %v2093_v54 = vrot.slane %v1031_v40, 10  ;;  %v2096_v28 = vld [vmem:[%s3744_s0 + $0x8] sm:$0x3]  ;;  %v2801_v40 = vld [vmem:[%s3743_s1 + $0x370] ss:$8 sps:$4 sm:$0xff]  }
  0x40   :  { %2335 = vmatpush1.bf16.msra.mxu0 %v2753_v55  ;;  %2209 = vmatprep.subr.bf16.mxu1 %v2754_v57  ;;  %v1061_v43 = vsel %vm3204_vm5, %v2090_v27, %v1060_v31  ;;  %v36_v55 = vunpack.c.l.bf16 %v28_v51  ;;  %v2086_v57 = vld [vmem:[%s3744_s0 + $0x24] sm:$0x6] }
  0x41   :  { %2337 = vmatprep.subr.bf16.mxu0 %v2757_v60  ;;  %v1131_v47 = vcombine.low %v1061_v43, %v1065_v44  ;;  %v1068_v60 = vrot.slane %v1046_v48, 6  ;;  %v1072_v61 = vrot.slane %v1047_v49, 6  ;;  %v1032_v62 = vunpack.c.l.bf16 %v2086_v57  ;;  %v2802_v43 = vld [vmem:[%s3743_s1 + $0x184] ss:$8 sps:$4 sm:$0xff]   ;;  %v405_v44 = vld [vmem:[%s3744_s0 + $0x8] sm:$0x6] }
  0x42   :  { %379 = vmatmul.mubr.f32.vlgmr.msra.gmra.mrb[0].mxu1 %v306_v0  ;;  %v2783_v0 = vld [vmem:[%s3743_s1 + $0x340] ss:$8 sps:$4 sm:$0xff]   ;;  %v309_v2 = vcombine.low %v36_v55, %v37_v56  ;;  %v413_v48 = vunpack.c.l.bf16 %v405_v44  ;;  %v2099_v55 = vld [vmem:[%s3744_s0 + $0x14] sm:$0x3] }
  0x43   :  { %1203 = vmatmul.mubr.f32.vlgmr.msra.gmra.mrb[0].mxu0 %v1130_v6  ;;  %2211 = vmatpush1.bf16.msra.mxu1 %v2756_v63  ;;  %v1033_v63 = vunpack.c.l.bf16 %v2087_v58  ;;  %v1069_v4 = vsel %vm3204_vm5, %v2092_v50, %v1068_v60  ;;  %v1048_v6 = vcombine.high %v1032_v62, %v1032_v62  ;;  %v2804_v50 = vld [vmem:[%s3743_s1 + $0x180] ss:$8 sps:$4 sm:$0xff]  }
  0x44   :  { %2339 = vmatpush1.bf16.msra.mxu0 %v2759_v3  ;;  %2213 = vmatprep.subr.bf16.mxu1 %v2760_v5  ;;  %v2784_v3 = vld [vmem:[%s3743_s1 + $0x154] ss:$8 sps:$4 sm:$0xff]   ;;  %v1073_v5 = vsel %vm3204_vm5, %v2093_v54, %v1072_v61  ;;  %v2098_v54 = vld [vmem:[%s3744_s0 + $0x10] sm:$0x3]  ;;  %v2807_v56 = vld [vmem:[%s3743_s1 + $0x380] ss:$8 sps:$4 sm:$0xff]   ;;  %v429_v57 = vcombine.high %v413_v48, %v413_v48 }
  0x45   :  { %2341 = vmatprep.subr.bf16.mxu0 %v2763_v7  ;;  %384 = vmatprep.mubr.f32.mxu1 %v2876_v1  ;;  %v2094_v7 = vrot.slane %v1032_v62, 10  ;;  %v1049_v11 = vcombine.high %v1033_v63, %v1033_v63  ;;  %v2095_v12 = vrot.slane %v1033_v63, 10  ;;  %v1076_v15 = vrot.slane %v1048_v6, 6  ;;  %v2808_v61 = vld [vmem:[%s3743_s1 + $0x194] ss:$8 sps:$4 sm:$0xff]  }
  0x46   :  { %1208 = vmatprep.mubr.f32.mxu0 %v2876_v1  ;;  %385 = vmatmul.mubr.f32.gmra.mrb[2].mxu1 %v307_v24  ;;  %v2793_v24 = vld [vmem:[%s3743_s1 + $0x364] ss:$8 sps:$4 sm:$0xff]   ;;  %v1246_v62 = vunpack.c.l.bf16 %v2098_v54  ;;  %v1247_v63 = vunpack.c.l.bf16 %v2099_v55  ;;  %v2825_v54 = vld [vmem:[%s3743_s1 + $0x3b0] ss:$8 sps:$4 sm:$0xff]  }
  0x47   :  { %2215 = vmatpush1.bf16.msra.mxu1 %v2762_v8  ;;  %390 = vmatprep.mubr.f32.mxu1 %v2876_v1  ;;  %v403_v8 = vld [vmem:[%s3744_s0] sm:$0x6]  ;;  %v1080_v17 = vrot.slane %v1049_v11, 6  ;;  %v2101_v11 = vld [vmem:[%s3744_s0 + $0x24] sm:$0x3] }
  0x48   :  { %2343 = vmatpush1.bf16.msra.mxu0 %v2765_v9  ;;  %2217 = vmatprep.subr.bf16.mxu1 %v2766_v10  ;;  %v2787_v9 = vld [vmem:[%s3743_s1 + $0x354] ss:$8 sps:$4 sm:$0xff]   ;;  %v1132_v10 = vcombine.low %v1069_v4, %v1073_v5  ;;  %v411_v14 = vunpack.c.l.bf16 %v403_v8  ;;  %v448_v4 = vrot.slane %v429_v57, 6  ;;  %v2810_v8 = vld [vmem:[%s3743_s1 + $0x190] ss:$8 sps:$4 sm:$0xff]  }
  0x49   :  { %2345 = vmatprep.subr.bf16.mxu0 %v2769_v16  ;;  %1209 = vmatmul.mubr.f32.gmra.mrb[2].mxu0 %v1131_v47  ;;  %v412_v16 = vunpack.c.l.bf16 %v404_v13  ;;  %v1081_v25 = vsel %vm3204_vm5, %v2095_v12, %v1080_v17  ;;  %v2805_v47 = vld [vmem:[%s3743_s1 + $0x384] ss:$8 sps:$4 sm:$0xff]   ;;  %v2813_v12 = vld [vmem:[%s3743_s1 + $0x390] ss:$8 sps:$4 sm:$0xff]  }
  0x4a   :  { %391 = vmatmul.mubr.f32.gmra.mrb[4].mxu1 %v308_v46  ;;  %1214 = vmatprep.mubr.f32.mxu0 %v2876_v1  ;;  %v427_v18 = vcombine.high %v411_v14, %v411_v14  ;;  %v2048_v30 = vrot.slane %v411_v14, 10  ;;  %v406_v46 = vld [vmem:[%s3744_s0 + $0xc] sm:$0x6] }
  0x4b   :  { %2219 = vmatpush1.bf16.msra.mxu1 %v2768_v20  ;;  %396 = vmatprep.mubr.f32.mxu1 %v2876_v1  ;;  %v2789_v20 = vld [vmem:[%s3743_s1 + $0x350] ss:$8 sps:$4 sm:$0xff]   ;;  %v2049_v32 = vrot.slane %v412_v16, 10  ;;  %v414_v49 = vunpack.c.l.bf16 %v406_v46  ;;  %v2814_v17 = vld [vmem:[%s3743_s1 + $0x1a4] ss:$8 sps:$4 sm:$0xff]  }
  0x4c   :  { %2347 = vmatpush1.bf16.msra.mxu0 %v2771_v21  ;;  %2221 = vmatprep.subr.bf16.mxu1 %v2772_v22  ;;  %v1077_v21 = vsel %vm3204_vm5, %v2094_v7, %v1076_v15  ;;  %v428_v22 = vcombine.high %v412_v16, %v412_v16  ;;  %v440_v31 = vrot.slane %v427_v18, 6  ;;  %v2826_v57 = vld [vmem:[%s3743_s1 + $0x1c4] ss:$8 sps:$4 sm:$0xff]  }
  0x4d   :  { %2349 = vmatprep.subr.bf16.mxu0 %v2775_v23  ;;  %1215 = vmatmul.mubr.f32.gmra.mrb[4].mxu0 %v1132_v10  ;;  %v2790_v23 = vld [vmem:[%s3743_s1 + $0x164] ss:$8 sps:$4 sm:$0xff]   ;;  %v1133_v27 = vcombine.low %v1077_v21, %v1081_v25  ;;  %v430_v58 = vcombine.high %v414_v49, %v414_v49  ;;  %v2051_v60 = vrot.slane %v414_v49, 10  ;;  %v2100_v10 = vld [vmem:[%s3744_s0 + $0x20] sm:$0x3]  ;;  %v1249_v25 = vunpack.c.l.bf16 %v2101_v11 }
  0x4e   :  { %397 = vmatmul.mubr.f32.gmra.mrb[6].mxu1 %v309_v2  ;;  %1220 = vmatprep.mubr.f32.mxu0 %v2876_v1  ;;  %v444_v33 = vrot.slane %v428_v22, 6  ;;  %v408_v2 = vld [vmem:[%s3744_s0 + $0x1c] sm:$0x6]  ;;  %v1248_v21 = vunpack.c.l.bf16 %v2100_v10  ;;  %v409_v22 = vld [vmem:[%s3744_s0 + $0x20] sm:$0x6] }
  0x4f   :  { %2223 = vmatpush1.bf16.msra.mxu1 %v2774_v37  ;;  %590 = vmatprep.mubr.f32.mxu1 %v2876_v1  ;;  %v2798_v37 = vld [vmem:[%s3743_s1 + $0x170] ss:$8 sps:$4 sm:$0xff]   ;;  %v452_v5 = vrot.slane %v430_v58, 6  ;;  %v416_v7 = vunpack.c.l.bf16 %v408_v2  ;;  %v2829_v58 = vld [vmem:[%s3743_s1 + $0x3c4] ss:$8 sps:$4 sm:$0xff]  }
  0x50   :  { %2351 = vmatpush1.bf16.msra.mxu0 %v2777_v38  ;;  %2225 = vmatprep.subr.bf16.mxu1 %v2778_v41  ;;  %v1244_v38 = vunpack.c.l.bf16 %v2096_v28  ;;  %v441_v41 = vsel %vm3204_vm5, %v2048_v30, %v440_v31  ;;  %v2102_v30 = vld [vmem:[%s3744_s0 + $0x28] sm:$0x3]  ;;  %v2822_v49 = vld [vmem:[%s3743_s1 + $0x1b0] ss:$8 sps:$4 sm:$0xff]   ;;  %v2107_v2 = vld [vmem:[%s3744_s0 + $0x14] sm:$0x7] }
  0x51   :  { %2353 = vmatprep.subr.bf16.mxu0 %v2781_v42  ;;  %1221 = vmatmul.mubr.f32.gmra.mrb[6].mxu0 %v1133_v27  ;;  %v445_v42 = vsel %vm3204_vm5, %v2049_v32, %v444_v33  ;;  %v453_v14 = vsel %vm3204_vm5, %v2051_v60, %v452_v5  ;;  %v417_v27 = vunpack.c.l.bf16 %v409_v22  ;;  %v1310_v32 = vcombine.low %v1248_v21, %v1249_v25  ;;  %v2838_v11 = vld [vmem:[%s3743_s1 + $0x1e4] ss:$8 sps:$4 sm:$0xff]   ;;  %v2844_v25 = vld [vmem:[%s3743_s1 + $0x1f4] ss:$8 sps:$4 sm:$0xff]  }
  0x52   :  { %1380 = vmatprep.mubr.f32.mxu0 %v2876_v1  ;;  %v518_v51 = vcombine.low %v441_v41, %v445_v42  ;;  %v1308_v53 = vcombine.low %v1244_v38, %v1245_v39  ;;  %v1250_v41 = vunpack.c.l.bf16 %v2102_v30  ;;  %v2820_v42 = vld [vmem:[%s3743_s1 + $0x1b4] ss:$8 sps:$4 sm:$0xff]   ;;  %v1424_v10 = vunpack.c.l.bf16 %v2107_v2  ;;  %v2111_v30 = vld [vmem:[%s3744_s0 + $0x2c] sm:$0x7] }
  0x53   :  { %2227 = vmatpush1.bf16.msra.mxu1 %v2780_v59  ;;  %v2050_v59 = vrot.slane %v413_v48, 10  ;;  %v433_v33 = vcombine.high %v417_v27, %v417_v27  ;;  %v2853_v2 = vld [vmem:[%s3743_s1 + $0x414] ss:$8 sps:$4 sm:$0xff]  }
  0x54   :  { %2355 = vmatpush1.bf16.msra.mxu0 %v2783_v0  ;;  %2229 = vmatprep.subr.bf16.mxu1 %v2784_v3  ;;  %v407_v0 = vld [vmem:[%s3744_s0 + $0x18] sm:$0x6]  ;;  %v2811_v3 = vld [vmem:[%s3743_s1 + $0x394] ss:$8 sps:$4 sm:$0xff]   ;;  %v1440_v22 = vcombine.high %v1424_v10, %v1424_v10 }
  0x55   :  { %2357 = vmatprep.subr.bf16.mxu0 %v2787_v9  ;;  %v415_v6 = vunpack.c.l.bf16 %v407_v0  ;;  %v1309_v9 = vcombine.low %v1246_v62, %v1247_v63  ;;  %v449_v13 = vsel %vm3204_vm5, %v2050_v59, %v448_v4  ;;  %v464_v46 = vrot.slane %v433_v33, 6  ;;  %v2831_v62 = vld [vmem:[%s3743_s1 + $0x3c0] ss:$8 sps:$4 sm:$0xff]   ;;  %v2106_v0 = vld [vmem:[%s3744_s0 + $0x10] sm:$0x7] }
  0x56   :  { %v519_v18 = vcombine.low %v449_v13, %v453_v14  ;;  %v2835_v4 = vld [vmem:[%s3743_s1 + $0x3d4] ss:$8 sps:$4 sm:$0xff]   ;;  %v2108_v13 = vld [vmem:[%s3744_s0 + $0x20] sm:$0x7]  ;;  %v2109_v14 = vld [vmem:[%s3744_s0 + $0x24] sm:$0x7] }
  0x57   :  { %2231 = vmatpush1.bf16.msra.mxu1 %v2786_v19  ;;  %v431_v15 = vcombine.high %v415_v6, %v415_v6  ;;  %v2052_v16 = vrot.slane %v415_v6, 10  ;;  %v432_v19 = vcombine.high %v416_v7, %v416_v7  ;;  %v2834_v6 = vld [vmem:[%s3743_s1 + $0x1d0] ss:$8 sps:$4 sm:$0xff]  }
  0x58   :  { %2359 = vmatpush1.bf16.msra.mxu0 %v2789_v20  ;;  %2233 = vmatprep.subr.bf16.mxu1 %v2790_v23  ;;  %v2053_v20 = vrot.slane %v416_v7, 10  ;;  %v2817_v23 = vld [vmem:[%s3743_s1 + $0x3a4] ss:$8 sps:$4 sm:$0xff]   ;;  %v2837_v7 = vld [vmem:[%s3743_s1 + $0x3d0] ss:$8 sps:$4 sm:$0xff]  }
  0x59   :  { %2361 = vmatprep.subr.bf16.mxu0 %v2793_v24  ;;  %v456_v24 = vrot.slane %v431_v15, 6  ;;  %v460_v28 = vrot.slane %v432_v19, 6  ;;  %v2056_v15 = vld [vmem:[%s3744_s0 + $0x4] sm:$0x3] }
  0x5b   :  { %2235 = vmatpush1.bf16.msra.mxu1 %v2792_v26  ;;  %v410_v26 = vld [vmem:[%s3744_s0 + $0x24] sm:$0x6]  ;;  %v457_v31 = vsel %vm3204_vm5, %v2052_v16, %v456_v24  ;;  %v461_v38 = vsel %vm3204_vm5, %v2053_v20, %v460_v28  ;;  %v2843_v24 = vld [vmem:[%s3743_s1 + $0x3e0] ss:$8 sps:$4 sm:$0xff]   ;;  %v2847_v28 = vld [vmem:[%s3743_s1 + $0x3f4] ss:$8 sps:$4 sm:$0xff]  }
  0x5c   :  { %2363 = vmatpush1.bf16.msra.mxu0 %v2795_v34  ;;  %2237 = vmatprep.subr.bf16.mxu1 %v2796_v35  ;;  %v418_v29 = vunpack.c.l.bf16 %v410_v26  ;;  %v2054_v34 = vrot.slane %v417_v27, 10  ;;  %v2103_v35 = vld [vmem:[%s3744_s0 + $0x2c] sm:$0x3]  ;;  %v520_v44 = vcombine.low %v457_v31, %v461_v38  ;;  %v1425_v26 = vunpack.c.l.bf16 %v2108_v13  ;;  %v2063_v13 = vld [vmem:[%s3744_s0 + $0x28] sm:$0x3] }
  0x5d   :  { %2365 = vmatprep.subr.bf16.mxu0 %v2799_v36  ;;  %v2816_v36 = vld [vmem:[%s3743_s1 + $0x1a0] ss:$8 sps:$4 sm:$0xff]   ;;  %v1426_v27 = vunpack.c.l.bf16 %v2109_v14  ;;  %v632_v31 = vunpack.c.l.bf16 %v2056_v15 }
  0x5e   :  { %v434_v39 = vcombine.high %v418_v29, %v418_v29 }
  0x5f   :  { %2239 = vmatpush1.bf16.msra.mxu1 %v2798_v37  ;;  %v2819_v37 = vld [vmem:[%s3743_s1 + $0x3a0] ss:$8 sps:$4 sm:$0xff]  }
  0x60   :  { %2367 = vmatpush1.bf16.msra.mxu0 %v2801_v40  ;;  %2241 = vmatprep.subr.bf16.mxu1 %v2802_v43  ;;  %v2055_v40 = vrot.slane %v418_v29, 10  ;;  %v2823_v43 = vld [vmem:[%s3743_s1 + $0x3b4] ss:$8 sps:$4 sm:$0xff]   ;;  %v468_v48 = vrot.slane %v434_v39, 6  ;;  %v2110_v29 = vld [vmem:[%s3744_s0 + $0x28] sm:$0x7] }
  0x61   :  { %2369 = vmatprep.subr.bf16.mxu0 %v2805_v47  ;;  %v1251_v47 = vunpack.c.l.bf16 %v2103_v35  ;;  %v2115_v39 = vrot.slane %v1424_v10, 9 }
  0x62   :  { %591 = vmatmul.mubr.f32.vlgmr.msra.gmra.mrb[0].mxu1 %v518_v51  ;;  %v469_v55 = vsel %vm3204_vm5, %v2055_v40, %v468_v48  ;;  %v1459_v40 = vrot.slane %v1440_v22, 5  ;;  %v2850_v48 = vld [vmem:[%s3743_s1 + $0x404] ss:$8 sps:$4 sm:$0xff]  }
  0x63   :  { %1381 = vmatmul.mubr.f32.vlgmr.msra.gmra.mrb[0].mxu0 %v1308_v53  ;;  %2243 = vmatpush1.bf16.msra.mxu1 %v2804_v50  ;;  %v465_v50 = vsel %vm3204_vm5, %v2054_v34, %v464_v46  ;;  %v1311_v51 = vcombine.low %v1250_v41, %v1251_v47  ;;  %v2104_v53 = vld [vmem:[%s3744_s0 + $0x8] sm:$0x7]  ;;  %v2058_v34 = vld [vmem:[%s3744_s0 + $0xc] sm:$0x3]  ;;  %v2846_v41 = vld [vmem:[%s3743_s1 + $0x1f0] ss:$8 sps:$4 sm:$0xff]   ;;  %v1427_v46 = vunpack.c.l.bf16 %v2110_v29  ;;  %v1428_v47 = vunpack.c.l.bf16 %v2111_v30 }
  0x64   :  { %2371 = vmatpush1.bf16.msra.mxu0 %v2807_v56  ;;  %2245 = vmatprep.subr.bf16.mxu1 %v2808_v61  ;;  %v2105_v56 = vld [vmem:[%s3744_s0 + $0xc] sm:$0x7]  ;;  %v521_v59 = vcombine.low %v465_v50, %v469_v55  ;;  %v1421_v60 = vunpack.c.l.bf16 %v2104_v53  ;;  %v2828_v61 = vld [vmem:[%s3743_s1 + $0x1c0] ss:$8 sps:$4 sm:$0xff]   ;;  %v1460_v55 = vsel %vm3019_vm2, %v2115_v39, %v1459_v40  ;;  %v2125_v30 = vld [vmem:[%s3744_s0 + $0x24] sm:$0x6] }
  0x65   :  { %2373 = vmatprep.subr.bf16.mxu0 %v2811_v3  ;;  %596 = vmatprep.mubr.f32.mxu1 %v2876_v1  ;;  %v1422_v63 = vunpack.c.l.bf16 %v2105_v56  ;;  %v2832_v3 = vld [vmem:[%s3743_s1 + $0x1d4] ss:$8 sps:$4 sm:$0xff]   ;;  %v2124_v29 = vld [vmem:[%s3744_s0 + $0x20] sm:$0x6]  ;;  %v2126_v40 = vld [vmem:[%s3744_s0 + $0x28] sm:$0x6] }
  0x66   :  { %1386 = vmatprep.mubr.f32.mxu0 %v2876_v1  ;;  %597 = vmatmul.mubr.f32.gmra.mrb[2].mxu1 %v519_v18  ;;  %v1437_v5 = vcombine.high %v1421_v60, %v1421_v60  ;;  %v2112_v16 = vrot.slane %v1421_v60, 9  ;;  %v2057_v18 = vld [vmem:[%s3744_s0 + $0x8] sm:$0x3]  ;;  %v2060_v56 = vld [vmem:[%s3744_s0 + $0x1c] sm:$0x3] }
  0x67   :  { %1387 = vmatmul.mubr.f32.gmra.mrb[2].mxu0 %v1309_v9  ;;  %2247 = vmatpush1.bf16.msra.mxu1 %v2810_v8  ;;  %v1438_v8 = vcombine.high %v1422_v63, %v1422_v63  ;;  %v1423_v9 = vunpack.c.l.bf16 %v2106_v0  ;;  %v2113_v19 = vrot.slane %v1422_v63, 9  ;;  %v2852_v60 = vld [vmem:[%s3743_s1 + $0x400] ss:$8 sps:$4 sm:$0xff]   ;;  %v1443_v63 = vcombine.high %v1427_v46, %v1427_v46  ;;  %v2865_v39 = vld [vmem:[%s3743_s1 + $0x454] ss:$8 sps:$4 sm:$0xff]  }
  0x68   :  { %2375 = vmatpush1.bf16.msra.mxu0 %v2813_v12  ;;  %2249 = vmatprep.subr.bf16.mxu1 %v2814_v17  ;;  %v2841_v12 = vld [vmem:[%s3743_s1 + $0x3e4] ss:$8 sps:$4 sm:$0xff]   ;;  %v1447_v17 = vrot.slane %v1437_v5, 5  ;;  %v1444_v0 = vcombine.high %v1428_v47, %v1428_v47 }
  0x69   :  { %2377 = vmatprep.subr.bf16.mxu0 %v2817_v23  ;;  %602 = vmatprep.mubr.f32.mxu1 %v2876_v1  ;;  %v1451_v20 = vrot.slane %v1438_v8, 5  ;;  %v1439_v21 = vcombine.high %v1423_v9, %v1423_v9  ;;  %v2840_v23 = vld [vmem:[%s3743_s1 + $0x1e0] ss:$8 sps:$4 sm:$0xff]   ;;  %v2114_v35 = vrot.slane %v1423_v9, 9  ;;  %v2118_v8 = vrot.slane %v1427_v46, 9 }
  0x6a   :  { %1392 = vmatprep.mubr.f32.mxu0 %v2876_v1  ;;  %603 = vmatmul.mubr.f32.gmra.mrb[4].mxu1 %v520_v44  ;;  %v1448_v33 = vsel %vm3019_vm2, %v2112_v16, %v1447_v17  ;;  %v1442_v44 = vcombine.high %v1426_v27, %v1426_v27  ;;  %v2119_v9 = vrot.slane %v1428_v47, 9  ;;  %v1471_v14 = vrot.slane %v1443_v63, 5  ;;  %v2856_v16 = vld [vmem:[%s3743_s1 + $0x424] ss:$8 sps:$4 sm:$0xff]  }
  0x6b   :  { %1393 = vmatmul.mubr.f32.gmra.mrb[4].mxu0 %v1310_v32  ;;  %2251 = vmatpush1.bf16.msra.mxu1 %v2816_v36  ;;  %v633_v32 = vunpack.c.l.bf16 %v2057_v18  ;;  %v1452_v36 = vsel %vm3019_vm2, %v2113_v19, %v1451_v20  ;;  %v1455_v38 = vrot.slane %v1439_v21, 5  ;;  %v1475_v15 = vrot.slane %v1444_v0, 5  ;;  %v2858_v21 = vld [vmem:[%s3743_s1 + $0x420] ss:$8 sps:$4 sm:$0xff]  }
  0x6c   :  { %2379 = vmatpush1.bf16.msra.mxu0 %v2819_v37  ;;  %2253 = vmatprep.subr.bf16.mxu1 %v2820_v42  ;;  %v2059_v37 = vld [vmem:[%s3744_s0 + $0x10] sm:$0x3]  ;;  %v1525_v50 = vcombine.low %v1448_v33, %v1452_v36  ;;  %v639_v20 = vunpack.c.l.bf16 %v2063_v13  ;;  %v1472_v22 = vsel %vm3019_vm2, %v2118_v8, %v1471_v14  ;;  %v1639_v33 = vunpack.c.l.bf16 %v2121_v45  ;;  %v2864_v36 = vld [vmem:[%s3743_s1 + $0x440] ss:$8 sps:$4 sm:$0xff]  }
  0x6d   :  { %2381 = vmatprep.subr.bf16.mxu0 %v2823_v43  ;;  %608 = vmatprep.mubr.f32.mxu1 %v2876_v1  ;;  %v2849_v42 = vld [vmem:[%s3743_s1 + $0x3f0] ss:$8 sps:$4 sm:$0xff]   ;;  %v1441_v43 = vcombine.high %v1425_v26, %v1425_v26  ;;  %v635_v53 = vunpack.c.l.bf16 %v2059_v37  ;;  %v2870_v0 = vld [vmem:[%s3743_s1 + $0x460] ss:$8 sps:$4 sm:$0xff]  }
  0x6e   :  { %1398 = vmatprep.mubr.f32.mxu0 %v2876_v1  ;;  %609 = vmatmul.mubr.f32.gmra.mrb[6].mxu1 %v521_v59  ;;  %v2117_v59 = vrot.slane %v1426_v27, 9  ;;  %v2120_v27 = vld [vmem:[%s3744_s0 + $0x8] sm:$0x6]  ;;  %v2122_v37 = vld [vmem:[%s3744_s0 + $0x10] sm:$0x6] }
  0x6f   :  { %1399 = vmatmul.mubr.f32.gmra.mrb[6].mxu0 %v1311_v51  ;;  %2255 = vmatpush1.bf16.msra.mxu1 %v2822_v49  ;;  %v696_v49 = vcombine.low %v632_v31, %v633_v32  ;;  %v634_v51 = vunpack.c.l.bf16 %v2058_v34  ;;  %v2862_v31 = vld [vmem:[%s3743_s1 + $0x444] ss:$8 sps:$4 sm:$0xff]   ;;  %v1638_v32 = vunpack.c.l.bf16 %v2120_v27  ;;  %v1642_v34 = vunpack.c.l.bf16 %v2124_v29  ;;  %v2873_v13 = vld [vmem:[%s3743_s1 + $0x470] ss:$8 sps:$4 sm:$0xff]  }
  0x70   :  { %2383 = vmatpush1.bf16.msra.mxu0 %v2825_v54  ;;  %2257 = vmatprep.subr.bf16.mxu1 %v2826_v57  ;;  %v1456_v54 = vsel %vm3019_vm2, %v2114_v35, %v1455_v38  ;;  %v2061_v57 = vld [vmem:[%s3744_s0 + $0x20] sm:$0x3]  ;;  %v1643_v35 = vunpack.c.l.bf16 %v2125_v30  ;;  %v2123_v38 = vld [vmem:[%s3744_s0 + $0x14] sm:$0x6]  ;;  %v1640_v47 = vunpack.c.l.bf16 %v2122_v37 }
  0x71   :  { %2385 = vmatprep.subr.bf16.mxu0 %v2829_v58  ;;  %768 = vmatprep.mubr.f32.mxu1 %v2876_v1  ;;  %v2116_v58 = vrot.slane %v1425_v26, 9  ;;  %v697_v5 = vcombine.low %v634_v51, %v635_v53  ;;  %v2868_v53 = vld [vmem:[%s3743_s1 + $0x464] ss:$8 sps:$4 sm:$0xff]  }
  0x72   :  { %1597 = vmatprep.mubr.f32.mxu0 %v2876_v1  ;;  %v1659_v46 = vcombine.high %v1643_v35, %v1643_v35 }
  0x73   :  { %2259 = vmatpush1.bf16.msra.mxu1 %v2828_v61  ;;  %v1463_v61 = vrot.slane %v1441_v43, 5  ;;  %v1655_v43 = vcombine.high %v1639_v33, %v1639_v33 }
  0x74   :  { %2387 = vmatpush1.bf16.msra.mxu0 %v2831_v62  ;;  %2261 = vmatprep.subr.bf16.mxu1 %v2832_v3  ;;  %v1467_v62 = vrot.slane %v1442_v44, 5  ;;  %v636_v3 = vunpack.c.l.bf16 %v2060_v56  ;;  %v1658_v44 = vcombine.high %v1642_v34, %v1642_v34 }
  0x75   :  { %2389 = vmatprep.subr.bf16.mxu0 %v2835_v4  ;;  %v637_v4 = vunpack.c.l.bf16 %v2061_v57  ;;  %v1464_v10 = vsel %vm3019_vm2, %v2116_v58, %v1463_v61  ;;  %v1668_v57 = vrot.slane %v1655_v43, 6  ;;  %v2132_v58 = vrot.slane %v1642_v34, 10  ;;  %v1847_v43 = vld [vmem:[%s3745_s2] sm:$0x3]  ;;  %s2877_s2 = smov 64  }
  0x76   :  { %v1684_v61 = vrot.slane %v1659_v46, 6 }
  0x77   :  { %2263 = vmatpush1.bf16.msra.mxu1 %v2834_v6  ;;  %v1526_v6 = vcombine.low %v1456_v54, %v1460_v55  ;;  %v698_v17 = vcombine.low %v636_v3, %v637_v4  ;;  %v2128_v54 = vrot.slane %v1638_v32, 10  ;;  %v2129_v55 = vrot.slane %v1639_v33, 10  ;;  %v2871_v4 = vld [vmem:[%s3743_s1 + $0x474] ss:$8 sps:$4 sm:$0xff]  }
  0x78   :  { %2391 = vmatpush1.bf16.msra.mxu0 %v2837_v7  ;;  %2265 = vmatprep.subr.bf16.mxu1 %v2838_v11  ;;  %v2855_v7 = vld [vmem:[%s3743_s1 + $0x410] ss:$8 sps:$4 sm:$0xff]   ;;  %v1468_v11 = vsel %vm3019_vm2, %v2117_v59, %v1467_v62  ;;  %v2133_v59 = vrot.slane %v1643_v35, 10  ;;  %v1656_v62 = vcombine.high %v1640_v47, %v1640_v47 }
  0x79   :  { %2393 = vmatprep.subr.bf16.mxu0 %v2841_v12  ;;  %v2062_v12 = vld [vmem:[%s3744_s0 + $0x24] sm:$0x3]  ;;  %v1527_v18 = vcombine.low %v1464_v10, %v1468_v11 }
  0x7a   :  { %v638_v19 = vunpack.c.l.bf16 %v2062_v12  ;;  %v1685_v10 = vsel %vm3204_vm5, %v2133_v59, %v1684_v61  ;;  %v1672_v11 = vrot.slane %v1656_v62, 6 }
  0x7b   :  { %2267 = vmatpush1.bf16.msra.mxu1 %v2840_v23  ;;  %v1476_v23 = vsel %vm3019_vm2, %v2119_v9, %v1475_v15 }
  0x7c   :  { %2395 = vmatpush1.bf16.msra.mxu0 %v2843_v24  ;;  %2269 = vmatprep.subr.bf16.mxu1 %v2844_v25  ;;  %v2859_v24 = vld [vmem:[%s3743_s1 + $0x434] ss:$8 sps:$4 sm:$0xff]   ;;  %v699_v25 = vcombine.low %v638_v19, %v639_v20  ;;  %v1528_v26 = vcombine.low %v1472_v22, %v1476_v23 }
  0x7d   :  { %2397 = vmatprep.subr.bf16.mxu0 %v2847_v28  ;;  %v2861_v28 = vld [vmem:[%s3743_s1 + $0x430] ss:$8 sps:$4 sm:$0xff]  }
  0x7f   :  { %2271 = vmatpush1.bf16.msra.mxu1 %v2846_v41  ;;  %v2127_v41 = vld [vmem:[%s3744_s0 + $0x2c] sm:$0x6] }
  0x80   :  { %2399 = vmatpush1.bf16.msra.mxu0 %v2849_v42  ;;  %2432 = vmatprep.subr.bf16.mxu1 %v2850_v48  ;;  %v1654_v42 = vcombine.high %v1638_v32, %v1638_v32  ;;  %v1645_v51 = vunpack.c.l.bf16 %v2127_v41 }
  0x81   :  { %2401 = vmatprep.subr.bf16.mxu0 %v2850_v48  ;;  %v1641_v48 = vunpack.c.l.bf16 %v2123_v38 }
  0x82   :  { %769 = vmatmul.mubr.f32.vlgmr.msra.gmra.mrb[0].mxu1 %v696_v49  ;;  %v2867_v49 = vld [vmem:[%s3743_s1 + $0x450] ss:$8 sps:$4 sm:$0xff]   ;;  %v1664_v56 = vrot.slane %v1654_v42, 6  ;;  %v1661_v3 = vcombine.high %v1645_v51, %v1645_v51 }
  0x83   :  { %1598 = vmatmul.mubr.f32.vlgmr.msra.gmra.mrb[0].mxu0 %v1525_v50  ;;  %2440 = vmatpush1.bf16.msra.mxu1 %v2852_v60  ;;  %v1644_v50 = vunpack.c.l.bf16 %v2126_v40  ;;  %v1657_v63 = vcombine.high %v1641_v48, %v1641_v48  ;;  %v2131_v8 = vrot.slane %v1641_v48, 10  ;;  %v1849_v40 = vlaneseq }
  0x84   :  { %2403 = vmatpush1.bf16.msra.mxu0 %v2852_v60  ;;  %774 = vmatprep.mubr.f32.mxu1 %v2876_v1  ;;  %v1680_v60 = vrot.slane %v1658_v44, 6 }
  0x85   :  { %1603 = vmatprep.mubr.f32.mxu0 %v2876_v1  ;;  %2405 = vmatprep.subr.bf16.mxu0 %v2853_v2  ;;  %v1676_v12 = vrot.slane %v1657_v63, 6  ;;  %v2134_v14 = vrot.slane %v1644_v50, 10 }
  0x86   :  { %2433 = vmatprep.subr.bf16.mxu1 %v2853_v2  ;;  %775 = vmatmul.mubr.f32.gmra.mrb[2].mxu1 %v697_v5  ;;  %v1660_v2 = vcombine.high %v1644_v50, %v1644_v50  ;;  %v1665_v5 = vsel %vm3204_vm5, %v2128_v54, %v1664_v56  ;;  %v1681_v9 = vsel %vm3204_vm5, %v2132_v58, %v1680_v60 }
  0x87   :  { %1604 = vmatmul.mubr.f32.gmra.mrb[2].mxu0 %v1526_v6  ;;  %2441 = vmatpush1.bf16.msra.mxu1 %v2855_v7  ;;  %v1669_v6 = vsel %vm3204_vm5, %v2129_v55, %v1668_v57  ;;  %v1744_v19 = vcombine.low %v1681_v9, %v1685_v10 }
  0x88   :  { %2407 = vmatpush1.bf16.msra.mxu0 %v2855_v7  ;;  %780 = vmatprep.mubr.f32.mxu1 %v2876_v1  ;;  %v2130_v7 = vrot.slane %v1640_v47, 10  ;;  %v1688_v15 = vrot.slane %v1660_v2, 6 }
  0x89   :  { %1609 = vmatprep.mubr.f32.mxu0 %v2876_v1  ;;  %2409 = vmatprep.subr.bf16.mxu0 %v2856_v16 }
  0x8a   :  { %2434 = vmatprep.subr.bf16.mxu1 %v2856_v16  ;;  %781 = vmatmul.mubr.f32.gmra.mrb[4].mxu1 %v698_v17  ;;  %v2135_v16 = vrot.slane %v1645_v51, 10  ;;  %v1692_v17 = vrot.slane %v1661_v3, 6  ;;  %v1673_v20 = vsel %vm3204_vm5, %v2130_v7, %v1672_v11  ;;  %v1689_v22 = vsel %vm3204_vm5, %v2134_v14, %v1688_v15 }
  0x8b   :  { %1610 = vmatmul.mubr.f32.gmra.mrb[4].mxu0 %v1527_v18  ;;  %2442 = vmatpush1.bf16.msra.mxu1 %v2858_v21  ;;  %v1742_v18 = vcombine.low %v1665_v5, %v1669_v6 }
  0x8c   :  { %2411 = vmatpush1.bf16.msra.mxu0 %v2858_v21  ;;  %786 = vmatprep.mubr.f32.mxu1 %v2876_v1  ;;  %v1677_v21 = vsel %vm3204_vm5, %v2131_v8, %v1676_v12  ;;  %v1693_v23 = vsel %vm3204_vm5, %v2135_v16, %v1692_v17 }
  0x8d   :  { %1615 = vmatprep.mubr.f32.mxu0 %v2876_v1  ;;  %2413 = vmatprep.subr.bf16.mxu0 %v2859_v24 }
  0x8e   :  { %2435 = vmatprep.subr.bf16.mxu1 %v2859_v24  ;;  %787 = vmatmul.mubr.f32.gmra.mrb[6].mxu1 %v699_v25  ;;  %v1743_v24 = vcombine.low %v1673_v20, %v1677_v21  ;;  %v1745_v25 = vcombine.low %v1689_v22, %v1693_v23 }
  0x8f   :  { %1616 = vmatmul.mubr.f32.gmra.mrb[6].mxu0 %v1528_v26  ;;  %2443 = vmatpush1.bf16.msra.mxu1 %v2861_v28 }
  0x90   :  { %2415 = vmatpush1.bf16.msra.mxu0 %v2861_v28  ;;  %2436 = vmatprep.subr.bf16.mxu1 %v2862_v31 }
  0x91   :  { %2417 = vmatprep.subr.bf16.mxu0 %v2862_v31  ;;  %1814 = vmatprep.mubr.f32.mxu0 %v2876_v1 }
  0x92   :  { %1826 = vmatprep.mubr.f32.mxu1 %v2876_v1 }
  0x93   :  { %2444 = vmatpush1.bf16.msra.mxu1 %v2864_v36 }
  0x94   :  { %2419 = vmatpush1.bf16.msra.mxu0 %v2864_v36  ;;  %2437 = vmatprep.subr.bf16.mxu1 %v2865_v39 }
  0x95   :  { %2421 = vmatprep.subr.bf16.mxu0 %v2865_v39 }
  0x97   :  { %2445 = vmatpush1.bf16.msra.mxu1 %v2867_v49 }
  0x98   :  { %2423 = vmatpush1.bf16.msra.mxu0 %v2867_v49  ;;  %2438 = vmatprep.subr.bf16.mxu1 %v2868_v53 }
  0x99   :  { %2425 = vmatprep.subr.bf16.mxu0 %v2868_v53 }
  0x9b   :  { %2446 = vmatpush1.bf16.msra.mxu1 %v2870_v0 }
  0x9c   :  { %2427 = vmatpush1.bf16.msra.mxu0 %v2870_v0  ;;  %2439 = vmatprep.subr.bf16.mxu1 %v2871_v4 }
  0x9d   :  { %2429 = vmatprep.subr.bf16.mxu0 %v2871_v4 }
  0x9f   :  { %2447 = vmatpush1.bf16.msra.mxu1 %v2873_v13 }
  0xa0   :  { %2431 = vmatpush1.bf16.msra.mxu0 %v2873_v13 }
  0xa2   :  { %1827 = vmatmul.mubr.f32.vlgmr.msra.gmra.mrb[8].mxu1 %v1744_v19 }
  0xa3   :  { %1815 = vmatmul.mubr.f32.vlgmr.msra.gmra.mrb[0].mxu0 %v1742_v18  ;;  %1832 = vmatprep.mubr.f32.mxu1 %v2876_v1 }
  0xa4   :  { %1820 = vmatprep.mubr.f32.mxu0 %v2876_v1  ;;  %v1850_v1 = vshrl.u32 %v1849_v40, 7 }
  0xa6   :  { %1833 = vmatmul.mubr.f32.gmra.mrb[10].mxu1 %v1745_v25  ;;  %v3699_v41 = vsub.s32 0, %v1850_v1  ;;  %v1855_v46 = vsub.s32 1, %v1850_v1 }
  0xa7   :  { %1821 = vmatmul.mubr.f32.gmra.mrb[2].mxu0 %v1743_v24 }
  0xa8   :  { %v1852_v54 = vrot.slane %v1847_v43, %v3699_v41  ;;  %v1856_v55 = vrot.slane %v1847_v43, %v1855_v46 }
 0x155   :  { %v770_v26 = vpop.f32.mrb[0].mxu1 }
 0x156   :  { %v772_v27 = vpop.f32.mrb[1].mxu1 }
 0x159   :  { %v776_v45 = vpop.f32.mrb[2].mxu1 }
 0x15a   :  { %v778_v28 = vpop.f32.mrb[3].mxu1 }
 0x15d   :  { %v782_v29 = vpop.f32.mrb[4].mxu1 }
 0x15e   :  { %v1611_v30 = vpop.f32.mrb[4].mxu0  ;;  %v784_v32 = vpop.f32.mrb[5].mxu1 }
 0x15f   :  { %v2452_v31 = vadd.f32 %v1611_v30, %v782_v29  ;;  %v1613_v52 = vpop.f32.mrb[5].mxu0 }
 0x160   :  { %v2454_v33 = vadd.f32 %v1613_v52, %v784_v32 }
 0x161   :  { %v788_v34 = vpop.f32.mrb[6].mxu1 }
 0x162   :  { %v1617_v35 = vpop.f32.mrb[6].mxu0  ;;  %v790_v37 = vpop.f32.mrb[7].mxu1 }
 0x163   :  { %v2456_v36 = vadd.f32 %v1617_v35, %v788_v34  ;;  %v1619_v38 = vpop.f32.mrb[7].mxu0 }
 0x164   :  { %v2458_v39 = vadd.f32 %v1619_v38, %v790_v37 }
 0x175   :  { %v1828_v44 = vpop.f32.mrb[8].mxu1 }
 0x176   :  { %v1816_v42 = vpop.f32.mrb[0].mxu0  ;;  %v2453_v48 = vadd.f32 %v2452_v31, %v1828_v44  ;;  %v1830_v50 = vpop.f32.mrb[9].mxu1 }
 0x177   :  { %v2448_v47 = vadd.f32 %v1816_v42, %v770_v26  ;;  %v1818_v49 = vpop.f32.mrb[1].mxu0  ;;  %v2455_v53 = vadd.f32 %v2454_v33, %v1830_v50 }
 0x178   :  { %v2449_v51 = vadd.f32 %v1818_v49, %v772_v27  ;;  %v1863_v5 = vadd.f32 %v2453_v48, %v1852_v54 }
 0x179   :  { %v1834_v57 = vpop.f32.mrb[10].mxu1  ;;  %v1859_v0 = vadd.f32 %v2448_v47, %v1852_v54  ;;  %v1864_v7 = vadd.f32 %v2455_v53, %v1856_v55 }
 0x17a   :  { %v1822_v56 = vpop.f32.mrb[2].mxu0  ;;  %v2457_v59 = vadd.f32 %v2456_v36, %v1834_v57  ;;  %v1836_v61 = vpop.f32.mrb[11].mxu1  ;;  %v1860_v3 = vadd.f32 %v2449_v51, %v1856_v55 }
 0x17b   :  { %v2450_v58 = vadd.f32 %v1822_v56, %v776_v45  ;;  %v1824_v60 = vpop.f32.mrb[3].mxu0  ;;  %v2459_v63 = vadd.f32 %v2458_v39, %v1836_v61 }
 0x17c   :  { %v2451_v62 = vadd.f32 %v1824_v60, %v778_v28  ;;  %v1865_v9 = vadd.f32 %v2457_v59, %v1852_v54 }
 0x17d   :  { %v1861_v2 = vadd.f32 %v2450_v58, %v1852_v54  ;;  %v1866_v11 = vadd.f32 %v2459_v63, %v1856_v55 }
 0x17e   :  { %v1862_v4 = vadd.f32 %v2451_v62, %v1856_v55 }
 0x17f   :  { %v1867_v6 = vadd.f32 %v1861_v2, %v1859_v0 }
 0x180   :  { %v1876_v8 = vadd.f32 %v1862_v4, %v1860_v3 }
 0x181   :  { %v1868_v10 = vadd.f32 %v1867_v6, %v1863_v5 }
 0x182   :  { %v1877_v12 = vadd.f32 %v1876_v8, %v1864_v7 }
 0x183   :  { %v1869_v13 = vadd.f32 %v1868_v10, %v1865_v9 }
 0x184   :  { %v1878_v14 = vadd.f32 %v1877_v12, %v1866_v11 }
 0x185   :  { %v1870_v15 = vrot.slane %v1869_v13, 4 }
 0x186   :  { %v1879_v16 = vrot.slane %v1878_v14, 4 }
 0x187   :  { %v1871_v17 = vadd.f32 %v1870_v15, %v1869_v13 }
 0x188   :  { %v1880_v18 = vadd.f32 %v1879_v16, %v1878_v14  ;;  %v20_v16 = vld [vmem:[%s3747_s3] sm:$0x1] }
 0x189   :  { %v1872_v19 = vrot.slane %v1871_v17, 2 }
 0x18a   :  { %v1881_v20 = vrot.slane %v1880_v18, 2 }
 0x18b   :  { %v1873_v21 = vadd.f32 %v1872_v19, %v1871_v17 }
 0x18c   :  { %v1882_v22 = vadd.f32 %v1881_v20, %v1880_v18 }
 0x18d   :  { %v1874_v23 = vrot.slane %v1873_v21, 1 }
 0x18e   :  { %v1883_v25 = vrot.slane %v1882_v22, 1 }
 0x18f   :  { %v1875_v24 = vadd.f32 %v1874_v23, %v1873_v21 }
 0x190   :  { %v1884_v26 = vadd.f32 %v1883_v25, %v1882_v22 }
 0x191   :  { %1887 = vrot.lane.b32.xlu0 %v1875_v24, %s2877_s2 }
 0x195   :  { %1893 = vrot.lane.b32.xlu0 %v1884_v26, %s2877_s2 }
 0x203   :  { %v1888_v27 = vpop.permute.xlu0 %1887 }
 0x204   :  { %v1890_v45 = vadd.f32 %v1888_v27, %v1875_v24 }
 0x206   :  { %v1891_v28 = vadd.f32 %v1890_v45, %v1884_v26 }
 0x207   :  { %v1894_v29 = vpop.permute.xlu0 %1893 }
 0x208   :  { %v1896_v30 = vadd.f32 %v1894_v29, %v1891_v28 }
 0x20a   :  { %v1897_v31 = vmul.f32 0.0078125, %v1896_v30 }
 0x20c   :  { %1899 = vrot.lane.b32.xlu1 %v1897_v31, %s2877_s2 }
 0x27e   :  { %v1900_v32 = vpop.permute.xlu1 %1899 }
 0x27f   :  { %v1903_v52 = vsel %vm1902_vm6, %v1897_v31, %v1900_v32 }
 0x280   :  { %v1907_v33 = vrot.slane %v1903_v52, %v3699_v41 }
 0x282   :  { %v1909_v34 = vsub.f32 %v1860_v3, %v1907_v33  ;;  %v1911_v35 = vsub.f32 %v1862_v4, %v1907_v33  ;;  %v3710_v36 = vsub.f32 %v1864_v7, %v1907_v33  ;;  %v1908_v37 = vsub.f32 %v1859_v0, %v1907_v33  ;;  %v21_v7 = vld [vmem:[%s3746_s4] sm:$0x1] }
 0x283   :  { %v1910_v38 = vsub.f32 %v1861_v2, %v1907_v33  ;;  %v1912_v39 = vsub.f32 %v1863_v5, %v1907_v33  ;;  %v1915_v40 = vsub.f32 %v1866_v11, %v1907_v33  ;;  %v1914_v43 = vsub.f32 %v1865_v9, %v1907_v33 }
 0x284   :  { %v1917_v1 = vmul.f32 %v1909_v34, %v1909_v34  ;;  %v1919_v42 = vmul.f32 %v1911_v35, %v1911_v35  ;;  %v1916_v44 = vmul.f32 %v1908_v37, %v1908_v37  ;;  %v1921_v47 = vmul.f32 %v3710_v36, %v3710_v36 }
 0x285   :  { %v1918_v46 = vmul.f32 %v1910_v38, %v1910_v38  ;;  %v1920_v49 = vmul.f32 %v1912_v39, %v1912_v39  ;;  %v1923_v51 = vmul.f32 %v1915_v40, %v1915_v40  ;;  %v1922_v54 = vmul.f32 %v1914_v43, %v1914_v43 }
 0x286   :  { %v1933_v48 = vadd.f32 %v1919_v42, %v1917_v1  ;;  %v1983_v8 = vrot.slane %v21_v7, %v3699_v41 }
 0x287   :  { %v1924_v50 = vadd.f32 %v1918_v46, %v1916_v44 }
 0x288   :  { %v1934_v53 = vadd.f32 %v1933_v48, %v1921_v47 }
 0x289   :  { %v1925_v55 = vadd.f32 %v1924_v50, %v1920_v49 }
 0x28a   :  { %v1935_v56 = vadd.f32 %v1934_v53, %v1923_v51 }
 0x28b   :  { %v1926_v57 = vadd.f32 %v1925_v55, %v1922_v54 }
 0x28c   :  { %v1936_v58 = vrot.slane %v1935_v56, 4 }
 0x28d   :  { %v1927_v59 = vrot.slane %v1926_v57, 4 }
 0x28e   :  { %v1937_v60 = vadd.f32 %v1936_v58, %v1935_v56 }
 0x28f   :  { %v1928_v61 = vadd.f32 %v1927_v59, %v1926_v57 }
 0x290   :  { %v1938_v62 = vrot.slane %v1937_v60, 2 }
 0x291   :  { %v1929_v63 = vrot.slane %v1928_v61, 2 }
 0x292   :  { %v1939_v0 = vadd.f32 %v1938_v62, %v1937_v60 }
 0x293   :  { %v1930_v2 = vadd.f32 %v1929_v63, %v1928_v61 }
 0x294   :  { %v1940_v3 = vrot.slane %v1939_v0, 1 }
 0x295   :  { %v1931_v4 = vrot.slane %v1930_v2, 1 }
 0x296   :  { %v1941_v5 = vadd.f32 %v1940_v3, %v1939_v0 }
 0x297   :  { %v1932_v6 = vadd.f32 %v1931_v4, %v1930_v2 }
 0x298   :  { %1950 = vrot.lane.b32.xlu0 %v1941_v5, %s2877_s2 }
 0x299   :  { %1944 = vrot.lane.b32.xlu1 %v1932_v6, %s2877_s2 }
 0x29c   :  { %1984 = vrot.lane.b32.xlu0 %v1983_v8, %s2877_s2 }
 0x30a   :  { %v1951_v12 = vpop.permute.xlu0 %1950 }
 0x30b   :  { %v1945_v9 = vpop.permute.xlu1 %1944 }
 0x30c   :  { %v1947_v10 = vadd.f32 %v1945_v9, %v1932_v6 }
 0x30e   :  { %v1948_v11 = vadd.f32 %v1947_v10, %v1941_v5  ;;  %v1985_v20 = vpop.permute.xlu0 %1984 }
 0x30f   :  { %v1987_v21 = vsel %vm1902_vm6, %v21_v7, %v1985_v20 }
 0x310   :  { %v1953_v13 = vadd.f32 %v1951_v12, %v1948_v11  ;;  %v1991_v25 = vrot.slane %v1987_v21, %v3699_v41 }
 0x312   :  { %v1954_v14 = vmul.f32 0.0078125, %v1953_v13 }
 0x314   :  { %v1955_v15 = vadd.f32 1e-05, %v1954_v14 }
 0x316   :  { %2874 = vrsqrt.f32 %v1955_v15 }
 0x320   :  { %v2875_v17 = vpop.eup %2874 }
 0x321   :  { %v1957_v18 = vmul.f32 %v2875_v17, %v20_v16 }
 0x323   :  { %v1962_v19 = vrot.slane %v1957_v18, %v3699_v41 }
 0x325   :  { %1963 = vrot.lane.b32.xlu1 %v1962_v19, %s2877_s2 }
 0x397   :  { %v1964_v22 = vpop.permute.xlu1 %1963 }
 0x398   :  { %v1966_v23 = vsel %vm1902_vm6, %v1957_v18, %v1964_v22 }
 0x399   :  { %v1970_v24 = vrot.slane %v1966_v23, %v3699_v41 }
 0x39b   :  { %v1971_v26 = vmul.f32 %v1970_v24, %v1908_v37  ;;  %v1972_v27 = vmul.f32 %v1970_v24, %v1909_v34  ;;  %v1973_v45 = vmul.f32 %v1970_v24, %v1910_v38  ;;  %v1974_v28 = vmul.f32 %v1970_v24, %v1911_v35 }
 0x39c   :  { %v1975_v29 = vmul.f32 %v1970_v24, %v1912_v39  ;;  %v1976_v30 = vmul.f32 %v1970_v24, %v3710_v36  ;;  %v1977_v31 = vmul.f32 %v1970_v24, %v1914_v43  ;;  %v1978_v32 = vmul.f32 %v1970_v24, %v1915_v40 }
 0x39d   :  { %v1992_v52 = vadd.f32 %v1991_v25, %v1971_v26  ;;  %v1993_v33 = vadd.f32 %v1991_v25, %v1972_v27  ;;  %v1994_v1 = vadd.f32 %v1991_v25, %v1973_v45  ;;  %v1995_v42 = vadd.f32 %v1991_v25, %v1974_v28 }
 0x39e   :  { %v1996_v44 = vadd.f32 %v1991_v25, %v1975_v29  ;;  %v1997_v46 = vadd.f32 %v1991_v25, %v1976_v30  ;;  %v1998_v47 = vadd.f32 %v1991_v25, %v1977_v31  ;;  %v1999_v48 = vadd.f32 %v1991_v25, %v1978_v32 }
 0x39f   :  { %v2000_v49 = vmax.f32 %v1992_v52, 0.0  ;;  %v2001_v50 = vmax.f32 %v1993_v33, 0.0  ;;  %v2002_v41 = vmax.f32 %v1994_v1, 0.0  ;;  %v2003_v37 = vmax.f32 %v1995_v42, 0.0 }
 0x3a0   :  { %v2004_v34 = vmax.f32 %v1996_v44, 0.0  ;;  %v2005_v38 = vmax.f32 %v1997_v46, 0.0  ;;  %v2006_v35 = vmax.f32 %v1998_v47, 0.0  ;;  %v2007_v39 = vmax.f32 %v1999_v48, 0.0 }
 0x3a1   :  { %v2140_v51 = vpack.c.bf16 %v2001_v50, %v2000_v49  ;;  %v2141_v36 = vpack.c.bf16 %v2003_v37, %v2002_v41 }
 0x3a2   :  { %v2142_v43 = vpack.c.bf16 %v2005_v38, %v2004_v34  ;;  %v2143_v40 = vpack.c.bf16 %v2007_v39, %v2006_v35 }
 0x3a3   :  { %2032 = vst [vmem:[%s3748_s5] sm:$0xff] %v2140_v51  ;;  %2033 = vst [vmem:[%s3748_s5 + $0x8] sm:$0xff] %v2141_v36 }
 0x3a4   :  { %2034 = vst [vmem:[%s3748_s5 + $0x10] sm:$0xff] %v2142_v43  ;;  %2035 = vst [vmem:[%s3748_s5 + $0x18] sm:$0xff] %v2143_v40 }

// kernel: generator_forward.6
= control target key start
LH: loop header
LB: loop body
LE: loop exit
PB: predicated region body
PF: predicated region fallthrough
CT: control target
= control target key end

     0   :  { %vm134_vm0 = vcmask 1046528   ;;  %vm199_vm1 = vcmask 523264   ;;  %vm602_vm2 = vcmask 1045504   ;;  %s4412_s19 = smov 96   ;;  %s4413_s20 = smov 64   ;;  %vm2761_vm3 = vcmask 261120   ;;  %s5958_s1 = inlined_call_operand.vmem [shape: bf16[576,128], index: 1, kind: input, shape index: {}]   ;;  %s5959_s0 = inlined_call_operand.vmem [shape: bf16[2,10,10,64], index: 0, kind: input, shape index: {}]   ;;  %s5960_s2 = inlined_call_operand.vmem [shape: f32[1,128], index: 2, kind: input, shape index: {}]   ;;  %s5961_s4 = inlined_call_operand.vmem [shape: f32[1,32], index: 4, kind: input, shape index: {}]   ;;  %s5962_s3 = inlined_call_operand.vmem [shape: f32[1,32], index: 3, kind: input, shape index: {}]   ;;  %s5963_s5 = inlined_call_operand.vmem [shape: bf16[128,128], index: 5, kind: output, shape index: {}]  }
   0x1   :  { %v3507_v0 = vld [vmem:[%s5958_s1 + $0x20] sm:$0xff]   ;;  %v3508_v2 = vld [vmem:[%s5958_s1 + $0x28] sm:$0xff]   ;;  %v3509_v4 = vld [vmem:[%s5958_s1 + $0x30] sm:$0xff]   ;;  %vm2764_vm4 = vcmask 785408  }
   0x2   :  { %v3519_v1 = vld [vmem:[%s5958_s1 + $0x80] sm:$0xff]   ;;  %4123 = vmatprep.subr.bf16.mxu1 %v3507_v0  ;;  %v3520_v3 = vld [vmem:[%s5958_s1 + $0x88] sm:$0xff]   ;;  %v3521_v11 = vld [vmem:[%s5958_s1 + $0x90] sm:$0xff]  }
   0x3   :  { %4187 = vmatprep.subr.bf16.mxu0 %v3519_v1  ;;  %4125 = vmatpush3.bf16.msra.mxu1 %v3507_v0  ;;  %v4462_v5 = vld [vmem:[%s5959_s0] ss:$8 sps:$4 sm:$0xff]   ;;  %v4468_v7 = vld [vmem:[%s5959_s0 + $0x4] sm:$0x1]  ;;  %v4473_v8 = vld [vmem:[%s5959_s0 + $0xc] sm:$0x1] }
   0x4   :  { %4189 = vmatpush3.bf16.msra.mxu0 %v3519_v1  ;;  %4127 = vmatprep.subr.bf16.mxu1 %v3508_v2  ;;  %v38_v6 = vunpack.c.l.bf16 %v4462_v5  ;;  %v1150_v9 = vunpack.c.h.bf16 %v4462_v5  ;;  %v4479_v10 = vld [vmem:[%s5959_s0 + $0x8] ss:$8 sps:$4 sm:$0xff]   ;;  %v5971_v12 = vunpack.c.l.bf16 %v4468_v7  ;;  %v1151_v13 = vunpack.c.l.bf16 %v4473_v8  ;;  %v4490_v15 = vld [vmem:[%s5959_s0 + $0xc] sm:$0x1]  ;;  %v3098_v16 = vld [vmem:[%s5959_s0 + $0x14] sm:$0x1] }
   0x5   :  { %4191 = vmatprep.subr.bf16.mxu0 %v3520_v3  ;;  %v39_v14 = vunpack.c.l.bf16 %v4479_v10  ;;  %v1152_v17 = vunpack.c.h.bf16 %v4479_v10  ;;  %v5970_v20 = vunpack.c.l.bf16 %v4490_v15  ;;  %v1153_v21 = vunpack.c.l.bf16 %v3098_v16  ;;  %v4502_v22 = vld [vmem:[%s5959_s0 + $0x10] ss:$8 sps:$4 sm:$0xff]   ;;  %v4516_v28 = vld [vmem:[%s5959_s0 + $0x14] sm:$0x1]  ;;  %v4528_v33 = vld [vmem:[%s5959_s0 + $0x1c] sm:$0x1] }
   0x6   :  { %v135_v18 = vrot.slane %v38_v6, 1  ;;  %v1214_v19 = vrot.slane %v1150_v9, 1  ;;  %v3510_v23 = vld [vmem:[%s5958_s1 + $0x38] sm:$0xff]   ;;  %v136_v24 = vrot.slane %v5971_v12, 1  ;;  %v1215_v25 = vrot.slane %v1151_v13, 1  ;;  %v3321_v51 = vld [vmem:[%s5958_s1] sm:$0xff]  }
   0x7   :  { %4129 = vmatpush3.bf16.msra.mxu1 %v3508_v2  ;;  %v138_v26 = vrot.slane %v39_v14, 1  ;;  %v1217_v27 = vrot.slane %v1152_v17, 1  ;;  %v3522_v29 = vld [vmem:[%s5958_s1 + $0x98] sm:$0xff]   ;;  %v139_v30 = vrot.slane %v5970_v20, 1  ;;  %v1218_v31 = vrot.slane %v1153_v21, 1  ;;  %v3523_v52 = vld [vmem:[%s5958_s1 + $0xa0] sm:$0xff]  }
   0x8   :  { %4193 = vmatpush3.bf16.msra.mxu0 %v3520_v3  ;;  %4131 = vmatprep.subr.bf16.mxu1 %v3509_v4  ;;  %v4523_v32 = vrot.slane %v1153_v21, 2  ;;  %v137_v34 = vsel %vm134_vm0, %v135_v18, %v136_v24  ;;  %v1216_v35 = vsel %vm134_vm0, %v1214_v19, %v1215_v25  ;;  %v40_v36 = vunpack.c.l.bf16 %v4502_v22  ;;  %v4537_v38 = vld [vmem:[%s5959_s0 + $0x18] ss:$8 sps:$4 sm:$0xff]   ;;  %v4542_v39 = vld [vmem:[%s5959_s0 + $0x1c] sm:$0x1]  ;;  %v3505_v8 = vld [vmem:[%s5958_s1 + $0x10] sm:$0xff]  }
   0x9   :  { %4195 = vmatprep.subr.bf16.mxu0 %v3521_v11  ;;  %v5969_v37 = vunpack.c.l.bf16 %v4516_v28  ;;  %v4547_v40 = vld [vmem:[%s5959_s0 + $0x24] sm:$0x1]  ;;  %3778 = vmatprep.mubr.msk.f32.mxu1 %vm199_vm1, %v137_v34  ;;  %v140_v41 = vsel %vm134_vm0, %v138_v26, %v139_v30  ;;  %v1219_v42 = vsel %vm134_vm0, %v1217_v27, %v1218_v31  ;;  %v1154_v43 = vunpack.c.h.bf16 %v4502_v22  ;;  %v4558_v45 = vld [vmem:[%s5959_s0 + $0x20] ss:$8 sps:$4 sm:$0xff]   ;;  %v4584_v57 = vld [vmem:[%s5959_s0 + $0x2c] sm:$0x1] }
   0xa   :  { %3938 = vmatprep.mubr.msk.f32.mxu0 %vm199_vm1, %v1216_v35  ;;  %v1155_v44 = vunpack.c.l.bf16 %v4528_v33  ;;  %v141_v46 = vrot.slane %v40_v36, 1  ;;  %v41_v48 = vunpack.c.l.bf16 %v4537_v38  ;;  %v5968_v49 = vunpack.c.l.bf16 %v4542_v39  ;;  %v4569_v50 = vld [vmem:[%s5959_s0 + $0x24] sm:$0x1]  ;;  %v4595_v62 = vld [vmem:[%s5959_s0 + $0x28] ss:$8 sps:$4 sm:$0xff]  }
   0xb   :  { %4133 = vmatpush3.bf16.msra.mxu1 %v3509_v4  ;;  %v142_v47 = vrot.slane %v5969_v37, 1  ;;  %v1220_v53 = vrot.slane %v1154_v43, 1  ;;  %v1156_v55 = vunpack.c.h.bf16 %v4537_v38  ;;  %v1157_v56 = vunpack.c.l.bf16 %v4547_v40  ;;  %v4600_v63 = vld [vmem:[%s5959_s0 + $0x2c] sm:$0x1]  ;;  %v4609_v4 = vld [vmem:[%s5959_s0 + $0x34] sm:$0x1] }
   0xc   :  { %4197 = vmatpush3.bf16.msra.mxu0 %v3521_v11  ;;  %4135 = vmatprep.subr.bf16.mxu1 %v3510_v23  ;;  %v1221_v54 = vrot.slane %v1155_v44, 1  ;;  %v144_v59 = vrot.slane %v41_v48, 1  ;;  %v145_v60 = vrot.slane %v5968_v49, 1  ;;  %v42_v61 = vunpack.c.l.bf16 %v4558_v45  ;;  %v4619_v18 = vld [vmem:[%s5959_s0 + $0x30] ss:$8 sps:$4 sm:$0xff]   ;;  %v3524_v26 = vld [vmem:[%s5958_s1 + $0xa8] sm:$0xff]  }
   0xd   :  { %4199 = vmatprep.subr.bf16.mxu0 %v3522_v29  ;;  %v143_v58 = vsel %vm134_vm0, %v141_v46, %v142_v47  ;;  %v1223_v1 = vrot.slane %v1156_v55, 1  ;;  %v1224_v2 = vrot.slane %v1157_v56, 1  ;;  %v5966_v3 = vunpack.c.l.bf16 %v4569_v50  ;;  %v4629_v25 = vld [vmem:[%s5959_s0 + $0x34] sm:$0x1]  ;;  %v3504_v30 = vld [vmem:[%s5958_s1 + $0x8] sm:$0xff]  }
   0xe   :  { %v1222_v0 = vsel %vm134_vm0, %v1220_v53, %v1221_v54  ;;  %v146_v9 = vsel %vm134_vm0, %v144_v59, %v145_v60  ;;  %v147_v11 = vrot.slane %v42_v61, 1  ;;  %v1158_v16 = vunpack.c.h.bf16 %v4558_v45  ;;  %v4644_v35 = vld [vmem:[%s5959_s0 + $0x3c] sm:$0x1]  ;;  %v4657_v54 = vld [vmem:[%s5959_s0 + $0x38] ss:$8 sps:$4 sm:$0xff]   ;;  %v3528_v40 = vld [vmem:[%s5958_s1 + $0xc8] sm:$0xff]  }
   0xf   :  { %4137 = vmatpush3.bf16.msra.mxu1 %v3510_v23  ;;  %v1159_v17 = vunpack.c.l.bf16 %v4584_v57  ;;  %v1225_v19 = vsel %vm134_vm0, %v1223_v1, %v1224_v2  ;;  %v148_v21 = vrot.slane %v5966_v3, 1  ;;  %v43_v23 = vunpack.c.l.bf16 %v4595_v62  ;;  %v4671_v1 = vld [vmem:[%s5959_s0 + $0x44] sm:$0x1]  ;;  %v4717_v3 = vld [vmem:[%s5959_s0 + $0x5c] sm:$0x1]  ;;  %v3513_v22 = vld [vmem:[%s5958_s1 + $0x50] sm:$0xff]  }
  0x10   :  { %4201 = vmatpush3.bf16.msra.mxu0 %v3522_v29  ;;  %4139 = vmatprep.subr.bf16.mxu1 %v3321_v51  ;;  %v5965_v24 = vunpack.c.l.bf16 %v4600_v63  ;;  %v1226_v27 = vrot.slane %v1158_v16, 1  ;;  %v1160_v31 = vunpack.c.h.bf16 %v4595_v62  ;;  %v1161_v34 = vunpack.c.l.bf16 %v4609_v4  ;;  %v4683_v16 = vld [vmem:[%s5959_s0 + $0x50] ss:$8 sps:$4 sm:$0xff]   ;;  %v4730_v49 = vld [vmem:[%s5959_s0 + $0x60] ss:$8 sps:$4 sm:$0xff]  }
  0x11   :  { %4203 = vmatprep.subr.bf16.mxu0 %v3523_v52  ;;  %v1227_v29 = vrot.slane %v1159_v17, 1  ;;  %v149_v43 = vsel %vm134_vm0, %v147_v11, %v148_v21  ;;  %v150_v46 = vrot.slane %v43_v23, 1  ;;  %v44_v53 = vunpack.c.l.bf16 %v4619_v18  ;;  %v4735_v37 = vld [vmem:[%s5959_s0 + $0x64] sm:$0x1]  ;;  %v3145_v12 = vld [vmem:[%s5959_s0 + $0x18] sm:$0xe] }
  0x12   :  { %3779 = vmatmul.mubr.msk.f32.vlgmr.msra.gmra.mrb[0].mxu1 %vm199_vm1, %v140_v41  ;;  %v151_v47 = vrot.slane %v5965_v24, 1  ;;  %v4662_v41 = vld [vmem:[%s5959_s0 + $0x3c] sm:$0x1]  ;;  %v1229_v55 = vrot.slane %v1160_v31, 1  ;;  %v1230_v59 = vrot.slane %v1161_v34, 1  ;;  %v5964_v60 = vunpack.c.l.bf16 %v4629_v25 }
  0x13   :  { %3939 = vmatmul.mubr.msk.f32.vlgmr.msra.gmra.mrb[0].mxu0 %vm199_vm1, %v1219_v42  ;;  %4141 = vmatpush3.bf16.msra.mxu1 %v3321_v51  ;;  %v1228_v42 = vsel %vm134_vm0, %v1226_v27, %v1227_v29  ;;  %v1162_v2 = vunpack.c.h.bf16 %v4619_v18  ;;  %v1163_v11 = vunpack.c.l.bf16 %v4644_v35  ;;  %v45_v27 = vunpack.c.l.bf16 %v4657_v54  ;;  %v4696_v31 = vld [vmem:[%s5959_s0 + $0x54] sm:$0x1]  ;;  %v3150_v4 = vld [vmem:[%s5959_s0 + $0x40] sm:$0xe]  ;;  %v3514_v45 = vld [vmem:[%s5958_s1 + $0x58] sm:$0xff]  }
  0x14   :  { %4205 = vmatpush3.bf16.msra.mxu0 %v3523_v52  ;;  %3781 = vmatprep.mubr.msk.f32.mxu1 %vm199_vm1, %v143_v58  ;;  %v152_v51 = vsel %vm134_vm0, %v150_v46, %v151_v47  ;;  %v153_v52 = vrot.slane %v44_v53, 1  ;;  %v1231_v58 = vsel %vm134_vm0, %v1229_v55, %v1230_v59  ;;  %v154_v21 = vrot.slane %v5964_v60, 1  ;;  %v3143_v60 = vld [vmem:[%s5959_s0 + $0x8] sm:$0xe] }
  0x15   :  { %3941 = vmatprep.mubr.msk.f32.mxu0 %vm199_vm1, %v1222_v0  ;;  %4207 = vmatprep.subr.bf16.mxu0 %v3524_v26  ;;  %v3525_v0 = vld [vmem:[%s5958_s1 + $0xb0] sm:$0xff]   ;;  %v5967_v29 = vunpack.c.l.bf16 %v4662_v41  ;;  %v1232_v46 = vrot.slane %v1162_v2, 1  ;;  %v1233_v47 = vrot.slane %v1163_v11, 1  ;;  %v1164_v55 = vunpack.c.h.bf16 %v4657_v54  ;;  %v3177_v62 = vld [vmem:[%s5959_s0 + $0x20] ss:$8 sps:$4 sm:$0xff]  }
  0x16   :  { %4143 = vmatprep.subr.bf16.mxu1 %v3504_v30  ;;  %3782 = vmatmul.mubr.msk.f32.gmra.mrb[2].mxu1 %vm199_vm1, %v146_v9  ;;  %v1165_v59 = vunpack.c.l.bf16 %v4671_v1  ;;  %v155_v24 = vsel %vm134_vm0, %v153_v52, %v154_v21  ;;  %v156_v9 = vrot.slane %v45_v27, 1  ;;  %v5973_v2 = vunpack.c.l.bf16 %v4683_v16  ;;  %v3179_v54 = vld [vmem:[%s5959_s0 + $0x30] ss:$8 sps:$4 sm:$0xff]  }
  0x17   :  { %3942 = vmatmul.mubr.msk.f32.gmra.mrb[2].mxu0 %vm199_vm1, %v1225_v19  ;;  %3784 = vmatprep.mubr.msk.f32.mxu1 %vm199_vm1, %v149_v43  ;;  %v157_v19 = vrot.slane %v5967_v29, 1  ;;  %v1234_v43 = vsel %vm134_vm0, %v1232_v46, %v1233_v47  ;;  %v1235_v52 = vrot.slane %v1164_v55, 1  ;;  %v5972_v29 = vunpack.c.l.bf16 %v4696_v31  ;;  %v3526_v46 = vld [vmem:[%s5958_s1 + $0xb8] sm:$0xff]  }
  0x18   :  { %4209 = vmatpush3.bf16.msra.mxu0 %v3524_v26  ;;  %v3144_v26 = vld [vmem:[%s5959_s0 + $0x10] sm:$0xe]  ;;  %3944 = vmatprep.mubr.msk.f32.mxu0 %vm199_vm1, %v1228_v42  ;;  %v1236_v21 = vrot.slane %v1165_v59, 1  ;;  %v159_v47 = vrot.slane %v5973_v2, 1  ;;  %v1487_v55 = vunpack.c.l.bf16 %v3143_v60  ;;  %v1520_v20 = vrot.slane %v1151_v13, 2 }
  0x19   :  { %4211 = vmatprep.subr.bf16.mxu0 %v3525_v0  ;;  %4145 = vmatpush3.bf16.msra.mxu1 %v3504_v30  ;;  %v158_v42 = vsel %vm134_vm0, %v156_v9, %v157_v19  ;;  %v160_v9 = vrot.slane %v5972_v29, 1  ;;  %v5977_v19 = vunpack.c.h.bf16 %v4683_v16  ;;  %v5974_v60 = vunpack.c.l.bf16 %v4717_v3 }
  0x1a   :  { %3785 = vmatmul.mubr.msk.f32.gmra.mrb[4].mxu1 %vm199_vm1, %v152_v51  ;;  %v1237_v30 = vsel %vm134_vm0, %v1235_v52, %v1236_v21  ;;  %v1519_v13 = vrot.slane %v1487_v55, 2  ;;  %v1488_v51 = vunpack.c.l.bf16 %v3144_v26  ;;  %v5976_v52 = vunpack.c.l.bf16 %v4735_v37  ;;  %v3146_v26 = vld [vmem:[%s5959_s0 + $0x20] sm:$0xe]  ;;  %4147 = vmatprep.subr.bf16.mxu1 %v3505_v8 }
  0x1b   :  { %3945 = vmatmul.mubr.msk.f32.gmra.mrb[4].mxu0 %vm199_vm1, %v1231_v58  ;;  %3787 = vmatprep.mubr.msk.f32.mxu1 %vm199_vm1, %v155_v24  ;;  %v5975_v58 = vunpack.c.l.bf16 %v4730_v49  ;;  %v161_v21 = vsel %vm134_vm0, %v159_v47, %v160_v9  ;;  %v162_v29 = vrot.slane %v5977_v19, 1  ;;  %v163_v2 = vrot.slane %v5974_v60, 1  ;;  %v4770_v24 = vld [vmem:[%s5959_s0 + $0x6c] sm:$0x1]  ;;  %v3527_v55 = vld [vmem:[%s5958_s1 + $0xc0] sm:$0xff]  }
  0x1c   :  { %4213 = vmatpush3.bf16.msra.mxu0 %v3525_v0  ;;  %3947 = vmatprep.mubr.msk.f32.mxu0 %vm199_vm1, %v1234_v43  ;;  %v1489_v0 = vunpack.c.l.bf16 %v3145_v12  ;;  %v1521_v43 = vsel %vm602_vm2, %v1519_v13, %v1520_v20  ;;  %v1522_v47 = vrot.slane %v1488_v51, 2  ;;  %v166_v9 = vrot.slane %v5976_v52, 1  ;;  %v4786_v60 = vld [vmem:[%s5959_s0 + $0x70] ss:$8 sps:$4 sm:$0xff]   ;;  %v4797_v52 = vld [vmem:[%s5959_s0 + $0x74] sm:$0x1] }
  0x1d   :  { %4215 = vmatprep.subr.bf16.mxu0 %v3526_v46  ;;  %v165_v12 = vrot.slane %v5975_v58, 1  ;;  %v164_v20 = vsel %vm134_vm0, %v162_v29, %v163_v2  ;;  %v1526_v51 = vrot.slane %v1155_v44, 2  ;;  %v5990_v58 = vunpack.c.h.bf16 %v4730_v49  ;;  %v3147_v19 = vld [vmem:[%s5959_s0 + $0x28] sm:$0xe]  ;;  %4149 = vmatpush3.bf16.msra.mxu1 %v3505_v8 }
  0x1e   :  { %3788 = vmatmul.mubr.msk.f32.gmra.mrb[6].mxu1 %vm199_vm1, %v158_v42  ;;  %v1525_v13 = vrot.slane %v1489_v0, 2  ;;  %v1524_v29 = vsel %vm602_vm2, %v1522_v47, %v4523_v32  ;;  %v5978_v44 = vunpack.c.l.bf16 %v4770_v24  ;;  %v1490_v2 = vunpack.c.l.bf16 %v3146_v26  ;;  %v4810_v42 = vld [vmem:[%s5959_s0 + $0x7c] sm:$0x1] }
  0x1f   :  { %3948 = vmatmul.mubr.msk.f32.gmra.mrb[6].mxu0 %vm199_vm1, %v1237_v30  ;;  %3790 = vmatprep.mubr.msk.f32.mxu1 %vm199_vm1, %v161_v21  ;;  %v167_v33 = vsel %vm134_vm0, %v165_v12, %v166_v9  ;;  %v168_v30 = vrot.slane %v5990_v58, 1  ;;  %v1529_v32 = vrot.slane %v1157_v56, 2  ;;  %v5979_v21 = vunpack.c.l.bf16 %v4786_v60  ;;  %v3148_v9 = vld [vmem:[%s5959_s0 + $0x30] sm:$0xe] }
  0x20   :  { %4217 = vmatpush3.bf16.msra.mxu0 %v3526_v46  ;;  %3978 = vmatprep.mubr.msk.f32.mxu0 %vm199_vm1, %v1521_v43  ;;  %v1527_v46 = vsel %vm602_vm2, %v1525_v13, %v1526_v51  ;;  %v169_v0 = vrot.slane %v5978_v44, 1  ;;  %v1528_v26 = vrot.slane %v1490_v2, 2  ;;  %v5982_v47 = vunpack.c.l.bf16 %v4797_v52  ;;  %v3506_v43 = vld [vmem:[%s5958_s1 + $0x18] sm:$0xff]   ;;  %v4842_v51 = vld [vmem:[%s5959_s0 + $0x80] ss:$8 sps:$4 sm:$0xff]  }
  0x21   :  { %4219 = vmatprep.subr.bf16.mxu0 %v3527_v55  ;;  %v1491_v12 = vunpack.c.l.bf16 %v3147_v19  ;;  %v171_v56 = vrot.slane %v5979_v21, 1  ;;  %v1532_v19 = vrot.slane %v1159_v17, 2  ;;  %v5987_v8 = vunpack.c.h.bf16 %v4786_v60  ;;  %v3149_v44 = vld [vmem:[%s5959_s0 + $0x38] sm:$0xe]  ;;  %4151 = vmatprep.subr.bf16.mxu1 %v3506_v43 }
  0x22   :  { %3791 = vmatmul.mubr.msk.f32.gmra.mrb[8].mxu1 %vm199_vm1, %v164_v20  ;;  %v5981_v13 = vunpack.c.l.bf16 %v4810_v42  ;;  %v4847_v20 = vld [vmem:[%s5959_s0 + $0x84] sm:$0x1]  ;;  %v170_v57 = vsel %vm134_vm0, %v168_v30, %v169_v0  ;;  %v1530_v17 = vsel %vm602_vm2, %v1528_v26, %v1529_v32  ;;  %v1535_v30 = vrot.slane %v1161_v34, 2  ;;  %v4867_v32 = vld [vmem:[%s5959_s0 + $0x8c] sm:$0x1] }
  0x23   :  { %3979 = vmatmul.mubr.msk.f32.vlgmr.msra.gmra.mrb[0].mxu0 %vm199_vm1, %v1524_v29  ;;  %3793 = vmatprep.mubr.msk.f32.mxu1 %vm199_vm1, %v167_v33  ;;  %v172_v29 = vrot.slane %v5982_v47, 1  ;;  %v1531_v2 = vrot.slane %v1491_v12, 2  ;;  %v174_v21 = vrot.slane %v5987_v8, 1  ;;  %v1492_v33 = vunpack.c.l.bf16 %v3148_v9  ;;  %v4879_v34 = vld [vmem:[%s5958_s1 + $0x40] sm:$0xff]  }
  0x24   :  { %4221 = vmatpush3.bf16.msra.mxu0 %v3527_v55  ;;  %3981 = vmatprep.mubr.msk.f32.mxu0 %vm199_vm1, %v1527_v46  ;;  %v175_v55 = vrot.slane %v5981_v13, 1  ;;  %v5986_v26 = vunpack.c.l.bf16 %v4842_v51  ;;  %v5980_v12 = vunpack.c.l.bf16 %v4847_v20  ;;  %v4920_v13 = vld [vmem:[%s5959_s0 + $0x6c] sm:$0x1] }
  0x25   :  { %v173_v0 = vsel %vm134_vm0, %v171_v56, %v172_v29  ;;  %v1533_v46 = vsel %vm602_vm2, %v1531_v2, %v1532_v19  ;;  %4223 = vmatprep.subr.bf16.mxu0 %v3528_v40  ;;  %4153 = vmatpush3.bf16.msra.mxu1 %v3506_v43  ;;  %v1534_v43 = vrot.slane %v1492_v33, 2  ;;  %v1493_v56 = vunpack.c.l.bf16 %v3149_v44  ;;  %v4889_v29 = vld [vmem:[%s5959_s0 + $0x5c] sm:$0x1]  ;;  %v3529_v2 = vld [vmem:[%s5958_s1 + $0xd0] sm:$0xff]  }
  0x26   :  { %3794 = vmatmul.mubr.msk.f32.gmra.mrb[10].mxu1 %vm199_vm1, %v170_v57  ;;  %v176_v9 = vsel %vm134_vm0, %v174_v21, %v175_v55  ;;  %v1538_v19 = vrot.slane %v1163_v11, 2  ;;  %v177_v21 = vrot.slane %v5986_v26, 1  ;;  %v178_v35 = vrot.slane %v5980_v12, 1  ;;  %v3151_v57 = vld [vmem:[%s5959_s0 + $0x58] sm:$0xe]  ;;  %4155 = vmatprep.subr.bf16.mxu1 %v4879_v34 }
  0x27   :  { %3982 = vmatmul.mubr.msk.f32.gmra.mrb[2].mxu0 %vm199_vm1, %v1530_v17  ;;  %3796 = vmatprep.mubr.msk.f32.mxu1 %vm199_vm1, %v173_v0  ;;  %v5984_v11 = vunpack.c.h.bf16 %v4842_v51  ;;  %v5983_v44 = vunpack.c.l.bf16 %v4867_v32  ;;  %v4908_v17 = vld [vmem:[%s5959_s0 + $0x64] sm:$0x1]  ;;  %v1536_v55 = vsel %vm602_vm2, %v1534_v43, %v1535_v30  ;;  %v1537_v33 = vrot.slane %v1493_v56, 2  ;;  %v3152_v12 = vld [vmem:[%s5959_s0 + $0x60] sm:$0xe] }
  0x28   :  { %3984 = vmatprep.mubr.msk.f32.mxu0 %vm199_vm1, %v1533_v46  ;;  %4225 = vmatpush3.bf16.msra.mxu0 %v3528_v40  ;;  %v1494_v0 = vunpack.c.l.bf16 %v3150_v4  ;;  %v1541_v46 = vrot.slane %v1165_v59, 2  ;;  %v179_v47 = vsel %vm134_vm0, %v177_v21, %v178_v35  ;;  %v5985_v59 = vunpack.c.l.bf16 %v4889_v29  ;;  %v3153_v30 = vld [vmem:[%s5959_s0 + $0x68] sm:$0xe]  ;;  %v4938_v35 = vld [vmem:[%s5959_s0 + $0x74] sm:$0x1] }
  0x29   :  { %v180_v40 = vrot.slane %v5984_v11, 1  ;;  %v181_v1 = vrot.slane %v5983_v44, 1  ;;  %4227 = vmatprep.subr.bf16.mxu0 %v3529_v2  ;;  %v1539_v4 = vsel %vm602_vm2, %v1537_v33, %v1538_v19  ;;  %v1495_v56 = vunpack.c.l.bf16 %v3151_v57  ;;  %v3154_v44 = vld [vmem:[%s5959_s0 + $0x70] sm:$0xe]  ;;  %v3155_v11 = vld [vmem:[%s5959_s0 + $0x78] sm:$0xe] }
  0x2a   :  { %3797 = vmatmul.mubr.msk.f32.gmra.mrb[12].mxu1 %vm199_vm1, %v176_v9  ;;  %v1540_v43 = vrot.slane %v1494_v0, 2  ;;  %v5989_v21 = vunpack.c.l.bf16 %v4908_v17  ;;  %v3530_v9 = vld [vmem:[%s5958_s1 + $0xd8] sm:$0xff]   ;;  %v1544_v57 = vrot.slane %v5985_v59, 2  ;;  %v5988_v33 = vunpack.c.l.bf16 %v4920_v13 }
  0x2b   :  { %3985 = vmatmul.mubr.msk.f32.gmra.mrb[4].mxu0 %vm199_vm1, %v1536_v55  ;;  %3799 = vmatprep.mubr.msk.f32.mxu1 %vm199_vm1, %v179_v47  ;;  %v182_v19 = vsel %vm134_vm0, %v180_v40, %v181_v1  ;;  %v1496_v55 = vunpack.c.l.bf16 %v3152_v12  ;;  %v4955_v0 = vld [vmem:[%s5959_s0 + $0x7c] sm:$0x1]  ;;  %v4966_v12 = vld [vmem:[%s5959_s0 + $0x84] sm:$0x1]  ;;  %v1497_v59 = vunpack.c.l.bf16 %v3153_v30  ;;  %v5991_v8 = vunpack.c.l.bf16 %v4938_v35 }
  0x2c   :  { %3987 = vmatprep.mubr.msk.f32.mxu0 %vm199_vm1, %v1539_v4  ;;  %v1542_v47 = vsel %vm602_vm2, %v1540_v43, %v1541_v46  ;;  %v1543_v4 = vrot.slane %v1495_v56, 2  ;;  %v1547_v40 = vrot.slane %v5989_v21, 2  ;;  %4229 = vmatpush3.bf16.msra.mxu0 %v3529_v2  ;;  %v1550_v26 = vrot.slane %v5988_v33, 2  ;;  %v3156_v46 = vld [vmem:[%s5959_s0 + $0x80] sm:$0xe] }
  0x2d   :  { %v1546_v1 = vrot.slane %v1496_v55, 2  ;;  %4231 = vmatprep.subr.bf16.mxu0 %v3530_v9  ;;  %v1498_v43 = vunpack.c.l.bf16 %v3154_v44  ;;  %v1175_v56 = vunpack.c.l.bf16 %v4955_v0  ;;  %v1499_v30 = vunpack.c.l.bf16 %v3155_v11  ;;  %v4981_v55 = vld [vmem:[%s5959_s0 + $0x8c] sm:$0x1]  ;;  %v3157_v33 = vld [vmem:[%s5959_s0 + $0x88] sm:$0xe] }
  0x2e   :  { %3800 = vmatmul.mubr.msk.f32.gmra.mrb[14].mxu1 %vm199_vm1, %v182_v19  ;;  %v1545_v2 = vsel %vm602_vm2, %v1543_v4, %v1544_v57  ;;  %v4989_v19 = vld [vmem:[%s5958_s1 + $0xe0] sm:$0xff]   ;;  %v1549_v44 = vrot.slane %v1497_v59, 2  ;;  %v1553_v57 = vrot.slane %v5991_v8, 2  ;;  %v5002_v4 = vld [vmem:[%s5959_s0 + $0x94] sm:$0x1]  ;;  %v1501_v8 = vunpack.c.l.bf16 %v3157_v33 }
  0x2f   :  { %3988 = vmatmul.mubr.msk.f32.gmra.mrb[6].mxu0 %vm199_vm1, %v1542_v47  ;;  %3818 = vmatprep.mubr.msk.f32.mxu1 %vm199_vm1, %v38_v6  ;;  %v1548_v11 = vsel %vm602_vm2, %v1546_v1, %v1547_v40  ;;  %v1177_v47 = vunpack.c.l.bf16 %v4966_v12  ;;  %v1552_v21 = vrot.slane %v1498_v43, 2  ;;  %v1555_v58 = vrot.slane %v1499_v30, 2  ;;  %v3158_v59 = vld [vmem:[%s5959_s0 + $0x90] sm:$0xe]  ;;  %v3512_v1 = vld [vmem:[%s5958_s1 + $0x48] sm:$0xff]  }
  0x30   :  { %3990 = vmatprep.mubr.msk.f32.mxu0 %vm199_vm1, %v1545_v2  ;;  %v1556_v5 = vrot.slane %v1175_v56, 2  ;;  %v1500_v6 = vunpack.c.l.bf16 %v3156_v46  ;;  %4233 = vmatpush3.bf16.msra.mxu0 %v3530_v9  ;;  %v1551_v40 = vsel %vm602_vm2, %v1549_v44, %v1550_v26  ;;  %v5993_v2 = vunpack.c.l.bf16 %v4981_v55  ;;  %v3270_v0 = vld [vmem:[%s5959_s0 + $0x98] sm:$0xe] }
  0x31   :  { %4235 = vmatprep.subr.bf16.mxu0 %v4989_v19  ;;  %v1559_v9 = vrot.slane %v1177_v47, 2  ;;  %v1554_v26 = vsel %vm602_vm2, %v1552_v21, %v1553_v57  ;;  %v5992_v46 = vunpack.c.l.bf16 %v5002_v4  ;;  %v1502_v43 = vunpack.c.l.bf16 %v3158_v59  ;;  %v3181_v59 = vld [vmem:[%s5959_s0 + $0x40] ss:$8 sps:$4 sm:$0xff]  }
  0x32   :  { %3819 = vmatmul.mubr.msk.f32.vlgmr.msra.gmra.mrb[0].mxu1 %vm199_vm1, %v39_v14  ;;  %v1558_v33 = vrot.slane %v1500_v6, 2  ;;  %v1557_v10 = vsel %vm602_vm2, %v1555_v58, %v1556_v5  ;;  %v1561_v14 = vrot.slane %v1501_v8, 2  ;;  %v1562_v30 = vrot.slane %v5993_v2, 2  ;;  %v3175_v8 = vld [vmem:[%s5959_s0 + $0x10] ss:$8 sps:$4 sm:$0xff]  }
  0x33   :  { %3991 = vmatmul.mubr.msk.f32.gmra.mrb[8].mxu0 %vm199_vm1, %v1548_v11  ;;  %4157 = vmatpush3.bf16.msra.mxu1 %v4879_v34  ;;  %v1564_v58 = vrot.slane %v1502_v43, 2  ;;  %v1565_v38 = vrot.slane %v5992_v46, 2  ;;  %v1793_v34 = vunpack.c.l.bf16 %v3175_v8  ;;  %v1794_v18 = vunpack.c.h.bf16 %v3175_v8  ;;  %v554_v11 = vld [vmem:[%s5959_s0] sm:$0xe] }
  0x34   :  { %3821 = vmatprep.mubr.msk.f32.mxu1 %vm199_vm1, %v40_v36  ;;  %3993 = vmatprep.mubr.msk.f32.mxu0 %vm199_vm1, %v1551_v40  ;;  %v1560_v36 = vsel %vm602_vm2, %v1558_v33, %v1559_v9  ;;  %v1795_v21 = vunpack.c.l.bf16 %v3177_v62  ;;  %v5995_v44 = vunpack.c.h.bf16 %v4683_v16  ;;  %v1796_v57 = vunpack.c.h.bf16 %v3177_v62  ;;  %v555_v40 = vld [vmem:[%s5959_s0 + $0x8] sm:$0xe] }
  0x35   :  { %4159 = vmatprep.subr.bf16.mxu1 %v3512_v1  ;;  %v5996_v5 = vunpack.c.l.bf16 %v4730_v49  ;;  %v1797_v6 = vunpack.c.l.bf16 %v3179_v54  ;;  %v1798_v9 = vunpack.c.h.bf16 %v3179_v54  ;;  %v5998_v33 = vunpack.c.l.bf16 %v4786_v60 }
  0x36   :  { %3822 = vmatmul.mubr.msk.f32.gmra.mrb[2].mxu1 %vm199_vm1, %v41_v48  ;;  %v1563_v48 = vsel %vm602_vm2, %v1561_v14, %v1562_v30  ;;  %v1799_v43 = vunpack.c.l.bf16 %v3181_v59  ;;  %v5999_v30 = vunpack.c.l.bf16 %v4468_v7  ;;  %v1800_v8 = vunpack.c.h.bf16 %v3181_v59  ;;  %v559_v7 = vld [vmem:[%s5959_s0 + $0x28] sm:$0xe]  ;;  %v562_v59 = vld [vmem:[%s5959_s0 + $0x50] sm:$0xe] }
  0x37   :  { %3994 = vmatmul.mubr.msk.f32.gmra.mrb[10].mxu0 %vm199_vm1, %v1554_v26  ;;  %3824 = vmatprep.mubr.msk.f32.mxu1 %vm199_vm1, %v42_v61  ;;  %v1566_v61 = vsel %vm602_vm2, %v1564_v58, %v1565_v38  ;;  %v3533_v26 = vld [vmem:[%s5958_s1 + $0xf0] sm:$0xff]   ;;  %v558_v38 = vld [vmem:[%s5959_s0 + $0x20] sm:$0xe]  ;;  %v6022_v12 = vunpack.c.l.bf16 %v4981_v55 }
  0x38   :  { %3996 = vmatprep.mubr.msk.f32.mxu0 %vm199_vm1, %v1557_v10  ;;  %4161 = vmatpush3.bf16.msra.mxu1 %v3512_v1  ;;  %v5997_v1 = vunpack.c.h.bf16 %v4730_v49  ;;  %v571_v10 = vunpack.c.l.bf16 %v555_v40  ;;  %v557_v49 = vld [vmem:[%s5959_s0 + $0x18] sm:$0xe] }
  0x39   :  { %4163 = vmatprep.subr.bf16.mxu1 %v3513_v22 }
  0x3a   :  { %3825 = vmatmul.mubr.msk.f32.gmra.mrb[4].mxu1 %vm199_vm1, %v43_v23  ;;  %v5071_v23 = vld [vmem:[%s5958_s1 + $0x60] sm:$0xff]  }
  0x3b   :  { %3997 = vmatmul.mubr.msk.f32.gmra.mrb[12].mxu0 %vm199_vm1, %v1560_v36  ;;  %3827 = vmatprep.mubr.msk.f32.mxu1 %vm199_vm1, %v44_v53  ;;  %v5994_v53 = vunpack.c.l.bf16 %v4683_v16  ;;  %v570_v16 = vunpack.c.l.bf16 %v554_v11  ;;  %v3183_v36 = vld [vmem:[%s5959_s0 + $0x60] ss:$8 sps:$4 sm:$0xff]  }
  0x3c   :  { %3999 = vmatprep.mubr.msk.f32.mxu0 %vm199_vm1, %v1563_v48  ;;  %4165 = vmatpush3.bf16.msra.mxu1 %v3513_v22  ;;  %v604_v22 = vrot.slane %v5999_v30, 2  ;;  %v6000_v48 = vunpack.c.h.bf16 %v4786_v60  ;;  %v1801_v60 = vunpack.c.l.bf16 %v3183_v36 }
  0x3d   :  { %4167 = vmatprep.subr.bf16.mxu1 %v3514_v45  ;;  %v603_v14 = vrot.slane %v570_v16, 2  ;;  %v6004_v16 = vunpack.c.h.bf16 %v4842_v51 }
  0x3e   :  { %3828 = vmatmul.mubr.msk.f32.gmra.mrb[6].mxu1 %vm199_vm1, %v45_v27  ;;  %v3532_v27 = vld [vmem:[%s5958_s1 + $0xe8] sm:$0xff]  }
  0x3f   :  { %4000 = vmatmul.mubr.msk.f32.gmra.mrb[14].mxu0 %vm199_vm1, %v1566_v61  ;;  %3830 = vmatprep.mubr.msk.f32.mxu1 %vm199_vm1, %v5994_v53  ;;  %v3534_v61 = vld [vmem:[%s5958_s1 + $0xf8] sm:$0xff]   ;;  %v606_v53 = vrot.slane %v571_v10, 2  ;;  %v605_v54 = vsel %vm602_vm2, %v603_v14, %v604_v22  ;;  %v6006_v22 = vunpack.c.l.bf16 %v4569_v50 }
  0x40   :  { %4018 = vmatprep.mubr.msk.f32.mxu0 %vm199_vm1, %v1793_v34  ;;  %4169 = vmatpush3.bf16.msra.mxu1 %v3514_v45  ;;  %v573_v45 = vunpack.c.l.bf16 %v557_v49  ;;  %v6001_v34 = vunpack.c.l.bf16 %v4490_v15  ;;  %v6003_v15 = vunpack.c.l.bf16 %v4516_v28  ;;  %v1802_v28 = vunpack.c.h.bf16 %v3183_v36  ;;  %v5183_v10 = vld [vmem:[%s5959_s0 + $0x10] ss:$8 sps:$4 sm:$0xff]   ;;  %v5188_v49 = vld [vmem:[%s5959_s0 + $0x14] sm:$0x1] }
  0x41   :  { %4171 = vmatprep.subr.bf16.mxu1 %v5071_v23  ;;  %v616_v36 = vrot.slane %v6006_v22, 2 }
  0x42   :  { %3831 = vmatmul.mubr.msk.f32.gmra.mrb[8].mxu1 %vm199_vm1, %v5995_v44  ;;  %v607_v62 = vrot.slane %v6001_v34, 2  ;;  %v610_v11 = vrot.slane %v6003_v15, 2  ;;  %v574_v44 = vunpack.c.l.bf16 %v558_v38  ;;  %v612_v40 = vrot.slane %v573_v45, 2  ;;  %v5207_v34 = vld [vmem:[%s5959_s0 + $0x90] ss:$8 sps:$4 sm:$0xff]  }
  0x43   :  { %4019 = vmatmul.mubr.msk.f32.vlgmr.msra.gmra.mrb[0].mxu0 %vm199_vm1, %v1794_v18  ;;  %3833 = vmatprep.mubr.msk.f32.mxu1 %vm199_vm1, %v5996_v5  ;;  %v6002_v18 = vunpack.c.l.bf16 %v4842_v51  ;;  %v561_v5 = vld [vmem:[%s5959_s0 + $0x38] sm:$0xe] }
  0x44   :  { %4237 = vmatpush3.bf16.msra.mxu0 %v4989_v19  ;;  %4021 = vmatprep.mubr.msk.f32.mxu0 %vm199_vm1, %v1795_v21  ;;  %v556_v19 = vld [vmem:[%s5959_s0 + $0x10] sm:$0xe]  ;;  %v608_v51 = vsel %vm602_vm2, %v606_v53, %v607_v62  ;;  %v615_v30 = vrot.slane %v574_v44, 2  ;;  %v2067_v62 = vunpack.c.l.bf16 %v5188_v49  ;;  %v6008_v53 = vunpack.c.l.bf16 %v4629_v25 }
  0x45   :  { %4239 = vmatprep.subr.bf16.mxu0 %v3532_v27  ;;  %v572_v58 = vunpack.c.l.bf16 %v556_v19  ;;  %v5146_v21 = vld [vmem:[%s5959_s0 + $0x70] ss:$8 sps:$4 sm:$0xff]   ;;  %v6005_v19 = vunpack.c.l.bf16 %v4542_v39  ;;  %v6010_v25 = vunpack.c.l.bf16 %v4696_v31 }
  0x46   :  { %3834 = vmatmul.mubr.msk.f32.gmra.mrb[10].mxu1 %vm199_vm1, %v5997_v1  ;;  %v1804_v38 = vunpack.c.h.bf16 %v5146_v21  ;;  %v617_v44 = vsel %vm602_vm2, %v615_v30, %v616_v36  ;;  %v3517_v31 = vld [vmem:[%s5958_s1 + $0x70] sm:$0xff]  }
  0x47   :  { %4022 = vmatmul.mubr.msk.f32.gmra.mrb[2].mxu0 %vm199_vm1, %v1796_v57  ;;  %3836 = vmatprep.mubr.msk.f32.mxu1 %vm199_vm1, %v5998_v33  ;;  %v560_v57 = vld [vmem:[%s5959_s0 + $0x30] sm:$0xe]  ;;  %v613_v1 = vrot.slane %v6005_v19, 2  ;;  %v5178_v33 = vld [vmem:[%s5959_s0 + $0x80] ss:$8 sps:$4 sm:$0xff]  }
  0x48   :  { %4024 = vmatprep.mubr.msk.f32.mxu0 %vm199_vm1, %v1797_v6  ;;  %4241 = vmatpush3.bf16.msra.mxu0 %v3532_v27  ;;  %v609_v27 = vrot.slane %v572_v58, 2  ;;  %v575_v6 = vunpack.c.l.bf16 %v559_v7  ;;  %v576_v39 = vunpack.c.l.bf16 %v560_v57  ;;  %v578_v58 = vunpack.c.l.bf16 %v562_v59  ;;  %v3516_v7 = vld [vmem:[%s5958_s1 + $0x68] sm:$0xff]   ;;  %v5245_v19 = vld [vmem:[%s5959_s0 + $0x24] sm:$0x1] }
  0x49   :  { %4243 = vmatprep.subr.bf16.mxu0 %v3533_v26  ;;  %v614_v50 = vsel %vm602_vm2, %v612_v40, %v613_v1  ;;  %v565_v1 = vld [vmem:[%s5959_s0 + $0x68] sm:$0xe] }
  0x4a   :  { %3837 = vmatmul.mubr.msk.f32.gmra.mrb[12].mxu1 %vm199_vm1, %v6000_v48  ;;  %v611_v14 = vsel %vm602_vm2, %v609_v27, %v610_v11  ;;  %v618_v48 = vrot.slane %v575_v6, 2  ;;  %v6009_v27 = vunpack.c.l.bf16 %v4662_v41  ;;  %v5223_v11 = vld [vmem:[%s5959_s0 + $0x1c] sm:$0x1]  ;;  %v627_v57 = vrot.slane %v578_v58, 2  ;;  %v564_v41 = vld [vmem:[%s5959_s0 + $0x60] sm:$0xe] }
  0x4b   :  { %4025 = vmatmul.mubr.msk.f32.gmra.mrb[4].mxu0 %vm199_vm1, %v1798_v9  ;;  %3839 = vmatprep.mubr.msk.f32.mxu1 %vm199_vm1, %v6002_v18  ;;  %v5169_v9 = vld [vmem:[%s5958_s1 + $0x100] sm:$0xff]   ;;  %v563_v18 = vld [vmem:[%s5959_s0 + $0x58] sm:$0xe] }
  0x4c   :  { %4027 = vmatprep.mubr.msk.f32.mxu0 %vm199_vm1, %v1799_v43  ;;  %4245 = vmatpush3.bf16.msra.mxu0 %v3533_v26  ;;  %v1803_v26 = vunpack.c.l.bf16 %v5146_v21  ;;  %v577_v43 = vunpack.c.l.bf16 %v561_v5  ;;  %v622_v21 = vrot.slane %v6008_v53, 2  ;;  %v625_v15 = vrot.slane %v6009_v27, 2  ;;  %v3211_v6 = vld [vmem:[%s5959_s0 + $0x20] ss:$8 sps:$4 sm:$0xff]   ;;  %v567_v27 = vld [vmem:[%s5959_s0 + $0x78] sm:$0xe] }
  0x4d   :  { %4247 = vmatprep.subr.bf16.mxu0 %v3534_v61  ;;  %v628_v5 = vrot.slane %v6010_v25, 2  ;;  %v579_v40 = vunpack.c.l.bf16 %v563_v18  ;;  %v2070_v36 = vunpack.c.l.bf16 %v3211_v6 }
  0x4e   :  { %3840 = vmatmul.mubr.msk.f32.gmra.mrb[14].mxu1 %vm199_vm1, %v6004_v16  ;;  %v1807_v16 = vunpack.c.l.bf16 %v5207_v34 }
  0x4f   :  { %4028 = vmatmul.mubr.msk.f32.gmra.mrb[6].mxu0 %vm199_vm1, %v1800_v8  ;;  %3858 = vmatprep.mubr.msk.f32.mxu1 %vm199_vm1, %v605_v54  ;;  %v6007_v8 = vunpack.c.l.bf16 %v4600_v63  ;;  %v2066_v63 = vunpack.c.l.bf16 %v5183_v10  ;;  %v624_v54 = vrot.slane %v577_v43, 2  ;;  %v5259_v43 = vld [vmem:[%s5959_s0 + $0x2c] sm:$0x1]  ;;  %v629_v58 = vsel %vm602_vm2, %v627_v57, %v628_v5  ;;  %v568_v5 = vld [vmem:[%s5959_s0 + $0x80] sm:$0xe] }
  0x50   :  { %4030 = vmatprep.mubr.msk.f32.mxu0 %vm199_vm1, %v1801_v60  ;;  %4249 = vmatpush3.bf16.msra.mxu0 %v3534_v61  ;;  %v1805_v61 = vunpack.c.l.bf16 %v5178_v33  ;;  %v621_v60 = vrot.slane %v576_v39, 2  ;;  %v2069_v39 = vunpack.c.l.bf16 %v5223_v11  ;;  %v4410_v11 = vld [vmem:[%s5958_s1 + $0x98] sm:$0xff]  }
  0x51   :  { %v619_v45 = vrot.slane %v6007_v8, 2  ;;  %4251 = vmatprep.subr.bf16.mxu0 %v5169_v9  ;;  %v626_v22 = vsel %vm602_vm2, %v624_v54, %v625_v15  ;;  %v2071_v8 = vunpack.c.l.bf16 %v5245_v19  ;;  %v3518_v15 = vld [vmem:[%s5958_s1 + $0x78] sm:$0xff]   ;;  %v3262_v19 = vld [vmem:[%s5959_s0 + $0x48] sm:$0xe] }
  0x52   :  { %3859 = vmatmul.mubr.msk.f32.vlgmr.msra.gmra.mrb[0].mxu1 %vm199_vm1, %v608_v51  ;;  %v2130_v51 = vrot.slane %v2066_v63, 1  ;;  %v623_v30 = vsel %vm602_vm2, %v621_v60, %v622_v21  ;;  %v2073_v63 = vunpack.c.l.bf16 %v5259_v43  ;;  %v2134_v53 = vrot.slane %v2069_v39, 1  ;;  %v3263_v43 = vld [vmem:[%s5959_s0 + $0x60] sm:$0xe] }
  0x53   :  { %4031 = vmatmul.mubr.msk.f32.gmra.mrb[8].mxu0 %vm199_vm1, %v1802_v28  ;;  %4173 = vmatpush3.bf16.msra.mxu1 %v5071_v23  ;;  %v1806_v23 = vunpack.c.h.bf16 %v5178_v33  ;;  %v620_v59 = vsel %vm602_vm2, %v618_v48, %v619_v45  ;;  %v1808_v28 = vunpack.c.h.bf16 %v5207_v34  ;;  %v2068_v33 = vunpack.c.h.bf16 %v5183_v10 }
  0x54   :  { %3861 = vmatprep.mubr.msk.f32.mxu1 %vm199_vm1, %v611_v14  ;;  %4033 = vmatprep.mubr.msk.f32.mxu0 %vm199_vm1, %v1803_v26  ;;  %v2131_v26 = vrot.slane %v2067_v62, 1  ;;  %v566_v14 = vld [vmem:[%s5959_s0 + $0x70] sm:$0xe]  ;;  %v580_v10 = vunpack.c.l.bf16 %v564_v41  ;;  %v581_v45 = vunpack.c.l.bf16 %v565_v1  ;;  %v630_v34 = vrot.slane %v579_v40, 2 }
  0x55   :  { %4175 = vmatprep.subr.bf16.mxu1 %v3516_v7  ;;  %v2133_v60 = vrot.slane %v2068_v33, 1  ;;  %v6012_v21 = vunpack.c.l.bf16 %v4735_v37  ;;  %v5303_v37 = vld [vmem:[%s5959_s0 + $0x3c] sm:$0x1]  ;;  %v2137_v41 = vrot.slane %v2071_v8, 1  ;;  %v6014_v40 = vunpack.c.l.bf16 %v4797_v52 }
  0x56   :  { %3862 = vmatmul.mubr.msk.f32.gmra.mrb[2].mxu1 %vm199_vm1, %v614_v50  ;;  %v5275_v50 = vld [vmem:[%s5959_s0 + $0x30] ss:$8 sps:$4 sm:$0xff]   ;;  %v2132_v18 = vsel %vm134_vm0, %v2130_v51, %v2131_v26  ;;  %v5317_v51 = vld [vmem:[%s5959_s0 + $0x40] ss:$8 sps:$4 sm:$0xff]   ;;  %v2140_v33 = vrot.slane %v2073_v63, 1 }
  0x57   :  { %4034 = vmatmul.mubr.msk.f32.gmra.mrb[10].mxu0 %vm199_vm1, %v1804_v38  ;;  %3864 = vmatprep.mubr.msk.f32.mxu1 %vm199_vm1, %v617_v44  ;;  %v6011_v38 = vunpack.c.l.bf16 %v4717_v3  ;;  %v582_v3 = vunpack.c.l.bf16 %v566_v14  ;;  %v634_v54 = vrot.slane %v6012_v21, 2  ;;  %v633_v44 = vrot.slane %v580_v10, 2 }
  0x58   :  { %4036 = vmatprep.mubr.msk.f32.mxu0 %vm199_vm1, %v1805_v61  ;;  %4177 = vmatpush3.bf16.msra.mxu1 %v3516_v7  ;;  %v5280_v61 = vld [vmem:[%s5959_s0 + $0x34] sm:$0x1]  ;;  %v2072_v7 = vunpack.c.h.bf16 %v3211_v6  ;;  %v2074_v57 = vunpack.c.l.bf16 %v5275_v50  ;;  %v636_v6 = vrot.slane %v581_v45, 2  ;;  %v640_v1 = vrot.slane %v6014_v40, 2 }
  0x59   :  { %v631_v48 = vrot.slane %v6011_v38, 2  ;;  %4179 = vmatprep.subr.bf16.mxu1 %v3517_v31  ;;  %v2075_v25 = vunpack.c.l.bf16 %v5280_v61  ;;  %v583_v14 = vunpack.c.l.bf16 %v567_v27  ;;  %v2076_v10 = vunpack.c.h.bf16 %v5275_v50 }
  0x5a   :  { %3865 = vmatmul.mubr.msk.f32.gmra.mrb[4].mxu1 %vm199_vm1, %v620_v59  ;;  %v6013_v59 = vunpack.c.l.bf16 %v4770_v24  ;;  %v2139_v26 = vrot.slane %v2072_v7, 1  ;;  %v5324_v24 = vld [vmem:[%s5959_s0 + $0x44] sm:$0x1]  ;;  %v635_v38 = vsel %vm602_vm2, %v633_v44, %v634_v54  ;;  %v2142_v45 = vrot.slane %v2074_v57, 1 }
  0x5b   :  { %4037 = vmatmul.mubr.msk.f32.gmra.mrb[12].mxu0 %vm199_vm1, %v1806_v23  ;;  %3867 = vmatprep.mubr.msk.f32.mxu1 %vm199_vm1, %v623_v30  ;;  %v2136_v23 = vrot.slane %v2070_v36, 1  ;;  %v632_v52 = vsel %vm602_vm2, %v630_v34, %v631_v48  ;;  %v2135_v30 = vsel %vm134_vm0, %v2133_v60, %v2134_v53  ;;  %v2077_v36 = vunpack.c.l.bf16 %v5303_v37  ;;  %v5364_v44 = vld [vmem:[%s5959_s0 + $0x64] sm:$0x1] }
  0x5c   :  { %4039 = vmatprep.mubr.msk.f32.mxu0 %vm199_vm1, %v1807_v16  ;;  %4181 = vmatpush3.bf16.msra.mxu1 %v3517_v31  ;;  %v637_v16 = vrot.slane %v6013_v59, 2  ;;  %v639_v31 = vrot.slane %v582_v3, 2  ;;  %v584_v7 = vunpack.c.l.bf16 %v568_v5  ;;  %v2078_v34 = vunpack.c.l.bf16 %v5317_v51 }
  0x5d   :  { %4183 = vmatprep.subr.bf16.mxu1 %v3518_v15  ;;  %v2138_v48 = vsel %vm134_vm0, %v2136_v23, %v2137_v41  ;;  %v2079_v3 = vunpack.c.l.bf16 %v5324_v24  ;;  %v2141_v60 = vsel %vm134_vm0, %v2139_v26, %v2140_v33  ;;  %v642_v21 = vrot.slane %v583_v14, 2  ;;  %v5369_v23 = vld [vmem:[%s5958_s1 + $0x80] sm:$0xff]   ;;  %v3537_v14 = vld [vmem:[%s5958_s1 + $0x110] sm:$0xff]  }
  0x5e   :  { %3868 = vmatmul.mubr.msk.f32.gmra.mrb[6].mxu1 %vm199_vm1, %v626_v22  ;;  %v2143_v22 = vrot.slane %v2075_v25, 1  ;;  %v638_v50 = vsel %vm602_vm2, %v636_v6, %v637_v16  ;;  %v641_v53 = vsel %vm602_vm2, %v639_v31, %v640_v1  ;;  %v6015_v54 = vunpack.c.l.bf16 %v4810_v42  ;;  %v5391_v31 = vld [vmem:[%s5959_s0 + $0x10] ss:$88 sps:$4 sm:$0xff]  }
  0x5f   :  { %4040 = vmatmul.mubr.msk.f32.gmra.mrb[14].mxu0 %vm199_vm1, %v1808_v28  ;;  %3870 = vmatprep.mubr.msk.f32.mxu1 %vm199_vm1, %v629_v58  ;;  %v569_v28 = vld [vmem:[%s5959_s0 + $0x88] sm:$0xe]  ;;  %v2145_v42 = vrot.slane %v2076_v10, 1  ;;  %v2146_v57 = vrot.slane %v2077_v36, 1  ;;  %v6016_v5 = vunpack.c.l.bf16 %v4847_v20  ;;  %v645_v16 = vrot.slane %v584_v7, 2 }
  0x60   :  { %4058 = vmatprep.mubr.msk.f32.mxu0 %vm199_vm1, %v2132_v18  ;;  %v3536_v58 = vld [vmem:[%s5958_s1 + $0x108] sm:$0xff]   ;;  %4185 = vmatpush3.bf16.msra.mxu1 %v3518_v15  ;;  %v643_v27 = vrot.slane %v6015_v54, 2  ;;  %v585_v6 = vunpack.c.l.bf16 %v569_v28  ;;  %v2144_v59 = vsel %vm134_vm0, %v2142_v45, %v2143_v22  ;;  %v2080_v40 = vunpack.c.h.bf16 %v5317_v51  ;;  %v5410_v22 = vld [vmem:[%s5959_s0 + $0x18] ss:$88 sps:$4 sm:$0xff]   ;;  %v5415_v7 = vld [vmem:[%s5959_s0 + $0x74] sm:$0x1] }
  0x61   :  { %v5350_v18 = vld [vmem:[%s5959_s0 + $0x4c] sm:$0x1]  ;;  %v5359_v15 = vld [vmem:[%s5959_s0 + $0x8] ss:$88 sps:$4 sm:$0xff]   ;;  %4266 = vmatprep.subr.bf16.mxu1 %v5369_v23  ;;  %v646_v41 = vrot.slane %v6016_v5, 2  ;;  %v2148_v26 = vrot.slane %v2078_v34, 1 }
  0x62   :  { %3871 = vmatmul.mubr.msk.f32.gmra.mrb[8].mxu1 %vm199_vm1, %v632_v52  ;;  %v2081_v1 = vunpack.c.l.bf16 %v5350_v18  ;;  %v2149_v20 = vrot.slane %v2079_v3, 1  ;;  %v2082_v33 = vunpack.c.h.bf16 %v5359_v15  ;;  %v5396_v51 = vld [vmem:[%s5959_s0 + $0x6c] sm:$0x1]  ;;  %v644_v52 = vsel %vm602_vm2, %v642_v21, %v643_v27  ;;  %v5426_v34 = vld [vmem:[%s5959_s0 + $0x20] ss:$88 sps:$4 sm:$0xff]  }
  0x63   :  { %4059 = vmatmul.mubr.msk.f32.vlgmr.msra.gmra.mrb[0].mxu0 %vm199_vm1, %v2135_v30  ;;  %3873 = vmatprep.mubr.msk.f32.mxu1 %vm199_vm1, %v635_v38  ;;  %v2147_v30 = vsel %vm134_vm0, %v2145_v42, %v2146_v57  ;;  %v648_v10 = vrot.slane %v585_v6, 2  ;;  %v6017_v38 = vunpack.c.l.bf16 %v4867_v32  ;;  %v2151_v28 = vrot.slane %v2080_v40, 1  ;;  %v5442_v5 = vld [vmem:[%s5959_s0 + $0x28] ss:$88 sps:$4 sm:$0xff]  }
  0x64   :  { %4253 = vmatpush3.bf16.msra.mxu0 %v5169_v9  ;;  %4061 = vmatprep.mubr.msk.f32.mxu0 %vm199_vm1, %v2138_v48  ;;  %v2083_v9 = vunpack.c.l.bf16 %v5364_v44  ;;  %v2152_v48 = vrot.slane %v2081_v1, 1  ;;  %v2084_v32 = vunpack.c.h.bf16 %v5391_v31  ;;  %v2150_v21 = vsel %vm134_vm0, %v2148_v26, %v2149_v20 }
  0x65   :  { %4255 = vmatprep.subr.bf16.mxu0 %v3536_v58  ;;  %v649_v45 = vrot.slane %v6017_v38, 2  ;;  %v2154_v54 = vrot.slane %v2082_v33, 1  ;;  %v2086_v42 = vunpack.c.h.bf16 %v5410_v22  ;;  %v2087_v57 = vunpack.c.l.bf16 %v5415_v7  ;;  %v5469_v38 = vld [vmem:[%s5959_s0 + $0x30] ss:$88 sps:$4 sm:$0xff]  }
  0x66   :  { %3874 = vmatmul.mubr.msk.f32.gmra.mrb[10].mxu1 %vm199_vm1, %v638_v50  ;;  %v2085_v50 = vunpack.c.l.bf16 %v5396_v51  ;;  %v2155_v27 = vrot.slane %v2083_v9, 1  ;;  %v2088_v6 = vunpack.c.h.bf16 %v5426_v34  ;;  %v2153_v26 = vsel %vm134_vm0, %v2151_v28, %v2152_v48  ;;  %v5486_v48 = vld [vmem:[%s5959_s0 + $0x94] sm:$0x1] }
  0x67   :  { %4062 = vmatmul.mubr.msk.f32.gmra.mrb[2].mxu0 %vm199_vm1, %v2141_v60  ;;  %3876 = vmatprep.mubr.msk.f32.mxu1 %vm199_vm1, %v641_v53  ;;  %v5431_v60 = vld [vmem:[%s5959_s0 + $0x7c] sm:$0x1]  ;;  %v647_v53 = vsel %vm602_vm2, %v645_v16, %v646_v41  ;;  %v877_v41 = vunpack.c.l.bf16 %v5359_v15  ;;  %v650_v40 = vsel %vm602_vm2, %v648_v10, %v649_v45  ;;  %v2157_v20 = vrot.slane %v2084_v32, 1  ;;  %v5474_v10 = vld [vmem:[%s5959_s0 + $0x8c] sm:$0x1] }
  0x68   :  { %4064 = vmatprep.mubr.msk.f32.mxu0 %vm199_vm1, %v2144_v59  ;;  %4257 = vmatpush3.bf16.msra.mxu0 %v3536_v58  ;;  %v5447_v58 = vld [vmem:[%s5959_s0 + $0x84] sm:$0x1]  ;;  %v2089_v59 = vunpack.c.l.bf16 %v5431_v60  ;;  %v3538_v16 = vld [vmem:[%s5958_s1 + $0x118] sm:$0xff]   ;;  %v2158_v15 = vrot.slane %v2085_v50, 1  ;;  %v2156_v33 = vsel %vm134_vm0, %v2154_v54, %v2155_v27  ;;  %v2160_v45 = vrot.slane %v2086_v42, 1 }
  0x69   :  { %4259 = vmatprep.subr.bf16.mxu0 %v3537_v14  ;;  %v2161_v28 = vrot.slane %v2087_v57, 1  ;;  %v878_v32 = vunpack.c.l.bf16 %v5391_v31  ;;  %v879_v27 = vunpack.c.l.bf16 %v5410_v22  ;;  %v2092_v42 = vunpack.c.h.bf16 %v5469_v38  ;;  %v5511_v22 = vld [vmem:[%s5959_s0 + $0x9c] sm:$0x1] }
  0x6a   :  { %3877 = vmatmul.mubr.msk.f32.gmra.mrb[12].mxu1 %vm199_vm1, %v644_v52  ;;  %v2090_v52 = vunpack.c.h.bf16 %v5442_v5  ;;  %v2159_v54 = vsel %vm134_vm0, %v2157_v20, %v2158_v15  ;;  %v880_v15 = vunpack.c.l.bf16 %v5426_v34  ;;  %v2451_v61 = vrot.slane %v2077_v36, 2 }
  0x6b   :  { %4065 = vmatmul.mubr.msk.f32.gmra.mrb[4].mxu0 %vm199_vm1, %v2147_v30  ;;  %3879 = vmatprep.mubr.msk.f32.mxu1 %vm199_vm1, %v647_v53  ;;  %v2091_v30 = vunpack.c.l.bf16 %v5447_v58  ;;  %v2163_v53 = vrot.slane %v2088_v6, 1  ;;  %v2162_v20 = vsel %vm134_vm0, %v2160_v45, %v2161_v28  ;;  %v2169_v2 = vrot.slane %v2092_v42, 1 }
  0x6c   :  { %4067 = vmatprep.mubr.msk.f32.mxu0 %vm199_vm1, %v2150_v21  ;;  %4261 = vmatpush3.bf16.msra.mxu0 %v3537_v14  ;;  %v5481_v14 = vld [vmem:[%s5959_s0 + $0x38] ss:$88 sps:$4 sm:$0xff]   ;;  %v2164_v21 = vrot.slane %v2089_v59, 1  ;;  %v2166_v46 = vrot.slane %v2090_v52, 1  ;;  %v881_v52 = vunpack.c.l.bf16 %v5442_v5  ;;  %v4408_v5 = vld [vmem:[%s5958_s1 + $0x88] sm:$0xff]   ;;  %v2457_v24 = vrot.slane %v2081_v1, 2 }
  0x6d   :  { %4263 = vmatprep.subr.bf16.mxu0 %v3538_v16  ;;  %v2167_v31 = vrot.slane %v2091_v30, 1  ;;  %v2094_v6 = vunpack.c.h.bf16 %v5481_v14  ;;  %v883_v42 = vunpack.c.l.bf16 %v5481_v14  ;;  %v2436_v14 = vrot.slane %v2067_v62, 2 }
  0x6e   :  { %3880 = vmatmul.mubr.msk.f32.gmra.mrb[14].mxu1 %vm199_vm1, %v650_v40  ;;  %v2093_v40 = vunpack.c.l.bf16 %v5474_v10 }
  0x6f   :  { %4068 = vmatmul.mubr.msk.f32.gmra.mrb[6].mxu0 %vm199_vm1, %v2153_v26  ;;  %3898 = vmatprep.mubr.msk.f32.mxu1 %vm199_vm1, %v877_v41  ;;  %v2095_v26 = vunpack.c.l.bf16 %v5486_v48  ;;  %v5506_v41 = vld [vmem:[%s5959_s0 + $0x40] ss:$88 sps:$4 sm:$0xff]   ;;  %v2168_v34 = vsel %vm134_vm0, %v2166_v46, %v2167_v31  ;;  %v882_v46 = vunpack.c.l.bf16 %v5469_v38 }
  0x70   :  { %4070 = vmatprep.mubr.msk.f32.mxu0 %vm199_vm1, %v2156_v33  ;;  %4265 = vmatpush3.bf16.msra.mxu0 %v3538_v16  ;;  %v3255_v16 = vld [vmem:[%s5959_s0 + $0x10] sm:$0xe]  ;;  %v2165_v33 = vsel %vm134_vm0, %v2163_v53, %v2164_v21  ;;  %v2170_v45 = vrot.slane %v2093_v40, 1  ;;  %v2096_v28 = vunpack.c.h.bf16 %v5506_v41  ;;  %v884_v49 = vunpack.c.l.bf16 %v5506_v41 }
  0x71   :  { %v2173_v53 = vrot.slane %v2095_v26, 1  ;;  %v2403_v21 = vunpack.c.l.bf16 %v3255_v16  ;;  %v3071_v16 = vld [vmem:[%s5959_s0 + $0x58] ss:$8 sps:$4 sm:$0xff]   ;;  %v3073_v41 = vld [vmem:[%s5959_s0 + $0x68] ss:$8 sps:$4 sm:$0xff]  }
  0x72   :  { %3899 = vmatmul.mubr.msk.f32.vlgmr.msra.gmra.mrb[0].mxu1 %vm199_vm1, %v878_v32  ;;  %v2097_v32 = vunpack.c.l.bf16 %v5511_v22  ;;  %v2171_v31 = vsel %vm134_vm0, %v2169_v2, %v2170_v45  ;;  %v3258_v2 = vld [vmem:[%s5959_s0 + $0x28] sm:$0xe]  ;;  %v4409_v45 = vld [vmem:[%s5958_s1 + $0x90] sm:$0xff]   ;;  %v885_v62 = vunpack.c.l.bf16 %v3071_v16 }
  0x73   :  { %4071 = vmatmul.mubr.msk.f32.gmra.mrb[8].mxu0 %vm199_vm1, %v2159_v54  ;;  %4270 = vmatpush3.bf16.msra.mxu1 %v5369_v23  ;;  %v2172_v23 = vrot.slane %v2094_v6, 1  ;;  %v3256_v54 = vld [vmem:[%s5959_s0 + $0x18] sm:$0xe]  ;;  %v2175_v6 = vrot.slane %v2096_v28, 1  ;;  %v3259_v28 = vld [vmem:[%s5959_s0 + $0x30] sm:$0xe] }
  0x74   :  { %3901 = vmatprep.mubr.msk.f32.mxu1 %vm199_vm1, %v879_v27  ;;  %4073 = vmatprep.mubr.msk.f32.mxu0 %vm199_vm1, %v2162_v20  ;;  %v3257_v27 = vld [vmem:[%s5959_s0 + $0x20] sm:$0xe]  ;;  %v2176_v20 = vrot.slane %v2097_v32, 1  ;;  %v2481_v48 = vrot.slane %v2097_v32, 2 }
  0x75   :  { %4267 = vmatprep.subr.bf16.mxu1 %v4408_v5  ;;  %v2174_v38 = vsel %vm134_vm0, %v2172_v23, %v2173_v53  ;;  %v2439_v23 = vrot.slane %v2069_v39, 2  ;;  %v2406_v53 = vunpack.c.l.bf16 %v3258_v2  ;;  %v3261_v39 = vld [vmem:[%s5959_s0 + $0x40] sm:$0xe] }
  0x76   :  { %3902 = vmatmul.mubr.msk.f32.gmra.mrb[2].mxu1 %vm199_vm1, %v880_v15  ;;  %v2404_v15 = vunpack.c.l.bf16 %v3256_v54  ;;  %v2409_v2 = vunpack.c.l.bf16 %v3261_v39 }
  0x77   :  { %4074 = vmatmul.mubr.msk.f32.gmra.mrb[10].mxu0 %vm199_vm1, %v2165_v33  ;;  %3904 = vmatprep.mubr.msk.f32.mxu1 %vm199_vm1, %v881_v52  ;;  %v2435_v33 = vrot.slane %v2403_v21, 2  ;;  %v2405_v52 = vunpack.c.l.bf16 %v3257_v27  ;;  %v3260_v21 = vld [vmem:[%s5959_s0 + $0x38] sm:$0xe] }
  0x78   :  { %4076 = vmatprep.mubr.msk.f32.mxu0 %vm199_vm1, %v2168_v34  ;;  %4271 = vmatpush3.bf16.msra.mxu1 %v4408_v5  ;;  %v2177_v34 = vsel %vm134_vm0, %v2175_v6, %v2176_v20  ;;  %v2438_v5 = vrot.slane %v2404_v15, 2  ;;  %v2408_v6 = vunpack.c.l.bf16 %v3260_v21  ;;  %v887_v20 = vunpack.c.l.bf16 %v3073_v41 }
  0x79   :  { %4268 = vmatprep.subr.bf16.mxu1 %v4409_v45  ;;  %v2437_v54 = vsel %vm602_vm2, %v2435_v33, %v2436_v14  ;;  %v2441_v27 = vrot.slane %v2405_v52, 2  ;;  %v2444_v15 = vrot.slane %v2406_v53, 2  ;;  %v2448_v52 = vrot.slane %v2075_v25, 2 }
  0x7a   :  { %3905 = vmatmul.mubr.msk.f32.gmra.mrb[4].mxu1 %vm199_vm1, %v882_v46  ;;  %v2442_v46 = vrot.slane %v2071_v8, 2  ;;  %v2440_v8 = vsel %vm602_vm2, %v2438_v5, %v2439_v23  ;;  %v2454_v5 = vrot.slane %v2079_v3, 2  ;;  %v3264_v23 = vld [vmem:[%s5959_s0 + $0x68] sm:$0xe]  ;;  %v2453_v36 = vrot.slane %v2409_v2, 2 }
  0x7b   :  { %4077 = vmatmul.mubr.msk.f32.gmra.mrb[12].mxu0 %vm199_vm1, %v2171_v31  ;;  %3907 = vmatprep.mubr.msk.f32.mxu1 %vm199_vm1, %v883_v42  ;;  %v2407_v42 = vunpack.c.l.bf16 %v3259_v28  ;;  %v886_v31 = vunpack.c.h.bf16 %v3071_v16  ;;  %v3075_v16 = vld [vmem:[%s5959_s0 + $0x78] ss:$8 sps:$4 sm:$0xff]   ;;  %v2411_v21 = vunpack.c.l.bf16 %v3263_v43  ;;  %v2412_v1 = vunpack.c.l.bf16 %v3264_v23 }
  0x7c   :  { %4079 = vmatprep.mubr.msk.f32.mxu0 %vm199_vm1, %v2174_v38  ;;  %4272 = vmatpush3.bf16.msra.mxu1 %v4409_v45  ;;  %v2445_v38 = vrot.slane %v2073_v63, 2  ;;  %v2443_v33 = vsel %vm602_vm2, %v2441_v27, %v2442_v46  ;;  %v2410_v45 = vunpack.c.l.bf16 %v3262_v19  ;;  %v3111_v28 = vld [vmem:[%s5959_s0 + $0x58] ss:$8 sps:$4 sm:$0xff]   ;;  %v888_v63 = vunpack.c.h.bf16 %v3073_v41  ;;  %v3265_v41 = vld [vmem:[%s5959_s0 + $0x70] sm:$0xe] }
  0x7d   :  { %4269 = vmatprep.subr.bf16.mxu1 %v4410_v11  ;;  %v2447_v14 = vrot.slane %v2407_v42, 2  ;;  %v1166_v53 = vunpack.c.l.bf16 %v3111_v28  ;;  %v1168_v3 = vunpack.c.h.bf16 %v3111_v28  ;;  %v6018_v46 = vunpack.c.l.bf16 %v4908_v17  ;;  %v3266_v17 = vld [vmem:[%s5959_s0 + $0x78] sm:$0xe] }
  0x7e   :  { %3908 = vmatmul.mubr.msk.f32.gmra.mrb[6].mxu1 %vm199_vm1, %v884_v49  ;;  %v2450_v49 = vrot.slane %v2408_v6, 2  ;;  %v2446_v25 = vsel %vm602_vm2, %v2444_v15, %v2445_v38  ;;  %v2456_v27 = vrot.slane %v2410_v45, 2  ;;  %v6019_v6 = vunpack.c.l.bf16 %v4889_v29  ;;  %v3267_v45 = vld [vmem:[%s5959_s0 + $0x80] sm:$0xe] }
  0x7f   :  { %4080 = vmatmul.mubr.msk.f32.gmra.mrb[14].mxu0 %vm199_vm1, %v2177_v34  ;;  %3910 = vmatprep.mubr.msk.f32.mxu1 %vm199_vm1, %v885_v62  ;;  %v889_v62 = vunpack.c.l.bf16 %v3075_v16  ;;  %v3077_v34 = vld [vmem:[%s5959_s0 + $0x88] ss:$8 sps:$4 sm:$0xff]   ;;  %v2449_v37 = vsel %vm602_vm2, %v2447_v14, %v2448_v52  ;;  %v1242_v42 = vrot.slane %v6018_v46, 1  ;;  %v2455_v15 = vsel %vm602_vm2, %v2453_v36, %v2454_v5 }
  0x80   :  { %4098 = vmatprep.mubr.msk.f32.mxu0 %vm199_vm1, %v2437_v54  ;;  %4273 = vmatpush3.bf16.msra.mxu1 %v4410_v11  ;;  %v3115_v54 = vld [vmem:[%s5959_s0 + $0x68] ss:$8 sps:$4 sm:$0xff]   ;;  %v890_v11 = vunpack.c.h.bf16 %v3075_v16  ;;  %v2452_v39 = vsel %vm602_vm2, %v2450_v49, %v2451_v61  ;;  %v1239_v18 = vrot.slane %v6019_v6, 1  ;;  %v1238_v38 = vrot.slane %v1166_v53, 1 }
  0x81   :  { %v1170_v19 = vunpack.c.l.bf16 %v3115_v54  ;;  %v2460_v16 = vrot.slane %v2083_v9, 2  ;;  %v892_v29 = vunpack.c.h.bf16 %v3077_v34  ;;  %v2458_v14 = vsel %vm602_vm2, %v2456_v27, %v2457_v24  ;;  %v3123_v5 = vld [vmem:[%s5959_s0 + $0x88] ss:$8 sps:$4 sm:$0xff]  }
  0x82   :  { %3911 = vmatmul.mubr.msk.f32.gmra.mrb[8].mxu1 %vm199_vm1, %v886_v31  ;;  %v891_v31 = vunpack.c.l.bf16 %v3077_v34  ;;  %v1241_v52 = vrot.slane %v1168_v3, 1  ;;  %v1172_v2 = vunpack.c.h.bf16 %v3115_v54  ;;  %v2463_v28 = vrot.slane %v2085_v50, 2  ;;  %v3269_v53 = vld [vmem:[%s5959_s0 + $0x90] sm:$0xe] }
  0x83   :  { %4099 = vmatmul.mubr.msk.f32.vlgmr.msra.gmra.mrb[0].mxu0 %vm199_vm1, %v2440_v8  ;;  %3913 = vmatprep.mubr.msk.f32.mxu1 %vm199_vm1, %v887_v20  ;;  %v2413_v8 = vunpack.c.l.bf16 %v3265_v41  ;;  %v3119_v20 = vld [vmem:[%s5959_s0 + $0x78] ss:$8 sps:$4 sm:$0xff]   ;;  %v6020_v43 = vunpack.c.l.bf16 %v4920_v13  ;;  %v2414_v9 = vunpack.c.l.bf16 %v3266_v17  ;;  %v2462_v49 = vrot.slane %v2412_v1, 2  ;;  %v3268_v13 = vld [vmem:[%s5959_s0 + $0x88] sm:$0xe] }
  0x84   :  { %4101 = vmatprep.mubr.msk.f32.mxu0 %vm199_vm1, %v2443_v33  ;;  %v2459_v33 = vrot.slane %v2411_v21, 2  ;;  %v1244_v61 = vrot.slane %v1170_v19, 1  ;;  %v1240_v34 = vsel %vm134_vm0, %v1238_v38, %v1239_v18  ;;  %v2415_v50 = vunpack.c.l.bf16 %v3267_v45 }
  0x85   :  { %v1245_v44 = vrot.slane %v6020_v43, 1  ;;  %v1243_v23 = vsel %vm134_vm0, %v1241_v52, %v1242_v42  ;;  %v6021_v36 = vunpack.c.l.bf16 %v4938_v35  ;;  %v2468_v21 = vrot.slane %v2414_v9, 2 }
  0x86   :  { %3914 = vmatmul.mubr.msk.f32.gmra.mrb[10].mxu1 %vm199_vm1, %v888_v63  ;;  %v1174_v63 = vunpack.c.l.bf16 %v3119_v20  ;;  %v2461_v51 = vsel %vm602_vm2, %v2459_v33, %v2460_v16  ;;  %v1251_v41 = vrot.slane %v1175_v56, 1  ;;  %v1176_v27 = vunpack.c.h.bf16 %v3119_v20 }
  0x87   :  { %4102 = vmatmul.mubr.msk.f32.gmra.mrb[2].mxu0 %vm199_vm1, %v2446_v25  ;;  %3916 = vmatprep.mubr.msk.f32.mxu1 %vm199_vm1, %v889_v62  ;;  %v2465_v25 = vrot.slane %v2413_v8, 2  ;;  %v2466_v62 = vrot.slane %v2087_v57, 2  ;;  %v1248_v7 = vrot.slane %v6021_v36, 1  ;;  %v2469_v57 = vrot.slane %v2089_v59, 2 }
  0x88   :  { %4104 = vmatprep.mubr.msk.f32.mxu0 %vm199_vm1, %v2449_v37  ;;  %v1247_v37 = vrot.slane %v1172_v2, 1  ;;  %v1250_v54 = vrot.slane %v1174_v63, 1  ;;  %v2464_v35 = vsel %vm602_vm2, %v2462_v49, %v2463_v28  ;;  %v1246_v60 = vsel %vm134_vm0, %v1244_v61, %v1245_v44  ;;  %v5735_v49 = vld [vmem:[%s5960_s2] ss:$0 sm:$0xff]  ;;  %s4411_s2 = smov 32  }
  0x89   :  { %v2467_v59 = vsel %vm602_vm2, %v2465_v25, %v2466_v62  ;;  %v2416_v24 = vunpack.c.l.bf16 %v3268_v13  ;;  %v2471_v3 = vrot.slane %v2415_v50, 2  ;;  %v2472_v46 = vrot.slane %v2091_v30, 2 }
  0x8a   :  { %3917 = vmatmul.mubr.msk.f32.gmra.mrb[12].mxu1 %vm199_vm1, %v890_v11  ;;  %v1178_v42 = vunpack.c.l.bf16 %v3123_v5  ;;  %v2417_v11 = vunpack.c.l.bf16 %v3269_v53  ;;  %v1249_v56 = vsel %vm134_vm0, %v1247_v37, %v1248_v7  ;;  %v1252_v58 = vsel %vm134_vm0, %v1250_v54, %v1251_v41 }
  0x8b   :  { %4105 = vmatmul.mubr.msk.f32.gmra.mrb[4].mxu0 %vm199_vm1, %v2452_v39  ;;  %3919 = vmatprep.mubr.msk.f32.mxu1 %vm199_vm1, %v891_v31  ;;  %v1254_v39 = vrot.slane %v1177_v47, 1  ;;  %v2470_v31 = vsel %vm602_vm2, %v2468_v21, %v2469_v57  ;;  %v1253_v30 = vrot.slane %v1176_v27, 1  ;;  %v2475_v6 = vrot.slane %v2093_v40, 2 }
  0x8c   :  { %4107 = vmatprep.mubr.msk.f32.mxu0 %vm199_vm1, %v2455_v15  ;;  %v2474_v18 = vrot.slane %v2416_v24, 2  ;;  %v1257_v47 = vrot.slane %v6022_v12, 1  ;;  %v1180_v1 = vunpack.c.h.bf16 %v3123_v5  ;;  %v2418_v19 = vunpack.c.l.bf16 %v3270_v0 }
  0x8d   :  { %v2473_v8 = vsel %vm602_vm2, %v2471_v3, %v2472_v46  ;;  %v1256_v17 = vrot.slane %v1178_v42, 1  ;;  %v2477_v20 = vrot.slane %v2417_v11, 2  ;;  %v2478_v15 = vrot.slane %v2095_v26, 2 }
  0x8e   :  { %3920 = vmatmul.mubr.msk.f32.gmra.mrb[14].mxu1 %vm199_vm1, %v892_v29  ;;  %v1255_v10 = vsel %vm134_vm0, %v1253_v30, %v1254_v39  ;;  %v6023_v40 = vunpack.c.l.bf16 %v5002_v4  ;;  %v2476_v55 = vsel %vm602_vm2, %v2474_v18, %v2475_v6  ;;  %v1259_v33 = vrot.slane %v1180_v1, 1 }
  0x8f   :  { %4108 = vmatmul.mubr.msk.f32.gmra.mrb[6].mxu0 %vm199_vm1, %v2458_v14  ;;  %3950 = vmatprep.mubr.msk.f32.mxu1 %vm199_vm1, %v1240_v34  ;;  %v2480_v16 = vrot.slane %v2418_v19, 2  ;;  %v1258_v26 = vsel %vm134_vm0, %v1256_v17, %v1257_v47  ;;  %v2479_v29 = vsel %vm602_vm2, %v2477_v20, %v2478_v15 }
  0x90   :  { %4110 = vmatprep.mubr.msk.f32.mxu0 %vm199_vm1, %v2461_v51  ;;  %v1260_v38 = vrot.slane %v6023_v40, 1 }
  0x91   :  { %v2482_v14 = vsel %vm602_vm2, %v2480_v16, %v2481_v48 }
  0x92   :  { %3951 = vmatmul.mubr.msk.f32.vlgmr.msra.gmra.mrb[8].mxu1 %vm199_vm1, %v1243_v23  ;;  %v1261_v4 = vsel %vm134_vm0, %v1259_v33, %v1260_v38 }
  0x93   :  { %4111 = vmatmul.mubr.msk.f32.gmra.mrb[8].mxu0 %vm199_vm1, %v2464_v35  ;;  %3953 = vmatprep.mubr.msk.f32.mxu1 %vm199_vm1, %v1246_v60 }
  0x94   :  { %4113 = vmatprep.mubr.msk.f32.mxu0 %vm199_vm1, %v2467_v59 }
  0x96   :  { %3954 = vmatmul.mubr.msk.f32.gmra.mrb[10].mxu1 %vm199_vm1, %v1249_v56 }
  0x97   :  { %4114 = vmatmul.mubr.msk.f32.gmra.mrb[10].mxu0 %vm199_vm1, %v2470_v31  ;;  %3956 = vmatprep.mubr.msk.f32.mxu1 %vm199_vm1, %v1252_v58 }
  0x98   :  { %4116 = vmatprep.mubr.msk.f32.mxu0 %vm199_vm1, %v2473_v8 }
  0x9a   :  { %3957 = vmatmul.mubr.msk.f32.gmra.mrb[12].mxu1 %vm199_vm1, %v1255_v10 }
  0x9b   :  { %4117 = vmatmul.mubr.msk.f32.gmra.mrb[12].mxu0 %vm199_vm1, %v2476_v55  ;;  %3959 = vmatprep.mubr.msk.f32.mxu1 %vm199_vm1, %v1258_v26 }
  0x9c   :  { %4119 = vmatprep.mubr.msk.f32.mxu0 %vm199_vm1, %v2479_v29 }
  0x9e   :  { %3960 = vmatmul.mubr.msk.f32.gmra.mrb[14].mxu1 %vm199_vm1, %v1261_v4 }
  0x9f   :  { %4120 = vmatmul.mubr.msk.f32.gmra.mrb[14].mxu0 %vm199_vm1, %v2482_v14 }
 0x145   :  { %v3900_v22 = vpop.f32.mrb[0].mxu1 }
 0x146   :  { %v1023_v32 = vpop.f32.mrb[1].mxu1 }
 0x149   :  { %v3903_v52 = vpop.f32.mrb[2].mxu1 }
 0x14a   :  { %v1033_v2 = vpop.f32.mrb[3].mxu1 }
 0x14d   :  { %v3906_v45 = vpop.f32.mrb[4].mxu1 }
 0x14e   :  { %v1043_v28 = vpop.f32.mrb[5].mxu1 }
 0x151   :  { %v3909_v43 = vpop.f32.mrb[6].mxu1 }
 0x152   :  { %v1053_v44 = vpop.f32.mrb[7].mxu1 }
 0x156   :  { %v4100_v9 = vpop.f32.mrb[0].mxu0 }
 0x157   :  { %v4274_v63 = vadd.f32 %v4100_v9, %v3900_v22  ;;  %v2597_v61 = vpop.f32.mrb[1].mxu0 }
 0x158   :  { %v4275_v25 = vadd.f32 %v2597_v61, %v1023_v32 }
 0x159   :  { %v5738_v62 = vadd.f32 %v4274_v63, %v5735_v49 }
 0x15a   :  { %v5741_v34 = vadd.f32 %v4275_v25, %v5735_v49  ;;  %v4103_v51 = vpop.f32.mrb[2].mxu0 }
 0x15b   :  { %v4276_v50 = vadd.f32 %v4103_v51, %v3903_v52  ;;  %v2607_v13 = vpop.f32.mrb[3].mxu0 }
 0x15c   :  { %v4277_v5 = vadd.f32 %v2607_v13, %v1033_v2  ;;  %v2715_v23 = vadd.f32 %v5738_v62, %v5741_v34 }
 0x15d   :  { %v5749_v53 = vadd.f32 %v4276_v50, %v5735_v49 }
 0x15e   :  { %v5746_v37 = vadd.f32 %v4277_v5, %v5735_v49  ;;  %v4106_v36 = vpop.f32.mrb[4].mxu0 }
 0x15f   :  { %v4278_v7 = vadd.f32 %v4106_v36, %v3906_v45  ;;  %v2617_v57 = vpop.f32.mrb[5].mxu0 }
 0x160   :  { %v2716_v21 = vadd.f32 %v2715_v23, %v5746_v37  ;;  %v4279_v54 = vadd.f32 %v2617_v57, %v1043_v28 }
 0x161   :  { %v5757_v24 = vadd.f32 %v4278_v7, %v5735_v49 }
 0x162   :  { %v5753_v41 = vadd.f32 %v4279_v54, %v5735_v49  ;;  %v2717_v27 = vadd.f32 %v2716_v21, %v5749_v53  ;;  %v4109_v35 = vpop.f32.mrb[6].mxu0 }
 0x163   :  { %v4280_v60 = vadd.f32 %v4109_v35, %v3909_v43  ;;  %v2627_v59 = vpop.f32.mrb[7].mxu0 }
 0x164   :  { %v2718_v3 = vadd.f32 %v2717_v27, %v5753_v41  ;;  %v4281_v46 = vadd.f32 %v2627_v59, %v1053_v44 }
 0x165   :  { %v3952_v0 = vpop.f32.mrb[8].mxu1  ;;  %v5765_v30 = vadd.f32 %v4280_v60, %v5735_v49 }
 0x166   :  { %v5761_v42 = vadd.f32 %v4281_v46, %v5735_v49  ;;  %v2719_v11 = vadd.f32 %v2718_v3, %v5757_v24  ;;  %v4112_v56 = vpop.f32.mrb[8].mxu0  ;;  %v1416_v31 = vpop.f32.mrb[9].mxu1 }
 0x167   :  { %v4282_v39 = vadd.f32 %v4112_v56, %v3952_v0  ;;  %v2637_v58 = vpop.f32.mrb[9].mxu0 }
 0x168   :  { %v2720_v6 = vadd.f32 %v2719_v11, %v5761_v42  ;;  %v4283_v18 = vadd.f32 %v2637_v58, %v1416_v31  ;;  %v2766_v11 = vlaneseq }
 0x169   :  { %v3955_v1 = vpop.f32.mrb[10].mxu1  ;;  %v5773_v15 = vadd.f32 %v4282_v39, %v5735_v49 }
 0x16a   :  { %v5769_v12 = vadd.f32 %v4283_v18, %v5735_v49  ;;  %v2721_v47 = vadd.f32 %v2720_v6, %v5765_v30  ;;  %v4115_v19 = vpop.f32.mrb[10].mxu0  ;;  %v1426_v17 = vpop.f32.mrb[11].mxu1  ;;  %v2767_v0 = vshrl.u32 %v2766_v11, 7 }
 0x16b   :  { %v4284_v8 = vadd.f32 %v4115_v19, %v3955_v1  ;;  %v2647_v20 = vpop.f32.mrb[11].mxu0 }
 0x16c   :  { %v2722_v10 = vadd.f32 %v2721_v47, %v5769_v12  ;;  %v4285_v40 = vadd.f32 %v2647_v20, %v1426_v17  ;;  %v5808_v58 = vsub.s32 0, %v2767_v0 }
 0x16d   :  { %v3958_v33 = vpop.f32.mrb[12].mxu1  ;;  %v5781_v4 = vadd.f32 %v4284_v8, %v5735_v49 }
 0x16e   :  { %v5777_v38 = vadd.f32 %v4285_v40, %v5735_v49  ;;  %v2723_v55 = vadd.f32 %v2722_v10, %v5773_v15  ;;  %v4118_v16 = vpop.f32.mrb[12].mxu0  ;;  %v1436_v26 = vpop.f32.mrb[13].mxu1 }
 0x16f   :  { %v4286_v48 = vadd.f32 %v4118_v16, %v3958_v33  ;;  %v2657_v29 = vpop.f32.mrb[13].mxu0 }
 0x170   :  { %v2724_v14 = vadd.f32 %v2723_v55, %v5777_v38  ;;  %v4287_v22 = vadd.f32 %v2657_v29, %v1436_v26 }
 0x171   :  { %v3961_v2 = vpop.f32.mrb[14].mxu1  ;;  %v5789_v9 = vadd.f32 %v4286_v48, %v5735_v49 }
 0x172   :  { %v5785_v32 = vadd.f32 %v4287_v22, %v5735_v49  ;;  %v2725_v52 = vadd.f32 %v2724_v14, %v5781_v4  ;;  %v4121_v45 = vpop.f32.mrb[14].mxu0  ;;  %v1446_v43 = vpop.f32.mrb[15].mxu1 }
 0x173   :  { %v4288_v28 = vadd.f32 %v4121_v45, %v3961_v2  ;;  %v2667_v44 = vpop.f32.mrb[15].mxu0 }
 0x174   :  { %v2726_v63 = vadd.f32 %v2725_v52, %v5785_v32  ;;  %v4289_v61 = vadd.f32 %v2667_v44, %v1446_v43 }
 0x175   :  { %v5797_v50 = vadd.f32 %v4288_v28, %v5735_v49 }
 0x176   :  { %v5793_v25 = vadd.f32 %v4289_v61, %v5735_v49  ;;  %v2727_v51 = vadd.f32 %v2726_v63, %v5789_v9 }
 0x178   :  { %v2728_v13 = vadd.f32 %v2727_v51, %v5793_v25 }
 0x17a   :  { %v2729_v5 = vadd.f32 %v2728_v13, %v5797_v50 }
 0x17c   :  { %v2730_v23 = vrot.slane %v2729_v5, 4 }
 0x17e   :  { %v2731_v36 = vadd.f32 %v2730_v23, %v2729_v5 }
 0x180   :  { %v2732_v7 = vrot.slane %v2731_v36, 2 }
 0x182   :  { %v2733_v57 = vadd.f32 %v2732_v7, %v2731_v36 }
 0x184   :  { %v2734_v21 = vrot.slane %v2733_v57, 1 }
 0x186   :  { %v2735_v54 = vadd.f32 %v2734_v21, %v2733_v57 }
 0x188   :  { %2746 = vrot.lane.b32.xlu1 %v2735_v54, %s4411_s2  ;;  %2738 = vrot.lane.b32.xlu0 %v2735_v54, %s4412_s19 }
 0x18c   :  { %2742 = vrot.lane.b32.xlu0 %v2735_v54, %s4413_s20 }
 0x1fa   :  { %v2739_v49 = vpop.permute.xlu0 %2738  ;;  %v2747_v59 = vpop.permute.xlu1 %2746 }
 0x1fb   :  { %v2741_v27 = vadd.f32 %v2739_v49, %v2735_v54 }
 0x1fe   :  { %v2743_v35 = vpop.permute.xlu0 %2742 }
 0x1ff   :  { %v2745_v60 = vadd.f32 %v2743_v35, %v2741_v27 }
 0x201   :  { %v2749_v3 = vadd.f32 %v2747_v59, %v2745_v60 }
 0x203   :  { %v2750_v46 = vmul.f32 0.001953125, %v2749_v3 }
 0x205   :  { %2755 = vrot.lane.b32.xlu0 %v2750_v46, %s4413_s20  ;;  %2752 = vrot.lane.b32.xlu1 %v2750_v46, %s4411_s2 }
 0x209   :  { %2758 = vrot.lane.b32.xlu1 %v2750_v46, %s4412_s19 }
 0x277   :  { %v2753_v56 = vpop.permute.xlu1 %2752  ;;  %v2756_v39 = vpop.permute.xlu0 %2755 }
 0x278   :  { %v2762_v31 = vsel %vm2761_vm3, %v2750_v46, %v2753_v56  ;;  %v21_v46 = vld [vmem:[%s5961_s4] sm:$0x1] }
 0x279   :  { %v2763_v6 = vsel %vm199_vm1, %v2762_v31, %v2756_v39  ;;  %v2882_v11 = vrot.slane %v21_v46, %v5808_v58 }
 0x27b   :  { %v2759_v18 = vpop.permute.xlu1 %2758 }
 0x27c   :  { %v2765_v47 = vsel %vm2764_vm4, %v2763_v6, %v2759_v18 }
 0x27d   :  { %v2769_v1 = vrot.slane %v2765_v47, %v5808_v58 }
 0x27f   :  { %v5814_v19 = vsub.f32 %v5741_v34, %v2769_v1  ;;  %v5817_v8 = vsub.f32 %v5738_v62, %v2769_v1  ;;  %v5820_v17 = vsub.f32 %v5746_v37, %v2769_v1  ;;  %v5827_v40 = vsub.f32 %v5749_v53, %v2769_v1 }
 0x280   :  { %v5830_v55 = vsub.f32 %v5753_v41, %v2769_v1  ;;  %v5835_v33 = vsub.f32 %v5757_v24, %v2769_v1  ;;  %v5840_v48 = vsub.f32 %v5761_v42, %v2769_v1  ;;  %v5845_v41 = vsub.f32 %v5765_v30, %v2769_v1 }
 0x281   :  { %v2786_v20 = vmul.f32 %v5814_v19, %v5814_v19  ;;  %v2787_v10 = vmul.f32 %v5817_v8, %v5817_v8  ;;  %v2788_v34 = vmul.f32 %v5820_v17, %v5820_v17  ;;  %v2789_v37 = vmul.f32 %v5827_v40, %v5827_v40 }
 0x282   :  { %v2790_v53 = vmul.f32 %v5830_v55, %v5830_v55  ;;  %v2791_v29 = vmul.f32 %v5835_v33, %v5835_v33  ;;  %v5850_v24 = vsub.f32 %v5769_v12, %v2769_v1  ;;  %v2792_v22 = vmul.f32 %v5840_v48, %v5840_v48 }
 0x283   :  { %v2802_v62 = vadd.f32 %v2787_v10, %v2786_v20  ;;  %v5855_v42 = vsub.f32 %v5773_v15, %v2769_v1  ;;  %v2793_v2 = vmul.f32 %v5845_v41, %v5845_v41  ;;  %v5860_v30 = vsub.f32 %v5777_v38, %v2769_v1  ;;  %v20_v20 = vld [vmem:[%s5962_s3] sm:$0x1] }
 0x284   :  { %v2794_v28 = vmul.f32 %v5850_v24, %v5850_v24  ;;  %v5865_v12 = vsub.f32 %v5781_v4, %v2769_v1  ;;  %v5870_v15 = vsub.f32 %v5785_v32, %v2769_v1  ;;  %v5875_v38 = vsub.f32 %v5789_v9, %v2769_v1 }
 0x285   :  { %v2803_v16 = vadd.f32 %v2802_v62, %v2788_v34  ;;  %v2795_v44 = vmul.f32 %v5855_v42, %v5855_v42  ;;  %v2796_v61 = vmul.f32 %v5860_v30, %v5860_v30  ;;  %v5880_v4 = vsub.f32 %v5793_v25, %v2769_v1 }
 0x286   :  { %v2797_v13 = vmul.f32 %v5865_v12, %v5865_v12  ;;  %v2798_v23 = vmul.f32 %v5870_v15, %v5870_v15  ;;  %v5885_v32 = vsub.f32 %v5797_v50, %v2769_v1  ;;  %v2799_v7 = vmul.f32 %v5875_v38, %v5875_v38 }
 0x287   :  { %v2804_v26 = vadd.f32 %v2803_v16, %v2789_v37  ;;  %v2800_v9 = vmul.f32 %v5880_v4, %v5880_v4 }
 0x288   :  { %v2801_v54 = vmul.f32 %v5885_v32, %v5885_v32 }
 0x289   :  { %v2805_v14 = vadd.f32 %v2804_v26, %v2790_v53 }
 0x28b   :  { %v2806_v52 = vadd.f32 %v2805_v14, %v2791_v29 }
 0x28d   :  { %v2807_v45 = vadd.f32 %v2806_v52, %v2792_v22 }
 0x28f   :  { %v2808_v43 = vadd.f32 %v2807_v45, %v2793_v2 }
 0x291   :  { %v2809_v63 = vadd.f32 %v2808_v43, %v2794_v28 }
 0x293   :  { %v2810_v51 = vadd.f32 %v2809_v63, %v2795_v44 }
 0x295   :  { %v2811_v5 = vadd.f32 %v2810_v51, %v2796_v61 }
 0x297   :  { %v2812_v36 = vadd.f32 %v2811_v5, %v2797_v13 }
 0x299   :  { %v2813_v57 = vadd.f32 %v2812_v36, %v2798_v23 }
 0x29b   :  { %v2814_v21 = vadd.f32 %v2813_v57, %v2799_v7 }
 0x29d   :  { %v2815_v25 = vadd.f32 %v2814_v21, %v2800_v9 }
 0x29f   :  { %v2816_v49 = vadd.f32 %v2815_v25, %v2801_v54 }
 0x2a1   :  { %v2817_v27 = vrot.slane %v2816_v49, 4 }
 0x2a3   :  { %v2818_v35 = vadd.f32 %v2817_v27, %v2816_v49 }
 0x2a5   :  { %v2819_v60 = vrot.slane %v2818_v35, 2 }
 0x2a7   :  { %v2820_v59 = vadd.f32 %v2819_v60, %v2818_v35 }
 0x2a9   :  { %v2821_v3 = vrot.slane %v2820_v59, 1 }
 0x2ab   :  { %v2822_v50 = vadd.f32 %v2821_v3, %v2820_v59 }
 0x2ad   :  { %2829 = vrot.lane.b32.xlu1 %v2822_v50, %s4413_s20  ;;  %2825 = vrot.lane.b32.xlu0 %v2822_v50, %s4412_s19 }
 0x2b1   :  { %2833 = vrot.lane.b32.xlu0 %v2822_v50, %s4411_s2 }
 0x2b5   :  { %2883 = vrot.lane.b32.xlu0 %v2882_v11, %s4411_s2 }
 0x31f   :  { %v2826_v0 = vpop.permute.xlu0 %2825  ;;  %v2830_v39 = vpop.permute.xlu1 %2829 }
 0x320   :  { %v2828_v56 = vadd.f32 %v2826_v0, %v2822_v50 }
 0x322   :  { %v2832_v31 = vadd.f32 %v2830_v39, %v2828_v56 }
 0x323   :  { %v2834_v6 = vpop.permute.xlu0 %2833 }
 0x324   :  { %v2836_v18 = vadd.f32 %v2834_v6, %v2832_v31 }
 0x326   :  { %v2837_v47 = vmul.f32 0.001953125, %v2836_v18 }
 0x327   :  { %v2884_v37 = vpop.permute.xlu0 %2883 }
 0x328   :  { %v2838_v1 = vadd.f32 1e-05, %v2837_v47  ;;  %v2892_v28 = vsel %vm2761_vm3, %v21_v46, %v2884_v37 }
 0x32a   :  { %4405 = vrsqrt.f32 %v2838_v1 }
 0x334   :  { %v4406_v10 = vpop.eup %4405 }
 0x335   :  { %v2840_v34 = vmul.f32 %v4406_v10, %v20_v20 }
 0x337   :  { %v2845_v62 = vrot.slane %v2840_v34, %v5808_v58 }
 0x339   :  { %2849 = vrot.lane.b32.xlu0 %v2845_v62, %s4413_s20  ;;  %2846 = vrot.lane.b32.xlu1 %v2845_v62, %s4411_s2 }
 0x33d   :  { %2852 = vrot.lane.b32.xlu1 %v2845_v62, %s4412_s19  ;;  %2889 = vrot.lane.b32.xlu0 %v2882_v11, %s4412_s19 }
 0x341   :  { %2886 = vrot.lane.b32.xlu1 %v2882_v11, %s4413_s20 }
 0x3ab   :  { %v2847_v16 = vpop.permute.xlu1 %2846  ;;  %v2850_v26 = vpop.permute.xlu0 %2849 }
 0x3ac   :  { %v2855_v53 = vsel %vm2761_vm3, %v2840_v34, %v2847_v16 }
 0x3ad   :  { %v2856_v29 = vsel %vm199_vm1, %v2855_v53, %v2850_v26 }
 0x3af   :  { %v2853_v14 = vpop.permute.xlu1 %2852  ;;  %v2890_v45 = vpop.permute.xlu0 %2889 }
 0x3b0   :  { %v2857_v22 = vsel %vm2764_vm4, %v2856_v29, %v2853_v14 }
 0x3b1   :  { %v2861_v52 = vrot.slane %v2857_v22, %v5808_v58 }
 0x3b3   :  { %v2887_v2 = vpop.permute.xlu1 %2886  ;;  %v2862_v43 = vmul.f32 %v2861_v52, %v5814_v19  ;;  %v2863_v44 = vmul.f32 %v2861_v52, %v5817_v8  ;;  %v2864_v63 = vmul.f32 %v2861_v52, %v5820_v17  ;;  %v2865_v61 = vmul.f32 %v2861_v52, %v5827_v40 }
 0x3b4   :  { %v2866_v51 = vmul.f32 %v2861_v52, %v5830_v55  ;;  %v2867_v13 = vmul.f32 %v2861_v52, %v5835_v33  ;;  %v2893_v5 = vsel %vm199_vm1, %v2892_v28, %v2887_v2  ;;  %v2868_v23 = vmul.f32 %v2861_v52, %v5840_v48 }
 0x3b5   :  { %v2869_v36 = vmul.f32 %v2861_v52, %v5845_v41  ;;  %v2870_v7 = vmul.f32 %v2861_v52, %v5850_v24  ;;  %v2894_v19 = vsel %vm2764_vm4, %v2893_v5, %v2890_v45  ;;  %v2871_v8 = vmul.f32 %v2861_v52, %v5855_v42 }
 0x3b6   :  { %v2872_v17 = vmul.f32 %v2861_v52, %v5860_v30  ;;  %v2873_v40 = vmul.f32 %v2861_v52, %v5865_v12  ;;  %v2898_v55 = vrot.slane %v2894_v19, %v5808_v58  ;;  %v2874_v33 = vmul.f32 %v2861_v52, %v5870_v15 }
 0x3b7   :  { %v2875_v57 = vmul.f32 %v2861_v52, %v5875_v38  ;;  %v2876_v48 = vmul.f32 %v2861_v52, %v5880_v4  ;;  %v2877_v41 = vmul.f32 %v2861_v52, %v5885_v32 }
 0x3b8   :  { %v2899_v9 = vadd.f32 %v2898_v55, %v2862_v43  ;;  %v2900_v24 = vadd.f32 %v2898_v55, %v2863_v44  ;;  %v2901_v21 = vadd.f32 %v2898_v55, %v2864_v63  ;;  %v2902_v54 = vadd.f32 %v2898_v55, %v2865_v61 }
 0x3b9   :  { %v2903_v25 = vadd.f32 %v2898_v55, %v2866_v51  ;;  %v2904_v42 = vadd.f32 %v2898_v55, %v2867_v13  ;;  %v2905_v49 = vadd.f32 %v2898_v55, %v2868_v23  ;;  %v2906_v30 = vadd.f32 %v2898_v55, %v2869_v36 }
 0x3ba   :  { %v2907_v27 = vadd.f32 %v2898_v55, %v2870_v7  ;;  %v2908_v12 = vadd.f32 %v2898_v55, %v2871_v8  ;;  %v2909_v35 = vadd.f32 %v2898_v55, %v2872_v17  ;;  %v2910_v58 = vadd.f32 %v2898_v55, %v2873_v40 }
 0x3bb   :  { %v2911_v60 = vadd.f32 %v2898_v55, %v2874_v33  ;;  %v2912_v15 = vadd.f32 %v2898_v55, %v2875_v57  ;;  %v2913_v59 = vadd.f32 %v2898_v55, %v2876_v48  ;;  %v2914_v38 = vadd.f32 %v2898_v55, %v2877_v41 }
 0x3bc   :  { %v2915_v3 = vmax.f32 %v2899_v9, 0.0  ;;  %v2916_v4 = vmax.f32 %v2900_v24, 0.0  ;;  %v2917_v50 = vmax.f32 %v2901_v21, 0.0  ;;  %v2918_v32 = vmax.f32 %v2902_v54, 0.0 }
 0x3bd   :  { %v2919_v46 = vmax.f32 %v2903_v25, 0.0  ;;  %v2920_v11 = vmax.f32 %v2904_v42, 0.0  ;;  %v2921_v0 = vmax.f32 %v2905_v49, 0.0  ;;  %v2922_v56 = vmax.f32 %v2906_v30, 0.0 }
 0x3be   :  { %v2923_v39 = vmax.f32 %v2907_v27, 0.0  ;;  %v2924_v31 = vmax.f32 %v2908_v12, 0.0  ;;  %v2925_v6 = vmax.f32 %v2909_v35, 0.0  ;;  %v2926_v18 = vmax.f32 %v2910_v58, 0.0 }
 0x3bf   :  { %v2927_v47 = vmax.f32 %v2911_v60, 0.0  ;;  %v2928_v1 = vmax.f32 %v2912_v15, 0.0  ;;  %v2929_v20 = vmax.f32 %v2913_v59, 0.0  ;;  %v2930_v10 = vmax.f32 %v2914_v38, 0.0 }
 0x3c0   :  { %v3467_v34 = vpack.c.bf16 %v2916_v4, %v2915_v3  ;;  %v3472_v62 = vpack.c.bf16 %v2918_v32, %v2917_v50  ;;  %v3477_v37 = vpack.c.bf16 %v2920_v11, %v2919_v46  ;;  %v3482_v16 = vpack.c.bf16 %v2922_v56, %v2921_v0 }
 0x3c1   :  { %v3487_v53 = vpack.c.bf16 %v2924_v31, %v2923_v39  ;;  %v3492_v26 = vpack.c.bf16 %v2926_v18, %v2925_v6  ;;  %v3497_v29 = vpack.c.bf16 %v2928_v1, %v2927_v47  ;;  %v3502_v14 = vpack.c.bf16 %v2930_v10, %v2929_v20 }
 0x3c2   :  { %3468 = vst [vmem:[%s5963_s5] sm:$0xff] %v3467_v34   ;;  %3539 = vst [vmem:[%s5963_s5 + $0x8] sm:$0xff] %v3472_v62  }
 0x3c3   :  { %3540 = vst [vmem:[%s5963_s5 + $0x10] sm:$0xff] %v3477_v37   ;;  %3541 = vst [vmem:[%s5963_s5 + $0x18] sm:$0xff] %v3482_v16  }
 0x3c4   :  { %3542 = vst [vmem:[%s5963_s5 + $0x20] sm:$0xff] %v3487_v53   ;;  %3543 = vst [vmem:[%s5963_s5 + $0x28] sm:$0xff] %v3492_v26  }
 0x3c5   :  { %3544 = vst [vmem:[%s5963_s5 + $0x30] sm:$0xff] %v3497_v29   ;;  %3545 = vst [vmem:[%s5963_s5 + $0x38] sm:$0xff] %v3502_v14  }

// kernel: generator_forward.7
= control target key start
LH: loop header
LB: loop body
LE: loop exit
PB: predicated region body
PF: predicated region fallthrough
CT: control target
= control target key end

     0   :  { %vm310_vm0 = vcmask 1046528   ;;  %vm479_vm1 = vcmask 261120   ;;  %vm1602_vm2 = vcmask 1045504   ;;  %vm7787_vm3 = vcmask 31744   ;;  %s15750_s1 = inlined_call_operand.vmem [shape: bf16[288,4], index: 1, kind: input, shape index: {}]   ;;  %s15751_s0 = inlined_call_operand.vmem [shape: bf16[2,18,18,32], index: 0, kind: input, shape index: {}]   ;;  %s15752_s2 = inlined_call_operand.vmem [shape: f32[1,4], index: 2, kind: input, shape index: {}]   ;;  %s15753_s3 = inlined_call_operand.vmem [shape: f32[512,4], index: 3, kind: output, shape index: {}]  }
   0x1   :  { %v9225_v0 = vld [vmem:[%s15750_s1 + $0x10] sm:$0xff]   ;;  %v9263_v1 = vld [vmem:[%s15750_s1 + $0x40] sm:$0xff]   ;;  %v9226_v2 = vld [vmem:[%s15750_s1 + $0x18] sm:$0xff]  }
   0x2   :  { %10854 = vmatprep.subr.bf16.mxu1 %v9225_v0  ;;  %10886 = vmatprep.subr.bf16.mxu0 %v9263_v1  ;;  %v9264_v3 = vld [vmem:[%s15750_s1 + $0x48] sm:$0xff]   ;;  %v11615_v4 = vld [vmem:[%s15751_s0] sm:$0xff]   ;;  %v11636_v11 = vld [vmem:[%s15751_s0 + $0x14] sm:$0x1] }
   0x3   :  { %v11620_v5 = vld [vmem:[%s15751_s0 + $0xc] sm:$0xff]   ;;  %10856 = vmatpush3.bf16.msra.mxu1 %v9225_v0  ;;  %10888 = vmatpush3.bf16.msra.mxu0 %v9263_v1  ;;  %v15767_v6 = vunpack.c.l.bf16 %v11615_v4  ;;  %v11624_v7 = vunpack.c.h.bf16 %v11615_v4  ;;  %v11631_v10 = vld [vmem:[%s15751_s0 + $0x8] sm:$0x1]  ;;  %v8882_v13 = vld [vmem:[%s15750_s1] sm:$0xff]   ;;  %v15784_v14 = vunpack.c.l.bf16 %v11636_v11 }
   0x4   :  { %v3222_v8 = vunpack.c.l.bf16 %v11620_v5  ;;  %v15782_v9 = vunpack.c.h.bf16 %v11620_v5  ;;  %16026 = vst [vmem:[#allocation2_spill] sm:$0xff] %v11631_v10  ;;  %10858 = vmatprep.subr.bf16.mxu1 %v9226_v2  ;;  %10890 = vmatprep.subr.bf16.mxu0 %v9264_v3  ;;  %v15759_v12 = vunpack.c.l.bf16 %v11631_v10  ;;  %v11646_v15 = vld [vmem:[%s15751_s0 + $0xc] sm:$0xff]   ;;  %v11659_v21 = vld [vmem:[%s15751_s0 + $0x18] sm:$0xff]   ;;  %v11668_v24 = vld [vmem:[%s15751_s0 + $0x14] sm:$0x1] }
   0x5   :  { %v311_v16 = vrot.slane %v15767_v6, 1  ;;  %v312_v17 = vrot.slane %v11624_v7, 1  ;;  %v9265_v20 = vld [vmem:[%s15750_s1 + $0x50] sm:$0xff]   ;;  %16027 = vst [vmem:[#allocation3_spill] sm:$0xff] %v11659_v21  ;;  %v3417_v23 = vrot.slane %v15784_v14, 1  ;;  %16028 = vst [vmem:[#allocation4_spill] sm:$0xff] %v11668_v24  ;;  %v15766_v28 = vunpack.c.l.bf16 %v11646_v15 }
   0x6   :  { %v3414_v18 = vrot.slane %v3222_v8, 1  ;;  %v3415_v19 = vrot.slane %v15782_v9, 1  ;;  %v314_v22 = vrot.slane %v15759_v12, 1  ;;  %v11673_v25 = vld [vmem:[%s15751_s0 + $0x20] sm:$0x1]  ;;  %v11679_v29 = vunpack.c.h.bf16 %v11646_v15  ;;  %v11684_v30 = vld [vmem:[%s15751_s0 + $0x24] sm:$0xff]  }
   0x7   :  { %10860 = vmatpush3.bf16.msra.mxu1 %v9226_v2  ;;  %10892 = vmatpush3.bf16.msra.mxu0 %v9264_v3  ;;  %v313_v26 = vsel %vm310_vm0, %v311_v16, %v312_v17  ;;  %v15764_v33 = vunpack.c.l.bf16 %v11659_v21  ;;  %v11692_v34 = vunpack.c.h.bf16 %v11659_v21  ;;  %v11697_v35 = vld [vmem:[%s15751_s0 + $0x20] sm:$0x1]  ;;  %v316_v36 = vrot.slane %v15766_v28, 1  ;;  %v11707_v40 = vld [vmem:[%s15751_s0 + $0x2c] sm:$0x1]  ;;  %v11719_v45 = vld [vmem:[%s15751_s0 + $0x24] sm:$0xff]  }
   0x8   :  { %v3416_v27 = vsel %vm310_vm0, %v3414_v18, %v3415_v19  ;;  %16029 = vst [vmem:[#allocation5_spill] sm:$0xff] %v11679_v29  ;;  %9925 = vmatprep.mubr.msk.f32.mxu1 %vm479_vm1, %v313_v26  ;;  %v315_v31 = vsel %vm310_vm0, %v312_v17, %v314_v22  ;;  %v3418_v32 = vsel %vm310_vm0, %v3415_v19, %v3417_v23  ;;  %16030 = vst [vmem:[#allocation6_spill] sm:$0xff] %v11697_v35  ;;  %v11730_v50 = vld [vmem:[%s15751_s0 + $0x30] sm:$0xff]   ;;  %v11740_v55 = vld [vmem:[%s15751_s0 + $0x2c] sm:$0x1] }
   0x9   :  { %10341 = vmatprep.mubr.msk.f32.mxu0 %vm479_vm1, %v3416_v27  ;;  %10862 = vmatprep.subr.bf16.mxu1 %v8882_v13  ;;  %v317_v37 = vrot.slane %v11679_v29, 1  ;;  %v15757_v38 = vunpack.c.l.bf16 %v11668_v24  ;;  %v15776_v39 = vunpack.c.l.bf16 %v11673_v25  ;;  %v3419_v41 = vrot.slane %v15764_v33, 1  ;;  %16031 = vst [vmem:[#allocation7_spill] sm:$0xff] %v11719_v45  ;;  %16032 = vst [vmem:[#allocation8_spill] sm:$0xff] %v11730_v50  ;;  %v11751_v60 = vld [vmem:[%s15751_s0 + $0x38] sm:$0x1] }
   0xa   :  { %10894 = vmatprep.subr.bf16.mxu0 %v9265_v20  ;;  %9926 = vmatmul.mubr.msk.f32.vlgmr.msra.gmra.mrb[0].mxu1 %vm479_vm1, %v315_v31  ;;  %v3420_v42 = vrot.slane %v11692_v34, 1  ;;  %v3228_v43 = vunpack.c.l.bf16 %v11684_v30  ;;  %v15779_v44 = vunpack.c.h.bf16 %v11684_v30  ;;  %v15756_v49 = vunpack.c.l.bf16 %v11697_v35  ;;  %16033 = vst [vmem:[#allocation9_spill] sm:$0xff] %v11740_v55  ;;  %v11765_v1 = vld [vmem:[%s15751_s0 + $0x3c] sm:$0xff]   ;;  %v11779_v16 = vld [vmem:[%s15751_s0 + $0x38] sm:$0x1] }
   0xb   :  { %10342 = vmatmul.mubr.msk.f32.vlgmr.msra.gmra.mrb[0].mxu0 %vm479_vm1, %v3418_v32  ;;  %10864 = vmatpush3.bf16.msra.mxu1 %v8882_v13  ;;  %v318_v46 = vsel %vm310_vm0, %v316_v36, %v317_v37  ;;  %v319_v47 = vrot.slane %v15757_v38, 1  ;;  %v3422_v48 = vrot.slane %v15776_v39, 1  ;;  %v15778_v54 = vunpack.c.l.bf16 %v11707_v40  ;;  %16035 = vst [vmem:[#allocation11_spill] sm:$0xff] %v11779_v16  ;;  %v11784_v17 = vld [vmem:[%s15751_s0 + $0x44] sm:$0x1]  ;;  %v9266_v18 = vld [vmem:[%s15750_s1 + $0x58] sm:$0xff]  }
   0xc   :  { %10896 = vmatpush3.bf16.msra.mxu0 %v9265_v20  ;;  %9928 = vmatprep.mubr.msk.f32.mxu1 %vm479_vm1, %v318_v46  ;;  %v3421_v51 = vsel %vm310_vm0, %v3419_v41, %v3420_v42  ;;  %v3424_v52 = vrot.slane %v3228_v43, 1  ;;  %v3425_v53 = vrot.slane %v15779_v44, 1  ;;  %v324_v58 = vrot.slane %v15756_v49, 1  ;;  %v11802_v36 = vld [vmem:[%s15751_s0 + $0x3c] sm:$0xff]   ;;  %v11814_v46 = vld [vmem:[%s15751_s0 + $0x48] sm:$0xff]  }
   0xd   :  { %10344 = vmatprep.mubr.msk.f32.mxu0 %vm479_vm1, %v3421_v51  ;;  %v320_v56 = vsel %vm310_vm0, %v317_v37, %v319_v47  ;;  %v3423_v57 = vsel %vm310_vm0, %v3420_v42, %v3422_v48  ;;  %v15763_v59 = vunpack.c.l.bf16 %v11719_v45  ;;  %v3427_v62 = vrot.slane %v15778_v54, 1  ;;  %10898 = vmatprep.subr.bf16.mxu0 %v9266_v18  ;;  %16036 = vst [vmem:[#allocation12_spill] sm:$0xff] %v11802_v36  ;;  %v11893_v12 = vld [vmem:[%s15751_s0 + $0x60] sm:$0xff]   ;;  %v11990_v44 = vld [vmem:[%s15751_s0 + $0x74] sm:$0x1] }
   0xe   :  { %9929 = vmatmul.mubr.msk.f32.gmra.mrb[2].mxu1 %vm479_vm1, %v320_v56  ;;  %v3426_v61 = vsel %vm310_vm0, %v3424_v52, %v3425_v53  ;;  %v11759_v63 = vunpack.c.h.bf16 %v11719_v45  ;;  %v15762_v0 = vunpack.c.l.bf16 %v11730_v50  ;;  %v325_v2 = vsel %vm310_vm0, %v3420_v42, %v324_v58  ;;  %16037 = vst [vmem:[#allocation13_spill] sm:$0xff] %v11814_v46  ;;  %16042 = vst [vmem:[#allocation18_spill] sm:$0xff] %v11893_v12  ;;  %v11913_v33 = vld [vmem:[%s15750_s1 + $0x60] sm:$0xff]  }
   0xf   :  { %10345 = vmatmul.mubr.msk.f32.gmra.mrb[2].mxu0 %vm479_vm1, %v3423_v57  ;;  %9931 = vmatprep.mubr.msk.f32.mxu1 %vm479_vm1, %v3421_v51  ;;  %v326_v3 = vrot.slane %v15763_v59, 1  ;;  %v11773_v8 = vunpack.c.h.bf16 %v11730_v50  ;;  %v15755_v13 = vunpack.c.l.bf16 %v11740_v55  ;;  %v3428_v19 = vsel %vm310_vm0, %v3425_v53, %v3427_v62  ;;  %v11824_v53 = vld [vmem:[%s15751_s0 + $0x44] sm:$0x1]  ;;  %v11836_v62 = vld [vmem:[%s15751_s0 + $0x50] sm:$0x1]  ;;  %v9224_v59 = vld [vmem:[%s15750_s1 + $0x8] sm:$0xff]  }
  0x10   :  { %16034 = vst [vmem:[#allocation10_spill] sm:$0xff] %v11759_v63  ;;  %10347 = vmatprep.mubr.msk.f32.mxu0 %vm479_vm1, %v3426_v61  ;;  %v327_v20 = vrot.slane %v11759_v63, 1  ;;  %v3429_v22 = vrot.slane %v15762_v0, 1  ;;  %v15772_v23 = vunpack.c.l.bf16 %v11751_v60  ;;  %v3234_v31 = vunpack.c.l.bf16 %v11765_v1  ;;  %10900 = vmatpush3.bf16.msra.mxu0 %v9266_v18  ;;  %16038 = vst [vmem:[#allocation14_spill] sm:$0xff] %v11824_v53  ;;  %v12004_v9 = vld [vmem:[%s15751_s0 + $0x80] sm:$0x1] }
  0x11   :  { %v3430_v26 = vrot.slane %v11773_v8, 1  ;;  %v329_v27 = vrot.slane %v15755_v13, 1  ;;  %v15775_v32 = vunpack.c.h.bf16 %v11765_v1  ;;  %v15754_v42 = vunpack.c.l.bf16 %v11779_v16  ;;  %10866 = vmatprep.subr.bf16.mxu1 %v9224_v59  ;;  %10902 = vmatprep.subr.bf16.mxu0 %v11913_v33  ;;  %16048 = vst [vmem:[#allocation24_spill] sm:$0xff] %v11990_v44  ;;  %v12023_v14 = vld [vmem:[%s15751_s0 + $0x80] sm:$0x1]  ;;  %v12043_v55 = vld [vmem:[%s15751_s0 + $0x84] sm:$0xff]  }
  0x12   :  { %9932 = vmatmul.mubr.msk.f32.gmra.mrb[4].mxu1 %vm479_vm1, %v325_v2  ;;  %v328_v37 = vsel %vm310_vm0, %v326_v3, %v327_v20  ;;  %v3432_v41 = vrot.slane %v15772_v23, 1  ;;  %v15773_v43 = vunpack.c.l.bf16 %v11784_v17  ;;  %v3434_v51 = vrot.slane %v3234_v31, 1  ;;  %16050 = vst [vmem:[#allocation26_spill] sm:$0xff] %v12023_v14  ;;  %16051 = vst [vmem:[#allocation27_spill] sm:$0xff] %v12043_v55  ;;  %v12055_v16 = vld [vmem:[%s15751_s0 + $0x90] sm:$0xff]  }
  0x13   :  { %10348 = vmatmul.mubr.msk.f32.gmra.mrb[4].mxu0 %vm479_vm1, %v3428_v19  ;;  %9934 = vmatprep.mubr.msk.f32.mxu1 %vm479_vm1, %v328_v37  ;;  %v3431_v47 = vsel %vm310_vm0, %v3429_v22, %v3430_v26  ;;  %v330_v48 = vsel %vm310_vm0, %v327_v20, %v329_v27  ;;  %v3435_v52 = vrot.slane %v15775_v32, 1  ;;  %v334_v57 = vrot.slane %v15754_v42, 1  ;;  %v11849_v20 = vld [vmem:[%s15751_s0 + $0x54] sm:$0xff]   ;;  %v11854_v22 = vld [vmem:[%s15751_s0 + $0x50] sm:$0x1]  ;;  %16052 = vst [vmem:[#allocation28_spill] sm:$0xff] %v12055_v16 }
  0x14   :  { %10350 = vmatprep.mubr.msk.f32.mxu0 %vm479_vm1, %v3431_v47  ;;  %v3433_v56 = vsel %vm310_vm0, %v3430_v26, %v3432_v41  ;;  %v3437_v58 = vrot.slane %v15773_v43, 1  ;;  %v15761_v61 = vunpack.c.l.bf16 %v11802_v36  ;;  %v11840_v3 = vunpack.c.h.bf16 %v11802_v36  ;;  %16040 = vst [vmem:[#allocation16_spill] sm:$0xff] %v11854_v22  ;;  %10868 = vmatpush3.bf16.msra.mxu1 %v9224_v59  ;;  %v11966_v43 = vld [vmem:[%s15751_s0 + $0x6c] sm:$0xff]   ;;  %v11978_v32 = vld [vmem:[%s15751_s0 + $0x78] sm:$0xff]  }
  0x15   :  { %v3436_v2 = vsel %vm310_vm0, %v3434_v51, %v3435_v52  ;;  %v15760_v18 = vunpack.c.l.bf16 %v11814_v46  ;;  %v11844_v19 = vunpack.c.h.bf16 %v11814_v46  ;;  %v335_v27 = vsel %vm310_vm0, %v3430_v26, %v334_v57  ;;  %v11866_v51 = vld [vmem:[%s15751_s0 + $0x5c] sm:$0x1]  ;;  %16046 = vst [vmem:[#allocation22_spill] sm:$0xff] %v11966_v43  ;;  %16047 = vst [vmem:[#allocation23_spill] sm:$0xff] %v11978_v32 }
  0x16   :  { %16039 = vst [vmem:[#allocation15_spill] sm:$0xff] %v11840_v3  ;;  %9935 = vmatmul.mubr.msk.f32.gmra.mrb[6].mxu1 %vm479_vm1, %v330_v48  ;;  %v3438_v31 = vsel %vm310_vm0, %v3435_v52, %v3437_v58  ;;  %v336_v37 = vrot.slane %v15761_v61, 1  ;;  %v15758_v41 = vunpack.c.l.bf16 %v11824_v53  ;;  %v337_v48 = vrot.slane %v11840_v3, 1  ;;  %v12197_v46 = vld [vmem:[%s15751_s0 + $0xbc] sm:$0x1] }
  0x17   :  { %10351 = vmatmul.mubr.msk.f32.gmra.mrb[6].mxu0 %vm479_vm1, %v3433_v56  ;;  %9937 = vmatprep.mubr.msk.f32.mxu1 %vm479_vm1, %v3431_v47  ;;  %v3439_v26 = vrot.slane %v15760_v18, 1  ;;  %v3440_v52 = vrot.slane %v11844_v19, 1  ;;  %v15768_v56 = vunpack.c.l.bf16 %v11836_v62  ;;  %v3240_v58 = vunpack.c.l.bf16 %v11849_v20  ;;  %v11898_v18 = vld [vmem:[%s15751_s0 + $0x5c] sm:$0x1] }
  0x18   :  { %10353 = vmatprep.mubr.msk.f32.mxu0 %vm479_vm1, %v3436_v2  ;;  %v339_v57 = vrot.slane %v15758_v41, 1  ;;  %v15770_v42 = vunpack.c.h.bf16 %v11849_v20  ;;  %v15765_v47 = vunpack.c.l.bf16 %v11854_v22  ;;  %v11883_v2 = vld [vmem:[%s15751_s0 + $0x54] sm:$0xff]   ;;  %v338_v13 = vsel %vm310_vm0, %v336_v37, %v337_v48  ;;  %16043 = vst [vmem:[#allocation19_spill] sm:$0xff] %v11898_v18 }
  0x19   :  { %16041 = vst [vmem:[#allocation17_spill] sm:$0xff] %v11883_v2  ;;  %v3441_v49 = vsel %vm310_vm0, %v3439_v26, %v3440_v52  ;;  %v3442_v38 = vrot.slane %v15768_v56, 1  ;;  %v15769_v41 = vunpack.c.l.bf16 %v11866_v51  ;;  %v3444_v26 = vrot.slane %v3240_v58, 1  ;;  %v11927_v58 = vld [vmem:[%s15751_s0 + $0x68] sm:$0x1] }
  0x1a   :  { %9938 = vmatmul.mubr.msk.f32.gmra.mrb[8].mxu1 %vm479_vm1, %v335_v27  ;;  %v340_v37 = vsel %vm310_vm0, %v337_v48, %v339_v57  ;;  %v3445_v61 = vrot.slane %v15770_v42, 1  ;;  %v344_v0 = vrot.slane %v15765_v47, 1  ;;  %v15771_v48 = vunpack.c.l.bf16 %v11883_v2  ;;  %v11943_v56 = vld [vmem:[%s15751_s0 + $0x68] sm:$0x1]  ;;  %v11954_v42 = vld [vmem:[%s15751_s0 + $0x74] sm:$0x1] }
  0x1b   :  { %10354 = vmatmul.mubr.msk.f32.gmra.mrb[8].mxu0 %vm479_vm1, %v3438_v31  ;;  %9940 = vmatprep.mubr.msk.f32.mxu1 %vm479_vm1, %v338_v13  ;;  %v3443_v27 = vsel %vm310_vm0, %v3440_v52, %v3442_v38  ;;  %v3447_v31 = vrot.slane %v15769_v41, 1  ;;  %v11922_v57 = vunpack.c.h.bf16 %v11883_v2  ;;  %v11932_v13 = vld [vmem:[%s15751_s0 + $0x6c] sm:$0xff]   ;;  %v15774_v28 = vunpack.c.l.bf16 %v11893_v12  ;;  %16045 = vst [vmem:[#allocation21_spill] sm:$0xff] %v11943_v56 }
  0x1c   :  { %10356 = vmatprep.mubr.msk.f32.mxu0 %vm479_vm1, %v3441_v49  ;;  %v3446_v38 = vsel %vm310_vm0, %v3444_v26, %v3445_v61  ;;  %v345_v47 = vsel %vm310_vm0, %v3440_v52, %v344_v0  ;;  %v11938_v6 = vunpack.c.h.bf16 %v11893_v12  ;;  %v346_v26 = vrot.slane %v15771_v48, 1 }
  0x1d   :  { %16044 = vst [vmem:[#allocation20_spill] sm:$0xff] %v11922_v57  ;;  %v3448_v41 = vsel %vm310_vm0, %v3445_v61, %v3447_v31  ;;  %v347_v0 = vrot.slane %v11922_v57, 1  ;;  %v15777_v52 = vunpack.c.l.bf16 %v11898_v18  ;;  %v3449_v61 = vrot.slane %v15774_v28, 1 }
  0x1e   :  { %9941 = vmatmul.mubr.msk.f32.gmra.mrb[10].mxu1 %vm479_vm1, %v340_v37  ;;  %v3450_v31 = vrot.slane %v11938_v6, 1  ;;  %v15780_v48 = vunpack.c.l.bf16 %v11927_v58  ;;  %v3246_v23 = vunpack.c.l.bf16 %v11932_v13  ;;  %v15783_v28 = vunpack.c.l.bf16 %v11943_v56 }
  0x1f   :  { %10357 = vmatmul.mubr.msk.f32.gmra.mrb[10].mxu0 %vm479_vm1, %v3443_v27  ;;  %9943 = vmatprep.mubr.msk.f32.mxu1 %vm479_vm1, %v3441_v49  ;;  %v348_v59 = vsel %vm310_vm0, %v346_v26, %v347_v0  ;;  %v349_v37 = vrot.slane %v15777_v52, 1  ;;  %v15781_v27 = vunpack.c.h.bf16 %v11932_v13  ;;  %v15785_v26 = vunpack.c.l.bf16 %v11954_v42 }
  0x20   :  { %10359 = vmatprep.mubr.msk.f32.mxu0 %vm479_vm1, %v3446_v38  ;;  %v3451_v39 = vsel %vm310_vm0, %v3449_v61, %v3450_v31  ;;  %v3452_v49 = vrot.slane %v15780_v48, 1  ;;  %v3454_v38 = vrot.slane %v3246_v23, 1  ;;  %v15793_v54 = vunpack.c.l.bf16 %v11966_v43 }
  0x21   :  { %v3455_v52 = vrot.slane %v15781_v27, 1  ;;  %v350_v61 = vsel %vm310_vm0, %v347_v0, %v349_v37  ;;  %v354_v23 = vrot.slane %v15783_v28, 1  ;;  %v11998_v48 = vunpack.c.h.bf16 %v11966_v43 }
  0x22   :  { %9944 = vmatmul.mubr.msk.f32.gmra.mrb[12].mxu1 %vm479_vm1, %v345_v47  ;;  %v15792_v27 = vunpack.c.l.bf16 %v11978_v32  ;;  %v12009_v47 = vld [vmem:[%s15751_s0 + $0x84] sm:$0xff]   ;;  %v3457_v37 = vrot.slane %v15785_v26, 1  ;;  %v12018_v28 = vunpack.c.h.bf16 %v11978_v32  ;;  %v15795_v56 = vunpack.c.l.bf16 %v11990_v44 }
  0x23   :  { %10360 = vmatmul.mubr.msk.f32.gmra.mrb[12].mxu0 %vm479_vm1, %v3448_v41  ;;  %16049 = vst [vmem:[#allocation25_spill] sm:$0xff] %v11998_v48  ;;  %9946 = vmatprep.mubr.msk.f32.mxu1 %vm479_vm1, %v348_v59  ;;  %v3453_v41 = vsel %vm310_vm0, %v3450_v31, %v3452_v49  ;;  %v3456_v0 = vsel %vm310_vm0, %v3454_v38, %v3455_v52  ;;  %v12028_v59 = vld [vmem:[%s15751_s0 + $0x8c] sm:$0x1]  ;;  %v356_v49 = vrot.slane %v15793_v54, 1  ;;  %v357_v38 = vrot.slane %v11998_v48, 1 }
  0x24   :  { %10362 = vmatprep.mubr.msk.f32.mxu0 %vm479_vm1, %v3451_v39  ;;  %v3459_v26 = vrot.slane %v15792_v27, 1  ;;  %v3460_v18 = vrot.slane %v12018_v28, 1  ;;  %v3252_v53 = vunpack.c.l.bf16 %v12009_v47  ;;  %v355_v27 = vsel %vm310_vm0, %v3450_v31, %v354_v23 }
  0x25   :  { %v359_v54 = vrot.slane %v15795_v56, 1  ;;  %v16053_v31 = vunpack.c.l.bf16 %v12004_v9  ;;  %v16054_v56 = vunpack.c.h.bf16 %v12009_v47  ;;  %v358_v35 = vsel %vm310_vm0, %v356_v49, %v357_v38  ;;  %v12089_v49 = vld [vmem:[%s15751_s0 + $0x9c] sm:$0xff]  }
  0x26   :  { %9947 = vmatmul.mubr.msk.f32.gmra.mrb[14].mxu1 %vm479_vm1, %v350_v61  ;;  %v3458_v61 = vsel %vm310_vm0, %v3455_v52, %v3457_v37  ;;  %v3461_v44 = vsel %vm310_vm0, %v3459_v26, %v3460_v18  ;;  %v15801_v10 = vunpack.c.l.bf16 %v12043_v55  ;;  %v12103_v37 = vunpack.c.h.bf16 %v12055_v16 }
  0x27   :  { %10363 = vmatmul.mubr.msk.f32.gmra.mrb[14].mxu0 %vm479_vm1, %v3453_v41  ;;  %9949 = vmatprep.mubr.msk.f32.mxu1 %vm479_vm1, %v3451_v39  ;;  %v3462_v23 = vrot.slane %v16053_v31, 1  ;;  %v3464_v41 = vrot.slane %v3252_v53, 1  ;;  %v3465_v22 = vrot.slane %v16054_v56, 1  ;;  %v360_v24 = vsel %vm310_vm0, %v357_v38, %v359_v54  ;;  %v12071_v39 = vld [vmem:[%s15751_s0 + $0x8c] sm:$0x1] }
  0x28   :  { %10365 = vmatprep.mubr.msk.f32.mxu0 %vm479_vm1, %v3456_v0  ;;  %16055 = vst [vmem:[#allocation29_spill] sm:$0xff] %v12071_v39  ;;  %v12076_v53 = vld [vmem:[%s15751_s0 + $0x98] sm:$0x1]  ;;  %v16056_v56 = vunpack.c.l.bf16 %v12023_v14  ;;  %v16057_v0 = vunpack.c.l.bf16 %v12028_v59  ;;  %v12083_v54 = vunpack.c.h.bf16 %v12043_v55 }
  0x29   :  { %v12094_v38 = vld [vmem:[%s15751_s0 + $0x98] sm:$0x1]  ;;  %v3463_v31 = vsel %vm310_vm0, %v3460_v18, %v3462_v23  ;;  %v12129_v23 = vld [vmem:[%s15750_s1 + $0x20] sm:$0xff]   ;;  %v16062_v48 = vunpack.c.l.bf16 %v12076_v53 }
  0x2a   :  { %v364_v52 = vrot.slane %v16056_v56, 1  ;;  %v3467_v26 = vrot.slane %v16057_v0, 1  ;;  %16058 = vst [vmem:[#allocation30_spill] sm:$0xff] %v12083_v54  ;;  %16059 = vst [vmem:[#allocation31_spill] sm:$0xff] %v12094_v38  ;;  %9950 = vmatmul.mubr.msk.f32.gmra.mrb[16].mxu1 %vm479_vm1, %v355_v27  ;;  %v3466_v56 = vsel %vm310_vm0, %v3464_v41, %v3465_v22  ;;  %v366_v0 = vrot.slane %v15801_v10, 1  ;;  %10870 = vmatprep.subr.bf16.mxu1 %v12129_v23 }
  0x2b   :  { %10366 = vmatmul.mubr.msk.f32.gmra.mrb[16].mxu0 %vm479_vm1, %v3458_v61  ;;  %9952 = vmatprep.mubr.msk.f32.mxu1 %vm479_vm1, %v358_v35  ;;  %v367_v14 = vrot.slane %v12083_v54, 1  ;;  %v16060_v27 = vunpack.c.l.bf16 %v12055_v16  ;;  %v15810_v61 = vunpack.c.l.bf16 %v12071_v39  ;;  %v12115_v41 = vld [vmem:[%s15751_s0 + $0xa4] sm:$0x1]  ;;  %v3470_v10 = vrot.slane %v12103_v37, 1  ;;  %v12138_v54 = vld [vmem:[%s15751_s0 + $0xa8] sm:$0xff]  }
  0x2c   :  { %10368 = vmatprep.mubr.msk.f32.mxu0 %vm479_vm1, %v3461_v44  ;;  %v3258_v35 = vunpack.c.l.bf16 %v12089_v49  ;;  %v3472_v43 = vrot.slane %v16062_v48, 1  ;;  %16063 = vst [vmem:[#allocation33_spill] sm:$0xff] %v12138_v54  ;;  %v365_v55 = vsel %vm310_vm0, %v3460_v18, %v364_v52  ;;  %v3468_v12 = vsel %vm310_vm0, %v3465_v22, %v3467_v26  ;;  %v12149_v48 = vld [vmem:[%s15751_s0 + $0xa4] sm:$0x1] }
  0x2d   :  { %v3469_v32 = vrot.slane %v16060_v27, 1  ;;  %v12124_v27 = vld [vmem:[%s15751_s0 + $0x9c] sm:$0xff]   ;;  %v369_v16 = vrot.slane %v15810_v61, 1  ;;  %16064 = vst [vmem:[#allocation34_spill] sm:$0xff] %v12149_v48  ;;  %v368_v39 = vsel %vm310_vm0, %v366_v0, %v367_v14  ;;  %v16065_v22 = vunpack.c.h.bf16 %v12089_v49 }
  0x2e   :  { %16061 = vst [vmem:[#allocation32_spill] sm:$0xff] %v12124_v27  ;;  %9953 = vmatmul.mubr.msk.f32.gmra.mrb[18].mxu1 %vm479_vm1, %v360_v24  ;;  %v16066_v26 = vunpack.c.l.bf16 %v12094_v38  ;;  %v12161_v57 = vunpack.c.h.bf16 %v12124_v27  ;;  %v16069_v18 = vunpack.c.l.bf16 %v12115_v41  ;;  %v16071_v2 = vunpack.c.l.bf16 %v12138_v54 }
  0x2f   :  { %10369 = vmatmul.mubr.msk.f32.gmra.mrb[18].mxu0 %vm479_vm1, %v3463_v31  ;;  %9955 = vmatprep.mubr.msk.f32.mxu1 %vm479_vm1, %v3461_v44  ;;  %v3471_v24 = vsel %vm310_vm0, %v3469_v32, %v3470_v10  ;;  %v3474_v31 = vrot.slane %v3258_v35, 1  ;;  %v3475_v52 = vrot.slane %v16065_v22, 1  ;;  %v12172_v32 = vld [vmem:[%s15751_s0 + $0xb4] sm:$0xff]   ;;  %v370_v0 = vsel %vm310_vm0, %v367_v14, %v369_v16  ;;  %v12183_v44 = vld [vmem:[%s15751_s0 + $0xb0] sm:$0x1] }
  0x30   :  { %10371 = vmatprep.mubr.msk.f32.mxu0 %vm479_vm1, %v3466_v56  ;;  %v374_v61 = vrot.slane %v16066_v26, 1  ;;  %16067 = vst [vmem:[#allocation35_spill] sm:$0xff] %v12161_v57  ;;  %v12167_v56 = vld [vmem:[%s15751_s0 + $0xb0] sm:$0x1]  ;;  %v3473_v35 = vsel %vm310_vm0, %v3470_v10, %v3472_v43  ;;  %v12177_v22 = vunpack.c.h.bf16 %v12138_v54  ;;  %16068 = vst [vmem:[#allocation36_spill] sm:$0xff] %v12183_v44  ;;  %v3477_v38 = vrot.slane %v16069_v18, 1 }
  0x31   :  { %v16070_v14 = vunpack.c.l.bf16 %v12124_v27  ;;  %v377_v43 = vrot.slane %v12161_v57, 1  ;;  %v3479_v26 = vrot.slane %v16071_v2, 1  ;;  %v3264_v18 = vunpack.c.l.bf16 %v12172_v32  ;;  %v12228_v27 = vld [vmem:[%s15751_s0 + $0xbc] sm:$0x1] }
  0x32   :  { %9956 = vmatmul.mubr.msk.f32.gmra.mrb[20].mxu1 %vm479_vm1, %v365_v55  ;;  %v3476_v54 = vsel %vm310_vm0, %v3474_v31, %v3475_v52  ;;  %v16072_v2 = vunpack.c.l.bf16 %v12149_v48  ;;  %v12218_v55 = vld [vmem:[%s15751_s0 + $0xc0] sm:$0xff]   ;;  %v375_v31 = vsel %vm310_vm0, %v3470_v10, %v374_v61  ;;  %16074 = vst [vmem:[#allocation38_spill] sm:$0xff] %v12228_v27  ;;  %v16080_v50 = vunpack.c.l.bf16 %v12183_v44 }
  0x33   :  { %10372 = vmatmul.mubr.msk.f32.gmra.mrb[20].mxu0 %vm479_vm1, %v3468_v12  ;;  %v376_v16 = vrot.slane %v16070_v14, 1  ;;  %9958 = vmatprep.mubr.msk.f32.mxu1 %vm479_vm1, %v368_v39  ;;  %v3480_v12 = vrot.slane %v12177_v22, 1  ;;  %v12213_v39 = vld [vmem:[%s15751_s0 + $0xb4] sm:$0xff]   ;;  %v3484_v10 = vrot.slane %v3264_v18, 1  ;;  %v16086_v18 = vunpack.c.h.bf16 %v12218_v55 }
  0x34   :  { %10374 = vmatprep.mubr.msk.f32.mxu0 %vm479_vm1, %v3471_v24  ;;  %v379_v57 = vrot.slane %v16072_v2, 1  ;;  %16073 = vst [vmem:[#allocation37_spill] sm:$0xff] %v12213_v39  ;;  %v3478_v2 = vsel %vm310_vm0, %v3475_v52, %v3477_v38  ;;  %v16076_v38 = vunpack.c.h.bf16 %v12172_v32  ;;  %v12240_v52 = vld [vmem:[%s15751_s0 + $0xc8] sm:$0x1]  ;;  %v384_v63 = vrot.slane %v16080_v50, 1 }
  0x35   :  { %v378_v3 = vsel %vm310_vm0, %v376_v16, %v377_v43  ;;  %v9007_v16 = vunpack.c.l.bf16 %v12218_v55 }
  0x36   :  { %9959 = vmatmul.mubr.msk.f32.gmra.mrb[22].mxu1 %vm479_vm1, %v370_v0  ;;  %v3481_v0 = vsel %vm310_vm0, %v3479_v26, %v3480_v12  ;;  %v3485_v61 = vrot.slane %v16076_v38, 1  ;;  %v12249_v26 = vunpack.c.h.bf16 %v12213_v39  ;;  %v16079_v38 = vunpack.c.l.bf16 %v11636_v11 }
  0x37   :  { %10375 = vmatmul.mubr.msk.f32.gmra.mrb[22].mxu0 %vm479_vm1, %v3473_v35  ;;  %9961 = vmatprep.mubr.msk.f32.mxu1 %vm479_vm1, %v3471_v24  ;;  %v16075_v35 = vunpack.c.l.bf16 %v12167_v56  ;;  %v12245_v24 = vld [vmem:[%s15751_s0 + $0xd8] sm:$0xff]   ;;  %v380_v36 = vsel %vm310_vm0, %v377_v43, %v379_v57  ;;  %v3489_v21 = vrot.slane %v9007_v16, 1  ;;  %v12303_v16 = vld [vmem:[%s15751_s0 + $0xec] sm:$0x1] }
  0x38   :  { %10377 = vmatprep.mubr.msk.f32.mxu0 %vm479_vm1, %v3476_v54  ;;  %16077 = vst [vmem:[#allocation39_spill] sm:$0xff] %v12245_v24  ;;  %16078 = vst [vmem:[#allocation40_spill] sm:$0xff] %v12249_v26  ;;  %v4258_v48 = vrot.slane %v16079_v38, 2  ;;  %v16081_v54 = vunpack.c.l.bf16 %v12197_v46  ;;  %v12269_v11 = vunpack.c.h.bf16 %v12245_v24  ;;  %v3486_v57 = vsel %vm310_vm0, %v3484_v10, %v3485_v61  ;;  %v12290_v10 = vld [vmem:[%s15751_s0 + $0xe4] sm:$0xff]  }
  0x39   :  { %v3482_v14 = vrot.slane %v16075_v35, 1  ;;  %v8336_v35 = vld [vmem:[%s15751_s0 + $0xc] sm:$0xe]  ;;  %v16085_v38 = vunpack.c.l.bf16 %v12213_v39  ;;  %16087 = vst [vmem:[#allocation43_spill] sm:$0xff] %v12303_v16 }
  0x3a   :  { %v3487_v45 = vrot.slane %v16081_v54, 1  ;;  %9962 = vmatmul.mubr.msk.f32.gmra.mrb[24].mxu1 %vm479_vm1, %v375_v31  ;;  %16082 = vst [vmem:[#allocation41_spill] sm:$0xff] %v12269_v11  ;;  %v4191_v43 = vunpack.c.l.bf16 %v8336_v35  ;;  %v16083_v31 = vunpack.c.h.bf16 %v11620_v5  ;;  %v12280_v54 = vld [vmem:[%s15751_s0 + $0xe0] sm:$0x1]  ;;  %v385_v5 = vsel %vm310_vm0, %v3480_v12, %v384_v63 }
  0x3b   :  { %10378 = vmatmul.mubr.msk.f32.gmra.mrb[24].mxu0 %vm479_vm1, %v3478_v2  ;;  %9964 = vmatprep.mubr.msk.f32.mxu1 %vm479_vm1, %v378_v3  ;;  %v3483_v50 = vsel %vm310_vm0, %v3480_v12, %v3482_v14  ;;  %16084 = vst [vmem:[#allocation42_spill] sm:$0xff] %v12280_v54  ;;  %v386_v29 = vrot.slane %v16085_v38, 1  ;;  %v387_v3 = vrot.slane %v12249_v26, 1  ;;  %v3490_v14 = vrot.slane %v16086_v18, 1  ;;  %v8337_v38 = vld [vmem:[%s15751_s0 + $0x18] sm:$0xe] }
  0x3c   :  { %10380 = vmatprep.mubr.msk.f32.mxu0 %vm479_vm1, %v3481_v0  ;;  %v4256_v2 = vrot.slane %v16083_v31, 2  ;;  %v3488_v35 = vsel %vm310_vm0, %v3485_v61, %v3487_v45  ;;  %v16088_v63 = vunpack.c.l.bf16 %v12228_v27  ;;  %v16089_v45 = vunpack.c.l.bf16 %v12240_v52  ;;  %v12317_v26 = vld [vmem:[%s15751_s0 + $0xf0] sm:$0xff]  }
  0x3d   :  { %v16090_v61 = vunpack.c.l.bf16 %v12245_v24  ;;  %v392_v44 = vrot.slane %v12269_v11, 1  ;;  %v3491_v27 = vsel %vm310_vm0, %v3489_v21, %v3490_v14  ;;  %v4192_v11 = vunpack.c.l.bf16 %v8337_v38 }
  0x3e   :  { %v12295_v31 = vsel %vm1602_vm2, %v4256_v2, %v4258_v48  ;;  %9965 = vmatmul.mubr.msk.f32.gmra.mrb[26].mxu1 %vm479_vm1, %v380_v36  ;;  %v389_v12 = vrot.slane %v16088_v63, 1  ;;  %v3492_v48 = vrot.slane %v16089_v45, 1  ;;  %v4255_v36 = vrot.slane %v4191_v43, 2 }
  0x3f   :  { %10381 = vmatmul.mubr.msk.f32.gmra.mrb[26].mxu0 %vm479_vm1, %v3483_v50  ;;  %v391_v18 = vrot.slane %v16090_v61, 1  ;;  %9967 = vmatprep.mubr.msk.f32.mxu1 %vm479_vm1, %v3481_v0  ;;  %v15840_v50 = vunpack.c.l.bf16 %v12280_v54  ;;  %v15841_v63 = vunpack.c.l.bf16 %v12290_v10  ;;  %v12324_v45 = vunpack.c.h.bf16 %v12290_v10 }
  0x40   :  { %10383 = vmatprep.mubr.msk.f32.mxu0 %vm479_vm1, %v3486_v57  ;;  %v388_v61 = vsel %vm310_vm0, %v386_v29, %v387_v3  ;;  %v12331_v0 = vunpack.c.h.bf16 %v12317_v26  ;;  %v8338_v57 = vld [vmem:[%s15751_s0 + $0x24] sm:$0xe]  ;;  %v390_v29 = vsel %vm310_vm0, %v387_v3, %v389_v12  ;;  %v3493_v21 = vsel %vm310_vm0, %v3490_v14, %v3492_v48  ;;  %v12354_v14 = vld [vmem:[%s15751_s0 + $0xf8] sm:$0x1] }
  0x41   :  { %16091 = vst [vmem:[#allocation44_spill] sm:$0xff] %v12324_v45  ;;  %v393_v43 = vsel %vm310_vm0, %v391_v18, %v392_v44  ;;  %v16092_v38 = vunpack.c.h.bf16 %v11684_v30  ;;  %v4257_v24 = vsel %vm1602_vm2, %v4255_v36, %v4256_v2  ;;  %v397_v3 = vrot.slane %v12324_v45, 1  ;;  %16093 = vst [vmem:[#allocation45_spill] sm:$0xff] %v12354_v14  ;;  %v12359_v30 = vld [vmem:[%s15751_s0 + $0xfc] sm:$0xff]   ;;  %v8339_v36 = vld [vmem:[%s15751_s0 + $0x30] sm:$0xe] }
  0x42   :  { %9968 = vmatmul.mubr.msk.f32.gmra.mrb[28].mxu1 %vm479_vm1, %v385_v5  ;;  %v394_v5 = vrot.slane %v15840_v50, 1  ;;  %16094 = vst [vmem:[#allocation46_spill] sm:$0xff] %v12359_v30  ;;  %v12362_v2 = vrot.slane %v11692_v34, 2  ;;  %v4193_v12 = vunpack.c.l.bf16 %v8338_v57  ;;  %v16096_v48 = vunpack.c.l.bf16 %v11707_v40 }
  0x43   :  { %10384 = vmatmul.mubr.msk.f32.gmra.mrb[28].mxu0 %vm479_vm1, %v3488_v35  ;;  %v4266_v39 = vrot.slane %v16092_v38, 2  ;;  %9970 = vmatprep.mubr.msk.f32.mxu1 %vm479_vm1, %v388_v61  ;;  %v396_v35 = vrot.slane %v15841_v63, 1  ;;  %v16097_v61 = vunpack.c.l.bf16 %v12303_v16  ;;  %v16098_v50 = vunpack.c.l.bf16 %v11673_v25 }
  0x44   :  { %10386 = vmatprep.mubr.msk.f32.mxu0 %vm479_vm1, %v3491_v27  ;;  %v4260_v27 = vrot.slane %v4192_v11, 2  ;;  %16095 = vst [vmem:[#allocation47_spill] sm:$0xff] %v12362_v2  ;;  %v4268_v18 = vrot.slane %v16096_v48, 2  ;;  %v16099_v54 = vunpack.c.l.bf16 %v12317_v26  ;;  %v12376_v45 = vrot.slane %v12331_v0, 1 }
  0x45   :  { %v399_v38 = vrot.slane %v16097_v61, 1  ;;  %v4263_v63 = vrot.slane %v16098_v50, 2  ;;  %v15845_v40 = vunpack.c.l.bf16 %v12354_v14  ;;  %v15846_v48 = vunpack.c.l.bf16 %v12359_v30 }
  0x46   :  { %v401_v11 = vrot.slane %v16099_v54, 1  ;;  %16100 = vst [vmem:[#allocation48_spill] sm:$0xff] %v12376_v45  ;;  %9971 = vmatmul.mubr.msk.f32.gmra.mrb[30].mxu1 %vm479_vm1, %v390_v29  ;;  %v12382_v57 = vsel %vm1602_vm2, %v4266_v39, %v4268_v18  ;;  %v395_v25 = vsel %vm310_vm0, %v392_v44, %v394_v5  ;;  %v12389_v54 = vunpack.c.h.bf16 %v12359_v30  ;;  %v12397_v18 = vld [vmem:[%s15751_s0 + $0x104] sm:$0x1] }
  0x47   :  { %10387 = vmatmul.mubr.msk.f32.gmra.mrb[30].mxu0 %vm479_vm1, %v3493_v21  ;;  %9973 = vmatprep.mubr.msk.f32.mxu1 %vm479_vm1, %v393_v43  ;;  %v4194_v50 = vunpack.c.l.bf16 %v8339_v36  ;;  %v398_v29 = vsel %vm310_vm0, %v396_v35, %v397_v3  ;;  %v4262_v21 = vsel %vm1602_vm2, %v4260_v27, %v12362_v2  ;;  %v4265_v61 = vrot.slane %v4193_v12, 2  ;;  %16102 = vst [vmem:[#allocation50_spill] sm:$0xff] %v12397_v18  ;;  %v8340_v35 = vld [vmem:[%s15751_s0 + $0x3c] sm:$0xe]  ;;  %v12419_v36 = vld [vmem:[%s15751_s0 + $0x114] sm:$0xff]  }
  0x48   :  { %10445 = vmatprep.mubr.msk.f32.mxu0 %vm479_vm1, %v4257_v24  ;;  %16101 = vst [vmem:[#allocation49_spill] sm:$0xff] %v12389_v54  ;;  %v12402_v24 = vld [vmem:[%s15751_s0 + $0x108] sm:$0xff]   ;;  %v400_v44 = vsel %vm310_vm0, %v397_v3, %v399_v38  ;;  %v4264_v43 = vsel %vm1602_vm2, %v12362_v2, %v4263_v63  ;;  %v403_v5 = vsel %vm310_vm0, %v401_v11, %v12376_v45  ;;  %v16104_v27 = vunpack.c.h.bf16 %v11765_v1  ;;  %v12437_v11 = vld [vmem:[%s15751_s0 + $0x110] sm:$0x1] }
  0x49   :  { %16103 = vst [vmem:[#allocation51_spill] sm:$0xff] %v12402_v24  ;;  %v9284_v63 = vld [vmem:[%s15750_s1 + $0x68] sm:$0xff]   ;;  %v404_v3 = vrot.slane %v15845_v40, 1  ;;  %v406_v1 = vrot.slane %v15846_v48, 1  ;;  %v12432_v38 = vrot.slane %v11773_v8, 2  ;;  %16106 = vst [vmem:[#allocation53_spill] sm:$0xff] %v12437_v11  ;;  %v15851_v48 = vunpack.c.l.bf16 %v12397_v18 }
  0x4a   :  { %v12414_v12 = vrot.slane %v16104_v27, 2  ;;  %9974 = vmatmul.mubr.msk.f32.gmra.mrb[32].mxu1 %vm479_vm1, %v395_v25  ;;  %v16107_v27 = vunpack.c.l.bf16 %v11784_v17  ;;  %v4270_v40 = vrot.slane %v4194_v50, 2  ;;  %v15852_v14 = vunpack.c.l.bf16 %v12402_v24 }
  0x4b   :  { %10446 = vmatmul.mubr.msk.f32.vlgmr.msra.gmra.mrb[0].mxu0 %vm479_vm1, %v12295_v31  ;;  %16105 = vst [vmem:[#allocation52_spill] sm:$0xff] %v12432_v38  ;;  %9976 = vmatprep.mubr.msk.f32.mxu1 %vm479_vm1, %v398_v29  ;;  %v407_v31 = vrot.slane %v12389_v54, 1  ;;  %v4267_v16 = vsel %vm1602_vm2, %v4265_v61, %v4266_v39  ;;  %v12449_v2 = vunpack.c.h.bf16 %v12402_v24  ;;  %v4195_v17 = vunpack.c.l.bf16 %v8340_v35 }
  0x4c   :  { %v4278_v25 = vrot.slane %v16107_v27, 2  ;;  %10904 = vmatpush3.bf16.msra.mxu0 %v11913_v33  ;;  %10448 = vmatprep.mubr.msk.f32.mxu0 %vm479_vm1, %v4262_v21  ;;  %v15860_v29 = vunpack.c.l.bf16 %v12437_v11  ;;  %v8341_v27 = vld [vmem:[%s15751_s0 + $0x48] sm:$0xe]  ;;  %v405_v39 = vsel %vm310_vm0, %v12376_v45, %v404_v3  ;;  %v16108_v21 = vunpack.c.l.bf16 %v11751_v60 }
  0x4d   :  { %10906 = vmatprep.subr.bf16.mxu0 %v9284_v63  ;;  %v12467_v35 = vunpack.c.h.bf16 %v12419_v36  ;;  %v409_v60 = vrot.slane %v15851_v48, 1  ;;  %v411_v3 = vrot.slane %v15852_v14, 1  ;;  %v8342_v48 = vld [vmem:[%s15751_s0 + $0x54] sm:$0xe]  ;;  %v16111_v14 = vunpack.c.h.bf16 %v11849_v20 }
  0x4e   :  { %v12453_v33 = vsel %vm1602_vm2, %v12414_v12, %v4278_v25  ;;  %9977 = vmatmul.mubr.msk.f32.gmra.mrb[34].mxu1 %vm479_vm1, %v400_v44  ;;  %v4273_v61 = vrot.slane %v16108_v21, 2  ;;  %v12472_v25 = vld [vmem:[%s15750_s1 + $0x70] sm:$0xff]   ;;  %v408_v44 = vsel %vm310_vm0, %v406_v1, %v407_v31  ;;  %v12486_v21 = vld [vmem:[%s15751_s0 + $0x11c] sm:$0x1]  ;;  %v4196_v1 = vunpack.c.l.bf16 %v8341_v27 }
  0x4f   :  { %10449 = vmatmul.mubr.msk.f32.gmra.mrb[2].mxu0 %vm479_vm1, %v4264_v43  ;;  %9979 = vmatprep.mubr.msk.f32.mxu1 %vm479_vm1, %v403_v5  ;;  %v4272_v43 = vsel %vm1602_vm2, %v4270_v40, %v12432_v38  ;;  %16109 = vst [vmem:[#allocation54_spill] sm:$0xff] %v12486_v21  ;;  %v12494_v5 = vrot.slane %v12449_v2, 1  ;;  %v4275_v40 = vrot.slane %v4195_v17, 2  ;;  %v4286_v50 = vrot.slane %v16111_v14, 2 }
  0x50   :  { %10451 = vmatprep.mubr.msk.f32.mxu0 %vm479_vm1, %v4267_v16  ;;  %v12491_v16 = vld [vmem:[%s15751_s0 + $0x120] sm:$0xff]   ;;  %10908 = vmatpush3.bf16.msra.mxu0 %v9284_v63  ;;  %v414_v45 = vrot.slane %v15860_v29, 1  ;;  %v16112_v18 = vunpack.c.l.bf16 %v12419_v36  ;;  %v16113_v54 = vunpack.c.l.bf16 %v11866_v51  ;;  %v417_v20 = vrot.slane %v12467_v35, 1 }
  0x51   :  { %16110 = vst [vmem:[#allocation55_spill] sm:$0xff] %v12494_v5  ;;  %10910 = vmatprep.subr.bf16.mxu0 %v12472_v25  ;;  %v15861_v14 = vunpack.c.l.bf16 %v12486_v21  ;;  %v15862_v63 = vunpack.c.l.bf16 %v12491_v16  ;;  %v12515_v17 = vunpack.c.h.bf16 %v12491_v16  ;;  %v410_v51 = vsel %vm310_vm0, %v407_v31, %v409_v60  ;;  %v12535_v31 = vld [vmem:[%s15751_s0 + $0x128] sm:$0x1] }
  0x52   :  { %v416_v24 = vrot.slane %v16112_v18, 1  ;;  %v4288_v30 = vrot.slane %v16113_v54, 2  ;;  %9980 = vmatmul.mubr.msk.f32.gmra.mrb[36].mxu1 %vm479_vm1, %v405_v39  ;;  %v4274_v54 = vsel %vm1602_vm2, %v12432_v38, %v4273_v61  ;;  %v4197_v18 = vunpack.c.l.bf16 %v8342_v48  ;;  %16115 = vst [vmem:[#allocation57_spill] sm:$0xff] %v12535_v31 }
  0x53   :  { %10452 = vmatmul.mubr.msk.f32.gmra.mrb[4].mxu0 %vm479_vm1, %v12382_v57  ;;  %9982 = vmatprep.mubr.msk.f32.mxu1 %vm479_vm1, %v408_v44  ;;  %v413_v27 = vsel %vm310_vm0, %v411_v3, %v12494_v5  ;;  %v4277_v39 = vsel %vm1602_vm2, %v4275_v40, %v12414_v12  ;;  %v4280_v29 = vrot.slane %v4196_v1, 2  ;;  %v12530_v44 = vrot.slane %v11844_v19, 2  ;;  %v12567_v1 = vld [vmem:[%s15751_s0 + $0x138] sm:$0xff]  }
  0x54   :  { %10454 = vmatprep.mubr.msk.f32.mxu0 %vm479_vm1, %v4272_v43  ;;  %v12523_v57 = vsel %vm1602_vm2, %v4286_v50, %v4288_v30  ;;  %v12540_v30 = vld [vmem:[%s15751_s0 + $0x12c] sm:$0xff]   ;;  %v415_v48 = vsel %vm310_vm0, %v12494_v5, %v414_v45  ;;  %v16116_v61 = vunpack.c.l.bf16 %v11836_v62  ;;  %v8343_v43 = vld [vmem:[%s15751_s0 + $0x60] sm:$0xe]  ;;  %v418_v60 = vsel %vm310_vm0, %v416_v24, %v417_v20  ;;  %v12562_v62 = vld [vmem:[%s15751_s0 + $0x134] sm:$0x1] }
  0x55   :  { %16114 = vst [vmem:[#allocation56_spill] sm:$0xff] %v12530_v44  ;;  %v419_v3 = vrot.slane %v15861_v14, 1  ;;  %v421_v40 = vrot.slane %v15862_v63, 1  ;;  %v12557_v45 = vrot.slane %v12515_v17, 1  ;;  %16118 = vst [vmem:[#allocation59_spill] sm:$0xff] %v12562_v62  ;;  %v4285_v24 = vrot.slane %v4197_v18, 2 }
  0x56   :  { %v4283_v12 = vrot.slane %v16116_v61, 2  ;;  %9983 = vmatmul.mubr.msk.f32.gmra.mrb[38].mxu1 %vm479_vm1, %v410_v51  ;;  %v15867_v51 = vunpack.c.l.bf16 %v12535_v31  ;;  %v16119_v61 = vunpack.c.h.bf16 %v11932_v13  ;;  %v4282_v63 = vsel %vm1602_vm2, %v4280_v29, %v12530_v44  ;;  %v8344_v13 = vld [vmem:[%s15751_s0 + $0x6c] sm:$0xe] }
  0x57   :  { %10455 = vmatmul.mubr.msk.f32.gmra.mrb[6].mxu0 %vm479_vm1, %v4274_v54  ;;  %16117 = vst [vmem:[#allocation58_spill] sm:$0xff] %v12557_v45  ;;  %9985 = vmatprep.mubr.msk.f32.mxu1 %vm479_vm1, %v413_v27  ;;  %v15868_v54 = vunpack.c.l.bf16 %v12540_v30  ;;  %v12580_v5 = vunpack.c.h.bf16 %v12540_v30  ;;  %v4198_v21 = vunpack.c.l.bf16 %v8343_v43  ;;  %v16120_v27 = vunpack.c.l.bf16 %v11954_v42 }
  0x58   :  { %10457 = vmatprep.mubr.msk.f32.mxu0 %vm479_vm1, %v4277_v39  ;;  %v12575_v14 = vrot.slane %v16119_v61, 2  ;;  %v15873_v18 = vunpack.c.l.bf16 %v12562_v62  ;;  %v15874_v39 = vunpack.c.l.bf16 %v12567_v1  ;;  %v420_v29 = vsel %vm310_vm0, %v417_v20, %v419_v3 }
  0x59   :  { %v4298_v11 = vrot.slane %v16120_v27, 2  ;;  %v4284_v43 = vsel %vm1602_vm2, %v12530_v44, %v4283_v12  ;;  %v12596_v42 = vunpack.c.h.bf16 %v12567_v1  ;;  %v424_v20 = vrot.slane %v15867_v51, 1 }
  0x5a   :  { %9986 = vmatmul.mubr.msk.f32.gmra.mrb[40].mxu1 %vm479_vm1, %v415_v48  ;;  %v423_v48 = vsel %vm310_vm0, %v421_v40, %v12557_v45  ;;  %v426_v12 = vrot.slane %v15868_v54, 1  ;;  %v4290_v3 = vrot.slane %v4198_v21, 2  ;;  %v4199_v40 = vunpack.c.l.bf16 %v8344_v13 }
  0x5b   :  { %10458 = vmatmul.mubr.msk.f32.gmra.mrb[8].mxu0 %vm479_vm1, %v12453_v33  ;;  %v12600_v61 = vsel %vm1602_vm2, %v12575_v14, %v4298_v11  ;;  %9988 = vmatprep.mubr.msk.f32.mxu1 %vm479_vm1, %v418_v60  ;;  %v4287_v33 = vsel %vm1602_vm2, %v4285_v24, %v4286_v50  ;;  %v12614_v11 = vld [vmem:[%s15751_s0 + $0x140] sm:$0x1]  ;;  %v427_v60 = vrot.slane %v12580_v5, 1  ;;  %v12623_v50 = vrot.slane %v11938_v6, 2  ;;  %v8345_v24 = vld [vmem:[%s15751_s0 + $0x78] sm:$0xe] }
  0x5c   :  { %10460 = vmatprep.mubr.msk.f32.mxu0 %vm479_vm1, %v4282_v63  ;;  %16121 = vst [vmem:[#allocation60_spill] sm:$0xff] %v12614_v11  ;;  %v12619_v63 = vld [vmem:[%s15751_s0 + $0x144] sm:$0xff]   ;;  %v429_v27 = vrot.slane %v15873_v18, 1  ;;  %v16123_v51 = vunpack.c.l.bf16 %v11927_v58  ;;  %v431_v31 = vrot.slane %v15874_v39, 1  ;;  %v12637_v21 = vrot.slane %v12596_v42, 1 }
  0x5d   :  { %16122 = vst [vmem:[#allocation61_spill] sm:$0xff] %v12623_v50  ;;  %v15875_v13 = vunpack.c.l.bf16 %v12614_v11  ;;  %v16125_v62 = vunpack.c.h.bf16 %v12009_v47  ;;  %v425_v58 = vsel %vm310_vm0, %v12557_v45, %v424_v20  ;;  %v428_v44 = vsel %vm310_vm0, %v426_v12, %v427_v60  ;;  %v12667_v20 = vld [vmem:[%s15751_s0 + $0x150] sm:$0xff]   ;;  %v12744_v11 = vld [vmem:[%s15751_s0 + $0x168] sm:$0xff]  }
  0x5e   :  { %v4293_v54 = vrot.slane %v16123_v51, 2  ;;  %9989 = vmatmul.mubr.msk.f32.gmra.mrb[42].mxu1 %vm479_vm1, %v420_v29  ;;  %16124 = vst [vmem:[#allocation62_spill] sm:$0xff] %v12637_v21  ;;  %v12650_v51 = vunpack.c.h.bf16 %v12619_v63  ;;  %v4200_v29 = vunpack.c.l.bf16 %v8345_v24  ;;  %v4292_v47 = vsel %vm1602_vm2, %v4290_v3, %v12623_v50  ;;  %16128 = vst [vmem:[#allocation64_spill] sm:$0xff] %v12667_v20 }
  0x5f   :  { %10461 = vmatmul.mubr.msk.f32.gmra.mrb[10].mxu0 %vm479_vm1, %v4284_v43  ;;  %v12643_v18 = vrot.slane %v16125_v62, 2  ;;  %9991 = vmatprep.mubr.msk.f32.mxu1 %vm479_vm1, %v423_v48  ;;  %v16126_v43 = vunpack.c.l.bf16 %v12028_v59  ;;  %v4295_v62 = vrot.slane %v4199_v40, 2  ;;  %v12660_v48 = vld [vmem:[%s15751_s0 + $0x14c] sm:$0x1]  ;;  %v8346_v59 = vld [vmem:[%s15751_s0 + $0x84] sm:$0xe]  ;;  %v433_v3 = vsel %vm310_vm0, %v431_v31, %v12637_v21 }
  0x60   :  { %10463 = vmatprep.mubr.msk.f32.mxu0 %vm479_vm1, %v4287_v33  ;;  %16127 = vst [vmem:[#allocation63_spill] sm:$0xff] %v12660_v48  ;;  %v4294_v33 = vsel %vm1602_vm2, %v12623_v50, %v4293_v54  ;;  %v430_v54 = vsel %vm310_vm0, %v427_v60, %v429_v27  ;;  %v434_v40 = vrot.slane %v15875_v13, 1  ;;  %v16129_v24 = vunpack.c.l.bf16 %v12619_v63 }
  0x61   :  { %v4308_v39 = vrot.slane %v16126_v43, 2  ;;  %v4300_v60 = vrot.slane %v4200_v29, 2  ;;  %v12695_v31 = vrot.slane %v12018_v28, 2  ;;  %v4201_v13 = vunpack.c.l.bf16 %v8346_v59  ;;  %v8347_v29 = vld [vmem:[%s15751_s0 + $0x90] sm:$0xe] }
  0x62   :  { %9992 = vmatmul.mubr.msk.f32.gmra.mrb[44].mxu1 %vm479_vm1, %v425_v58  ;;  %v436_v43 = vrot.slane %v16129_v24, 1  ;;  %v12701_v58 = vld [vmem:[%s15751_s0 + $0x15c] sm:$0xff]   ;;  %v4297_v24 = vsel %vm1602_vm2, %v4295_v62, %v12575_v14  ;;  %v16132_v27 = vunpack.c.l.bf16 %v12004_v9  ;;  %v16133_v50 = vunpack.c.h.bf16 %v12089_v49  ;;  %v12730_v9 = vld [vmem:[%s15751_s0 + $0x164] sm:$0x1] }
  0x63   :  { %v12674_v12 = vsel %vm1602_vm2, %v12643_v18, %v4308_v39  ;;  %10464 = vmatmul.mubr.msk.f32.gmra.mrb[12].mxu0 %vm479_vm1, %v12523_v57  ;;  %v12689_v39 = vld [vmem:[%s15751_s0 + $0x158] sm:$0x1]  ;;  %9994 = vmatprep.mubr.msk.f32.mxu1 %vm479_vm1, %v428_v44  ;;  %v437_v57 = vrot.slane %v12650_v51, 1  ;;  %16131 = vst [vmem:[#allocation66_spill] sm:$0xff] %v12695_v31  ;;  %v15883_v44 = vunpack.c.l.bf16 %v12667_v20  ;;  %v435_v14 = vsel %vm310_vm0, %v12637_v21, %v434_v40 }
  0x64   :  { %16130 = vst [vmem:[#allocation65_spill] sm:$0xff] %v12689_v39  ;;  %10466 = vmatprep.mubr.msk.f32.mxu0 %vm479_vm1, %v4292_v47  ;;  %v12707_v47 = vunpack.c.h.bf16 %v12667_v20  ;;  %v4303_v45 = vrot.slane %v16132_v27, 2  ;;  %v12717_v38 = vrot.slane %v16133_v50, 2  ;;  %v12725_v59 = vunpack.c.h.bf16 %v12701_v58  ;;  %16134 = vst [vmem:[#allocation67_spill] sm:$0xff] %v12730_v9 }
  0x65   :  { %v16135_v49 = vunpack.c.l.bf16 %v12115_v41  ;;  %v16136_v40 = vunpack.c.l.bf16 %v12660_v48  ;;  %v4202_v62 = vunpack.c.l.bf16 %v8347_v29  ;;  %v441_v41 = vrot.slane %v15883_v44, 1  ;;  %v12786_v44 = vld [vmem:[%s15751_s0 + $0x170] sm:$0x1] }
  0x66   :  { %9995 = vmatmul.mubr.msk.f32.gmra.mrb[46].mxu1 %vm479_vm1, %v430_v54  ;;  %v4302_v54 = vsel %vm1602_vm2, %v4300_v60, %v12695_v31  ;;  %v4304_v29 = vsel %vm1602_vm2, %v12695_v31, %v4303_v45  ;;  %v447_v48 = vrot.slane %v12725_v59, 1  ;;  %v12771_v20 = vunpack.c.h.bf16 %v12744_v11  ;;  %16141 = vst [vmem:[#allocation70_spill] sm:$0xff] %v12786_v44 }
  0x67   :  { %10467 = vmatmul.mubr.msk.f32.gmra.mrb[14].mxu0 %vm479_vm1, %v4294_v33  ;;  %v4318_v50 = vrot.slane %v16135_v49, 2  ;;  %9997 = vmatprep.mubr.msk.f32.mxu1 %vm479_vm1, %v433_v3  ;;  %v438_v33 = vsel %vm310_vm0, %v436_v43, %v437_v57  ;;  %v439_v27 = vrot.slane %v16136_v40, 1  ;;  %v12749_v3 = vrot.slane %v12707_v47, 1  ;;  %v8348_v43 = vld [vmem:[%s15751_s0 + $0x9c] sm:$0xe] }
  0x68   :  { %10469 = vmatprep.mubr.msk.f32.mxu0 %vm479_vm1, %v4297_v24  ;;  %v4305_v24 = vrot.slane %v4201_v13, 2  ;;  %v16138_v49 = vunpack.c.l.bf16 %v12689_v39  ;;  %v16139_v13 = vunpack.c.l.bf16 %v12701_v58  ;;  %v16150_v39 = vunpack.c.l.bf16 %v12240_v52 }
  0x69   :  { %16137 = vst [vmem:[#allocation68_spill] sm:$0xff] %v12749_v3  ;;  %v12756_v60 = vsel %vm1602_vm2, %v12717_v38, %v4318_v50  ;;  %v440_v45 = vsel %vm310_vm0, %v437_v57, %v439_v27  ;;  %v16143_v57 = vunpack.c.l.bf16 %v12730_v9  ;;  %v16144_v27 = vunpack.c.l.bf16 %v12076_v53 }
  0x6a   :  { %v444_v40 = vrot.slane %v16138_v49, 1  ;;  %9998 = vmatmul.mubr.msk.f32.gmra.mrb[48].mxu1 %vm479_vm1, %v435_v14  ;;  %v446_v21 = vrot.slane %v16139_v13, 1  ;;  %v4310_v14 = vrot.slane %v4202_v62, 2  ;;  %v12777_v49 = vrot.slane %v12103_v37, 2 }
  0x6b   :  { %10470 = vmatmul.mubr.msk.f32.gmra.mrb[16].mxu0 %vm479_vm1, %v12600_v61  ;;  %10000 = vmatprep.mubr.msk.f32.mxu1 %vm479_vm1, %v438_v33  ;;  %v4203_v61 = vunpack.c.l.bf16 %v8348_v43  ;;  %v443_v13 = vsel %vm310_vm0, %v441_v41, %v12749_v3  ;;  %v4307_v50 = vsel %vm1602_vm2, %v4305_v24, %v12643_v18  ;;  %v16142_v33 = vunpack.c.h.bf16 %v12172_v32  ;;  %v12799_v41 = vld [vmem:[%s15751_s0 + $0x174] sm:$0xff]   ;;  %v8349_v18 = vld [vmem:[%s15751_s0 + $0xa8] sm:$0xe] }
  0x6c   :  { %10472 = vmatprep.mubr.msk.f32.mxu0 %vm479_vm1, %v4302_v54  ;;  %16140 = vst [vmem:[#allocation69_spill] sm:$0xff] %v12777_v49  ;;  %v449_v62 = vrot.slane %v16143_v57, 1  ;;  %v4313_v43 = vrot.slane %v16144_v27, 2  ;;  %v16145_v24 = vunpack.c.l.bf16 %v12197_v46  ;;  %v445_v53 = vsel %vm310_vm0, %v12749_v3, %v444_v40  ;;  %v12829_v40 = vld [vmem:[%s15751_s0 + $0x180] sm:$0xff]  }
  0x6d   :  { %v12790_v54 = vrot.slane %v16142_v33, 2  ;;  %v448_v33 = vsel %vm310_vm0, %v446_v21, %v447_v48  ;;  %v16146_v57 = vunpack.c.l.bf16 %v12744_v11  ;;  %v12814_v9 = vrot.slane %v12771_v20, 1  ;;  %v12824_v21 = vld [vmem:[%s15751_s0 + $0x17c] sm:$0x1] }
  0x6e   :  { %v4328_v32 = vrot.slane %v16145_v24, 2  ;;  %10001 = vmatmul.mubr.msk.f32.gmra.mrb[50].mxu1 %vm479_vm1, %v440_v45  ;;  %v4312_v46 = vsel %vm1602_vm2, %v4310_v14, %v12777_v49  ;;  %v4315_v45 = vrot.slane %v4203_v61, 2  ;;  %16148 = vst [vmem:[#allocation72_spill] sm:$0xff] %v12824_v21  ;;  %v12837_v14 = vunpack.c.h.bf16 %v12799_v41  ;;  %v8350_v24 = vld [vmem:[%s15751_s0 + $0xb4] sm:$0xe] }
  0x6f   :  { %10473 = vmatmul.mubr.msk.f32.gmra.mrb[18].mxu0 %vm479_vm1, %v4304_v29  ;;  %v451_v27 = vrot.slane %v16146_v57, 1  ;;  %16147 = vst [vmem:[#allocation71_spill] sm:$0xff] %v12814_v9  ;;  %10003 = vmatprep.mubr.msk.f32.mxu1 %vm479_vm1, %v443_v13  ;;  %v4204_v61 = vunpack.c.l.bf16 %v8349_v18  ;;  %v16149_v57 = vunpack.c.h.bf16 %v12218_v55  ;;  %v450_v3 = vsel %vm310_vm0, %v447_v48, %v449_v62 }
  0x70   :  { %10475 = vmatprep.mubr.msk.f32.mxu0 %vm479_vm1, %v4307_v50  ;;  %v12833_v13 = vsel %vm1602_vm2, %v12790_v54, %v4328_v32  ;;  %v4314_v32 = vsel %vm1602_vm2, %v12777_v49, %v4313_v43  ;;  %v4333_v50 = vrot.slane %v16150_v39, 2  ;;  %v15896_v55 = vunpack.c.l.bf16 %v12824_v21  ;;  %v12870_v43 = vld [vmem:[%s15751_s0 + $0x188] sm:$0x1] }
  0x71   :  { %v12844_v29 = vrot.slane %v16149_v57, 2  ;;  %v453_v18 = vsel %vm310_vm0, %v451_v27, %v12814_v9  ;;  %v12859_v48 = vunpack.c.h.bf16 %v12829_v40  ;;  %v4317_v52 = vsel %vm1602_vm2, %v4315_v45, %v12717_v38  ;;  %16152 = vst [vmem:[#allocation73_spill] sm:$0xff] %v12870_v43  ;;  %v12885_v45 = vld [vmem:[%s15751_s0 + $0x18c] sm:$0xff]  }
  0x72   :  { %10004 = vmatmul.mubr.msk.f32.gmra.mrb[52].mxu1 %vm479_vm1, %v445_v53  ;;  %v16151_v39 = vunpack.c.l.bf16 %v12786_v44  ;;  %v4205_v62 = vunpack.c.l.bf16 %v8350_v24  ;;  %v4320_v57 = vrot.slane %v4204_v61, 2  ;;  %v12880_v38 = vrot.slane %v12177_v22, 2  ;;  %v8351_v24 = vld [vmem:[%s15751_s0 + $0xc0] sm:$0xe] }
  0x73   :  { %10476 = vmatmul.mubr.msk.f32.gmra.mrb[20].mxu0 %vm479_vm1, %v12674_v12  ;;  %10006 = vmatprep.mubr.msk.f32.mxu1 %vm479_vm1, %v448_v33  ;;  %v12874_v53 = vsel %vm1602_vm2, %v12844_v29, %v4333_v50  ;;  %v16153_v33 = vunpack.c.l.bf16 %v12799_v41  ;;  %v459_v50 = vrot.slane %v15896_v55, 1  ;;  %v16154_v61 = vunpack.c.l.bf16 %v12167_v56 }
  0x74   :  { %10478 = vmatprep.mubr.msk.f32.mxu0 %vm479_vm1, %v4312_v46  ;;  %v454_v12 = vrot.slane %v16151_v39, 1  ;;  %v457_v46 = vrot.slane %v12837_v14, 1  ;;  %v12899_v49 = vrot.slane %v12859_v48, 1  ;;  %v15901_v21 = vunpack.c.l.bf16 %v12870_v43 }
  0x75   :  { %v456_v27 = vrot.slane %v16153_v33, 1  ;;  %v4323_v39 = vrot.slane %v16154_v61, 2  ;;  %v16155_v33 = vunpack.c.l.bf16 %v12829_v40  ;;  %v15908_v55 = vunpack.c.l.bf16 %v12885_v45 }
  0x76   :  { %10007 = vmatmul.mubr.msk.f32.gmra.mrb[54].mxu1 %vm479_vm1, %v450_v3  ;;  %16156 = vst [vmem:[#allocation74_spill] sm:$0xff] %v12899_v49  ;;  %v455_v3 = vsel %vm310_vm0, %v12814_v9, %v454_v12  ;;  %v4322_v61 = vsel %vm1602_vm2, %v4320_v57, %v12880_v38  ;;  %v4206_v31 = vunpack.c.l.bf16 %v8351_v24  ;;  %v8352_v12 = vld [vmem:[%s15751_s0 + $0xe4] sm:$0xe]  ;;  %v460_v57 = vsel %vm310_vm0, %v457_v46, %v459_v50 }
  0x77   :  { %10479 = vmatmul.mubr.msk.f32.gmra.mrb[22].mxu0 %vm479_vm1, %v4314_v32  ;;  %v461_v44 = vrot.slane %v16155_v33, 1  ;;  %10009 = vmatprep.mubr.msk.f32.mxu1 %vm479_vm1, %v453_v18  ;;  %v4325_v32 = vrot.slane %v4205_v62, 2  ;;  %v458_v56 = vsel %vm310_vm0, %v456_v27, %v457_v46  ;;  %v12911_v33 = vunpack.c.h.bf16 %v12885_v45  ;;  %v12916_v18 = vld [vmem:[%s15751_s0 + $0x194] sm:$0x1] }
  0x78   :  { %10481 = vmatprep.mubr.msk.f32.mxu0 %vm479_vm1, %v4317_v52  ;;  %16157 = vst [vmem:[#allocation75_spill] sm:$0xff] %v12916_v18  ;;  %v12921_v52 = vld [vmem:[%s15751_s0 + $0xe8] ss:$24 sps:$4 sm:$0xff]   ;;  %v4324_v62 = vsel %vm1602_vm2, %v12880_v38, %v4323_v39  ;;  %v15907_v46 = vunpack.c.l.bf16 %v12916_v18  ;;  %v4330_v39 = vrot.slane %v4206_v31, 2  ;;  %v4207_v9 = vunpack.c.l.bf16 %v8352_v12 }
  0x79   :  { %16158 = vst [vmem:[#allocation76_spill] sm:$0xff] %v12921_v52  ;;  %v463_v27 = vsel %vm310_vm0, %v461_v44, %v12899_v49  ;;  %v4327_v24 = vsel %vm1602_vm2, %v4325_v32, %v12790_v54  ;;  %v467_v50 = vrot.slane %v12911_v33, 1  ;;  %v15902_v44 = vunpack.c.l.bf16 %v12921_v52  ;;  %v8353_v54 = vld [vmem:[%s15751_s0 + $0xf0] sm:$0xe] }
  0x7a   :  { %10010 = vmatmul.mubr.msk.f32.gmra.mrb[56].mxu1 %vm479_vm1, %v455_v3  ;;  %v464_v3 = vrot.slane %v15901_v21, 1  ;;  %v469_v32 = vrot.slane %v15907_v46, 1 }
  0x7b   :  { %10482 = vmatmul.mubr.msk.f32.gmra.mrb[24].mxu0 %vm479_vm1, %v12756_v60  ;;  %10012 = vmatprep.mubr.msk.f32.mxu1 %vm479_vm1, %v458_v56  ;;  %v466_v60 = vrot.slane %v15908_v55, 1  ;;  %v12948_v56 = vld [vmem:[%s15751_s0 + $0xec] sm:$0x1]  ;;  %v4336_v21 = vrot.slane %v15902_v44, 2 }
  0x7c   :  { %10484 = vmatprep.mubr.msk.f32.mxu0 %vm479_vm1, %v4322_v61  ;;  %16159 = vst [vmem:[#allocation77_spill] sm:$0xff] %v12948_v56  ;;  %v465_v31 = vsel %vm310_vm0, %v12899_v49, %v464_v3  ;;  %v15903_v61 = vunpack.c.l.bf16 %v12948_v56  ;;  %v8354_v3 = vld [vmem:[%s15751_s0 + $0xfc] sm:$0xe] }
  0x7d   :  { %v468_v12 = vsel %vm310_vm0, %v466_v60, %v467_v50  ;;  %v4209_v44 = vunpack.c.l.bf16 %v8354_v3 }
  0x7e   :  { %10013 = vmatmul.mubr.msk.f32.gmra.mrb[58].mxu1 %vm479_vm1, %v460_v57  ;;  %v4332_v57 = vsel %vm1602_vm2, %v4330_v39, %v12844_v29  ;;  %v4338_v29 = vrot.slane %v15903_v61, 2 }
  0x7f   :  { %10485 = vmatmul.mubr.msk.f32.gmra.mrb[26].mxu0 %vm479_vm1, %v4324_v62  ;;  %10015 = vmatprep.mubr.msk.f32.mxu1 %vm479_vm1, %v463_v27  ;;  %v4335_v62 = vrot.slane %v4207_v9, 2  ;;  %v12970_v27 = vld [vmem:[%s15751_s0 + $0xf8] sm:$0x1]  ;;  %v470_v9 = vsel %vm310_vm0, %v467_v50, %v469_v32  ;;  %v8355_v50 = vld [vmem:[%s15751_s0 + $0x108] sm:$0xe]  ;;  %v16162_v32 = vunpack.c.l.bf16 %v11615_v4  ;;  %v4345_v3 = vrot.slane %v4209_v44, 2 }
  0x80   :  { %10487 = vmatprep.mubr.msk.f32.mxu0 %vm479_vm1, %v4327_v24  ;;  %16160 = vst [vmem:[#allocation78_spill] sm:$0xff] %v12970_v27  ;;  %v4208_v24 = vunpack.c.l.bf16 %v8353_v54  ;;  %v15905_v60 = vunpack.c.l.bf16 %v12970_v27  ;;  %v15904_v54 = vunpack.c.h.bf16 %v12921_v52  ;;  %v4210_v61 = vunpack.c.l.bf16 %v8355_v50  ;;  %v13013_v4 = vld [vmem:[%s15751_s0 + $0x110] sm:$0x1]  ;;  %v8356_v44 = vld [vmem:[%s15751_s0 + $0x114] sm:$0xe] }
  0x81   :  { %v4337_v39 = vsel %vm1602_vm2, %v4335_v62, %v4336_v21  ;;  %16163 = vst [vmem:[#allocation80_spill] sm:$0xff] %v13013_v4 }
  0x82   :  { %10016 = vmatmul.mubr.msk.f32.gmra.mrb[60].mxu1 %vm479_vm1, %v465_v31  ;;  %v4340_v31 = vrot.slane %v4208_v24, 2  ;;  %v4343_v62 = vrot.slane %v15905_v60, 2  ;;  %v4211_v60 = vunpack.c.l.bf16 %v8356_v44 }
  0x83   :  { %10488 = vmatmul.mubr.msk.f32.gmra.mrb[28].mxu0 %vm479_vm1, %v12833_v13  ;;  %10018 = vmatprep.mubr.msk.f32.mxu1 %vm479_vm1, %v468_v12  ;;  %v12989_v13 = vld [vmem:[%s15751_s0 + $0x104] sm:$0x1]  ;;  %v12992_v12 = vrot.slane %v12331_v0, 2 }
  0x84   :  { %10490 = vmatprep.mubr.msk.f32.mxu0 %vm479_vm1, %v4332_v57  ;;  %16161 = vst [vmem:[#allocation79_spill] sm:$0xff] %v12989_v13  ;;  %v4339_v57 = vsel %vm1602_vm2, %v4336_v21, %v4338_v29  ;;  %v15906_v24 = vunpack.c.l.bf16 %v12989_v13  ;;  %v13020_v21 = vld [vmem:[%s15751_s0 + $0x118] ss:$24 sps:$4 sm:$0xff]   ;;  %v9228_v29 = vld [vmem:[%s15750_s1 + $0x28] sm:$0xff]  }
  0x85   :  { %16164 = vst [vmem:[#allocation81_spill] sm:$0xff] %v13020_v21  ;;  %v16170_v49 = vunpack.c.l.bf16 %v13020_v21 }
  0x86   :  { %10019 = vmatmul.mubr.msk.f32.gmra.mrb[62].mxu1 %vm479_vm1, %v470_v9  ;;  %v4346_v9 = vrot.slane %v15904_v54, 2  ;;  %v4348_v50 = vrot.slane %v15906_v24, 2  ;;  %v15914_v54 = vunpack.c.l.bf16 %v13013_v4  ;;  %v16167_v24 = vld [vmem:[#allocation5_spill] sm:$0xff] }
  0x87   :  { %10491 = vmatmul.mubr.msk.f32.gmra.mrb[30].mxu0 %vm479_vm1, %v12874_v53  ;;  %10029 = vmatprep.mubr.msk.f32.mxu1 %vm479_vm1, %v16162_v32  ;;  %v4342_v53 = vsel %vm1602_vm2, %v4340_v31, %v12992_v12  ;;  %v4344_v31 = vsel %vm1602_vm2, %v12992_v12, %v4343_v62  ;;  %v13040_v32 = vrot.slane %v12449_v2, 2  ;;  %v13049_v62 = vld [vmem:[%s15751_s0 + $0x11c] sm:$0x1]  ;;  %v4356_v13 = vrot.slane %v16170_v49, 2 }
  0x88   :  { %10493 = vmatprep.mubr.msk.f32.mxu0 %vm479_vm1, %v4337_v39  ;;  %v16165_v39 = vunpack.c.l.bf16 %v11646_v15  ;;  %16166 = vst [vmem:[#allocation82_spill] sm:$0xff] %v13049_v62  ;;  %v4349_v44 = vsel %vm1602_vm2, %v4346_v9, %v4348_v50  ;;  %v4353_v46 = vrot.slane %v15914_v54, 2  ;;  %v15913_v55 = vunpack.c.l.bf16 %v13049_v62 }
  0x89   :  { %v4355_v15 = vrot.slane %v4211_v60, 2  ;;  %v16172_v60 = vld [vmem:[#allocation7_spill] sm:$0xff]  ;;  %v16178_v62 = vunpack.c.h.bf16 %v13020_v21 }
  0x8a   :  { %10030 = vmatmul.mubr.msk.f32.vlgmr.msra.gmra.mrb[0].mxu1 %vm479_vm1, %v11624_v7  ;;  %v16173_v49 = vunpack.c.l.bf16 %v16172_v60  ;;  %v4358_v50 = vrot.slane %v15913_v55, 2  ;;  %v16175_v60 = vld [vmem:[#allocation10_spill] sm:$0xff] }
  0x8b   :  { %10494 = vmatmul.mubr.msk.f32.gmra.mrb[32].mxu0 %vm479_vm1, %v4339_v57  ;;  %10872 = vmatpush3.bf16.msra.mxu1 %v12129_v23  ;;  %v4347_v57 = vsel %vm1602_vm2, %v4345_v3, %v4346_v9  ;;  %v4350_v23 = vrot.slane %v4210_v61, 2  ;;  %v13060_v61 = vld [vmem:[%s15750_s1 + $0x30] sm:$0xff]   ;;  %v16168_v3 = vld [vmem:[#allocation3_spill] sm:$0xff] }
  0x8c   :  { %10032 = vmatprep.mubr.msk.f32.mxu1 %vm479_vm1, %v16165_v39  ;;  %10496 = vmatprep.mubr.msk.f32.mxu0 %vm479_vm1, %v4342_v53  ;;  %v8357_v39 = vld [vmem:[%s15751_s0 + $0x120] sm:$0xe]  ;;  %v16169_v53 = vunpack.c.l.bf16 %v16168_v3  ;;  %v13077_v3 = vld [vmem:[%s15751_s0 + $0x128] sm:$0x1]  ;;  %v8358_v9 = vld [vmem:[%s15751_s0 + $0x12c] sm:$0xe] }
  0x8d   :  { %10874 = vmatprep.subr.bf16.mxu1 %v9228_v29  ;;  %v4212_v27 = vunpack.c.l.bf16 %v8357_v39  ;;  %16171 = vst [vmem:[#allocation5_spill] sm:$0xff] %v13077_v3 }
  0x8e   :  { %10033 = vmatmul.mubr.msk.f32.gmra.mrb[2].mxu1 %vm479_vm1, %v16167_v24 }
  0x8f   :  { %10497 = vmatmul.mubr.msk.f32.gmra.mrb[34].mxu0 %vm479_vm1, %v4344_v31  ;;  %10035 = vmatprep.mubr.msk.f32.mxu1 %vm479_vm1, %v16169_v53  ;;  %v4352_v31 = vsel %vm1602_vm2, %v4350_v23, %v13040_v32  ;;  %v15917_v23 = vunpack.c.l.bf16 %v13077_v3  ;;  %v4360_v39 = vrot.slane %v4212_v27, 2  ;;  %v4359_v27 = vsel %vm1602_vm2, %v4356_v13, %v4358_v50  ;;  %v8360_v50 = vld [vmem:[%s15751_s0 + $0x144] sm:$0xe] }
  0x90   :  { %10499 = vmatprep.mubr.msk.f32.mxu0 %vm479_vm1, %v4347_v57  ;;  %10876 = vmatpush3.bf16.msra.mxu1 %v9228_v29  ;;  %v4354_v29 = vsel %vm1602_vm2, %v13040_v32, %v4353_v46  ;;  %v13095_v57 = vrot.slane %v12515_v17, 2  ;;  %v8359_v46 = vld [vmem:[%s15751_s0 + $0x138] sm:$0xe] }
  0x91   :  { %10878 = vmatprep.subr.bf16.mxu1 %v13060_v61  ;;  %v4214_v4 = vunpack.c.l.bf16 %v8359_v46  ;;  %v13148_v46 = vrot.slane %v12596_v42, 2 }
  0x92   :  { %10036 = vmatmul.mubr.msk.f32.gmra.mrb[4].mxu1 %vm479_vm1, %v11692_v34  ;;  %v4357_v34 = vsel %vm1602_vm2, %v4355_v15, %v4356_v13  ;;  %v4362_v54 = vsel %vm1602_vm2, %v4360_v39, %v13095_v57  ;;  %v13131_v13 = vld [vmem:[%s15751_s0 + $0x148] ss:$24 sps:$4 sm:$0xff]  }
  0x93   :  { %10500 = vmatmul.mubr.msk.f32.gmra.mrb[36].mxu0 %vm479_vm1, %v4349_v44  ;;  %10038 = vmatprep.mubr.msk.f32.mxu1 %vm479_vm1, %v16173_v49  ;;  %v4213_v44 = vunpack.c.l.bf16 %v8358_v9  ;;  %v16176_v49 = vld [vmem:[#allocation8_spill] sm:$0xff]  ;;  %v4363_v9 = vrot.slane %v15917_v23, 2  ;;  %16180 = vst [vmem:[#allocation10_spill] sm:$0xff] %v13131_v13  ;;  %v4215_v23 = vunpack.c.l.bf16 %v8360_v50  ;;  %v16187_v21 = vunpack.c.l.bf16 %v13131_v13 }
  0x94   :  { %10502 = vmatprep.mubr.msk.f32.mxu0 %vm479_vm1, %v4352_v31  ;;  %v13103_v31 = vld [vmem:[%s15751_s0 + $0x134] sm:$0x1]  ;;  %v16177_v15 = vunpack.c.l.bf16 %v16176_v49  ;;  %v13126_v49 = vld [vmem:[%s15751_s0 + $0x140] sm:$0x1] }
  0x95   :  { %16174 = vst [vmem:[#allocation3_spill] sm:$0xff] %v13103_v31  ;;  %v15918_v55 = vunpack.c.l.bf16 %v13103_v31  ;;  %v4365_v53 = vrot.slane %v4213_v44, 2  ;;  %16179 = vst [vmem:[#allocation7_spill] sm:$0xff] %v13126_v49  ;;  %v4364_v39 = vsel %vm1602_vm2, %v13095_v57, %v4363_v9  ;;  %v8361_v9 = vld [vmem:[%s15751_s0 + $0x150] sm:$0xe]  ;;  %v4375_v3 = vrot.slane %v4215_v23, 2 }
  0x96   :  { %10039 = vmatmul.mubr.msk.f32.gmra.mrb[6].mxu1 %vm479_vm1, %v16175_v60  ;;  %v4216_v56 = vunpack.c.l.bf16 %v8361_v9 }
  0x97   :  { %10503 = vmatmul.mubr.msk.f32.gmra.mrb[38].mxu0 %vm479_vm1, %v4354_v29  ;;  %10041 = vmatprep.mubr.msk.f32.mxu1 %vm479_vm1, %v16177_v15  ;;  %v4366_v29 = vrot.slane %v16178_v62, 2  ;;  %v16181_v62 = vld [vmem:[#allocation12_spill] sm:$0xff]  ;;  %v4368_v44 = vrot.slane %v15918_v55, 2  ;;  %v15925_v15 = vunpack.c.l.bf16 %v13126_v49  ;;  %v16185_v55 = vld [vmem:[#allocation13_spill] sm:$0xff]  ;;  %v16195_v49 = vunpack.c.h.bf16 %v13131_v13 }
  0x98   :  { %10505 = vmatprep.mubr.msk.f32.mxu0 %vm479_vm1, %v4357_v34  ;;  %v16182_v34 = vunpack.c.l.bf16 %v16181_v62 }
  0x99   :  { %v4373_v50 = vrot.slane %v15925_v15, 2 }
  0x9a   :  { %10042 = vmatmul.mubr.msk.f32.gmra.mrb[8].mxu1 %vm479_vm1, %v11773_v8  ;;  %v4367_v8 = vsel %vm1602_vm2, %v4365_v53, %v4366_v29  ;;  %v16186_v53 = vunpack.c.l.bf16 %v16185_v55  ;;  %v13179_v55 = vld [vmem:[%s15751_s0 + $0x158] sm:$0x1] }
  0x9b   :  { %10506 = vmatmul.mubr.msk.f32.gmra.mrb[40].mxu0 %vm479_vm1, %v4359_v27  ;;  %10044 = vmatprep.mubr.msk.f32.mxu1 %vm479_vm1, %v16182_v34  ;;  %v4370_v27 = vrot.slane %v4214_v4, 2  ;;  %v16184_v34 = vld [vmem:[#allocation15_spill] sm:$0xff]  ;;  %v4369_v4 = vsel %vm1602_vm2, %v4366_v29, %v4368_v44  ;;  %16188 = vst [vmem:[#allocation12_spill] sm:$0xff] %v13179_v55  ;;  %v8362_v29 = vld [vmem:[%s15751_s0 + $0x15c] sm:$0xe]  ;;  %v15930_v9 = vunpack.c.l.bf16 %v13179_v55 }
  0x9c   :  { %10508 = vmatprep.mubr.msk.f32.mxu0 %vm479_vm1, %v4362_v54  ;;  %v13156_v54 = vld [vmem:[%s15751_s0 + $0x14c] sm:$0x1]  ;;  %v16189_v44 = vld [vmem:[#allocation17_spill] sm:$0xff] }
  0x9d   :  { %16183 = vst [vmem:[#allocation8_spill] sm:$0xff] %v13156_v54  ;;  %v15924_v62 = vunpack.c.l.bf16 %v13156_v54  ;;  %v4372_v31 = vsel %vm1602_vm2, %v4370_v27, %v13148_v46  ;;  %v16190_v23 = vunpack.c.l.bf16 %v16189_v44  ;;  %v13196_v27 = vrot.slane %v12707_v47, 2 }
  0x9e   :  { %10045 = vmatmul.mubr.msk.f32.gmra.mrb[10].mxu1 %vm479_vm1, %v16184_v34  ;;  %v4217_v44 = vunpack.c.l.bf16 %v8362_v29  ;;  %v4383_v29 = vrot.slane %v15930_v9, 2 }
  0x9f   :  { %10509 = vmatmul.mubr.msk.f32.gmra.mrb[42].mxu0 %vm479_vm1, %v4364_v39  ;;  %10047 = vmatprep.mubr.msk.f32.mxu1 %vm479_vm1, %v16186_v53  ;;  %v4376_v39 = vrot.slane %v16187_v21, 2  ;;  %v4374_v21 = vsel %vm1602_vm2, %v13148_v46, %v4373_v50  ;;  %v4380_v53 = vrot.slane %v4216_v56, 2  ;;  %v8363_v50 = vld [vmem:[%s15751_s0 + $0x168] sm:$0xe] }
  0xa0   :  { %10511 = vmatprep.mubr.msk.f32.mxu0 %vm479_vm1, %v4367_v8  ;;  %v4378_v8 = vrot.slane %v15924_v62, 2  ;;  %v16193_v62 = vld [vmem:[#allocation18_spill] sm:$0xff]  ;;  %v4385_v54 = vrot.slane %v4217_v44, 2  ;;  %v4218_v52 = vunpack.c.l.bf16 %v8363_v50  ;;  %v13249_v50 = vrot.slane %v12771_v20, 2 }
  0xa2   :  { %10048 = vmatmul.mubr.msk.f32.gmra.mrb[12].mxu1 %vm479_vm1, %v11844_v19  ;;  %v4377_v19 = vsel %vm1602_vm2, %v4375_v3, %v4376_v39  ;;  %v16194_v3 = vunpack.c.l.bf16 %v16193_v62  ;;  %v4379_v56 = vsel %vm1602_vm2, %v4376_v39, %v4378_v8  ;;  %v13227_v62 = vld [vmem:[%s15751_s0 + $0x170] sm:$0x1]  ;;  %v8364_v8 = vld [vmem:[%s15751_s0 + $0x174] sm:$0xe] }
  0xa3   :  { %10512 = vmatmul.mubr.msk.f32.gmra.mrb[44].mxu0 %vm479_vm1, %v4369_v4  ;;  %10050 = vmatprep.mubr.msk.f32.mxu1 %vm479_vm1, %v16190_v23  ;;  %v16192_v23 = vld [vmem:[#allocation20_spill] sm:$0xff]  ;;  %v4382_v4 = vsel %vm1602_vm2, %v4380_v53, %v13196_v27  ;;  %16196 = vst [vmem:[#allocation13_spill] sm:$0xff] %v13227_v62  ;;  %v4384_v53 = vsel %vm1602_vm2, %v13196_v27, %v4383_v29  ;;  %v4219_v9 = vunpack.c.l.bf16 %v8364_v8  ;;  %v8365_v29 = vld [vmem:[%s15751_s0 + $0x180] sm:$0xe] }
  0xa4   :  { %10514 = vmatprep.mubr.msk.f32.mxu0 %vm479_vm1, %v4372_v31  ;;  %v13204_v31 = vld [vmem:[%s15751_s0 + $0x164] sm:$0x1]  ;;  %v13232_v39 = vld [vmem:[%s15751_s0 + $0x178] ss:$24 sps:$4 sm:$0xff]   ;;  %v4220_v18 = vunpack.c.l.bf16 %v8365_v29 }
  0xa5   :  { %16191 = vst [vmem:[#allocation15_spill] sm:$0xff] %v13204_v31  ;;  %v15931_v15 = vunpack.c.l.bf16 %v13204_v31  ;;  %16197 = vst [vmem:[#allocation17_spill] sm:$0xff] %v13232_v39  ;;  %v4395_v55 = vrot.slane %v4219_v9, 2  ;;  %v16204_v13 = vunpack.c.l.bf16 %v13232_v39 }
  0xa6   :  { %10051 = vmatmul.mubr.msk.f32.gmra.mrb[14].mxu1 %vm479_vm1, %v16192_v23 }
  0xa7   :  { %10515 = vmatmul.mubr.msk.f32.gmra.mrb[46].mxu0 %vm479_vm1, %v4374_v21  ;;  %10053 = vmatprep.mubr.msk.f32.mxu1 %vm479_vm1, %v16194_v3  ;;  %v4386_v21 = vrot.slane %v16195_v49, 2  ;;  %v16198_v49 = vld [vmem:[#allocation22_spill] sm:$0xff]  ;;  %v4388_v44 = vrot.slane %v15931_v15, 2  ;;  %v15938_v3 = vunpack.c.l.bf16 %v13227_v62  ;;  %v16202_v15 = vld [vmem:[#allocation23_spill] sm:$0xff] }
  0xa8   :  { %10517 = vmatprep.mubr.msk.f32.mxu0 %vm479_vm1, %v4377_v19  ;;  %v16199_v19 = vunpack.c.l.bf16 %v16198_v49 }
  0xa9   :  { %v4393_v8 = vrot.slane %v15938_v3, 2 }
  0xaa   :  { %10054 = vmatmul.mubr.msk.f32.gmra.mrb[16].mxu1 %vm479_vm1, %v11938_v6  ;;  %v4387_v6 = vsel %vm1602_vm2, %v4385_v54, %v4386_v21  ;;  %v16203_v54 = vunpack.c.l.bf16 %v16202_v15  ;;  %v13280_v15 = vld [vmem:[%s15751_s0 + $0x188] sm:$0x1] }
  0xab   :  { %10518 = vmatmul.mubr.msk.f32.gmra.mrb[48].mxu0 %vm479_vm1, %v4379_v56  ;;  %10056 = vmatprep.mubr.msk.f32.mxu1 %vm479_vm1, %v16199_v19  ;;  %v4390_v56 = vrot.slane %v4218_v52, 2  ;;  %v16201_v19 = vld [vmem:[#allocation25_spill] sm:$0xff]  ;;  %v4389_v52 = vsel %vm1602_vm2, %v4386_v21, %v4388_v44  ;;  %16205 = vst [vmem:[#allocation18_spill] sm:$0xff] %v13280_v15  ;;  %v8366_v21 = vld [vmem:[%s15751_s0 + $0x18c] sm:$0xe]  ;;  %v15942_v29 = vunpack.c.l.bf16 %v13280_v15 }
  0xac   :  { %10520 = vmatprep.mubr.msk.f32.mxu0 %vm479_vm1, %v4382_v4  ;;  %v13257_v4 = vld [vmem:[%s15751_s0 + $0x17c] sm:$0x1]  ;;  %v16206_v44 = vld [vmem:[#allocation27_spill] sm:$0xff] }
  0xad   :  { %16200 = vst [vmem:[#allocation20_spill] sm:$0xff] %v13257_v4  ;;  %v15937_v49 = vunpack.c.l.bf16 %v13257_v4  ;;  %v4392_v31 = vsel %vm1602_vm2, %v4390_v56, %v13249_v50  ;;  %v16207_v9 = vunpack.c.l.bf16 %v16206_v44  ;;  %v13297_v56 = vrot.slane %v12859_v48, 2 }
  0xae   :  { %10057 = vmatmul.mubr.msk.f32.gmra.mrb[18].mxu1 %vm479_vm1, %v16201_v19  ;;  %v4221_v44 = vunpack.c.l.bf16 %v8366_v21  ;;  %v4403_v3 = vrot.slane %v15942_v29, 2 }
  0xaf   :  { %10521 = vmatmul.mubr.msk.f32.gmra.mrb[50].mxu0 %vm479_vm1, %v4384_v53  ;;  %10059 = vmatprep.mubr.msk.f32.mxu1 %vm479_vm1, %v16203_v54  ;;  %v4396_v53 = vrot.slane %v16204_v13, 2  ;;  %v4394_v13 = vsel %vm1602_vm2, %v13249_v50, %v4393_v8  ;;  %v4400_v54 = vrot.slane %v4220_v18, 2  ;;  %v13310_v8 = vld [vmem:[%s15751_s0 + $0x198] sm:$0xff]   ;;  %v16210_v18 = vld [vmem:[#allocation28_spill] sm:$0xff] }
  0xb0   :  { %10523 = vmatprep.mubr.msk.f32.mxu0 %vm479_vm1, %v4387_v6  ;;  %v4398_v6 = vrot.slane %v15937_v49, 2  ;;  %v16209_v49 = vld [vmem:[#allocation30_spill] sm:$0xff]  ;;  %v13327_v4 = vunpack.c.h.bf16 %v13310_v8 }
  0xb1   :  { %v4402_v62 = vsel %vm1602_vm2, %v4400_v54, %v13297_v56  ;;  %v4404_v54 = vsel %vm1602_vm2, %v13297_v56, %v4403_v3 }
  0xb2   :  { %10060 = vmatmul.mubr.msk.f32.gmra.mrb[20].mxu1 %vm479_vm1, %v12018_v28  ;;  %v4397_v28 = vsel %vm1602_vm2, %v4395_v55, %v4396_v53  ;;  %v16211_v55 = vunpack.c.l.bf16 %v16210_v18  ;;  %v4399_v21 = vsel %vm1602_vm2, %v4396_v53, %v4398_v6  ;;  %16212 = vst [vmem:[#allocation25_spill] sm:$0xff] %v13327_v4  ;;  %v16213_v18 = vunpack.c.h.bf16 %v13232_v39  ;;  %v13336_v53 = vld [vmem:[%s15751_s0 + $0x1a0] sm:$0x1]  ;;  %v16215_v6 = vld [vmem:[#allocation32_spill] sm:$0xff] }
  0xb3   :  { %10524 = vmatmul.mubr.msk.f32.gmra.mrb[52].mxu0 %vm479_vm1, %v4389_v52  ;;  %10062 = vmatprep.mubr.msk.f32.mxu1 %vm479_vm1, %v16207_v9  ;;  %v8367_v9 = vld [vmem:[%s15751_s0 + $0x198] sm:$0xe]  ;;  %16214 = vst [vmem:[#allocation23_spill] sm:$0xff] %v13336_v53 }
  0xb4   :  { %10526 = vmatprep.mubr.msk.f32.mxu0 %vm479_vm1, %v4392_v31  ;;  %v13305_v31 = vld [vmem:[%s15751_s0 + $0x194] sm:$0x1]  ;;  %v4406_v43 = vrot.slane %v16213_v18, 2 }
  0xb5   :  { %16208 = vst [vmem:[#allocation22_spill] sm:$0xff] %v13305_v31  ;;  %v15944_v52 = vunpack.c.l.bf16 %v13305_v31  ;;  %v11570_v31 = vld [vmem:[%s15750_s1 + $0x40] sm:$0xff]  }
  0xb6   :  { %10063 = vmatmul.mubr.msk.f32.gmra.mrb[22].mxu1 %vm479_vm1, %v16209_v49 }
  0xb7   :  { %10527 = vmatmul.mubr.msk.f32.gmra.mrb[54].mxu0 %vm479_vm1, %v4394_v13  ;;  %10065 = vmatprep.mubr.msk.f32.mxu1 %vm479_vm1, %v16211_v55  ;;  %v4405_v13 = vrot.slane %v4221_v44, 2  ;;  %v4222_v55 = vunpack.c.l.bf16 %v8367_v9  ;;  %v4408_v44 = vrot.slane %v15944_v52, 2  ;;  %v15943_v9 = vunpack.c.l.bf16 %v13336_v53 }
  0xb8   :  { %10529 = vmatprep.mubr.msk.f32.mxu0 %vm479_vm1, %v4397_v28  ;;  %v16216_v28 = vunpack.c.l.bf16 %v16215_v6  ;;  %v16218_v6 = vld [vmem:[#allocation33_spill] sm:$0xff] }
  0xb9   :  { %v4407_v18 = vsel %vm1602_vm2, %v4405_v13, %v4406_v43  ;;  %v4410_v29 = vrot.slane %v4222_v55, 2  ;;  %v4409_v3 = vsel %vm1602_vm2, %v4406_v43, %v4408_v44  ;;  %v13366_v55 = vld [vmem:[%s15751_s0 + $0x18] sm:$0xff]   ;;  %v8434_v44 = vld [vmem:[%s15751_s0 + $0x24] sm:$0xff]  }
  0xba   :  { %10066 = vmatmul.mubr.msk.f32.gmra.mrb[24].mxu1 %vm479_vm1, %v12103_v37  ;;  %v4411_v37 = vrot.slane %v13327_v4, 2 }
  0xbb   :  { %10530 = vmatmul.mubr.msk.f32.gmra.mrb[56].mxu0 %vm479_vm1, %v4399_v21  ;;  %10068 = vmatprep.mubr.msk.f32.mxu1 %vm479_vm1, %v16216_v28  ;;  %v16217_v21 = vld [vmem:[#allocation35_spill] sm:$0xff]  ;;  %v4413_v28 = vrot.slane %v15943_v9, 2  ;;  %v16227_v9 = vld [vmem:[#allocation44_spill] sm:$0xff] }
  0xbc   :  { %10532 = vmatprep.mubr.msk.f32.mxu0 %vm479_vm1, %v4402_v62  ;;  %v16219_v62 = vunpack.c.l.bf16 %v16218_v6  ;;  %v4412_v13 = vsel %vm1602_vm2, %v4410_v29, %v4411_v37  ;;  %v15950_v29 = vunpack.c.l.bf16 %v13366_v55 }
  0xbd   :  { %v4414_v43 = vsel %vm1602_vm2, %v4411_v37, %v4413_v28  ;;  %v5067_v37 = vunpack.c.l.bf16 %v8434_v44  ;;  %v13395_v28 = vld [vmem:[%s15751_s0 + $0x30] sm:$0xff]  }
  0xbe   :  { %10069 = vmatmul.mubr.msk.f32.gmra.mrb[26].mxu1 %vm479_vm1, %v16217_v21 }
  0xbf   :  { %10533 = vmatmul.mubr.msk.f32.gmra.mrb[58].mxu0 %vm479_vm1, %v4404_v54  ;;  %10071 = vmatprep.mubr.msk.f32.mxu1 %vm479_vm1, %v16219_v62  ;;  %v16220_v54 = vld [vmem:[#allocation37_spill] sm:$0xff]  ;;  %v16223_v62 = vld [vmem:[#allocation39_spill] sm:$0xff] }
  0xc0   :  { %10535 = vmatprep.mubr.msk.f32.mxu0 %vm479_vm1, %v4407_v18  ;;  %v16221_v6 = vunpack.c.l.bf16 %v16220_v54  ;;  %v16222_v18 = vld [vmem:[#allocation40_spill] sm:$0xff]  ;;  %v16225_v54 = vld [vmem:[#allocation41_spill] sm:$0xff] }
  0xc2   :  { %10072 = vmatmul.mubr.msk.f32.gmra.mrb[28].mxu1 %vm479_vm1, %v12177_v22  ;;  %v13384_v22 = vunpack.c.h.bf16 %v13366_v55 }
  0xc3   :  { %10536 = vmatmul.mubr.msk.f32.gmra.mrb[60].mxu0 %vm479_vm1, %v4409_v3  ;;  %10074 = vmatprep.mubr.msk.f32.mxu1 %vm479_vm1, %v16221_v6  ;;  %v16224_v3 = vunpack.c.l.bf16 %v16223_v62  ;;  %v5068_v6 = vunpack.c.h.bf16 %v8434_v44  ;;  %v15945_v62 = vunpack.c.l.bf16 %v13395_v28  ;;  %v16228_v44 = vunpack.c.l.bf16 %v12317_v26 }
  0xc4   :  { %10538 = vmatprep.mubr.msk.f32.mxu0 %vm479_vm1, %v4412_v13  ;;  %v9302_v13 = vld [vmem:[%s15750_s1 + $0x78] sm:$0xff]  }
  0xc6   :  { %10075 = vmatmul.mubr.msk.f32.gmra.mrb[30].mxu1 %vm479_vm1, %v16222_v18 }
  0xc7   :  { %10539 = vmatmul.mubr.msk.f32.gmra.mrb[62].mxu0 %vm479_vm1, %v4414_v43  ;;  %10077 = vmatprep.mubr.msk.f32.mxu1 %vm479_vm1, %v16224_v3  ;;  %v16226_v43 = vunpack.c.l.bf16 %v12290_v10  ;;  %v8438_v3 = vld [vmem:[%s15751_s0 + $0x3c] sm:$0xff]  }
  0xc8   :  { %10549 = vmatprep.mubr.msk.f32.mxu0 %vm479_vm1, %v15950_v29  ;;  %v13422_v10 = vld [vmem:[%s15750_s1 + $0x80] sm:$0xff]   ;;  %v5072_v26 = vunpack.c.h.bf16 %v8438_v3  ;;  %v1609_v29 = vrot.slane %v16167_v24, 2 }
  0xca   :  { %10078 = vmatmul.mubr.msk.f32.gmra.mrb[32].mxu1 %vm479_vm1, %v16225_v54 }
  0xcb   :  { %10550 = vmatmul.mubr.msk.f32.vlgmr.msra.gmra.mrb[0].mxu0 %vm479_vm1, %v13384_v22  ;;  %10080 = vmatprep.mubr.msk.f32.mxu1 %vm479_vm1, %v16226_v43  ;;  %v16229_v43 = vld [vmem:[#allocation46_spill] sm:$0xff] }
  0xcc   :  { %10912 = vmatpush3.bf16.msra.mxu0 %v12472_v25  ;;  %10552 = vmatprep.mubr.msk.f32.mxu0 %vm479_vm1, %v5067_v37  ;;  %v13417_v25 = vunpack.c.h.bf16 %v13395_v28  ;;  %v5071_v37 = vunpack.c.l.bf16 %v8438_v3  ;;  %v16232_v3 = vld [vmem:[#allocation51_spill] sm:$0xff] }
  0xcd   :  { %10914 = vmatprep.subr.bf16.mxu0 %v9302_v13 }
  0xce   :  { %10081 = vmatmul.mubr.msk.f32.gmra.mrb[34].mxu1 %vm479_vm1, %v16227_v9 }
  0xcf   :  { %10553 = vmatmul.mubr.msk.f32.gmra.mrb[2].mxu0 %vm479_vm1, %v5068_v6  ;;  %10083 = vmatprep.mubr.msk.f32.mxu1 %vm479_vm1, %v16228_v44  ;;  %v13433_v6 = vld [vmem:[%s15751_s0 + $0x48] sm:$0xff]   ;;  %v16230_v44 = vunpack.c.l.bf16 %v16229_v43  ;;  %v16233_v43 = vunpack.c.l.bf16 %v16232_v3  ;;  %v16234_v3 = vunpack.c.l.bf16 %v12419_v36  ;;  %v16235_v36 = vunpack.c.l.bf16 %v12491_v16 }
  0xd0   :  { %10555 = vmatprep.mubr.msk.f32.mxu0 %vm479_vm1, %v15945_v62  ;;  %10916 = vmatpush3.bf16.msra.mxu0 %v9302_v13  ;;  %v15946_v52 = vunpack.c.l.bf16 %v13433_v6  ;;  %v8442_v13 = vld [vmem:[%s15751_s0 + $0x54] sm:$0xff]   ;;  %v16236_v16 = vunpack.c.l.bf16 %v12540_v30  ;;  %v16237_v30 = vunpack.c.l.bf16 %v12567_v1  ;;  %v16238_v1 = vunpack.c.l.bf16 %v12619_v63 }
  0xd1   :  { %10918 = vmatprep.subr.bf16.mxu0 %v13422_v10  ;;  %v16231_v62 = vld [vmem:[#allocation49_spill] sm:$0xff] }
  0xd2   :  { %10084 = vmatmul.mubr.msk.f32.gmra.mrb[36].mxu1 %vm479_vm1, %v12331_v0  ;;  %v13452_v0 = vunpack.c.h.bf16 %v13433_v6 }
  0xd3   :  { %10556 = vmatmul.mubr.msk.f32.gmra.mrb[4].mxu0 %vm479_vm1, %v13417_v25  ;;  %10086 = vmatprep.mubr.msk.f32.mxu1 %vm479_vm1, %v16230_v44  ;;  %v13463_v44 = vld [vmem:[%s15751_s0 + $0x60] sm:$0xff]  }
  0xd4   :  { %10558 = vmatprep.mubr.msk.f32.mxu0 %vm479_vm1, %v5071_v37  ;;  %v5075_v37 = vunpack.c.l.bf16 %v8442_v13 }
  0xd6   :  { %10087 = vmatmul.mubr.msk.f32.gmra.mrb[38].mxu1 %vm479_vm1, %v16231_v62 }
  0xd7   :  { %10559 = vmatmul.mubr.msk.f32.gmra.mrb[6].mxu0 %vm479_vm1, %v5072_v26  ;;  %10089 = vmatprep.mubr.msk.f32.mxu1 %vm479_vm1, %v16233_v43  ;;  %v5076_v26 = vunpack.c.h.bf16 %v8442_v13  ;;  %v15949_v43 = vunpack.c.l.bf16 %v13463_v44 }
  0xd8   :  { %10561 = vmatprep.mubr.msk.f32.mxu0 %vm479_vm1, %v15946_v52  ;;  %v8446_v52 = vld [vmem:[%s15751_s0 + $0x6c] sm:$0xff]  }
  0xd9   :  { %v5079_v13 = vunpack.c.l.bf16 %v8446_v52 }
  0xda   :  { %10090 = vmatmul.mubr.msk.f32.gmra.mrb[40].mxu1 %vm479_vm1, %v12449_v2  ;;  %v13481_v2 = vunpack.c.h.bf16 %v13463_v44 }
  0xdb   :  { %10562 = vmatmul.mubr.msk.f32.gmra.mrb[8].mxu0 %vm479_vm1, %v13452_v0  ;;  %10092 = vmatprep.mubr.msk.f32.mxu1 %vm479_vm1, %v16234_v3 }
  0xdc   :  { %10564 = vmatprep.mubr.msk.f32.mxu0 %vm479_vm1, %v5075_v37  ;;  %v13492_v37 = vld [vmem:[%s15751_s0 + $0x78] sm:$0xff]  }
  0xdd   :  { %v15948_v3 = vunpack.c.l.bf16 %v13492_v37 }
  0xde   :  { %10093 = vmatmul.mubr.msk.f32.gmra.mrb[42].mxu1 %vm479_vm1, %v12467_v35 }
  0xdf   :  { %10565 = vmatmul.mubr.msk.f32.gmra.mrb[10].mxu0 %vm479_vm1, %v5076_v26  ;;  %10095 = vmatprep.mubr.msk.f32.mxu1 %vm479_vm1, %v16235_v36  ;;  %v5080_v26 = vunpack.c.h.bf16 %v8446_v52  ;;  %v8450_v36 = vld [vmem:[%s15751_s0 + $0x84] sm:$0xff]  }
  0xe0   :  { %10567 = vmatprep.mubr.msk.f32.mxu0 %vm479_vm1, %v15949_v43  ;;  %v5083_v52 = vunpack.c.l.bf16 %v8450_v36 }
  0xe2   :  { %10096 = vmatmul.mubr.msk.f32.gmra.mrb[44].mxu1 %vm479_vm1, %v12515_v17  ;;  %v13510_v17 = vunpack.c.h.bf16 %v13492_v37 }
  0xe3   :  { %10568 = vmatmul.mubr.msk.f32.gmra.mrb[12].mxu0 %vm479_vm1, %v13481_v2  ;;  %10098 = vmatprep.mubr.msk.f32.mxu1 %vm479_vm1, %v16236_v16 }
  0xe4   :  { %10570 = vmatprep.mubr.msk.f32.mxu0 %vm479_vm1, %v5079_v13  ;;  %v13521_v13 = vld [vmem:[%s15751_s0 + $0x90] sm:$0xff]  }
  0xe5   :  { %v15947_v16 = vunpack.c.l.bf16 %v13521_v13 }
  0xe6   :  { %10099 = vmatmul.mubr.msk.f32.gmra.mrb[46].mxu1 %vm479_vm1, %v12580_v5 }
  0xe7   :  { %10571 = vmatmul.mubr.msk.f32.gmra.mrb[14].mxu0 %vm479_vm1, %v5080_v26  ;;  %10101 = vmatprep.mubr.msk.f32.mxu1 %vm479_vm1, %v16237_v30  ;;  %v5084_v26 = vunpack.c.h.bf16 %v8450_v36  ;;  %v8454_v30 = vld [vmem:[%s15751_s0 + $0x9c] sm:$0xff]   ;;  %v16239_v36 = vld [vmem:[#allocation64_spill] sm:$0xff] }
  0xe8   :  { %10573 = vmatprep.mubr.msk.f32.mxu0 %vm479_vm1, %v15948_v3  ;;  %v16240_v63 = vunpack.c.l.bf16 %v16239_v36  ;;  %v16241_v36 = vunpack.c.l.bf16 %v12701_v58  ;;  %v16242_v3 = vunpack.c.l.bf16 %v12744_v11  ;;  %v16243_v11 = vunpack.c.l.bf16 %v12799_v41 }
  0xe9   :  { %v16244_v41 = vunpack.c.l.bf16 %v12829_v40 }
  0xea   :  { %10102 = vmatmul.mubr.msk.f32.gmra.mrb[48].mxu1 %vm479_vm1, %v12596_v42  ;;  %v13539_v42 = vunpack.c.h.bf16 %v13521_v13 }
  0xeb   :  { %10574 = vmatmul.mubr.msk.f32.gmra.mrb[16].mxu0 %vm479_vm1, %v13510_v17  ;;  %10104 = vmatprep.mubr.msk.f32.mxu1 %vm479_vm1, %v16238_v1  ;;  %v9273_v1 = vld [vmem:[%s15751_s0 + $0xa8] sm:$0xff]  }
  0xec   :  { %10576 = vmatprep.mubr.msk.f32.mxu0 %vm479_vm1, %v5083_v52  ;;  %v5087_v52 = vunpack.c.l.bf16 %v8454_v30 }
  0xee   :  { %10105 = vmatmul.mubr.msk.f32.gmra.mrb[50].mxu1 %vm479_vm1, %v12650_v51 }
  0xef   :  { %10577 = vmatmul.mubr.msk.f32.gmra.mrb[18].mxu0 %vm479_vm1, %v5084_v26  ;;  %10107 = vmatprep.mubr.msk.f32.mxu1 %vm479_vm1, %v16240_v63  ;;  %v5088_v26 = vunpack.c.h.bf16 %v8454_v30  ;;  %v9083_v63 = vunpack.c.l.bf16 %v9273_v1  ;;  %v9274_v30 = vld [vmem:[%s15751_s0 + $0xc0] sm:$0xff]  }
  0xf0   :  { %10579 = vmatprep.mubr.msk.f32.mxu0 %vm479_vm1, %v15947_v16  ;;  %v8458_v16 = vld [vmem:[%s15751_s0 + $0xb4] sm:$0xff]  }
  0xf1   :  { %v5091_v58 = vunpack.c.l.bf16 %v8458_v16 }
  0xf2   :  { %10108 = vmatmul.mubr.msk.f32.gmra.mrb[52].mxu1 %vm479_vm1, %v12707_v47  ;;  %v9084_v47 = vunpack.c.h.bf16 %v9273_v1  ;;  %v5092_v1 = vunpack.c.h.bf16 %v8458_v16 }
  0xf3   :  { %10580 = vmatmul.mubr.msk.f32.gmra.mrb[20].mxu0 %vm479_vm1, %v13539_v42  ;;  %10110 = vmatprep.mubr.msk.f32.mxu1 %vm479_vm1, %v16241_v36 }
  0xf4   :  { %10582 = vmatprep.mubr.msk.f32.mxu0 %vm479_vm1, %v5087_v52  ;;  %v1506_v52 = vld [vmem:[%s15751_s0] sm:$0xe] }
  0xf5   :  { %v1538_v36 = vunpack.c.l.bf16 %v1506_v52  ;;  %v9275_v52 = vld [vmem:[%s15751_s0 + $0xf0] sm:$0xff]  }
  0xf6   :  { %10111 = vmatmul.mubr.msk.f32.gmra.mrb[54].mxu1 %vm479_vm1, %v12725_v59 }
  0xf7   :  { %10583 = vmatmul.mubr.msk.f32.gmra.mrb[22].mxu0 %vm479_vm1, %v5088_v26  ;;  %10113 = vmatprep.mubr.msk.f32.mxu1 %vm479_vm1, %v16242_v3  ;;  %v9087_v3 = vunpack.c.l.bf16 %v9274_v30  ;;  %v8462_v26 = vld [vmem:[%s15751_s0 + $0xcc] sm:$0xff]  }
  0xf8   :  { %10585 = vmatprep.mubr.msk.f32.mxu0 %vm479_vm1, %v9083_v63  ;;  %v1507_v63 = vld [vmem:[%s15751_s0 + $0xc] sm:$0xe]  ;;  %v5095_v16 = vunpack.c.l.bf16 %v8462_v26  ;;  %v5096_v40 = vunpack.c.h.bf16 %v8462_v26 }
  0xfa   :  { %10114 = vmatmul.mubr.msk.f32.gmra.mrb[56].mxu1 %vm479_vm1, %v12771_v20  ;;  %v9088_v20 = vunpack.c.h.bf16 %v9274_v30  ;;  %v16245_v30 = vld [vmem:[#allocation2_spill] sm:$0xff] }
  0xfb   :  { %10586 = vmatmul.mubr.msk.f32.gmra.mrb[24].mxu0 %vm479_vm1, %v9084_v47  ;;  %10116 = vmatprep.mubr.msk.f32.mxu1 %vm479_vm1, %v16243_v11  ;;  %v1603_v47 = vrot.slane %v1538_v36, 2  ;;  %v1539_v11 = vunpack.c.l.bf16 %v1507_v63  ;;  %v9091_v63 = vunpack.c.l.bf16 %v9275_v52 }
  0xfc   :  { %10588 = vmatprep.mubr.msk.f32.mxu0 %vm479_vm1, %v5091_v58  ;;  %v1604_v58 = vrot.slane %v11624_v7, 2  ;;  %v16247_v7 = vunpack.c.l.bf16 %v12885_v45  ;;  %v9092_v45 = vunpack.c.h.bf16 %v9275_v52  ;;  %v1510_v52 = vld [vmem:[%s15751_s0 + $0x30] sm:$0xe] }
  0xfd   :  { %v1608_v43 = vrot.slane %v1539_v11, 2 }
  0xfe   :  { %10117 = vmatmul.mubr.msk.f32.gmra.mrb[58].mxu1 %vm479_vm1, %v12837_v14 }
  0xff   :  { %10589 = vmatmul.mubr.msk.f32.gmra.mrb[26].mxu0 %vm479_vm1, %v5092_v1  ;;  %10119 = vmatprep.mubr.msk.f32.mxu1 %vm479_vm1, %v16244_v41  ;;  %v1508_v1 = vld [vmem:[%s15751_s0 + $0x18] sm:$0xe]  ;;  %v1605_v41 = vsel %vm1602_vm2, %v1603_v47, %v1604_v58  ;;  %v16248_v47 = vld [vmem:[#allocation4_spill] sm:$0xff] }
 0x100   :  { %10591 = vmatprep.mubr.msk.f32.mxu0 %vm479_vm1, %v9087_v3  ;;  %v16246_v3 = vunpack.c.l.bf16 %v16245_v30  ;;  %v1540_v26 = vunpack.c.l.bf16 %v1508_v1  ;;  %v16249_v11 = vunpack.c.l.bf16 %v16248_v47  ;;  %v1610_v30 = vsel %vm1602_vm2, %v1608_v43, %v1609_v29 }
 0x102   :  { %10120 = vmatmul.mubr.msk.f32.gmra.mrb[60].mxu1 %vm479_vm1, %v12859_v48  ;;  %v1606_v36 = vrot.slane %v16246_v3, 2  ;;  %v8466_v48 = vld [vmem:[%s15751_s0 + $0xfc] sm:$0xff]   ;;  %v1611_v1 = vrot.slane %v16249_v11, 2  ;;  %v1613_v3 = vrot.slane %v1540_v26, 2 }
 0x103   :  { %10592 = vmatmul.mubr.msk.f32.gmra.mrb[28].mxu0 %vm479_vm1, %v9088_v20  ;;  %10122 = vmatprep.mubr.msk.f32.mxu1 %vm479_vm1, %v16247_v7  ;;  %v1509_v20 = vld [vmem:[%s15751_s0 + $0x24] sm:$0xe]  ;;  %v9276_v7 = vld [vmem:[%s15751_s0 + $0x108] sm:$0xff]  }
 0x104   :  { %10594 = vmatprep.mubr.msk.f32.mxu0 %vm479_vm1, %v5095_v16  ;;  %v1607_v24 = vsel %vm1602_vm2, %v1604_v58, %v1606_v36  ;;  %v5099_v16 = vunpack.c.l.bf16 %v8466_v48  ;;  %v1541_v53 = vunpack.c.l.bf16 %v1509_v20  ;;  %v9246_v58 = vld [vmem:[%s15750_s1 + $0x38] sm:$0xff]   ;;  %v1612_v43 = vsel %vm1602_vm2, %v1609_v29, %v1611_v1  ;;  %v16252_v20 = vld [vmem:[#allocation47_spill] sm:$0xff] }
 0x105   :  { %v9095_v36 = vunpack.c.l.bf16 %v9276_v7  ;;  %v1615_v47 = vsel %vm1602_vm2, %v1613_v3, %v16252_v20  ;;  %v1511_v29 = vld [vmem:[%s15751_s0 + $0x3c] sm:$0xe] }
 0x106   :  { %10123 = vmatmul.mubr.msk.f32.gmra.mrb[62].mxu1 %vm479_vm1, %v12911_v33  ;;  %v1618_v11 = vrot.slane %v1541_v53, 2 }
 0x107   :  { %10595 = vmatmul.mubr.msk.f32.gmra.mrb[30].mxu0 %vm479_vm1, %v5096_v40  ;;  %10133 = vmatprep.mubr.msk.f32.mxu1 %vm479_vm1, %v1605_v41  ;;  %v5100_v40 = vunpack.c.h.bf16 %v8466_v48  ;;  %v1542_v48 = vunpack.c.l.bf16 %v1510_v52 }
 0x108   :  { %10597 = vmatprep.mubr.msk.f32.mxu0 %vm479_vm1, %v9091_v63  ;;  %v16250_v63 = vld [vmem:[#allocation6_spill] sm:$0xff] }
 0x109   :  { %v16251_v41 = vunpack.c.l.bf16 %v16250_v63  ;;  %v1623_v52 = vrot.slane %v1542_v48, 2 }
 0x10a   :  { %10134 = vmatmul.mubr.msk.f32.vlgmr.msra.gmra.mrb[0].mxu1 %vm479_vm1, %v1607_v24  ;;  %v1619_v24 = vrot.slane %v16175_v60, 2 }
 0x10b   :  { %10598 = vmatmul.mubr.msk.f32.gmra.mrb[32].mxu0 %vm479_vm1, %v9092_v45  ;;  %10880 = vmatpush3.bf16.msra.mxu1 %v13060_v61  ;;  %v1616_v26 = vrot.slane %v16251_v41, 2  ;;  %v8470_v61 = vld [vmem:[%s15751_s0 + $0x114] sm:$0xff]   ;;  %v9096_v45 = vunpack.c.h.bf16 %v9276_v7  ;;  %v1512_v7 = vld [vmem:[%s15751_s0 + $0x48] sm:$0xe] }
 0x10c   :  { %10136 = vmatprep.mubr.msk.f32.mxu1 %vm479_vm1, %v1610_v30  ;;  %10600 = vmatprep.mubr.msk.f32.mxu0 %vm479_vm1, %v5099_v16  ;;  %v5103_v53 = vunpack.c.l.bf16 %v8470_v61  ;;  %v16253_v16 = vld [vmem:[#allocation9_spill] sm:$0xff]  ;;  %v1620_v3 = vsel %vm1602_vm2, %v1618_v11, %v1619_v24  ;;  %v5104_v63 = vunpack.c.h.bf16 %v8470_v61  ;;  %v16257_v11 = vld [vmem:[#allocation52_spill] sm:$0xff] }
 0x10d   :  { %10882 = vmatprep.subr.bf16.mxu1 %v9246_v58  ;;  %v1617_v60 = vsel %vm1602_vm2, %v16252_v20, %v1616_v26  ;;  %v16254_v1 = vunpack.c.l.bf16 %v16253_v16  ;;  %v16255_v26 = vld [vmem:[#allocation11_spill] sm:$0xff]  ;;  %v1625_v48 = vsel %vm1602_vm2, %v1623_v52, %v16257_v11  ;;  %v1629_v16 = vrot.slane %v16184_v34, 2 }
 0x10e   :  { %10137 = vmatmul.mubr.msk.f32.gmra.mrb[2].mxu1 %vm479_vm1, %v1612_v43  ;;  %v9277_v43 = vld [vmem:[%s15751_s0 + $0x120] sm:$0xff]   ;;  %v16256_v20 = vunpack.c.l.bf16 %v16255_v26  ;;  %v8474_v61 = vld [vmem:[%s15751_s0 + $0x12c] sm:$0xff]  }
 0x10f   :  { %10601 = vmatmul.mubr.msk.f32.gmra.mrb[34].mxu0 %vm479_vm1, %v5100_v40  ;;  %10139 = vmatprep.mubr.msk.f32.mxu1 %vm479_vm1, %v1615_v47  ;;  %v1621_v30 = vrot.slane %v16254_v1, 2  ;;  %v1543_v40 = vunpack.c.l.bf16 %v1511_v29  ;;  %v9099_v41 = vunpack.c.l.bf16 %v9277_v43  ;;  %v16258_v1 = vld [vmem:[#allocation14_spill] sm:$0xff]  ;;  %v16260_v26 = vld [vmem:[#allocation16_spill] sm:$0xff] }
 0x110   :  { %10603 = vmatprep.mubr.msk.f32.mxu0 %vm479_vm1, %v9095_v36  ;;  %10884 = vmatpush3.bf16.msra.mxu1 %v9246_v58  ;;  %v11569_v36 = vld [vmem:[%s15750_s1 + $0x40] sm:$0xff]   ;;  %v1626_v47 = vrot.slane %v16256_v20, 2  ;;  %v16261_v20 = vunpack.c.l.bf16 %v16260_v26 }
 0x111   :  { %10925 = vmatprep.subr.bf16.mxu1 %v11569_v36  ;;  %v1622_v58 = vsel %vm1602_vm2, %v1619_v24, %v1621_v30  ;;  %v1628_v29 = vrot.slane %v1543_v40, 2  ;;  %v9100_v24 = vunpack.c.h.bf16 %v9277_v43  ;;  %v16259_v30 = vunpack.c.l.bf16 %v16258_v1  ;;  %v1514_v43 = vld [vmem:[%s15751_s0 + $0x60] sm:$0xe] }
 0x112   :  { %10140 = vmatmul.mubr.msk.f32.gmra.mrb[4].mxu1 %vm479_vm1, %v1617_v60  ;;  %v1513_v60 = vld [vmem:[%s15751_s0 + $0x54] sm:$0xe]  ;;  %v1627_v34 = vsel %vm1602_vm2, %v16257_v11, %v1626_v47  ;;  %v1636_v47 = vrot.slane %v16261_v20, 2 }
 0x113   :  { %10604 = vmatmul.mubr.msk.f32.gmra.mrb[36].mxu0 %vm479_vm1, %v9096_v45  ;;  %10142 = vmatprep.mubr.msk.f32.mxu1 %vm479_vm1, %v1620_v3  ;;  %v1544_v45 = vunpack.c.l.bf16 %v1512_v7  ;;  %v1631_v3 = vrot.slane %v16259_v30, 2  ;;  %v1630_v52 = vsel %vm1602_vm2, %v1628_v29, %v1629_v16  ;;  %v9278_v7 = vld [vmem:[%s15751_s0 + $0x138] sm:$0xff]   ;;  %v1545_v36 = vunpack.c.l.bf16 %v1513_v60  ;;  %v16262_v11 = vld [vmem:[#allocation56_spill] sm:$0xff] }
 0x114   :  { %10606 = vmatprep.mubr.msk.f32.mxu0 %vm479_vm1, %v5103_v53  ;;  %v5107_v53 = vunpack.c.l.bf16 %v8474_v61  ;;  %v1546_v60 = vunpack.c.l.bf16 %v1514_v43 }
 0x115   :  { %v1633_v40 = vrot.slane %v1544_v45, 2  ;;  %v1638_v29 = vrot.slane %v1545_v36, 2  ;;  %v1639_v45 = vrot.slane %v16192_v23, 2  ;;  %v1637_v23 = vsel %vm1602_vm2, %v16262_v11, %v1636_v47  ;;  %v16267_v47 = vld [vmem:[#allocation61_spill] sm:$0xff] }
 0x116   :  { %10143 = vmatmul.mubr.msk.f32.gmra.mrb[6].mxu1 %vm479_vm1, %v1622_v58  ;;  %v1632_v58 = vsel %vm1602_vm2, %v1629_v16, %v1631_v3  ;;  %v9104_v16 = vunpack.c.h.bf16 %v9278_v7 }
 0x117   :  { %10607 = vmatmul.mubr.msk.f32.gmra.mrb[38].mxu0 %vm479_vm1, %v5104_v63  ;;  %10145 = vmatprep.mubr.msk.f32.mxu1 %vm479_vm1, %v1625_v48  ;;  %v5108_v63 = vunpack.c.h.bf16 %v8474_v61  ;;  %v1635_v48 = vsel %vm1602_vm2, %v1633_v40, %v16262_v11  ;;  %v8478_v61 = vld [vmem:[%s15751_s0 + $0x144] sm:$0xff]   ;;  %v1640_v3 = vsel %vm1602_vm2, %v1638_v29, %v1639_v45  ;;  %v9279_v40 = vld [vmem:[%s15751_s0 + $0x150] sm:$0xff]   ;;  %v1649_v29 = vrot.slane %v16201_v19, 2 }
 0x118   :  { %10609 = vmatprep.mubr.msk.f32.mxu0 %vm479_vm1, %v9099_v41  ;;  %v9103_v41 = vunpack.c.l.bf16 %v9278_v7  ;;  %v1516_v7 = vld [vmem:[%s15751_s0 + $0x78] sm:$0xe]  ;;  %v5112_v43 = vunpack.c.h.bf16 %v8478_v61 }
 0x11a   :  { %10146 = vmatmul.mubr.msk.f32.gmra.mrb[8].mxu1 %vm479_vm1, %v1627_v34  ;;  %v5111_v34 = vunpack.c.l.bf16 %v8478_v61  ;;  %v8482_v61 = vld [vmem:[%s15751_s0 + $0x15c] sm:$0xff]  }
 0x11b   :  { %10610 = vmatmul.mubr.msk.f32.gmra.mrb[40].mxu0 %vm479_vm1, %v9100_v24  ;;  %10148 = vmatprep.mubr.msk.f32.mxu1 %vm479_vm1, %v1630_v52  ;;  %v1515_v24 = vld [vmem:[%s15751_s0 + $0x6c] sm:$0xe]  ;;  %v1643_v52 = vrot.slane %v1546_v60, 2  ;;  %v1548_v60 = vunpack.c.l.bf16 %v1516_v7 }
 0x11c   :  { %10612 = vmatprep.mubr.msk.f32.mxu0 %vm479_vm1, %v5107_v53  ;;  %v16263_v53 = vld [vmem:[#allocation19_spill] sm:$0xff]  ;;  %v1547_v36 = vunpack.c.l.bf16 %v1515_v24  ;;  %v1517_v24 = vld [vmem:[%s15751_s0 + $0x84] sm:$0xe] }
 0x11d   :  { %v16264_v1 = vunpack.c.l.bf16 %v16263_v53  ;;  %v1645_v11 = vsel %vm1602_vm2, %v1643_v52, %v16267_v47  ;;  %v1549_v52 = vunpack.c.l.bf16 %v1517_v24 }
 0x11e   :  { %10149 = vmatmul.mubr.msk.f32.gmra.mrb[10].mxu1 %vm479_vm1, %v1632_v58  ;;  %v9107_v58 = vunpack.c.l.bf16 %v9279_v40 }
 0x11f   :  { %10613 = vmatmul.mubr.msk.f32.gmra.mrb[42].mxu0 %vm479_vm1, %v5108_v63  ;;  %10151 = vmatprep.mubr.msk.f32.mxu1 %vm479_vm1, %v1635_v48  ;;  %v1641_v30 = vrot.slane %v16264_v1, 2  ;;  %v1648_v48 = vrot.slane %v1547_v36, 2  ;;  %v5116_v36 = vunpack.c.h.bf16 %v8482_v61 }
 0x120   :  { %10615 = vmatprep.mubr.msk.f32.mxu0 %vm479_vm1, %v9103_v41  ;;  %v16265_v41 = vld [vmem:[#allocation21_spill] sm:$0xff] }
 0x121   :  { %v1642_v63 = vsel %vm1602_vm2, %v1639_v45, %v1641_v30  ;;  %v16266_v26 = vunpack.c.l.bf16 %v16265_v41  ;;  %v9108_v45 = vunpack.c.h.bf16 %v9279_v40  ;;  %v1650_v1 = vsel %vm1602_vm2, %v1648_v48, %v1649_v29  ;;  %v1518_v40 = vld [vmem:[%s15751_s0 + $0x90] sm:$0xe]  ;;  %v8486_v48 = vld [vmem:[%s15751_s0 + $0x174] sm:$0xff]  }
 0x122   :  { %10152 = vmatmul.mubr.msk.f32.gmra.mrb[12].mxu1 %vm479_vm1, %v1637_v23  ;;  %v16268_v23 = vld [vmem:[#allocation24_spill] sm:$0xff]  ;;  %v1653_v30 = vrot.slane %v1548_v60, 2  ;;  %v1519_v60 = vld [vmem:[%s15751_s0 + $0x9c] sm:$0xe]  ;;  %v5119_v24 = vunpack.c.l.bf16 %v8486_v48 }
 0x123   :  { %10616 = vmatmul.mubr.msk.f32.gmra.mrb[44].mxu0 %vm479_vm1, %v9104_v16  ;;  %10154 = vmatprep.mubr.msk.f32.mxu1 %vm479_vm1, %v1640_v3  ;;  %v1646_v20 = vrot.slane %v16266_v26, 2  ;;  %v5115_v16 = vunpack.c.l.bf16 %v8482_v61  ;;  %v9280_v3 = vld [vmem:[%s15751_s0 + $0x168] sm:$0xff]   ;;  %v16272_v26 = vld [vmem:[#allocation66_spill] sm:$0xff]  ;;  %v1550_v61 = vunpack.c.l.bf16 %v1518_v40 }
 0x124   :  { %10618 = vmatprep.mubr.msk.f32.mxu0 %vm479_vm1, %v5111_v34  ;;  %v16269_v34 = vunpack.c.l.bf16 %v16268_v23 }
 0x125   :  { %v1647_v19 = vsel %vm1602_vm2, %v16267_v47, %v1646_v20  ;;  %v1655_v20 = vsel %vm1602_vm2, %v1653_v30, %v16272_v26  ;;  %v1658_v47 = vrot.slane %v1549_v52, 2  ;;  %v1520_v30 = vld [vmem:[%s15751_s0 + $0xa8] sm:$0xe] }
 0x126   :  { %10155 = vmatmul.mubr.msk.f32.gmra.mrb[14].mxu1 %vm479_vm1, %v1642_v63  ;;  %v1651_v53 = vrot.slane %v16269_v34, 2  ;;  %v16270_v63 = vld [vmem:[#allocation26_spill] sm:$0xff]  ;;  %v1663_v34 = vrot.slane %v1550_v61, 2 }
 0x127   :  { %10619 = vmatmul.mubr.msk.f32.gmra.mrb[46].mxu0 %vm479_vm1, %v5112_v43  ;;  %10157 = vmatprep.mubr.msk.f32.mxu1 %vm479_vm1, %v1645_v11  ;;  %v9111_v43 = vunpack.c.l.bf16 %v9280_v3  ;;  %v1659_v11 = vrot.slane %v16209_v49, 2 }
 0x128   :  { %10621 = vmatprep.mubr.msk.f32.mxu0 %vm479_vm1, %v9107_v58  ;;  %v1652_v7 = vsel %vm1602_vm2, %v1649_v29, %v1651_v53  ;;  %v16271_v58 = vunpack.c.l.bf16 %v16270_v63  ;;  %v9112_v29 = vunpack.c.h.bf16 %v9280_v3  ;;  %v9281_v53 = vld [vmem:[%s15751_s0 + $0x180] sm:$0xff]   ;;  %v5120_v3 = vunpack.c.h.bf16 %v8486_v48  ;;  %v16277_v63 = vld [vmem:[#allocation69_spill] sm:$0xff]  ;;  %v1521_v48 = vld [vmem:[%s15751_s0 + $0xb4] sm:$0xe] }
 0x129   :  { %v1660_v23 = vsel %vm1602_vm2, %v1658_v47, %v1659_v11  ;;  %v9115_v40 = vunpack.c.l.bf16 %v9281_v53  ;;  %v1552_v47 = vunpack.c.l.bf16 %v1520_v30 }
 0x12a   :  { %10158 = vmatmul.mubr.msk.f32.gmra.mrb[16].mxu1 %vm479_vm1, %v1647_v19  ;;  %v1656_v41 = vrot.slane %v16271_v58, 2  ;;  %v1665_v58 = vsel %vm1602_vm2, %v1663_v34, %v16277_v63  ;;  %v16280_v34 = vld [vmem:[#allocation36_spill] sm:$0xff] }
 0x12b   :  { %10622 = vmatmul.mubr.msk.f32.gmra.mrb[48].mxu0 %vm479_vm1, %v9108_v45  ;;  %10160 = vmatprep.mubr.msk.f32.mxu1 %vm479_vm1, %v1650_v1  ;;  %v16273_v45 = vld [vmem:[#allocation29_spill] sm:$0xff]  ;;  %v1551_v1 = vunpack.c.l.bf16 %v1519_v60  ;;  %v16278_v60 = vld [vmem:[#allocation34_spill] sm:$0xff] }
 0x12c   :  { %10624 = vmatprep.mubr.msk.f32.mxu0 %vm479_vm1, %v5115_v16  ;;  %v1657_v49 = vsel %vm1602_vm2, %v16272_v26, %v1656_v41  ;;  %v16274_v19 = vunpack.c.l.bf16 %v16273_v45  ;;  %v1669_v26 = vrot.slane %v16217_v21, 2 }
 0x12d   :  { %v1668_v41 = vrot.slane %v1551_v1, 2 }
 0x12e   :  { %10161 = vmatmul.mubr.msk.f32.gmra.mrb[18].mxu1 %vm479_vm1, %v1652_v7  ;;  %v1661_v16 = vrot.slane %v16274_v19, 2  ;;  %v1673_v19 = vrot.slane %v1552_v47, 2  ;;  %v16282_v47 = vld [vmem:[#allocation38_spill] sm:$0xff] }
 0x12f   :  { %10625 = vmatmul.mubr.msk.f32.gmra.mrb[50].mxu0 %vm479_vm1, %v5116_v36  ;;  %10163 = vmatprep.mubr.msk.f32.mxu1 %vm479_vm1, %v1655_v20  ;;  %v16275_v36 = vld [vmem:[#allocation31_spill] sm:$0xff]  ;;  %v1670_v45 = vsel %vm1602_vm2, %v1668_v41, %v1669_v26 }
 0x130   :  { %10627 = vmatprep.mubr.msk.f32.mxu0 %vm479_vm1, %v9111_v43  ;;  %v1662_v52 = vsel %vm1602_vm2, %v1659_v11, %v1661_v16  ;;  %v16276_v7 = vunpack.c.l.bf16 %v16275_v36  ;;  %v8490_v20 = vld [vmem:[%s15751_s0 + $0x18c] sm:$0xff]   ;;  %v9116_v11 = vunpack.c.h.bf16 %v9281_v53  ;;  %v1522_v16 = vld [vmem:[%s15751_s0 + $0xd8] sm:$0xe]  ;;  %v16281_v53 = vunpack.c.l.bf16 %v16280_v34  ;;  %v13835_v36 = vld [vmem:[%s15751_s0 + $0x20] sm:$0x1] }
 0x131   :  { %v5123_v61 = vunpack.c.l.bf16 %v8490_v20  ;;  %v13853_v41 = vld [vmem:[%s15751_s0 + $0x24] sm:$0xff]  }
 0x132   :  { %10164 = vmatmul.mubr.msk.f32.gmra.mrb[20].mxu1 %vm479_vm1, %v1657_v49  ;;  %v1666_v43 = vrot.slane %v16276_v7, 2  ;;  %v1676_v1 = vrot.slane %v16281_v53, 2  ;;  %v1675_v7 = vsel %vm1602_vm2, %v1673_v19, %v12880_v38  ;;  %v15968_v34 = vunpack.c.h.bf16 %v13853_v41  ;;  %v1524_v53 = vld [vmem:[%s15751_s0 + $0xf0] sm:$0xe] }
 0x133   :  { %10628 = vmatmul.mubr.msk.f32.gmra.mrb[52].mxu0 %vm479_vm1, %v9112_v29  ;;  %10166 = vmatprep.mubr.msk.f32.mxu1 %vm479_vm1, %v1660_v23  ;;  %v16279_v29 = vunpack.c.l.bf16 %v16278_v60  ;;  %v5124_v23 = vunpack.c.h.bf16 %v8490_v20  ;;  %v1684_v60 = vrot.slane %v16225_v54, 2 }
 0x134   :  { %10630 = vmatprep.mubr.msk.f32.mxu0 %vm479_vm1, %v5119_v24  ;;  %v1667_v21 = vsel %vm1602_vm2, %v16277_v63, %v1666_v43  ;;  %v1553_v24 = vunpack.c.l.bf16 %v1521_v48  ;;  %v8494_v43 = vld [vmem:[%s15751_s0 + $0x1a4] sm:$0xff]   ;;  %v1554_v63 = vunpack.c.l.bf16 %v1522_v16  ;;  %v16283_v48 = vunpack.c.l.bf16 %v16282_v47 }
 0x135   :  { %v1671_v49 = vrot.slane %v16279_v29, 2  ;;  %v5127_v20 = vunpack.c.l.bf16 %v8494_v43  ;;  %v16284_v29 = vunpack.c.l.bf16 %v13366_v55  ;;  %v5128_v55 = vunpack.c.h.bf16 %v8494_v43 }
 0x136   :  { %10167 = vmatmul.mubr.msk.f32.gmra.mrb[22].mxu1 %vm479_vm1, %v1662_v52  ;;  %v1678_v52 = vrot.slane %v1553_v24, 2  ;;  %v6067_v24 = vrot.slane %v13384_v22, 1 }
 0x137   :  { %10631 = vmatmul.mubr.msk.f32.gmra.mrb[54].mxu0 %vm479_vm1, %v5120_v3  ;;  %10169 = vmatprep.mubr.msk.f32.mxu1 %vm479_vm1, %v1665_v58  ;;  %v1672_v30 = vsel %vm1602_vm2, %v1669_v26, %v1671_v49  ;;  %v9119_v3 = vunpack.c.l.bf16 %v13310_v8  ;;  %v1523_v8 = vld [vmem:[%s15751_s0 + $0xe4] sm:$0xe]  ;;  %v15972_v58 = vunpack.c.l.bf16 %v13835_v36  ;;  %v6066_v49 = vrot.slane %v16284_v29, 1 }
 0x138   :  { %10633 = vmatprep.mubr.msk.f32.mxu0 %vm479_vm1, %v9115_v40  ;;  %v1679_v40 = vrot.slane %v16222_v18, 2  ;;  %v1677_v18 = vsel %vm1602_vm2, %v12880_v38, %v1676_v1  ;;  %v13863_v38 = vld [vmem:[%s15751_s0 + $0x2c] sm:$0x1] }
 0x139   :  { %v6069_v54 = vrot.slane %v15972_v58, 1  ;;  %v15967_v1 = vunpack.c.l.bf16 %v13863_v38 }
 0x13a   :  { %10170 = vmatmul.mubr.msk.f32.gmra.mrb[24].mxu1 %vm479_vm1, %v1667_v21  ;;  %v1680_v26 = vsel %vm1602_vm2, %v1678_v52, %v1679_v40  ;;  %v1555_v21 = vunpack.c.l.bf16 %v1523_v8  ;;  %v1689_v52 = vrot.slane %v16227_v9, 2  ;;  %v1556_v8 = vunpack.c.l.bf16 %v1524_v53 }
 0x13b   :  { %10634 = vmatmul.mubr.msk.f32.gmra.mrb[56].mxu0 %vm479_vm1, %v9116_v11  ;;  %10172 = vmatprep.mubr.msk.f32.mxu1 %vm479_vm1, %v1670_v45  ;;  %v1681_v11 = vrot.slane %v16283_v48, 2  ;;  %v16285_v45 = vld [vmem:[#allocation42_spill] sm:$0xff]  ;;  %v6070_v47 = vsel %vm310_vm0, %v6067_v24, %v6069_v54  ;;  %v16287_v48 = vld [vmem:[#allocation43_spill] sm:$0xff] }
 0x13c   :  { %10636 = vmatprep.mubr.msk.f32.mxu0 %vm479_vm1, %v5123_v61  ;;  %v1683_v61 = vrot.slane %v1554_v63, 2  ;;  %v16286_v19 = vunpack.c.l.bf16 %v16285_v45  ;;  %v6068_v63 = vsel %vm310_vm0, %v6066_v49, %v6067_v24  ;;  %v13920_v24 = vld [vmem:[%s15751_s0 + $0x44] sm:$0x1] }
 0x13e   :  { %10173 = vmatmul.mubr.msk.f32.gmra.mrb[26].mxu1 %vm479_vm1, %v1672_v30  ;;  %v1686_v16 = vrot.slane %v16286_v19, 2  ;;  %v1682_v30 = vsel %vm1602_vm2, %v1679_v40, %v1681_v11  ;;  %v1685_v43 = vsel %vm1602_vm2, %v1683_v61, %v1684_v60  ;;  %v13899_v40 = vld [vmem:[%s15751_s0 + $0x3c] sm:$0xff]   ;;  %v16288_v11 = vunpack.c.l.bf16 %v16287_v48 }
 0x13f   :  { %10637 = vmatmul.mubr.msk.f32.gmra.mrb[58].mxu0 %vm479_vm1, %v5124_v23  ;;  %10175 = vmatprep.mubr.msk.f32.mxu1 %vm479_vm1, %v1675_v7  ;;  %v5877_v23 = vunpack.c.l.bf16 %v13853_v41  ;;  %v13889_v7 = vld [vmem:[%s15751_s0 + $0x38] sm:$0x1]  ;;  %v6074_v61 = vrot.slane %v15967_v1, 1  ;;  %v5883_v45 = vunpack.c.l.bf16 %v13899_v40  ;;  %v15965_v19 = vunpack.c.h.bf16 %v13899_v40 }
 0x140   :  { %10639 = vmatprep.mubr.msk.f32.mxu0 %vm479_vm1, %v9119_v3  ;;  %v1688_v3 = vrot.slane %v1555_v21, 2  ;;  %v1687_v9 = vsel %vm1602_vm2, %v1684_v60, %v1686_v16  ;;  %v1691_v21 = vrot.slane %v16288_v11, 2  ;;  %v15966_v29 = vunpack.c.l.bf16 %v13889_v7  ;;  %v13944_v11 = vld [vmem:[%s15751_s0 + $0x50] sm:$0x1] }
 0x141   :  { %v1693_v16 = vrot.slane %v1556_v8, 2  ;;  %v15961_v48 = vunpack.c.l.bf16 %v13920_v24 }
 0x142   :  { %10176 = vmatmul.mubr.msk.f32.gmra.mrb[28].mxu1 %vm479_vm1, %v1677_v18  ;;  %v1525_v18 = vld [vmem:[%s15751_s0 + $0xfc] sm:$0xe]  ;;  %v1690_v60 = vsel %vm1602_vm2, %v1688_v3, %v1689_v52 }
 0x143   :  { %10640 = vmatmul.mubr.msk.f32.gmra.mrb[60].mxu0 %vm479_vm1, %v13327_v4  ;;  %10178 = vmatprep.mubr.msk.f32.mxu1 %vm479_vm1, %v1680_v26  ;;  %v6071_v26 = vrot.slane %v5877_v23, 1  ;;  %v1557_v49 = vunpack.c.l.bf16 %v1525_v18  ;;  %v16289_v23 = vunpack.c.l.bf16 %v13395_v28  ;;  %v9304_v18 = vld [vmem:[%s15750_s1 + $0x88] sm:$0xff]   ;;  %v1692_v28 = vsel %vm1602_vm2, %v1689_v52, %v1691_v21  ;;  %v1527_v21 = vld [vmem:[%s15751_s0 + $0x114] sm:$0xe] }
 0x144   :  { %10642 = vmatprep.mubr.msk.f32.mxu0 %vm479_vm1, %v5127_v20  ;;  %v6072_v20 = vrot.slane %v15968_v34, 1  ;;  %v6081_v52 = vrot.slane %v5883_v45, 1 }
 0x145   :  { %v6076_v53 = vrot.slane %v16289_v23, 1 }
 0x146   :  { %10179 = vmatmul.mubr.msk.f32.gmra.mrb[30].mxu1 %vm479_vm1, %v1682_v30  ;;  %v6073_v54 = vsel %vm310_vm0, %v6071_v26, %v6072_v20  ;;  %v16290_v30 = vld [vmem:[#allocation45_spill] sm:$0xff]  ;;  %v6075_v8 = vsel %vm310_vm0, %v6072_v20, %v6074_v61  ;;  %v6079_v26 = vrot.slane %v15966_v29, 1  ;;  %v6082_v20 = vrot.slane %v15965_v19, 1 }
 0x147   :  { %10643 = vmatmul.mubr.msk.f32.gmra.mrb[62].mxu0 %vm479_vm1, %v5128_v55  ;;  %10181 = vmatprep.mubr.msk.f32.mxu1 %vm479_vm1, %v1685_v43  ;;  %v6077_v55 = vrot.slane %v13417_v25, 1  ;;  %v16291_v3 = vunpack.c.l.bf16 %v16290_v30  ;;  %v1695_v61 = vsel %vm1602_vm2, %v1693_v16, %v12992_v12  ;;  %v16292_v16 = vld [vmem:[#allocation50_spill] sm:$0xff]  ;;  %v6084_v30 = vrot.slane %v15961_v48, 1 }
 0x148   :  { %10653 = vmatprep.mubr.msk.f32.mxu0 %vm479_vm1, %v6068_v63  ;;  %v1526_v63 = vld [vmem:[%s15751_s0 + $0x108] sm:$0xe] }
 0x149   :  { %v1696_v43 = vrot.slane %v16291_v3, 2  ;;  %v1558_v23 = vunpack.c.l.bf16 %v1526_v63  ;;  %v6080_v45 = vsel %vm310_vm0, %v6077_v55, %v6079_v26  ;;  %v1559_v3 = vunpack.c.l.bf16 %v1527_v21 }
 0x14a   :  { %10182 = vmatmul.mubr.msk.f32.gmra.mrb[32].mxu1 %vm479_vm1, %v1687_v9  ;;  %v1698_v9 = vrot.slane %v1557_v49, 2  ;;  %v15952_v49 = vunpack.c.l.bf16 %v13944_v11  ;;  %v16294_v26 = vunpack.c.l.bf16 %v13433_v6  ;;  %v1709_v6 = vrot.slane %v12467_v35, 2  ;;  %v1529_v35 = vld [vmem:[%s15751_s0 + $0x12c] sm:$0xe] }
 0x14b   :  { %10654 = vmatmul.mubr.msk.f32.vlgmr.msra.gmra.mrb[0].mxu0 %vm479_vm1, %v6070_v47  ;;  %10184 = vmatprep.mubr.msk.f32.mxu1 %vm479_vm1, %v1690_v60  ;;  %v1699_v47 = vrot.slane %v16231_v62, 2  ;;  %v13961_v62 = vld [vmem:[%s15751_s0 + $0x54] sm:$0xff]   ;;  %v1697_v60 = vsel %vm1602_vm2, %v12992_v12, %v1696_v43  ;;  %v6083_v43 = vsel %vm310_vm0, %v6081_v52, %v6082_v20 }
 0x14c   :  { %10920 = vmatpush3.bf16.msra.mxu0 %v13422_v10  ;;  %10656 = vmatprep.mubr.msk.f32.mxu0 %vm479_vm1, %v6073_v54  ;;  %v6078_v10 = vsel %vm310_vm0, %v6076_v53, %v6077_v55  ;;  %v16293_v53 = vunpack.c.l.bf16 %v16292_v16  ;;  %v5889_v63 = vunpack.c.l.bf16 %v13961_v62  ;;  %v13982_v55 = vld [vmem:[%s15751_s0 + $0x5c] sm:$0x1]  ;;  %v6086_v21 = vrot.slane %v16294_v26, 1 }
 0x14d   :  { %10922 = vmatprep.subr.bf16.mxu0 %v9304_v18  ;;  %v1700_v12 = vsel %vm1602_vm2, %v1698_v9, %v1699_v47  ;;  %v6089_v52 = vrot.slane %v15952_v49, 1  ;;  %v15953_v26 = vunpack.c.l.bf16 %v13982_v55 }
 0x14e   :  { %10185 = vmatmul.mubr.msk.f32.gmra.mrb[34].mxu1 %vm479_vm1, %v1692_v28  ;;  %v1701_v54 = vrot.slane %v16293_v53, 2  ;;  %v15954_v28 = vunpack.c.h.bf16 %v13961_v62  ;;  %v1528_v53 = vld [vmem:[%s15751_s0 + $0x120] sm:$0xe] }
 0x14f   :  { %10657 = vmatmul.mubr.msk.f32.gmra.mrb[2].mxu0 %vm479_vm1, %v6075_v8  ;;  %10187 = vmatprep.mubr.msk.f32.mxu1 %vm479_vm1, %v1695_v61  ;;  %v1703_v8 = vrot.slane %v1558_v23, 2  ;;  %v6087_v61 = vrot.slane %v13452_v0, 1  ;;  %v1708_v23 = vrot.slane %v1559_v3, 2 }
 0x150   :  { %10659 = vmatprep.mubr.msk.f32.mxu0 %vm479_vm1, %v6078_v10  ;;  %10924 = vmatpush3.bf16.msra.mxu0 %v9304_v18  ;;  %v16295_v10 = vld [vmem:[#allocation53_spill] sm:$0xff]  ;;  %v1702_v18 = vsel %vm1602_vm2, %v1699_v47, %v1701_v54  ;;  %v6092_v49 = vrot.slane %v15954_v28, 1  ;;  %v1560_v54 = vunpack.c.l.bf16 %v1528_v53  ;;  %v1561_v53 = vunpack.c.l.bf16 %v1529_v35 }
 0x151   :  { %v16296_v9 = vunpack.c.l.bf16 %v16295_v10  ;;  %v6085_v10 = vsel %vm310_vm0, %v6082_v20, %v6084_v30  ;;  %v6088_v47 = vsel %vm310_vm0, %v6086_v21, %v6087_v61  ;;  %v14018_v20 = vld [vmem:[%s15751_s0 + $0x6c] sm:$0xff]   ;;  %v6090_v3 = vsel %vm310_vm0, %v6087_v61, %v6089_v52 }
 0x152   :  { %10188 = vmatmul.mubr.msk.f32.gmra.mrb[36].mxu1 %vm479_vm1, %v1697_v60  ;;  %v14007_v60 = vld [vmem:[%s15751_s0 + $0x68] sm:$0x1]  ;;  %v15955_v52 = vunpack.c.h.bf16 %v14018_v20  ;;  %v16299_v35 = vunpack.c.l.bf16 %v13463_v44  ;;  %v1719_v44 = vrot.slane %v12580_v5, 2  ;;  %v1531_v5 = vld [vmem:[%s15751_s0 + $0x144] sm:$0xe] }
 0x153   :  { %v1706_v16 = vrot.slane %v16296_v9, 2  ;;  %10660 = vmatmul.mubr.msk.f32.gmra.mrb[4].mxu0 %vm479_vm1, %v6080_v45  ;;  %10190 = vmatprep.mubr.msk.f32.mxu1 %vm479_vm1, %v1700_v12  ;;  %v6091_v9 = vrot.slane %v5889_v63, 1  ;;  %v1705_v45 = vsel %vm1602_vm2, %v1703_v8, %v13040_v32  ;;  %v16297_v12 = vld [vmem:[#allocation54_spill] sm:$0xff]  ;;  %v6094_v8 = vrot.slane %v15953_v26, 1 }
 0x154   :  { %10662 = vmatprep.mubr.msk.f32.mxu0 %vm479_vm1, %v6083_v43  ;;  %v16298_v43 = vunpack.c.l.bf16 %v16297_v12  ;;  %v15957_v21 = vunpack.c.l.bf16 %v14007_v60  ;;  %v6096_v12 = vrot.slane %v16299_v35, 1 }
 0x155   :  { %v1707_v30 = vsel %vm1602_vm2, %v13040_v32, %v1706_v16  ;;  %v1710_v32 = vsel %vm1602_vm2, %v1708_v23, %v1709_v6  ;;  %v6093_v61 = vsel %vm310_vm0, %v6091_v9, %v6092_v49  ;;  %v5895_v16 = vunpack.c.l.bf16 %v14018_v20  ;;  %v1530_v9 = vld [vmem:[%s15751_s0 + $0x138] sm:$0xe] }
 0x156   :  { %10191 = vmatmul.mubr.msk.f32.gmra.mrb[38].mxu1 %vm479_vm1, %v1702_v18  ;;  %v1711_v63 = vrot.slane %v16298_v43, 2  ;;  %v14039_v18 = vld [vmem:[%s15751_s0 + $0x74] sm:$0x1]  ;;  %v6099_v26 = vrot.slane %v15957_v21, 1 }
 0x157   :  { %10663 = vmatmul.mubr.msk.f32.gmra.mrb[6].mxu0 %vm479_vm1, %v6085_v10  ;;  %10193 = vmatprep.mubr.msk.f32.mxu1 %vm479_vm1, %v1705_v45  ;;  %v1713_v10 = vrot.slane %v1560_v54, 2  ;;  %v6097_v45 = vrot.slane %v13481_v2, 1  ;;  %v1718_v54 = vrot.slane %v1561_v53, 2  ;;  %v15956_v35 = vunpack.c.l.bf16 %v14039_v18 }
 0x158   :  { %10665 = vmatprep.mubr.msk.f32.mxu0 %vm479_vm1, %v6088_v47  ;;  %v16300_v47 = vld [vmem:[#allocation57_spill] sm:$0xff]  ;;  %v6101_v28 = vrot.slane %v5895_v16, 1 }
 0x159   :  { %v16301_v43 = vunpack.c.l.bf16 %v16300_v47  ;;  %v1712_v47 = vsel %vm1602_vm2, %v1709_v6, %v1711_v63  ;;  %v1715_v53 = vsel %vm1602_vm2, %v1713_v10, %v13095_v57  ;;  %v6098_v6 = vsel %vm310_vm0, %v6096_v12, %v6097_v45 }
 0x15a   :  { %10194 = vmatmul.mubr.msk.f32.gmra.mrb[40].mxu1 %vm479_vm1, %v1707_v30  ;;  %v6102_v30 = vrot.slane %v15955_v52, 1  ;;  %v1562_v63 = vunpack.c.l.bf16 %v1530_v9  ;;  %v6100_v10 = vsel %vm310_vm0, %v6097_v45, %v6099_v26  ;;  %v6104_v12 = vrot.slane %v15956_v35, 1  ;;  %v14096_v26 = vld [vmem:[%s15751_s0 + $0x8c] sm:$0x1] }
 0x15b   :  { %v1716_v23 = vrot.slane %v16301_v43, 2  ;;  %10666 = vmatmul.mubr.msk.f32.gmra.mrb[8].mxu0 %vm479_vm1, %v6090_v3  ;;  %10196 = vmatprep.mubr.msk.f32.mxu1 %vm479_vm1, %v1710_v32  ;;  %v6095_v43 = vsel %vm310_vm0, %v6092_v49, %v6094_v8  ;;  %v14064_v3 = vld [vmem:[%s15751_s0 + $0x80] sm:$0x1]  ;;  %v14075_v49 = vld [vmem:[%s15751_s0 + $0x84] sm:$0xff]   ;;  %v1563_v52 = vunpack.c.l.bf16 %v1531_v5  ;;  %v16304_v5 = vunpack.c.l.bf16 %v13492_v37 }
 0x15c   :  { %10668 = vmatprep.mubr.msk.f32.mxu0 %vm479_vm1, %v6093_v61  ;;  %v16302_v32 = vld [vmem:[#allocation59_spill] sm:$0xff]  ;;  %v15960_v9 = vunpack.c.l.bf16 %v14064_v3  ;;  %v1723_v45 = vrot.slane %v1562_v63, 2  ;;  %v15958_v21 = vunpack.c.l.bf16 %v14096_v26 }
 0x15d   :  { %v1717_v8 = vsel %vm1602_vm2, %v13095_v57, %v1716_v23  ;;  %v16303_v61 = vunpack.c.l.bf16 %v16302_v32  ;;  %v1720_v57 = vsel %vm1602_vm2, %v1718_v54, %v1719_v44  ;;  %v6103_v23 = vsel %vm310_vm0, %v6101_v28, %v6102_v30  ;;  %v1532_v54 = vld [vmem:[%s15751_s0 + $0x150] sm:$0xe] }
 0x15e   :  { %10197 = vmatmul.mubr.msk.f32.gmra.mrb[42].mxu1 %vm479_vm1, %v1712_v47  ;;  %v5901_v47 = vunpack.c.l.bf16 %v14075_v49  ;;  %v6106_v32 = vrot.slane %v16304_v5, 1  ;;  %v6109_v63 = vrot.slane %v15960_v9, 1  ;;  %v1728_v37 = vrot.slane %v1563_v52, 2 }
 0x15f   :  { %v1721_v16 = vrot.slane %v16303_v61, 2  ;;  %10669 = vmatmul.mubr.msk.f32.gmra.mrb[10].mxu0 %vm479_vm1, %v6095_v43  ;;  %10199 = vmatprep.mubr.msk.f32.mxu1 %vm479_vm1, %v1715_v53  ;;  %v15959_v43 = vunpack.c.h.bf16 %v14075_v49  ;;  %v6107_v53 = vrot.slane %v13510_v17, 1  ;;  %v1729_v5 = vrot.slane %v12650_v51, 2 }
 0x160   :  { %10671 = vmatprep.mubr.msk.f32.mxu0 %vm479_vm1, %v6098_v6  ;;  %v16305_v6 = vld [vmem:[#allocation60_spill] sm:$0xff]  ;;  %v1725_v51 = vsel %vm1602_vm2, %v1723_v45, %v13148_v46 }
 0x161   :  { %v1722_v28 = vsel %vm1602_vm2, %v1719_v44, %v1721_v16  ;;  %v16306_v61 = vunpack.c.l.bf16 %v16305_v6  ;;  %v6105_v44 = vsel %vm310_vm0, %v6102_v30, %v6104_v12  ;;  %v6111_v16 = vrot.slane %v5901_v47, 1  ;;  %v16307_v12 = vld [vmem:[#allocation63_spill] sm:$0xff] }
 0x162   :  { %10200 = vmatmul.mubr.msk.f32.gmra.mrb[44].mxu1 %vm479_vm1, %v1717_v8  ;;  %v6112_v8 = vrot.slane %v15959_v43, 1  ;;  %v1564_v6 = vunpack.c.l.bf16 %v1532_v54  ;;  %v6108_v52 = vsel %vm310_vm0, %v6106_v32, %v6107_v53  ;;  %v14136_v54 = vld [vmem:[%s15751_s0 + $0x9c] sm:$0xff]   ;;  %v6110_v45 = vsel %vm310_vm0, %v6107_v53, %v6109_v63  ;;  %v1534_v53 = vld [vmem:[%s15751_s0 + $0x168] sm:$0xe] }
 0x163   :  { %v1726_v35 = vrot.slane %v16306_v61, 2  ;;  %10672 = vmatmul.mubr.msk.f32.gmra.mrb[12].mxu0 %vm479_vm1, %v6100_v10  ;;  %10202 = vmatprep.mubr.msk.f32.mxu1 %vm479_vm1, %v1720_v57  ;;  %v14121_v10 = vld [vmem:[%s15751_s0 + $0x98] sm:$0x1]  ;;  %v1533_v57 = vld [vmem:[%s15751_s0 + $0x15c] sm:$0xe]  ;;  %v1730_v32 = vsel %vm1602_vm2, %v1728_v37, %v1729_v5  ;;  %v6114_v61 = vrot.slane %v15958_v21, 1  ;;  %v16309_v63 = vunpack.c.l.bf16 %v13521_v13 }
 0x164   :  { %10674 = vmatprep.mubr.msk.f32.mxu0 %vm479_vm1, %v6103_v23  ;;  %v16308_v23 = vunpack.c.l.bf16 %v16307_v12  ;;  %v1733_v12 = vrot.slane %v1564_v6, 2  ;;  %v14164_v6 = vld [vmem:[%s15751_s0 + $0xa8] sm:$0xff]   ;;  %v1566_v48 = vunpack.c.l.bf16 %v1534_v53 }
 0x165   :  { %v1727_v30 = vsel %vm1602_vm2, %v13148_v46, %v1726_v35  ;;  %v15962_v46 = vunpack.c.l.bf16 %v14121_v10  ;;  %v6113_v35 = vsel %vm310_vm0, %v6111_v16, %v6112_v8  ;;  %v6116_v37 = vrot.slane %v16309_v63, 1 }
 0x166   :  { %v1731_v47 = vrot.slane %v16308_v23, 2  ;;  %10203 = vmatmul.mubr.msk.f32.gmra.mrb[46].mxu1 %vm479_vm1, %v1722_v28  ;;  %v1565_v23 = vunpack.c.l.bf16 %v1533_v57  ;;  %v14151_v28 = vld [vmem:[%s15751_s0 + $0xa4] sm:$0x1]  ;;  %v15964_v16 = vunpack.c.h.bf16 %v14136_v54  ;;  %v16310_v57 = vld [vmem:[#allocation65_spill] sm:$0xff]  ;;  %v6115_v13 = vsel %vm310_vm0, %v6112_v8, %v6114_v61  ;;  %v14185_v8 = vld [vmem:[%s15751_s0 + $0xb0] sm:$0x1] }
 0x167   :  { %10675 = vmatmul.mubr.msk.f32.gmra.mrb[14].mxu0 %vm479_vm1, %v6105_v44  ;;  %10205 = vmatprep.mubr.msk.f32.mxu1 %vm479_vm1, %v1725_v51  ;;  %v6117_v44 = vrot.slane %v13539_v42, 1  ;;  %v5907_v51 = vunpack.c.l.bf16 %v14136_v54  ;;  %v16311_v21 = vunpack.c.l.bf16 %v16310_v57  ;;  %v6119_v63 = vrot.slane %v15962_v46, 1  ;;  %v1535_v46 = vld [vmem:[%s15751_s0 + $0x174] sm:$0xe] }
 0x168   :  { %10677 = vmatprep.mubr.msk.f32.mxu0 %vm479_vm1, %v6108_v52  ;;  %v1732_v52 = vsel %vm1602_vm2, %v1729_v5, %v1731_v47  ;;  %v15963_v9 = vunpack.c.l.bf16 %v14151_v28  ;;  %v1738_v5 = vrot.slane %v1565_v23, 2  ;;  %v1739_v47 = vrot.slane %v12725_v59, 2  ;;  %v16312_v23 = vld [vmem:[#allocation67_spill] sm:$0xff] }
 0x169   :  { %v1736_v43 = vrot.slane %v16311_v21, 2  ;;  %v15979_v21 = vunpack.c.l.bf16 %v14164_v6  ;;  %v6121_v61 = vrot.slane %v5907_v51, 1  ;;  %v16313_v53 = vunpack.c.l.bf16 %v16312_v23 }
 0x16a   :  { %10206 = vmatmul.mubr.msk.f32.gmra.mrb[48].mxu1 %vm479_vm1, %v1727_v30  ;;  %v14180_v30 = vunpack.c.h.bf16 %v14164_v6  ;;  %v6120_v51 = vsel %vm310_vm0, %v6117_v44, %v6119_v63  ;;  %v1740_v23 = vsel %vm1602_vm2, %v1738_v5, %v1739_v47  ;;  %v14230_v5 = vld [vmem:[%s15751_s0 + $0xc0] sm:$0xff]  }
 0x16b   :  { %10678 = vmatmul.mubr.msk.f32.gmra.mrb[16].mxu0 %vm479_vm1, %v6110_v45  ;;  %10208 = vmatprep.mubr.msk.f32.mxu1 %vm479_vm1, %v1730_v32  ;;  %v1735_v45 = vsel %vm1602_vm2, %v1733_v12, %v13196_v27  ;;  %v6118_v32 = vsel %vm310_vm0, %v6116_v37, %v6117_v44  ;;  %v1737_v59 = vsel %vm1602_vm2, %v13196_v27, %v1736_v43  ;;  %v1741_v57 = vrot.slane %v16313_v53, 2  ;;  %v14202_v12 = vld [vmem:[%s15751_s0 + $0xb4] sm:$0xff]  }
 0x16c   :  { %10680 = vmatprep.mubr.msk.f32.mxu0 %vm479_vm1, %v6113_v35  ;;  %v6122_v35 = vrot.slane %v15964_v16, 1  ;;  %16314 = vst [vmem:[#allocation27_spill] sm:$0xff] %v14202_v12  ;;  %v6124_v37 = vrot.slane %v15963_v9, 1  ;;  %v1743_v27 = vrot.slane %v1566_v48, 2  ;;  %v15969_v43 = vunpack.c.l.bf16 %v14185_v8  ;;  %v1536_v48 = vld [vmem:[%s15751_s0 + $0x180] sm:$0xe] }
 0x16d   :  { %v6126_v53 = vrot.slane %v15979_v21, 1  ;;  %v5913_v44 = vunpack.c.l.bf16 %v14202_v12  ;;  %v15970_v63 = vunpack.c.h.bf16 %v14202_v12  ;;  %v1742_v9 = vsel %vm1602_vm2, %v1739_v47, %v1741_v57  ;;  %v16316_v16 = vld [vmem:[#allocation70_spill] sm:$0xff] }
 0x16e   :  { %10209 = vmatmul.mubr.msk.f32.gmra.mrb[50].mxu1 %vm479_vm1, %v1732_v52  ;;  %v6127_v52 = vrot.slane %v14180_v30, 1  ;;  %v16317_v19 = vunpack.c.l.bf16 %v16316_v16  ;;  %v1568_v34 = vunpack.c.l.bf16 %v1536_v48  ;;  %v1745_v16 = vsel %vm1602_vm2, %v1743_v27, %v13249_v50  ;;  %v1537_v27 = vld [vmem:[%s15751_s0 + $0x18c] sm:$0xe]  ;;  %v16319_v48 = vld [vmem:[#allocation72_spill] sm:$0xff] }
 0x16f   :  { %10681 = vmatmul.mubr.msk.f32.gmra.mrb[18].mxu0 %vm479_vm1, %v6115_v13  ;;  %10211 = vmatprep.mubr.msk.f32.mxu1 %vm479_vm1, %v1735_v45  ;;  %v14219_v13 = vld [vmem:[%s15751_s0 + $0xbc] sm:$0x1]  ;;  %v6123_v45 = vsel %vm310_vm0, %v6121_v61, %v6122_v35  ;;  %v6129_v61 = vrot.slane %v15969_v43, 1  ;;  %v15977_v47 = vunpack.c.l.bf16 %v14230_v5 }
 0x170   :  { %10683 = vmatprep.mubr.msk.f32.mxu0 %vm479_vm1, %v6118_v32  ;;  %16315 = vst [vmem:[#allocation30_spill] sm:$0xff] %v14219_v13  ;;  %v1567_v32 = vunpack.c.l.bf16 %v1535_v46  ;;  %v1746_v29 = vrot.slane %v16317_v19, 2  ;;  %v6125_v46 = vsel %vm310_vm0, %v6122_v35, %v6124_v37  ;;  %v15971_v1 = vunpack.c.l.bf16 %v14219_v13  ;;  %v14253_v35 = vld [vmem:[%s15751_s0 + $0xc8] sm:$0x1] }
 0x171   :  { %v6128_v19 = vsel %vm310_vm0, %v6126_v53, %v6127_v52  ;;  %16318 = vst [vmem:[#allocation28_spill] sm:$0xff] %v14253_v35  ;;  %v1749_v37 = vrot.slane %v12837_v14, 2 }
 0x172   :  { %10212 = vmatmul.mubr.msk.f32.gmra.mrb[52].mxu1 %vm479_vm1, %v1737_v59  ;;  %v14248_v59 = vunpack.c.h.bf16 %v14230_v5  ;;  %v1748_v57 = vrot.slane %v1567_v32, 2  ;;  %v1747_v53 = vsel %vm1602_vm2, %v13249_v50, %v1746_v29  ;;  %v14268_v32 = vld [vmem:[%s15751_s0 + $0xcc] sm:$0xff]   ;;  %v6134_v14 = vrot.slane %v15971_v1, 1 }
 0x173   :  { %10684 = vmatmul.mubr.msk.f32.gmra.mrb[20].mxu0 %vm479_vm1, %v6120_v51  ;;  %10214 = vmatprep.mubr.msk.f32.mxu1 %vm479_vm1, %v1740_v23  ;;  %v6131_v51 = vrot.slane %v5913_v44, 1  ;;  %v6132_v23 = vrot.slane %v15970_v63, 1  ;;  %16321 = vst [vmem:[#allocation32_spill] sm:$0xff] %v14268_v32  ;;  %v1753_v44 = vrot.slane %v1568_v34, 2  ;;  %v15975_v63 = vunpack.c.l.bf16 %v14253_v35 }
 0x174   :  { %10686 = vmatprep.mubr.msk.f32.mxu0 %vm479_vm1, %v6123_v45  ;;  %v16320_v45 = vunpack.c.l.bf16 %v16319_v48  ;;  %v6130_v50 = vsel %vm310_vm0, %v6127_v52, %v6129_v61  ;;  %v6136_v29 = vrot.slane %v15977_v47, 1  ;;  %v6137_v48 = vrot.slane %v14248_v59, 1  ;;  %v14294_v61 = vld [vmem:[%s15751_s0 + $0xf0] sm:$0xff]  }
 0x175   :  { %v5919_v34 = vunpack.c.l.bf16 %v14268_v32  ;;  %v15973_v1 = vunpack.c.h.bf16 %v14268_v32 }
 0x176   :  { %v1751_v43 = vrot.slane %v16320_v45, 2  ;;  %10215 = vmatmul.mubr.msk.f32.gmra.mrb[54].mxu1 %vm479_vm1, %v1742_v9  ;;  %v1569_v9 = vunpack.c.l.bf16 %v1537_v27  ;;  %v6133_v45 = vsel %vm310_vm0, %v6131_v51, %v6132_v23  ;;  %v16323_v51 = vld [vmem:[#allocation73_spill] sm:$0xff] }
 0x177   :  { %10687 = vmatmul.mubr.msk.f32.gmra.mrb[22].mxu0 %vm479_vm1, %v6125_v46  ;;  %10217 = vmatprep.mubr.msk.f32.mxu1 %vm479_vm1, %v1745_v16  ;;  %v1750_v46 = vsel %vm1602_vm2, %v1748_v57, %v1749_v37  ;;  %v14288_v16 = vld [vmem:[%s15751_s0 + $0xd4] sm:$0x1]  ;;  %v1755_v57 = vsel %vm1602_vm2, %v1753_v44, %v13297_v56  ;;  %v16324_v27 = vunpack.c.l.bf16 %v16323_v51  ;;  %v6142_v44 = vrot.slane %v15973_v1, 1 }
 0x178   :  { %10689 = vmatprep.mubr.msk.f32.mxu0 %vm479_vm1, %v6128_v19  ;;  %16322 = vst [vmem:[#allocation35_spill] sm:$0xff] %v14288_v16  ;;  %v1752_v52 = vsel %vm1602_vm2, %v1749_v37, %v1751_v43  ;;  %v6135_v19 = vsel %vm310_vm0, %v6132_v23, %v6134_v14  ;;  %v6139_v43 = vrot.slane %v15975_v63, 1  ;;  %v6138_v37 = vsel %vm310_vm0, %v6136_v29, %v6137_v48  ;;  %v14328_v29 = vld [vmem:[%s15751_s0 + $0xfc] sm:$0xff]  }
 0x179   :  { %v1756_v58 = vrot.slane %v16324_v27, 2  ;;  %v15974_v23 = vunpack.c.l.bf16 %v14288_v16  ;;  %v6141_v14 = vrot.slane %v5919_v34, 1  ;;  %v15976_v51 = vunpack.c.l.bf16 %v14294_v61  ;;  %16326 = vst [vmem:[#allocation37_spill] sm:$0xff] %v14328_v29 }
 0x17a   :  { %10218 = vmatmul.mubr.msk.f32.gmra.mrb[56].mxu1 %vm479_vm1, %v1747_v53  ;;  %v1758_v53 = vrot.slane %v1569_v9, 2  ;;  %v14314_v27 = vunpack.c.h.bf16 %v14294_v61  ;;  %v6140_v9 = vsel %vm310_vm0, %v6137_v48, %v6139_v43  ;;  %v8048_v48 = vld [vmem:[%s15751_s0 + $0xc] sm:$0xff]  }
 0x17b   :  { %10690 = vmatmul.mubr.msk.f32.gmra.mrb[24].mxu0 %vm479_vm1, %v6130_v50  ;;  %10220 = vmatprep.mubr.msk.f32.mxu1 %vm479_vm1, %v1750_v46  ;;  %v1759_v50 = vrot.slane %v12911_v33, 2  ;;  %v14319_v46 = vld [vmem:[%s15751_s0 + $0xf8] sm:$0x1]  ;;  %v1757_v33 = vsel %vm1602_vm2, %v13297_v56, %v1756_v58  ;;  %v14341_v56 = vld [vmem:[%s15751_s0 + $0x104] sm:$0x1]  ;;  %v6146_v43 = vrot.slane %v15976_v51, 1  ;;  %v2413_v51 = vunpack.c.l.bf16 %v8048_v48 }
 0x17c   :  { %10692 = vmatprep.mubr.msk.f32.mxu0 %vm479_vm1, %v6133_v45  ;;  %16325 = vst [vmem:[#allocation33_spill] sm:$0xff] %v14319_v46  ;;  %v16327_v45 = vld [vmem:[#allocation75_spill] sm:$0xff]  ;;  %16329 = vst [vmem:[#allocation40_spill] sm:$0xff] %v14341_v56 }
 0x17d   :  { %v16328_v34 = vunpack.c.l.bf16 %v16327_v45  ;;  %v1760_v58 = vsel %vm1602_vm2, %v1758_v53, %v1759_v50  ;;  %v5925_v45 = vunpack.c.l.bf16 %v14328_v29  ;;  %v15981_v53 = vunpack.c.l.bf16 %v14341_v56 }
 0x17e   :  { %10221 = vmatmul.mubr.msk.f32.gmra.mrb[58].mxu1 %vm479_vm1, %v1752_v52  ;;  %v6144_v52 = vrot.slane %v15974_v23, 1  ;;  %v14356_v23 = vld [vmem:[%s15751_s0 + $0x108] sm:$0xff]  }
 0x17f   :  { %10693 = vmatmul.mubr.msk.f32.gmra.mrb[26].mxu0 %vm479_vm1, %v6135_v19  ;;  %10223 = vmatprep.mubr.msk.f32.mxu1 %vm479_vm1, %v1755_v57  ;;  %v1761_v1 = vrot.slane %v16328_v34, 2  ;;  %v15978_v19 = vunpack.c.l.bf16 %v14319_v46  ;;  %v6143_v57 = vsel %vm310_vm0, %v6141_v14, %v6142_v44  ;;  %v15980_v34 = vunpack.c.h.bf16 %v14328_v29 }
 0x180   :  { %10695 = vmatprep.mubr.msk.f32.mxu0 %vm479_vm1, %v6138_v37  ;;  %v6147_v37 = vrot.slane %v14314_v27, 1  ;;  %v6145_v63 = vsel %vm310_vm0, %v6142_v44, %v6144_v52  ;;  %v14385_v52 = vld [vmem:[%s15751_s0 + $0x114] sm:$0xff]  }
 0x181   :  { %v1762_v14 = vsel %vm1602_vm2, %v1759_v50, %v1761_v1  ;;  %v6149_v47 = vrot.slane %v15978_v19, 1  ;;  %v14378_v1 = vunpack.c.h.bf16 %v14356_v23  ;;  %v6151_v50 = vrot.slane %v5925_v45, 1  ;;  %16331 = vst [vmem:[#allocation41_spill] sm:$0xff] %v14385_v52 }
 0x182   :  { %10224 = vmatmul.mubr.msk.f32.gmra.mrb[60].mxu1 %vm479_vm1, %v1757_v33  ;;  %v14370_v33 = vld [vmem:[%s15751_s0 + $0x110] sm:$0x1]  ;;  %v6152_v44 = vrot.slane %v15980_v34, 1  ;;  %v6154_v19 = vrot.slane %v15981_v53, 1  ;;  %v5931_v53 = vunpack.c.l.bf16 %v14385_v52 }
 0x183   :  { %10696 = vmatmul.mubr.msk.f32.gmra.mrb[28].mxu0 %vm479_vm1, %v6140_v9  ;;  %10226 = vmatprep.mubr.msk.f32.mxu1 %vm479_vm1, %v1760_v58  ;;  %16330 = vst [vmem:[#allocation39_spill] sm:$0xff] %v14370_v33  ;;  %v6148_v9 = vsel %vm310_vm0, %v6146_v43, %v6147_v37  ;;  %v9229_v58 = vld [vmem:[%s15751_s0 + $0x18] sm:$0xff]   ;;  %v2414_v43 = vunpack.c.h.bf16 %v8048_v48  ;;  %v6150_v45 = vsel %vm310_vm0, %v6147_v37, %v6149_v47  ;;  %v6157_v48 = vrot.slane %v14378_v1, 1  ;;  %v14411_v47 = vld [vmem:[%s15751_s0 + $0x120] sm:$0xff]  }
 0x184   :  { %10698 = vmatprep.mubr.msk.f32.mxu0 %vm479_vm1, %v6143_v57  ;;  %v8907_v34 = vunpack.c.l.bf16 %v9229_v58  ;;  %v8052_v57 = vld [vmem:[%s15751_s0 + $0x24] sm:$0xff]   ;;  %v6153_v37 = vsel %vm310_vm0, %v6151_v50, %v6152_v44  ;;  %v16334_v21 = vunpack.c.l.bf16 %v14370_v33  ;;  %v14446_v50 = vld [vmem:[%s15751_s0 + $0x12c] sm:$0xff]   ;;  %v16339_v33 = vunpack.c.l.bf16 %v14411_v47 }
 0x185   :  { %v2417_v15 = vunpack.c.l.bf16 %v8052_v57  ;;  %16337 = vst [vmem:[#allocation49_spill] sm:$0xff] %v14446_v50 }
 0x186   :  { %10227 = vmatmul.mubr.msk.f32.gmra.mrb[62].mxu1 %vm479_vm1, %v1762_v14  ;;  %v16332_v14 = vunpack.c.l.bf16 %v14356_v23  ;;  %v6159_v4 = vrot.slane %v16334_v21, 1  ;;  %v6166_v56 = vrot.slane %v16339_v33, 1  ;;  %v14473_v33 = vld [vmem:[%s15751_s0 + $0x138] sm:$0xff]  }
 0x187   :  { %10699 = vmatmul.mubr.msk.f32.gmra.mrb[30].mxu0 %vm479_vm1, %v6145_v63  ;;  %10237 = vmatprep.mubr.msk.f32.mxu1 %vm479_vm1, %v2413_v51  ;;  %v14406_v51 = vld [vmem:[%s15751_s0 + $0x11c] sm:$0x1] }
 0x188   :  { %10701 = vmatprep.mubr.msk.f32.mxu0 %vm479_vm1, %v6148_v9  ;;  %v6156_v63 = vrot.slane %v16332_v14, 1  ;;  %16333 = vst [vmem:[#allocation44_spill] sm:$0xff] %v14406_v51  ;;  %v8908_v9 = vunpack.c.h.bf16 %v9229_v58  ;;  %v6155_v14 = vsel %vm310_vm0, %v6152_v44, %v6154_v19  ;;  %v14431_v19 = vld [vmem:[%s15751_s0 + $0x128] sm:$0x1]  ;;  %v16336_v58 = vunpack.c.h.bf16 %v14385_v52 }
 0x189   :  { %16335 = vst [vmem:[#allocation46_spill] sm:$0xff] %v14431_v19  ;;  %v16338_v39 = vunpack.c.l.bf16 %v14406_v51 }
 0x18a   :  { %10238 = vmatmul.mubr.msk.f32.vlgmr.msra.gmra.mrb[0].mxu1 %vm479_vm1, %v2414_v43  ;;  %v6158_v21 = vsel %vm310_vm0, %v6156_v63, %v6157_v48  ;;  %v6162_v44 = vrot.slane %v16336_v58, 1  ;;  %v11571_v43 = vld [vmem:[%s15750_s1 + $0x48] sm:$0xff]   ;;  %v2418_v63 = vunpack.c.h.bf16 %v8052_v57  ;;  %v14462_v57 = vld [vmem:[%s15751_s0 + $0x134] sm:$0x1] }
 0x18b   :  { %10702 = vmatmul.mubr.msk.f32.gmra.mrb[32].mxu0 %vm479_vm1, %v6150_v45  ;;  %10927 = vmatpush3.bf16.msra.mxu1 %v11570_v31  ;;  %v14426_v45 = vunpack.c.h.bf16 %v14411_v47  ;;  %v9230_v31 = vld [vmem:[%s15751_s0 + $0x30] sm:$0xff]   ;;  %v6164_v52 = vrot.slane %v16338_v39, 1  ;;  %16340 = vst [vmem:[#allocation51_spill] sm:$0xff] %v14462_v57 }
 0x18c   :  { %10240 = vmatprep.mubr.msk.f32.mxu1 %vm479_vm1, %v8907_v34  ;;  %10704 = vmatprep.mubr.msk.f32.mxu0 %vm479_vm1, %v6153_v37  ;;  %v6161_v34 = vrot.slane %v5931_v53, 1  ;;  %v6160_v53 = vsel %vm310_vm0, %v6157_v48, %v6159_v4  ;;  %v15992_v37 = vunpack.c.l.bf16 %v14431_v19  ;;  %v8911_v58 = vunpack.c.l.bf16 %v9230_v31 }
 0x18d   :  { %10926 = vmatprep.subr.bf16.mxu1 %v11571_v43  ;;  %v5937_v48 = vunpack.c.l.bf16 %v14446_v50 }
 0x18e   :  { %10241 = vmatmul.mubr.msk.f32.gmra.mrb[2].mxu1 %vm479_vm1, %v8908_v9  ;;  %v6167_v9 = vrot.slane %v14426_v45, 1  ;;  %v6163_v4 = vsel %vm310_vm0, %v6161_v34, %v6162_v44  ;;  %v14491_v34 = vunpack.c.h.bf16 %v14473_v33 }
 0x18f   :  { %10705 = vmatmul.mubr.msk.f32.gmra.mrb[34].mxu0 %vm479_vm1, %v6155_v14  ;;  %10243 = vmatprep.mubr.msk.f32.mxu1 %vm479_vm1, %v2417_v15  ;;  %v8056_v15 = vld [vmem:[%s15751_s0 + $0x3c] sm:$0xff]   ;;  %v8912_v14 = vunpack.c.h.bf16 %v9230_v31  ;;  %v16341_v31 = vunpack.c.h.bf16 %v14446_v50 }
 0x190   :  { %10707 = vmatprep.mubr.msk.f32.mxu0 %vm479_vm1, %v6158_v21  ;;  %10928 = vmatpush3.bf16.msra.mxu1 %v11571_v43  ;;  %v6169_v21 = vrot.slane %v15992_v37, 1  ;;  %v6165_v43 = vsel %vm310_vm0, %v6162_v44, %v6164_v52  ;;  %v2421_v39 = vunpack.c.l.bf16 %v8056_v15  ;;  %v6168_v51 = vsel %vm310_vm0, %v6166_v56, %v6167_v9  ;;  %v14496_v52 = vld [vmem:[%s15751_s0 + $0x140] sm:$0x1]  ;;  %v14501_v56 = vld [vmem:[%s15751_s0 + $0x144] sm:$0xff]  }
 0x191   :  { %v6172_v19 = vrot.slane %v16341_v31, 1  ;;  %16342 = vst [vmem:[#allocation64_spill] sm:$0xff] %v14496_v52  ;;  %16343 = vst [vmem:[#allocation2_spill] sm:$0xff] %v14501_v56  ;;  %v2422_v44 = vunpack.c.h.bf16 %v8056_v15  ;;  %v15999_v37 = vunpack.c.l.bf16 %v14496_v52  ;;  %v5943_v50 = vunpack.c.l.bf16 %v14501_v56  ;;  %v14516_v15 = vld [vmem:[%s15751_s0 + $0x14c] sm:$0x1] }
 0x192   :  { %10244 = vmatmul.mubr.msk.f32.gmra.mrb[4].mxu1 %vm479_vm1, %v2418_v63  ;;  %v9231_v63 = vld [vmem:[%s15751_s0 + $0x48] sm:$0xff]   ;;  %16345 = vst [vmem:[#allocation4_spill] sm:$0xff] %v14516_v15  ;;  %v16000_v29 = vunpack.c.l.bf16 %v14516_v15  ;;  %v16347_v16 = vunpack.c.h.bf16 %v14501_v56 }
 0x193   :  { %10708 = vmatmul.mubr.msk.f32.gmra.mrb[36].mxu0 %vm479_vm1, %v6160_v53  ;;  %10246 = vmatprep.mubr.msk.f32.mxu1 %vm479_vm1, %v8911_v58  ;;  %v6171_v53 = vrot.slane %v5937_v48, 1  ;;  %v6170_v58 = vsel %vm310_vm0, %v6167_v9, %v6169_v21  ;;  %v8915_v31 = vunpack.c.l.bf16 %v9231_v63  ;;  %v6177_v21 = vrot.slane %v14491_v34, 1 }
 0x194   :  { %10710 = vmatprep.mubr.msk.f32.mxu0 %vm479_vm1, %v6163_v4  ;;  %v16344_v4 = vunpack.c.l.bf16 %v14462_v57  ;;  %v6179_v57 = vrot.slane %v15999_v37, 1  ;;  %v6181_v46 = vrot.slane %v5943_v50, 1  ;;  %v6182_v32 = vrot.slane %v16347_v16, 1  ;;  %v14556_v16 = vld [vmem:[%s15751_s0 + $0x15c] sm:$0xff]  }
 0x195   :  { %v6173_v9 = vsel %vm310_vm0, %v6171_v53, %v6172_v19  ;;  %16349 = vst [vmem:[#allocation47_spill] sm:$0xff] %v14556_v16 }
 0x196   :  { %10247 = vmatmul.mubr.msk.f32.gmra.mrb[6].mxu1 %vm479_vm1, %v8912_v14  ;;  %v6174_v48 = vrot.slane %v16344_v4, 1  ;;  %v8916_v4 = vunpack.c.h.bf16 %v9231_v63  ;;  %v14543_v63 = vld [vmem:[%s15751_s0 + $0x158] sm:$0x1] }
 0x197   :  { %10711 = vmatmul.mubr.msk.f32.gmra.mrb[38].mxu0 %vm479_vm1, %v6165_v43  ;;  %10249 = vmatprep.mubr.msk.f32.mxu1 %vm479_vm1, %v2421_v39  ;;  %v8060_v39 = vld [vmem:[%s15751_s0 + $0x54] sm:$0xff]   ;;  %16348 = vst [vmem:[#allocation6_spill] sm:$0xff] %v14543_v63 }
 0x198   :  { %10713 = vmatprep.mubr.msk.f32.mxu0 %vm479_vm1, %v6168_v51  ;;  %v16346_v51 = vunpack.c.l.bf16 %v14473_v33  ;;  %v14528_v43 = vld [vmem:[%s15751_s0 + $0x150] sm:$0xff]   ;;  %v6175_v53 = vsel %vm310_vm0, %v6172_v19, %v6174_v48  ;;  %v2426_v50 = vunpack.c.h.bf16 %v8060_v39 }
 0x199   :  { %v14551_v48 = vunpack.c.h.bf16 %v14528_v43 }
 0x19a   :  { %v6176_v14 = vrot.slane %v16346_v51, 1  ;;  %10250 = vmatmul.mubr.msk.f32.gmra.mrb[8].mxu1 %vm479_vm1, %v2422_v44  ;;  %v2425_v51 = vunpack.c.l.bf16 %v8060_v39  ;;  %v9232_v44 = vld [vmem:[%s15751_s0 + $0x60] sm:$0xff]   ;;  %v16350_v39 = vunpack.c.l.bf16 %v14528_v43 }
 0x19b   :  { %10714 = vmatmul.mubr.msk.f32.gmra.mrb[40].mxu0 %vm479_vm1, %v6170_v58  ;;  %10252 = vmatprep.mubr.msk.f32.mxu1 %vm479_vm1, %v8915_v31  ;;  %v6184_v31 = vrot.slane %v16000_v29, 1  ;;  %v8919_v37 = vunpack.c.l.bf16 %v9232_v44  ;;  %v6183_v58 = vsel %vm310_vm0, %v6181_v46, %v6182_v32  ;;  %v6187_v29 = vrot.slane %v14551_v48, 1  ;;  %v14583_v46 = vld [vmem:[%s15751_s0 + $0x168] sm:$0xff]  }
 0x19c   :  { %10716 = vmatprep.mubr.msk.f32.mxu0 %vm479_vm1, %v6173_v9  ;;  %v6178_v19 = vsel %vm310_vm0, %v6176_v14, %v6177_v21  ;;  %v6180_v14 = vsel %vm310_vm0, %v6177_v21, %v6179_v57  ;;  %v5949_v9 = vunpack.c.l.bf16 %v14556_v16  ;;  %v14578_v57 = vld [vmem:[%s15751_s0 + $0x164] sm:$0x1]  ;;  %v8920_v21 = vunpack.c.h.bf16 %v9232_v44  ;;  %v14600_v44 = vld [vmem:[%s15751_s0 + $0x170] sm:$0x1] }
 0x19d   :  { %16351 = vst [vmem:[#allocation9_spill] sm:$0xff] %v14578_v57  ;;  %v16007_v56 = vunpack.c.l.bf16 %v14578_v57  ;;  %v14595_v35 = vunpack.c.h.bf16 %v14583_v46  ;;  %16354 = vst [vmem:[#allocation52_spill] sm:$0xff] %v14600_v44  ;;  %v16011_v52 = vunpack.c.l.bf16 %v14600_v44 }
 0x19e   :  { %10253 = vmatmul.mubr.msk.f32.gmra.mrb[10].mxu1 %vm479_vm1, %v8916_v4  ;;  %v8064_v4 = vld [vmem:[%s15751_s0 + $0x6c] sm:$0xff]  }
 0x19f   :  { %10717 = vmatmul.mubr.msk.f32.gmra.mrb[42].mxu0 %vm479_vm1, %v6175_v53  ;;  %10255 = vmatprep.mubr.msk.f32.mxu1 %vm479_vm1, %v2425_v51  ;;  %v6186_v53 = vrot.slane %v16350_v39, 1  ;;  %v16352_v39 = vunpack.c.l.bf16 %v14543_v63  ;;  %v2429_v15 = vunpack.c.l.bf16 %v8064_v4  ;;  %16353 = vst [vmem:[#allocation11_spill] sm:$0xff] %v14595_v35 }
 0x1a0   :  { %10719 = vmatprep.mubr.msk.f32.mxu0 %vm479_vm1, %v6178_v19  ;;  %v6185_v19 = vsel %vm310_vm0, %v6182_v32, %v6184_v31 }
 0x1a1   :  { %v6189_v51 = vrot.slane %v16352_v39, 1  ;;  %v6188_v32 = vsel %vm310_vm0, %v6186_v53, %v6187_v29  ;;  %v2430_v39 = vunpack.c.h.bf16 %v8064_v4  ;;  %v14627_v4 = vld [vmem:[%s15751_s0 + $0x17c] sm:$0x1] }
 0x1a2   :  { %10256 = vmatmul.mubr.msk.f32.gmra.mrb[12].mxu1 %vm479_vm1, %v2426_v50  ;;  %v16355_v50 = vunpack.c.h.bf16 %v14556_v16  ;;  %v16357_v16 = vunpack.c.l.bf16 %v14583_v46  ;;  %16358 = vst [vmem:[#allocation16_spill] sm:$0xff] %v14627_v4 }
 0x1a3   :  { %10720 = vmatmul.mubr.msk.f32.gmra.mrb[44].mxu0 %vm479_vm1, %v6180_v14  ;;  %10258 = vmatprep.mubr.msk.f32.mxu1 %vm479_vm1, %v8919_v37  ;;  %v9233_v37 = vld [vmem:[%s15751_s0 + $0x78] sm:$0xff]   ;;  %v6190_v53 = vsel %vm310_vm0, %v6187_v29, %v6189_v51 }
 0x1a4   :  { %10722 = vmatprep.mubr.msk.f32.mxu0 %vm479_vm1, %v6183_v58  ;;  %v6191_v58 = vrot.slane %v5949_v9, 1  ;;  %v6192_v31 = vrot.slane %v16355_v50, 1  ;;  %v14611_v14 = vld [vmem:[%s15751_s0 + $0x174] sm:$0xff]   ;;  %v8923_v9 = vunpack.c.l.bf16 %v9233_v37  ;;  %v6194_v50 = vrot.slane %v16007_v56, 1 }
 0x1a5   :  { %16356 = vst [vmem:[#allocation14_spill] sm:$0xff] %v14611_v14  ;;  %v6196_v63 = vrot.slane %v16357_v16, 1  ;;  %v5955_v51 = vunpack.c.l.bf16 %v14611_v14  ;;  %v14638_v16 = vld [vmem:[%s15751_s0 + $0x180] sm:$0xff]  }
 0x1a6   :  { %10259 = vmatmul.mubr.msk.f32.gmra.mrb[14].mxu1 %vm479_vm1, %v8920_v21  ;;  %v6197_v21 = vrot.slane %v14595_v35, 1  ;;  %v6193_v29 = vsel %vm310_vm0, %v6191_v58, %v6192_v31  ;;  %16359 = vst [vmem:[#allocation56_spill] sm:$0xff] %v14638_v16  ;;  %v6199_v58 = vrot.slane %v16011_v52, 1  ;;  %v14656_v56 = vunpack.c.h.bf16 %v14638_v16  ;;  %v8072_v52 = vld [vmem:[%s15751_s0 + $0x9c] sm:$0xff]  }
 0x1a7   :  { %10723 = vmatmul.mubr.msk.f32.gmra.mrb[46].mxu0 %vm479_vm1, %v6185_v19  ;;  %10261 = vmatprep.mubr.msk.f32.mxu1 %vm479_vm1, %v2429_v15  ;;  %v8068_v15 = vld [vmem:[%s15751_s0 + $0x84] sm:$0xff]   ;;  %v6195_v19 = vsel %vm310_vm0, %v6192_v31, %v6194_v50 }
 0x1a8   :  { %10725 = vmatprep.mubr.msk.f32.mxu0 %vm479_vm1, %v6188_v32  ;;  %v8924_v32 = vunpack.c.h.bf16 %v9233_v37  ;;  %v2433_v57 = vunpack.c.l.bf16 %v8068_v15  ;;  %v6198_v13 = vsel %vm310_vm0, %v6196_v63, %v6197_v21  ;;  %v16360_v37 = vunpack.c.h.bf16 %v14611_v14  ;;  %16361 = vst [vmem:[#allocation19_spill] sm:$0xff] %v14656_v56  ;;  %v14661_v31 = vld [vmem:[%s15751_s0 + $0x188] sm:$0x1]  ;;  %v14666_v63 = vld [vmem:[%s15751_s0 + $0x18c] sm:$0xff]  }
 0x1a9   :  { %16362 = vst [vmem:[#allocation21_spill] sm:$0xff] %v14661_v31  ;;  %16363 = vst [vmem:[#allocation61_spill] sm:$0xff] %v14666_v63  ;;  %v6200_v50 = vsel %vm310_vm0, %v6197_v21, %v6199_v58  ;;  %v16021_v14 = vunpack.c.l.bf16 %v14661_v31 }
 0x1aa   :  { %10262 = vmatmul.mubr.msk.f32.gmra.mrb[16].mxu1 %vm479_vm1, %v2430_v39  ;;  %v9234_v39 = vld [vmem:[%s15751_s0 + $0x90] sm:$0xff]   ;;  %v6202_v44 = vrot.slane %v16360_v37, 1 }
 0x1ab   :  { %10726 = vmatmul.mubr.msk.f32.gmra.mrb[48].mxu0 %vm479_vm1, %v6190_v53  ;;  %10264 = vmatprep.mubr.msk.f32.mxu1 %vm479_vm1, %v8923_v9  ;;  %v6201_v53 = vrot.slane %v5955_v51, 1  ;;  %v2434_v9 = vunpack.c.h.bf16 %v8068_v15  ;;  %v8927_v37 = vunpack.c.l.bf16 %v9234_v39 }
 0x1ac   :  { %10728 = vmatprep.mubr.msk.f32.mxu0 %vm479_vm1, %v6193_v29  ;;  %v16364_v29 = vunpack.c.l.bf16 %v14627_v4  ;;  %v6209_v4 = vrot.slane %v16021_v14, 1 }
 0x1ad   :  { %v6203_v21 = vsel %vm310_vm0, %v6201_v53, %v6202_v44  ;;  %v8928_v53 = vunpack.c.h.bf16 %v9234_v39 }
 0x1ae   :  { %10265 = vmatmul.mubr.msk.f32.gmra.mrb[18].mxu1 %vm479_vm1, %v8924_v32  ;;  %v6204_v51 = vrot.slane %v16364_v29, 1  ;;  %v5961_v32 = vunpack.c.l.bf16 %v14666_v63  ;;  %v14693_v29 = vld [vmem:[%s15751_s0 + $0x198] sm:$0xff]  }
 0x1af   :  { %10729 = vmatmul.mubr.msk.f32.gmra.mrb[50].mxu0 %vm479_vm1, %v6195_v19  ;;  %10267 = vmatprep.mubr.msk.f32.mxu1 %vm479_vm1, %v2433_v57  ;;  %v16365_v19 = vunpack.c.l.bf16 %v14638_v16  ;;  %v6207_v57 = vrot.slane %v14656_v56, 1  ;;  %v16367_v16 = vunpack.c.h.bf16 %v14666_v63  ;;  %v16022_v39 = vunpack.c.l.bf16 %v14693_v29 }
 0x1b0   :  { %10731 = vmatprep.mubr.msk.f32.mxu0 %vm479_vm1, %v6198_v13  ;;  %v14688_v13 = vld [vmem:[%s15751_s0 + $0x194] sm:$0x1]  ;;  %v6205_v15 = vsel %vm310_vm0, %v6202_v44, %v6204_v51  ;;  %v6211_v56 = vrot.slane %v5961_v32, 1  ;;  %v14708_v44 = vunpack.c.h.bf16 %v14693_v29  ;;  %v14718_v51 = vld [vmem:[%s15751_s0 + $0x1a4] sm:$0xff]  }
 0x1b1   :  { %v6206_v58 = vrot.slane %v16365_v19, 1  ;;  %16366 = vst [vmem:[#allocation24_spill] sm:$0xff] %v14688_v13  ;;  %v2437_v19 = vunpack.c.l.bf16 %v8072_v52  ;;  %v6212_v35 = vrot.slane %v16367_v16, 1  ;;  %v16020_v12 = vunpack.c.l.bf16 %v14688_v13 }
 0x1b2   :  { %10268 = vmatmul.mubr.msk.f32.gmra.mrb[20].mxu1 %vm479_vm1, %v2434_v9  ;;  %v2438_v16 = vunpack.c.h.bf16 %v8072_v52  ;;  %v6216_v52 = vrot.slane %v16022_v39, 1 }
 0x1b3   :  { %10732 = vmatmul.mubr.msk.f32.gmra.mrb[52].mxu0 %vm479_vm1, %v6200_v50  ;;  %10270 = vmatprep.mubr.msk.f32.mxu1 %vm479_vm1, %v8927_v37  ;;  %v6208_v9 = vsel %vm310_vm0, %v6206_v58, %v6207_v57  ;;  %v14713_v50 = vld [vmem:[%s15751_s0 + $0x1a0] sm:$0x1]  ;;  %v6210_v37 = vsel %vm310_vm0, %v6207_v57, %v6209_v4  ;;  %v6213_v32 = vsel %vm310_vm0, %v6211_v56, %v6212_v35  ;;  %v14740_v56 = vld [vmem:[%s15751_s0 + $0x1ac] sm:$0x1]  ;;  %v8720_v57 = vld [vmem:[%s15751_s0 + $0x18] sm:$0xe] }
 0x1b4   :  { %10734 = vmatprep.mubr.msk.f32.mxu0 %vm479_vm1, %v6203_v21  ;;  %v6214_v21 = vrot.slane %v16020_v12, 1  ;;  %v5966_v58 = vunpack.c.l.bf16 %v14713_v50  ;;  %v5969_v4 = vunpack.c.l.bf16 %v14740_v56  ;;  %v6843_v31 = vunpack.c.l.bf16 %v8720_v57 }
 0x1b6   :  { %10271 = vmatmul.mubr.msk.f32.gmra.mrb[22].mxu1 %vm479_vm1, %v8928_v53  ;;  %v8076_v53 = vld [vmem:[%s15751_s0 + $0xb4] sm:$0xff]   ;;  %v6215_v12 = vsel %vm310_vm0, %v6212_v35, %v6214_v21  ;;  %v6219_v39 = vrot.slane %v5966_v58, 1  ;;  %v6224_v21 = vrot.slane %v5969_v4, 1  ;;  %v6907_v57 = vrot.slane %v6843_v31, 2 }
 0x1b7   :  { %10735 = vmatmul.mubr.msk.f32.gmra.mrb[54].mxu0 %vm479_vm1, %v6205_v15  ;;  %10273 = vmatprep.mubr.msk.f32.mxu1 %vm479_vm1, %v2437_v19  ;;  %v6217_v15 = vrot.slane %v14708_v44, 1  ;;  %v5967_v19 = vunpack.c.l.bf16 %v14718_v51  ;;  %v2441_v14 = vunpack.c.l.bf16 %v8076_v53  ;;  %v2442_v35 = vunpack.c.h.bf16 %v8076_v53 }
 0x1b8   :  { %10737 = vmatprep.mubr.msk.f32.mxu0 %vm479_vm1, %v6208_v9  ;;  %v16368_v9 = vunpack.c.l.bf16 %v14164_v6  ;;  %v8721_v6 = vld [vmem:[%s15751_s0 + $0x24] sm:$0xe] }
 0x1b9   :  { %v6218_v13 = vsel %vm310_vm0, %v6216_v52, %v6217_v15  ;;  %v6221_v63 = vrot.slane %v5967_v19, 1  ;;  %v8080_v19 = vld [vmem:[%s15751_s0 + $0xe4] sm:$0xff]  }
 0x1ba   :  { %10274 = vmatmul.mubr.msk.f32.gmra.mrb[24].mxu1 %vm479_vm1, %v2438_v16  ;;  %v16369_v16 = vunpack.c.h.bf16 %v14718_v51  ;;  %v2445_v31 = vunpack.c.l.bf16 %v8080_v19 }
 0x1bb   :  { %10738 = vmatmul.mubr.msk.f32.gmra.mrb[56].mxu0 %vm479_vm1, %v6210_v37  ;;  %10276 = vmatprep.mubr.msk.f32.mxu1 %vm479_vm1, %v16368_v9  ;;  %v6908_v9 = vrot.slane %v13384_v22, 2  ;;  %v16371_v22 = vunpack.c.l.bf16 %v13835_v36 }
 0x1bc   :  { %10740 = vmatprep.mubr.msk.f32.mxu0 %vm479_vm1, %v6213_v32  ;;  %v6222_v37 = vrot.slane %v16369_v16, 1  ;;  %v6220_v32 = vsel %vm310_vm0, %v6217_v15, %v6219_v39  ;;  %v16372_v16 = vunpack.c.h.bf16 %v13853_v41  ;;  %v16373_v41 = vunpack.c.l.bf16 %v13863_v38 }
 0x1bd   :  { %v6910_v39 = vrot.slane %v16371_v22, 2  ;;  %v6909_v53 = vsel %vm1602_vm2, %v6907_v57, %v6908_v9  ;;  %v16374_v38 = vunpack.c.l.bf16 %v14294_v61  ;;  %v8725_v61 = vld [vmem:[%s15751_s0 + $0x54] sm:$0xe] }
 0x1be   :  { %10277 = vmatmul.mubr.msk.f32.gmra.mrb[26].mxu1 %vm479_vm1, %v14180_v30  ;;  %v6223_v52 = vsel %vm310_vm0, %v6221_v63, %v6222_v37  ;;  %v6225_v63 = vsel %vm310_vm0, %v6222_v37, %v6224_v21  ;;  %v2446_v37 = vunpack.c.h.bf16 %v8080_v19  ;;  %v8724_v19 = vld [vmem:[%s15751_s0 + $0x48] sm:$0xe] }
 0x1bf   :  { %10741 = vmatmul.mubr.msk.f32.gmra.mrb[58].mxu0 %vm479_vm1, %v6215_v12  ;;  %10279 = vmatprep.mubr.msk.f32.mxu1 %vm479_vm1, %v2441_v14  ;;  %v6844_v12 = vunpack.c.l.bf16 %v8721_v6  ;;  %v8722_v14 = vld [vmem:[%s15751_s0 + $0x30] sm:$0xe]  ;;  %v6913_v6 = vrot.slane %v16372_v16, 2  ;;  %v6911_v36 = vsel %vm1602_vm2, %v6908_v9, %v6910_v39  ;;  %v16376_v39 = vunpack.c.h.bf16 %v13899_v40 }
 0x1c0   :  { %10743 = vmatprep.mubr.msk.f32.mxu0 %vm479_vm1, %v6218_v13  ;;  %v16370_v13 = vunpack.c.l.bf16 %v14230_v5  ;;  %v8723_v5 = vld [vmem:[%s15751_s0 + $0x3c] sm:$0xe]  ;;  %v16377_v40 = vunpack.c.l.bf16 %v13920_v24  ;;  %v16378_v24 = vunpack.c.l.bf16 %v14356_v23  ;;  %v8727_v23 = vld [vmem:[%s15751_s0 + $0x6c] sm:$0xe] }
 0x1c1   :  { %v6912_v15 = vrot.slane %v6844_v12, 2  ;;  %v6918_v12 = vrot.slane %v13417_v25, 2  ;;  %v16375_v25 = vunpack.c.l.bf16 %v13889_v7 }
 0x1c2   :  { %10280 = vmatmul.mubr.msk.f32.gmra.mrb[28].mxu1 %vm479_vm1, %v2442_v35  ;;  %v6845_v35 = vunpack.c.l.bf16 %v8722_v14  ;;  %v6846_v14 = vunpack.c.l.bf16 %v8723_v5  ;;  %v8088_v5 = vld [vmem:[%s15751_s0 + $0x114] sm:$0xff]  }
 0x1c3   :  { %10744 = vmatmul.mubr.msk.f32.gmra.mrb[60].mxu0 %vm479_vm1, %v6220_v32  ;;  %10282 = vmatprep.mubr.msk.f32.mxu1 %vm479_vm1, %v16370_v13  ;;  %v6915_v32 = vrot.slane %v16373_v41, 2  ;;  %v6914_v21 = vsel %vm1602_vm2, %v6912_v15, %v6913_v6  ;;  %v6847_v15 = vunpack.c.l.bf16 %v8724_v19  ;;  %v6848_v41 = vunpack.c.l.bf16 %v8725_v61 }
 0x1c4   :  { %10746 = vmatprep.mubr.msk.f32.mxu0 %vm479_vm1, %v6223_v52  ;;  %v8084_v52 = vld [vmem:[%s15751_s0 + $0xfc] sm:$0xff]   ;;  %v6917_v57 = vrot.slane %v6845_v35, 2  ;;  %v6922_v22 = vrot.slane %v6846_v14, 2  ;;  %v16380_v19 = vunpack.c.h.bf16 %v13961_v62  ;;  %v16381_v62 = vunpack.c.l.bf16 %v13982_v55 }
 0x1c5   :  { %v6916_v9 = vsel %vm1602_vm2, %v6913_v6, %v6915_v32  ;;  %v2449_v13 = vunpack.c.l.bf16 %v8084_v52  ;;  %v2450_v16 = vunpack.c.h.bf16 %v8084_v52  ;;  %v6925_v6 = vrot.slane %v16377_v40, 2  ;;  %v8726_v32 = vld [vmem:[%s15751_s0 + $0x60] sm:$0xe] }
 0x1c6   :  { %10283 = vmatmul.mubr.msk.f32.gmra.mrb[30].mxu1 %vm479_vm1, %v14248_v59  ;;  %v2453_v52 = vunpack.c.l.bf16 %v8088_v5  ;;  %v6932_v14 = vrot.slane %v6848_v41, 2  ;;  %v16382_v55 = vunpack.c.l.bf16 %v14411_v47  ;;  %v8729_v47 = vld [vmem:[%s15751_s0 + $0x84] sm:$0xe] }
 0x1c7   :  { %10747 = vmatmul.mubr.msk.f32.gmra.mrb[62].mxu0 %vm479_vm1, %v6225_v63  ;;  %10285 = vmatprep.mubr.msk.f32.mxu1 %vm479_vm1, %v2445_v31  ;;  %v6920_v63 = vrot.slane %v16375_v25, 2  ;;  %v6919_v31 = vsel %vm1602_vm2, %v6917_v57, %v6918_v12  ;;  %v6935_v25 = vrot.slane %v16381_v62, 2 }
 0x1c8   :  { %10757 = vmatprep.mubr.msk.f32.mxu0 %vm479_vm1, %v6909_v53  ;;  %v6923_v53 = vrot.slane %v16376_v39, 2  ;;  %v6938_v39 = vrot.slane %v13481_v2, 2  ;;  %v16383_v2 = vunpack.c.l.bf16 %v14007_v60 }
 0x1c9   :  { %v6921_v7 = vsel %vm1602_vm2, %v6918_v12, %v6920_v63 }
 0x1ca   :  { %10286 = vmatmul.mubr.msk.f32.gmra.mrb[32].mxu1 %vm479_vm1, %v2446_v37  ;;  %v6924_v35 = vsel %vm1602_vm2, %v6922_v22, %v6923_v53  ;;  %v6927_v37 = vrot.slane %v6847_v15, 2  ;;  %v8728_v15 = vld [vmem:[%s15751_s0 + $0x78] sm:$0xe] }
 0x1cb   :  { %10758 = vmatmul.mubr.msk.f32.vlgmr.msra.gmra.mrb[0].mxu0 %vm479_vm1, %v6911_v36  ;;  %10288 = vmatprep.mubr.msk.f32.mxu1 %vm479_vm1, %v16374_v38  ;;  %v6928_v36 = vrot.slane %v13452_v0, 2  ;;  %v16379_v0 = vunpack.c.l.bf16 %v13944_v11  ;;  %v6933_v38 = vrot.slane %v16380_v19, 2 }
 0x1cc   :  { %10760 = vmatprep.mubr.msk.f32.mxu0 %vm479_vm1, %v6914_v21  ;;  %v6926_v21 = vsel %vm1602_vm2, %v6923_v53, %v6925_v6  ;;  %v6850_v53 = vunpack.c.l.bf16 %v8727_v23  ;;  %v16388_v23 = vunpack.c.h.bf16 %v14075_v49  ;;  %v16389_v49 = vunpack.c.l.bf16 %v14096_v26 }
 0x1cd   :  { %v6930_v57 = vrot.slane %v16379_v0, 2  ;;  %v6929_v12 = vsel %vm1602_vm2, %v6927_v37, %v6928_v36  ;;  %v6934_v63 = vsel %vm1602_vm2, %v6932_v14, %v6933_v38  ;;  %v6936_v61 = vsel %vm1602_vm2, %v6933_v38, %v6935_v25 }
 0x1ce   :  { %10289 = vmatmul.mubr.msk.f32.gmra.mrb[34].mxu1 %vm479_vm1, %v14314_v27  ;;  %v6942_v6 = vrot.slane %v6850_v53, 2  ;;  %v6851_v37 = vunpack.c.l.bf16 %v8728_v15  ;;  %v6852_v0 = vunpack.c.l.bf16 %v8729_v47  ;;  %v6955_v25 = vrot.slane %v16389_v49, 2  ;;  %v8732_v15 = vld [vmem:[%s15751_s0 + $0xa8] sm:$0xe] }
 0x1cf   :  { %10761 = vmatmul.mubr.msk.f32.gmra.mrb[2].mxu0 %vm479_vm1, %v6916_v9  ;;  %10291 = vmatprep.mubr.msk.f32.mxu1 %vm479_vm1, %v2449_v13  ;;  %v6849_v9 = vunpack.c.l.bf16 %v8726_v32  ;;  %v2454_v13 = vunpack.c.h.bf16 %v8088_v5  ;;  %v6931_v11 = vsel %vm1602_vm2, %v6928_v36, %v6930_v57  ;;  %v8730_v57 = vld [vmem:[%s15751_s0 + $0x90] sm:$0xe]  ;;  %v16390_v26 = vunpack.c.l.bf16 %v14528_v43  ;;  %v8733_v43 = vld [vmem:[%s15751_s0 + $0xb4] sm:$0xe] }
 0x1d0   :  { %10763 = vmatprep.mubr.msk.f32.mxu0 %vm479_vm1, %v6919_v31  ;;  %v8092_v31 = vld [vmem:[%s15751_s0 + $0x12c] sm:$0xff]  }
 0x1d1   :  { %v6937_v22 = vrot.slane %v6849_v9, 2  ;;  %v2458_v36 = vunpack.c.h.bf16 %v8092_v31  ;;  %v6952_v9 = vrot.slane %v6852_v0, 2 }
 0x1d2   :  { %10292 = vmatmul.mubr.msk.f32.gmra.mrb[36].mxu1 %vm479_vm1, %v2450_v16  ;;  %v2457_v16 = vunpack.c.l.bf16 %v8092_v31  ;;  %v8100_v31 = vld [vmem:[%s15751_s0 + $0x15c] sm:$0xff]  }
 0x1d3   :  { %10764 = vmatmul.mubr.msk.f32.gmra.mrb[4].mxu0 %vm479_vm1, %v6921_v7  ;;  %10294 = vmatprep.mubr.msk.f32.mxu1 %vm479_vm1, %v16378_v24  ;;  %v6940_v7 = vrot.slane %v16383_v2, 2  ;;  %v6939_v40 = vsel %vm1602_vm2, %v6937_v22, %v6938_v39  ;;  %v8096_v24 = vld [vmem:[%s15751_s0 + $0x144] sm:$0xff]  }
 0x1d4   :  { %10766 = vmatprep.mubr.msk.f32.mxu0 %vm479_vm1, %v6924_v35  ;;  %v16384_v35 = vunpack.c.h.bf16 %v14018_v20  ;;  %v16385_v20 = vunpack.c.l.bf16 %v14039_v18  ;;  %v16386_v18 = vunpack.c.l.bf16 %v14473_v33  ;;  %v2461_v14 = vunpack.c.l.bf16 %v8096_v24  ;;  %v8731_v33 = vld [vmem:[%s15751_s0 + $0x9c] sm:$0xe] }
 0x1d5   :  { %v6941_v60 = vsel %vm1602_vm2, %v6938_v39, %v6940_v7  ;;  %v2462_v62 = vunpack.c.h.bf16 %v8096_v24  ;;  %v6958_v39 = vrot.slane %v13539_v42, 2  ;;  %v6854_v53 = vunpack.c.l.bf16 %v8731_v33 }
 0x1d6   :  { %10295 = vmatmul.mubr.msk.f32.gmra.mrb[38].mxu1 %vm479_vm1, %v14378_v1  ;;  %v6943_v5 = vrot.slane %v16384_v35, 2  ;;  %v6945_v41 = vrot.slane %v16385_v20, 2  ;;  %v16391_v42 = vunpack.c.l.bf16 %v14121_v10  ;;  %v6855_v35 = vunpack.c.l.bf16 %v8732_v15 }
 0x1d7   :  { %10767 = vmatmul.mubr.msk.f32.gmra.mrb[6].mxu0 %vm479_vm1, %v6926_v21  ;;  %10297 = vmatprep.mubr.msk.f32.mxu1 %vm479_vm1, %v2453_v52  ;;  %v6947_v21 = vrot.slane %v6851_v37, 2  ;;  %v6948_v52 = vrot.slane %v13510_v17, 2  ;;  %v16387_v17 = vunpack.c.l.bf16 %v14064_v3  ;;  %v6962_v7 = vrot.slane %v6854_v53, 2  ;;  %v16403_v53 = vld [vmem:[#allocation56_spill] sm:$0xff] }
 0x1d8   :  { %10769 = vmatprep.mubr.msk.f32.mxu0 %vm479_vm1, %v6929_v12  ;;  %v6944_v32 = vsel %vm1602_vm2, %v6942_v6, %v6943_v5  ;;  %v6946_v12 = vsel %vm1602_vm2, %v6943_v5, %v6945_v41  ;;  %v2466_v5 = vunpack.c.h.bf16 %v8100_v31  ;;  %v6968_v20 = vrot.slane %v14180_v30, 2 }
 0x1d9   :  { %v6950_v19 = vrot.slane %v16387_v17, 2  ;;  %v6949_v38 = vsel %vm1602_vm2, %v6947_v21, %v6948_v52  ;;  %v6856_v41 = vunpack.c.l.bf16 %v8733_v43  ;;  %v16395_v30 = vunpack.c.l.bf16 %v14185_v8 }
 0x1da   :  { %10298 = vmatmul.mubr.msk.f32.gmra.mrb[40].mxu1 %vm479_vm1, %v2454_v13  ;;  %v6953_v13 = vrot.slane %v16388_v23, 2  ;;  %v16404_v15 = vunpack.c.l.bf16 %v16403_v53 }
 0x1db   :  { %10770 = vmatmul.mubr.msk.f32.gmra.mrb[8].mxu0 %vm479_vm1, %v6931_v11  ;;  %10300 = vmatprep.mubr.msk.f32.mxu1 %vm479_vm1, %v16382_v55  ;;  %v6853_v11 = vunpack.c.l.bf16 %v8730_v57  ;;  %v6951_v3 = vsel %vm1602_vm2, %v6948_v52, %v6950_v19  ;;  %v6970_v52 = vrot.slane %v16395_v30, 2  ;;  %v6972_v57 = vrot.slane %v6856_v41, 2  ;;  %v16398_v19 = vld [vmem:[#allocation11_spill] sm:$0xff] }
 0x1dc   :  { %10772 = vmatprep.mubr.msk.f32.mxu0 %vm479_vm1, %v6934_v63  ;;  %v6954_v63 = vsel %vm1602_vm2, %v6952_v9, %v6953_v13  ;;  %v6956_v55 = vsel %vm1602_vm2, %v6953_v13, %v6955_v25  ;;  %v16399_v9 = vld [vmem:[#allocation30_spill] sm:$0xff] }
 0x1dd   :  { %v6957_v22 = vrot.slane %v6853_v11, 2  ;;  %v6971_v8 = vsel %vm1602_vm2, %v6968_v20, %v6970_v52  ;;  %v16400_v23 = vunpack.c.l.bf16 %v16399_v9  ;;  %v8108_v11 = vld [vmem:[%s15751_s0 + $0x18c] sm:$0xff]   ;;  %v8224_v25 = vld [vmem:[%s15751_s0 + $0xe4] ss:$24 sps:$4 sm:$0xff]   ;;  %v8738_v52 = vld [vmem:[%s15751_s0 + $0x108] sm:$0xe] }
 0x1de   :  { %10301 = vmatmul.mubr.msk.f32.gmra.mrb[42].mxu1 %vm479_vm1, %v14426_v45  ;;  %v2474_v43 = vunpack.c.h.bf16 %v8108_v11  ;;  %v3276_v9 = vunpack.c.h.bf16 %v8224_v25 }
 0x1df   :  { %10773 = vmatmul.mubr.msk.f32.gmra.mrb[10].mxu0 %vm479_vm1, %v6936_v61  ;;  %10303 = vmatprep.mubr.msk.f32.mxu1 %vm479_vm1, %v2457_v16  ;;  %v2465_v61 = vunpack.c.l.bf16 %v8100_v31  ;;  %v6960_v16 = vrot.slane %v16391_v42, 2  ;;  %v6959_v2 = vsel %vm1602_vm2, %v6957_v22, %v6958_v39  ;;  %v6975_v13 = vrot.slane %v16400_v23, 2  ;;  %v16401_v31 = vld [vmem:[#allocation28_spill] sm:$0xff] }
 0x1e0   :  { %10775 = vmatprep.mubr.msk.f32.mxu0 %vm479_vm1, %v6939_v40  ;;  %v16392_v40 = vunpack.c.h.bf16 %v14136_v54  ;;  %v16393_v54 = vunpack.c.l.bf16 %v14151_v28  ;;  %v16394_v28 = vunpack.c.l.bf16 %v14583_v46  ;;  %v8735_v46 = vld [vmem:[%s15751_s0 + $0xcc] sm:$0xe]  ;;  %v16402_v22 = vunpack.c.l.bf16 %v16401_v31 }
 0x1e1   :  { %v6961_v10 = vsel %vm1602_vm2, %v6958_v39, %v6960_v16  ;;  %v6858_v49 = vunpack.c.l.bf16 %v8735_v46  ;;  %v16416_v46 = vunpack.c.l.bf16 %v14693_v29  ;;  %v6861_v23 = vunpack.c.l.bf16 %v8738_v52 }
 0x1e2   :  { %10304 = vmatmul.mubr.msk.f32.gmra.mrb[44].mxu1 %vm479_vm1, %v2458_v36  ;;  %v6963_v6 = vrot.slane %v16392_v40, 2  ;;  %v6965_v37 = vrot.slane %v16393_v54, 2  ;;  %v8104_v36 = vld [vmem:[%s15751_s0 + $0x174] sm:$0xff]   ;;  %v6980_v39 = vrot.slane %v16402_v22, 2 }
 0x1e3   :  { %10776 = vmatmul.mubr.msk.f32.gmra.mrb[12].mxu0 %vm479_vm1, %v6941_v60  ;;  %10306 = vmatprep.mubr.msk.f32.mxu1 %vm479_vm1, %v16386_v18  ;;  %v6967_v60 = vrot.slane %v6855_v35, 2  ;;  %v2469_v21 = vunpack.c.l.bf16 %v8104_v36  ;;  %v16396_v18 = vld [vmem:[#allocation27_spill] sm:$0xff]  ;;  %v6982_v16 = vrot.slane %v6858_v49, 2  ;;  %v8739_v49 = vld [vmem:[%s15751_s0 + $0x114] sm:$0xe] }
 0x1e4   :  { %10778 = vmatprep.mubr.msk.f32.mxu0 %vm479_vm1, %v6944_v32  ;;  %v6964_v47 = vsel %vm1602_vm2, %v6962_v7, %v6963_v6  ;;  %v8734_v32 = vld [vmem:[%s15751_s0 + $0xc0] sm:$0xe]  ;;  %v6966_v24 = vsel %vm1602_vm2, %v6963_v6, %v6965_v37  ;;  %v8737_v6 = vld [vmem:[%s15751_s0 + $0xfc] sm:$0xe]  ;;  %v16407_v35 = vld [vmem:[#allocation19_spill] sm:$0xff] }
 0x1e5   :  { %v6969_v0 = vsel %vm1602_vm2, %v6967_v60, %v6968_v20  ;;  %v6857_v17 = vunpack.c.l.bf16 %v8734_v32  ;;  %v6988_v32 = vrot.slane %v14314_v27, 2  ;;  %v6860_v30 = vunpack.c.l.bf16 %v8737_v6 }
 0x1e6   :  { %10307 = vmatmul.mubr.msk.f32.gmra.mrb[46].mxu1 %vm479_vm1, %v14491_v34 }
 0x1e7   :  { %10779 = vmatmul.mubr.msk.f32.gmra.mrb[14].mxu0 %vm479_vm1, %v6946_v12  ;;  %10309 = vmatprep.mubr.msk.f32.mxu1 %vm479_vm1, %v2461_v14  ;;  %v16397_v12 = vunpack.c.h.bf16 %v16396_v18 }
 0x1e8   :  { %10781 = vmatprep.mubr.msk.f32.mxu0 %vm479_vm1, %v6949_v38  ;;  %v2470_v38 = vunpack.c.h.bf16 %v8104_v36  ;;  %v16410_v36 = vld [vmem:[#allocation76_spill] sm:$0xff] }
 0x1e9   :  { %v6973_v14 = vrot.slane %v16397_v12, 2  ;;  %v16411_v60 = vunpack.c.l.bf16 %v16410_v36  ;;  %v16414_v12 = vld [vmem:[#allocation33_spill] sm:$0xff] }
 0x1ea   :  { %10310 = vmatmul.mubr.msk.f32.gmra.mrb[48].mxu1 %vm479_vm1, %v2462_v62  ;;  %v6977_v62 = vrot.slane %v6857_v17, 2 }
 0x1eb   :  { %10782 = vmatmul.mubr.msk.f32.gmra.mrb[16].mxu0 %vm479_vm1, %v6951_v3  ;;  %10312 = vmatprep.mubr.msk.f32.mxu1 %vm479_vm1, %v16390_v26  ;;  %v6974_v33 = vsel %vm1602_vm2, %v6972_v57, %v6973_v14  ;;  %v6978_v3 = vrot.slane %v14248_v59, 2  ;;  %v6976_v59 = vsel %vm1602_vm2, %v6973_v14, %v6975_v13  ;;  %v2473_v26 = vunpack.c.l.bf16 %v8108_v11 }
 0x1ec   :  { %10784 = vmatprep.mubr.msk.f32.mxu0 %vm479_vm1, %v6954_v63  ;;  %v8736_v63 = vld [vmem:[%s15751_s0 + $0xf0] sm:$0xe]  ;;  %v3495_v20 = vrot.slane %v16411_v60, 1  ;;  %v16415_v14 = vunpack.c.l.bf16 %v16414_v12  ;;  %v6992_v11 = vrot.slane %v6860_v30, 2  ;;  %v16427_v60 = vld [vmem:[#allocation39_spill] sm:$0xff] }
 0x1ed   :  { %v6979_v42 = vsel %vm1602_vm2, %v6977_v62, %v6978_v3 }
 0x1ee   :  { %10313 = vmatmul.mubr.msk.f32.gmra.mrb[50].mxu1 %vm479_vm1, %v14551_v48  ;;  %v6990_v17 = vrot.slane %v16415_v14, 2 }
 0x1ef   :  { %10785 = vmatmul.mubr.msk.f32.gmra.mrb[18].mxu0 %vm479_vm1, %v6956_v55  ;;  %10315 = vmatprep.mubr.msk.f32.mxu1 %vm479_vm1, %v2465_v61  ;;  %v3270_v55 = vunpack.c.l.bf16 %v8224_v25  ;;  %v6859_v61 = vunpack.c.l.bf16 %v8736_v63  ;;  %v16419_v25 = vld [vmem:[#allocation78_spill] sm:$0xff] }
 0x1f0   :  { %10787 = vmatprep.mubr.msk.f32.mxu0 %vm479_vm1, %v6959_v2  ;;  %v16405_v2 = vld [vmem:[#allocation32_spill] sm:$0xff]  ;;  %v6991_v63 = vsel %vm1602_vm2, %v6988_v32, %v6990_v17  ;;  %v16420_v31 = vunpack.c.l.bf16 %v16419_v25 }
 0x1f1   :  { %v16406_v7 = vunpack.c.h.bf16 %v16405_v2  ;;  %v6987_v41 = vrot.slane %v6859_v61, 2  ;;  %v6997_v61 = vrot.slane %v6861_v23, 2  ;;  %v16431_v17 = vld [vmem:[#allocation80_spill] sm:$0xff] }
 0x1f2   :  { %10316 = vmatmul.mubr.msk.f32.gmra.mrb[52].mxu1 %vm479_vm1, %v2466_v5  ;;  %v6981_v5 = vsel %vm1602_vm2, %v6978_v3, %v6980_v39  ;;  %v3502_v22 = vrot.slane %v16420_v31, 1  ;;  %v16421_v39 = vld [vmem:[#allocation40_spill] sm:$0xff]  ;;  %v11574_v31 = vld [vmem:[%s15751_s0 + $0x120] sm:$0xff]  }
 0x1f3   :  { %10788 = vmatmul.mubr.msk.f32.gmra.mrb[20].mxu0 %vm479_vm1, %v6961_v10  ;;  %10318 = vmatprep.mubr.msk.f32.mxu1 %vm479_vm1, %v16394_v28  ;;  %v6983_v40 = vrot.slane %v16406_v7, 2  ;;  %v16408_v10 = vld [vmem:[#allocation35_spill] sm:$0xff]  ;;  %v16422_v53 = vunpack.c.l.bf16 %v16421_v39 }
 0x1f4   :  { %10790 = vmatprep.mubr.msk.f32.mxu0 %vm479_vm1, %v6964_v47  ;;  %v16409_v54 = vunpack.c.l.bf16 %v16408_v10  ;;  %v3494_v47 = vrot.slane %v3270_v55, 1  ;;  %v8740_v10 = vld [vmem:[%s15751_s0 + $0x120] sm:$0xe] }
 0x1f5   :  { %v6984_v28 = vsel %vm1602_vm2, %v6982_v16, %v6983_v40  ;;  %v16424_v16 = vld [vmem:[#allocation48_spill] sm:$0xff] }
 0x1f6   :  { %10319 = vmatmul.mubr.msk.f32.gmra.mrb[54].mxu1 %vm479_vm1, %v16398_v19  ;;  %v6985_v37 = vrot.slane %v16409_v54, 2 }
 0x1f7   :  { %10791 = vmatmul.mubr.msk.f32.gmra.mrb[22].mxu0 %vm479_vm1, %v6966_v24  ;;  %10321 = vmatprep.mubr.msk.f32.mxu1 %vm479_vm1, %v2469_v21  ;;  %v11572_v24 = vld [vmem:[%s15751_s0 + $0xf0] sm:$0xff]  }
 0x1f8   :  { %10793 = vmatprep.mubr.msk.f32.mxu0 %vm479_vm1, %v6969_v0  ;;  %v9011_v21 = vunpack.c.l.bf16 %v11572_v24  ;;  %v16412_v0 = vld [vmem:[#allocation77_spill] sm:$0xff]  ;;  %v6986_v27 = vsel %vm1602_vm2, %v6983_v40, %v6985_v37  ;;  %v11573_v40 = vld [vmem:[%s15751_s0 + $0x108] sm:$0xff]  }
 0x1f9   :  { %v16413_v57 = vunpack.c.l.bf16 %v16412_v0  ;;  %v9015_v6 = vunpack.c.l.bf16 %v11573_v40  ;;  %v16425_v37 = vld [vmem:[#allocation79_spill] sm:$0xff]  ;;  %v16429_v0 = vld [vmem:[#allocation41_spill] sm:$0xff] }
 0x1fa   :  { %10322 = vmatmul.mubr.msk.f32.gmra.mrb[56].mxu1 %vm479_vm1, %v2470_v38  ;;  %v3496_v38 = vsel %vm310_vm0, %v3494_v47, %v3495_v20  ;;  %v3499_v13 = vrot.slane %v9011_v21, 1  ;;  %v16426_v47 = vunpack.c.l.bf16 %v16425_v37  ;;  %v6863_v21 = vunpack.c.l.bf16 %v8740_v10 }
 0x1fb   :  { %10794 = vmatmul.mubr.msk.f32.gmra.mrb[24].mxu0 %vm479_vm1, %v6971_v8  ;;  %10324 = vmatprep.mubr.msk.f32.mxu1 %vm479_vm1, %v16404_v15  ;;  %v3497_v18 = vrot.slane %v16413_v57, 1  ;;  %v6989_v8 = vsel %vm1602_vm2, %v6987_v41, %v6988_v32  ;;  %v6995_v15 = vrot.slane %v16422_v53, 2  ;;  %v3509_v30 = vrot.slane %v9015_v6, 1  ;;  %v8742_v53 = vld [vmem:[%s15751_s0 + $0x138] sm:$0xe] }
 0x1fc   :  { %10796 = vmatprep.mubr.msk.f32.mxu0 %vm479_vm1, %v6974_v33  ;;  %v16417_v33 = vld [vmem:[#allocation37_spill] sm:$0xff]  ;;  %v3501_v2 = vsel %vm310_vm0, %v3499_v13, %v16424_v16  ;;  %v16430_v57 = vunpack.c.h.bf16 %v16429_v0  ;;  %v6865_v6 = vunpack.c.l.bf16 %v8742_v53 }
 0x1fd   :  { %v16418_v62 = vunpack.c.h.bf16 %v16417_v33  ;;  %v3498_v29 = vsel %vm310_vm0, %v3495_v20, %v3497_v18  ;;  %v16428_v20 = vunpack.c.l.bf16 %v16427_v60 }
 0x1fe   :  { %10325 = vmatmul.mubr.msk.f32.gmra.mrb[58].mxu1 %vm479_vm1, %v16407_v35  ;;  %v7003_v18 = vrot.slane %v16430_v57, 2  ;;  %v7017_v0 = vrot.slane %v6865_v6, 2  ;;  %v7018_v57 = vrot.slane %v14491_v34, 2  ;;  %v16460_v6 = vld [vmem:[#allocation10_spill] sm:$0xff] }
 0x1ff   :  { %10797 = vmatmul.mubr.msk.f32.gmra.mrb[26].mxu0 %vm479_vm1, %v6976_v59  ;;  %10327 = vmatprep.mubr.msk.f32.mxu1 %vm479_vm1, %v2473_v26  ;;  %v6993_v3 = vrot.slane %v16418_v62, 2  ;;  %v3504_v59 = vrot.slane %v3276_v9, 1  ;;  %v16423_v26 = vunpack.c.h.bf16 %v16410_v36  ;;  %v3507_v36 = vrot.slane %v16426_v47, 1  ;;  %v8743_v47 = vld [vmem:[%s15751_s0 + $0x144] sm:$0xe] }
 0x200   :  { %10799 = vmatprep.mubr.msk.f32.mxu0 %vm479_vm1, %v6979_v42  ;;  %v6998_v42 = vrot.slane %v14378_v1, 2  ;;  %v3503_v1 = vsel %vm310_vm0, %v16424_v16, %v3502_v22  ;;  %v7000_v41 = vrot.slane %v16428_v20, 2  ;;  %v9019_v22 = vunpack.c.l.bf16 %v11574_v31  ;;  %v16444_v20 = vld [vmem:[#allocation5_spill] sm:$0xff] }
 0x201   :  { %v3505_v55 = vrot.slane %v16423_v26, 1  ;;  %v6994_v7 = vsel %vm1602_vm2, %v6992_v11, %v6993_v3  ;;  %v6996_v54 = vsel %vm1602_vm2, %v6993_v3, %v6995_v15  ;;  %v16435_v11 = vld [vmem:[#allocation81_spill] sm:$0xff]  ;;  %v7007_v3 = vrot.slane %v6863_v21, 2 }
 0x202   :  { %10328 = vmatmul.mubr.msk.f32.gmra.mrb[60].mxu1 %vm479_vm1, %v2474_v43  ;;  %v6862_v43 = vunpack.c.l.bf16 %v8739_v49  ;;  %v7001_v14 = vsel %vm1602_vm2, %v6998_v42, %v7000_v41  ;;  %v16436_v33 = vunpack.c.l.bf16 %v16435_v11  ;;  %v7008_v49 = vrot.slane %v14426_v45, 2 }
 0x203   :  { %10800 = vmatmul.mubr.msk.f32.gmra.mrb[28].mxu0 %vm479_vm1, %v6981_v5  ;;  %10330 = vmatprep.mubr.msk.f32.mxu1 %vm479_vm1, %v16416_v46  ;;  %v8236_v5 = vld [vmem:[%s15751_s0 + $0x114] ss:$24 sps:$4 sm:$0xff]   ;;  %v3506_v32 = vsel %vm310_vm0, %v3504_v59, %v3505_v55  ;;  %v3508_v12 = vsel %vm310_vm0, %v3505_v55, %v3507_v36  ;;  %v16432_v46 = vunpack.c.l.bf16 %v16431_v17  ;;  %v16438_v59 = vld [vmem:[#allocation82_spill] sm:$0xff] }
 0x204   :  { %10802 = vmatprep.mubr.msk.f32.mxu0 %vm479_vm1, %v6984_v28  ;;  %v6999_v28 = vsel %vm1602_vm2, %v6997_v61, %v6998_v42  ;;  %v3282_v24 = vunpack.c.l.bf16 %v8236_v5  ;;  %v7002_v52 = vrot.slane %v6862_v43, 2  ;;  %v3515_v62 = vrot.slane %v16436_v33, 1  ;;  %v16440_v61 = vld [vmem:[#allocation46_spill] sm:$0xff]  ;;  %v16452_v33 = vld [vmem:[#allocation64_spill] sm:$0xff] }
 0x205   :  { %v16439_v26 = vunpack.c.l.bf16 %v16438_v59  ;;  %v16441_v42 = vunpack.c.l.bf16 %v16440_v61  ;;  %v3288_v40 = vunpack.c.h.bf16 %v8236_v5  ;;  %v3519_v43 = vrot.slane %v9019_v22, 1 }
 0x206   :  { %10331 = vmatmul.mubr.msk.f32.gmra.mrb[62].mxu1 %vm479_vm1, %v14708_v44  ;;  %v3514_v13 = vrot.slane %v3282_v24, 1  ;;  %v7004_v25 = vsel %vm1602_vm2, %v7002_v52, %v7003_v18  ;;  %v16445_v5 = vunpack.c.l.bf16 %v16444_v20 }
 0x207   :  { %10803 = vmatmul.mubr.msk.f32.gmra.mrb[30].mxu0 %vm479_vm1, %v6986_v27  ;;  %10389 = vmatprep.mubr.msk.f32.mxu1 %vm479_vm1, %v3496_v38  ;;  %v8741_v27 = vld [vmem:[%s15751_s0 + $0x12c] sm:$0xe]  ;;  %v3512_v38 = vrot.slane %v16432_v46, 1  ;;  %v3517_v55 = vrot.slane %v16439_v26, 1  ;;  %v7010_v16 = vrot.slane %v16441_v42, 2  ;;  %v3524_v21 = vrot.slane %v3288_v40, 1 }
 0x208   :  { %10805 = vmatprep.mubr.msk.f32.mxu0 %vm479_vm1, %v6989_v8  ;;  %v16433_v8 = vld [vmem:[#allocation44_spill] sm:$0xff]  ;;  %v6864_v39 = vunpack.c.l.bf16 %v8741_v27  ;;  %v3522_v41 = vrot.slane %v16445_v5, 1  ;;  %v6866_v46 = vunpack.c.l.bf16 %v8743_v47 }
 0x209   :  { %v16434_v9 = vunpack.c.l.bf16 %v16433_v8  ;;  %v3518_v36 = vsel %vm310_vm0, %v3515_v62, %v3517_v55  ;;  %v7011_v60 = vsel %vm1602_vm2, %v7008_v49, %v7010_v16  ;;  %v8744_v8 = vld [vmem:[%s15751_s0 + $0x150] sm:$0xe]  ;;  %v16456_v55 = vld [vmem:[#allocation7_spill] sm:$0xff] }
 0x20a   :  { %10390 = vmatmul.mubr.msk.f32.vlgmr.msra.gmra.mrb[32].mxu1 %vm479_vm1, %v3498_v29  ;;  %v16437_v29 = vld [vmem:[#allocation55_spill] sm:$0xff]  ;;  %v7012_v10 = vrot.slane %v6864_v39, 2  ;;  %v7022_v22 = vrot.slane %v6866_v46, 2  ;;  %v16454_v39 = vld [vmem:[#allocation2_spill] sm:$0xff]  ;;  %v16457_v61 = vunpack.c.l.bf16 %v16456_v55  ;;  %v16458_v16 = vld [vmem:[#allocation4_spill] sm:$0xff] }
 0x20b   :  { %10806 = vmatmul.mubr.msk.f32.gmra.mrb[32].mxu0 %vm479_vm1, %v6991_v63  ;;  %10392 = vmatprep.mubr.msk.f32.mxu1 %vm479_vm1, %v3501_v2  ;;  %v7005_v23 = vrot.slane %v16434_v9, 2  ;;  %v3511_v63 = vsel %vm310_vm0, %v3509_v30, %v16437_v29  ;;  %v3513_v45 = vsel %vm310_vm0, %v16437_v29, %v3512_v38  ;;  %v3516_v2 = vsel %vm310_vm0, %v3514_v13, %v3515_v62  ;;  %v8248_v38 = vld [vmem:[%s15751_s0 + $0x144] ss:$24 sps:$4 sm:$0xff]   ;;  %v16467_v46 = vld [vmem:[#allocation47_spill] sm:$0xff] }
 0x20c   :  { %10808 = vmatprep.mubr.msk.f32.mxu0 %vm479_vm1, %v6994_v7  ;;  %v7009_v7 = vsel %vm1602_vm2, %v7007_v3, %v7008_v49  ;;  %v16448_v30 = vunpack.c.h.bf16 %v16435_v11  ;;  %v16453_v62 = vunpack.c.l.bf16 %v16452_v33  ;;  %v7019_v29 = vsel %vm1602_vm2, %v7017_v0, %v7018_v57  ;;  %v8260_v55 = vld [vmem:[%s15751_s0 + $0x174] ss:$24 sps:$4 sm:$0xff]  }
 0x20d   :  { %v7006_v15 = vsel %vm1602_vm2, %v7003_v18, %v7005_v23  ;;  %v16449_v18 = vld [vmem:[#allocation58_spill] sm:$0xff]  ;;  %v16450_v23 = vld [vmem:[#allocation3_spill] sm:$0xff]  ;;  %v16455_v53 = vunpack.c.h.bf16 %v16454_v39  ;;  %v3532_v42 = vrot.slane %v16457_v61, 1  ;;  %v16474_v39 = vld [vmem:[#allocation68_spill] sm:$0xff] }
 0x20e   :  { %10393 = vmatmul.mubr.msk.f32.gmra.mrb[34].mxu1 %vm479_vm1, %v3503_v1  ;;  %v16442_v1 = vld [vmem:[#allocation49_spill] sm:$0xff]  ;;  %v3525_v52 = vrot.slane %v16448_v30, 1  ;;  %v3521_v27 = vsel %vm310_vm0, %v3519_v43, %v16449_v18  ;;  %v3523_v34 = vsel %vm310_vm0, %v16449_v18, %v3522_v41  ;;  %v16451_v13 = vunpack.c.l.bf16 %v16450_v23  ;;  %v8746_v41 = vld [vmem:[%s15751_s0 + $0x168] sm:$0xe]  ;;  %v16465_v30 = vld [vmem:[#allocation6_spill] sm:$0xff] }
 0x20f   :  { %10809 = vmatmul.mubr.msk.f32.gmra.mrb[34].mxu0 %vm479_vm1, %v6996_v54  ;;  %10395 = vmatprep.mubr.msk.f32.mxu1 %vm479_vm1, %v3506_v32  ;;  %v16443_v54 = vunpack.c.h.bf16 %v16442_v1  ;;  %v16446_v32 = vld [vmem:[#allocation51_spill] sm:$0xff]  ;;  %v7020_v3 = vrot.slane %v16453_v62, 2  ;;  %v16461_v43 = vunpack.c.l.bf16 %v16460_v6  ;;  %v16471_v62 = vld [vmem:[#allocation9_spill] sm:$0xff]  ;;  %v8748_v61 = vld [vmem:[%s15751_s0 + $0x180] sm:$0xe] }
 0x210   :  { %10811 = vmatprep.mubr.msk.f32.mxu0 %vm479_vm1, %v6999_v28  ;;  %v16447_v28 = vunpack.c.l.bf16 %v16446_v32  ;;  %v3527_v11 = vrot.slane %v16451_v13, 1  ;;  %v3526_v49 = vsel %vm310_vm0, %v3524_v21, %v3525_v52 }
 0x211   :  { %v7013_v37 = vrot.slane %v16443_v54, 2  ;;  %v7021_v26 = vsel %vm1602_vm2, %v7018_v57, %v7020_v3  ;;  %v7028_v54 = vrot.slane %v14551_v48, 2  ;;  %v16472_v3 = vunpack.c.l.bf16 %v16471_v62 }
 0x212   :  { %10396 = vmatmul.mubr.msk.f32.gmra.mrb[36].mxu1 %vm479_vm1, %v3508_v12  ;;  %v7015_v24 = vrot.slane %v16447_v28, 2  ;;  %v3528_v59 = vsel %vm310_vm0, %v3525_v52, %v3527_v11  ;;  %v16463_v28 = vld [vmem:[#allocation8_spill] sm:$0xff]  ;;  %v16466_v52 = vunpack.c.l.bf16 %v16465_v30 }
 0x213   :  { %10812 = vmatmul.mubr.msk.f32.gmra.mrb[36].mxu0 %vm479_vm1, %v7001_v14  ;;  %10398 = vmatprep.mubr.msk.f32.mxu1 %vm479_vm1, %v3511_v63  ;;  %v7014_v12 = vsel %vm1602_vm2, %v7012_v10, %v7013_v37  ;;  %v11575_v14 = vld [vmem:[%s15751_s0 + $0x138] sm:$0xff]   ;;  %v3294_v63 = vunpack.c.l.bf16 %v8248_v38  ;;  %v3535_v10 = vrot.slane %v16461_v43, 1  ;;  %v16469_v11 = vld [vmem:[#allocation12_spill] sm:$0xff] }
 0x214   :  { %10814 = vmatprep.mubr.msk.f32.mxu0 %vm479_vm1, %v7004_v25  ;;  %v9023_v17 = vunpack.c.l.bf16 %v11575_v14  ;;  %v7016_v9 = vsel %vm1602_vm2, %v7013_v37, %v7015_v24  ;;  %v6867_v25 = vunpack.c.l.bf16 %v8744_v8  ;;  %v16462_v37 = vld [vmem:[#allocation62_spill] sm:$0xff]  ;;  %v16464_v24 = vunpack.c.l.bf16 %v16463_v28  ;;  %v16481_v28 = vld [vmem:[#allocation13_spill] sm:$0xff]  ;;  %v16483_v30 = vld [vmem:[#allocation16_spill] sm:$0xff] }
 0x215   :  { %v3534_v40 = vrot.slane %v3294_v63, 1  ;;  %v3533_v48 = vsel %vm310_vm0, %v16462_v37, %v3532_v42  ;;  %v7030_v0 = vrot.slane %v16466_v52, 2  ;;  %v16468_v8 = vunpack.c.h.bf16 %v16467_v46  ;;  %v16487_v46 = vld [vmem:[#allocation71_spill] sm:$0xff] }
 0x216   :  { %10399 = vmatmul.mubr.msk.f32.gmra.mrb[38].mxu1 %vm479_vm1, %v3513_v45  ;;  %v3529_v31 = vrot.slane %v9023_v17, 1  ;;  %v7023_v45 = vrot.slane %v16455_v53, 2  ;;  %v7027_v1 = vrot.slane %v6867_v25, 2  ;;  %v3537_v21 = vrot.slane %v16464_v24, 1 }
 0x217   :  { %10815 = vmatmul.mubr.msk.f32.gmra.mrb[38].mxu0 %vm479_vm1, %v7006_v15  ;;  %10401 = vmatprep.mubr.msk.f32.mxu1 %vm479_vm1, %v3516_v2  ;;  %v8745_v15 = vld [vmem:[%s15751_s0 + $0x15c] sm:$0xe]  ;;  %v16459_v2 = vunpack.c.l.bf16 %v16458_v16  ;;  %v3536_v57 = vsel %vm310_vm0, %v3534_v40, %v3535_v10  ;;  %v7031_v13 = vsel %vm1602_vm2, %v7028_v54, %v7030_v0  ;;  %v16473_v63 = vunpack.c.h.bf16 %v16460_v6  ;;  %v16475_v16 = vld [vmem:[#allocation15_spill] sm:$0xff]  ;;  %v16477_v40 = vld [vmem:[#allocation52_spill] sm:$0xff] }
 0x218   :  { %10817 = vmatprep.mubr.msk.f32.mxu0 %vm479_vm1, %v7009_v7  ;;  %v3531_v47 = vsel %vm310_vm0, %v3529_v31, %v16462_v37  ;;  %v6868_v5 = vunpack.c.l.bf16 %v8745_v15  ;;  %v7029_v18 = vsel %vm1602_vm2, %v7027_v1, %v7028_v54  ;;  %v3538_v23 = vsel %vm310_vm0, %v3535_v10, %v3537_v21  ;;  %v11577_v15 = vld [vmem:[%s15751_s0 + $0x168] sm:$0xff]  }
 0x219   :  { %v7025_v7 = vrot.slane %v16459_v2, 2  ;;  %v3545_v25 = vrot.slane %v16473_v63, 1  ;;  %v16476_v2 = vunpack.c.l.bf16 %v16475_v16  ;;  %v16478_v6 = vunpack.c.l.bf16 %v16477_v40  ;;  %v16494_v16 = vld [vmem:[#allocation18_spill] sm:$0xff] }
 0x21a   :  { %10402 = vmatmul.mubr.msk.f32.gmra.mrb[40].mxu1 %vm479_vm1, %v3518_v36  ;;  %v7024_v36 = vsel %vm1602_vm2, %v7022_v22, %v7023_v45  ;;  %v7032_v17 = vrot.slane %v6868_v5, 2  ;;  %v7038_v22 = vrot.slane %v16398_v19, 2  ;;  %v3306_v54 = vunpack.c.l.bf16 %v8260_v55 }
 0x21b   :  { %10818 = vmatmul.mubr.msk.f32.gmra.mrb[40].mxu0 %vm479_vm1, %v7011_v60  ;;  %10404 = vmatprep.mubr.msk.f32.mxu1 %vm479_vm1, %v3521_v27  ;;  %v11576_v60 = vld [vmem:[%s15751_s0 + $0x150] sm:$0xff]   ;;  %v7026_v32 = vsel %vm1602_vm2, %v7023_v45, %v7025_v7  ;;  %v3300_v27 = vunpack.c.h.bf16 %v8248_v38  ;;  %v16470_v38 = vunpack.c.l.bf16 %v16469_v11  ;;  %v3547_v7 = vrot.slane %v16476_v2, 1  ;;  %v8750_v11 = vld [vmem:[%s15751_s0 + $0x198] sm:$0xe] }
 0x21c   :  { %10820 = vmatprep.mubr.msk.f32.mxu0 %vm479_vm1, %v7014_v12  ;;  %v9027_v20 = vunpack.c.l.bf16 %v11576_v60  ;;  %v6869_v12 = vunpack.c.l.bf16 %v8746_v41  ;;  %v7040_v43 = vrot.slane %v16478_v6, 2  ;;  %v6871_v37 = vunpack.c.l.bf16 %v8748_v61  ;;  %v16479_v60 = vld [vmem:[#allocation14_spill] sm:$0xff]  ;;  %v8749_v41 = vld [vmem:[%s15751_s0 + $0x18c] sm:$0xe] }
 0x21d   :  { %v3542_v33 = vrot.slane %v16470_v38, 1  ;;  %v16482_v24 = vunpack.c.l.bf16 %v16481_v28  ;;  %v16484_v52 = vunpack.c.l.bf16 %v16483_v30  ;;  %v8751_v61 = vld [vmem:[%s15751_s0 + $0x1a4] sm:$0xe] }
 0x21e   :  { %10405 = vmatmul.mubr.msk.f32.gmra.mrb[42].mxu1 %vm479_vm1, %v3523_v34  ;;  %v3539_v14 = vrot.slane %v9027_v20, 1  ;;  %v7033_v34 = vrot.slane %v16468_v8, 2  ;;  %v7037_v31 = vrot.slane %v6869_v12, 2  ;;  %v16480_v20 = vunpack.c.h.bf16 %v16479_v60 }
 0x21f   :  { %10821 = vmatmul.mubr.msk.f32.gmra.mrb[42].mxu0 %vm479_vm1, %v7016_v9  ;;  %10407 = vmatprep.mubr.msk.f32.mxu1 %vm479_vm1, %v3526_v49  ;;  %v8747_v9 = vld [vmem:[%s15751_s0 + $0x174] sm:$0xe]  ;;  %v7035_v49 = vrot.slane %v16472_v3, 2  ;;  %v3543_v19 = vsel %vm310_vm0, %v16474_v39, %v3542_v33  ;;  %v3552_v21 = vrot.slane %v16482_v24, 1  ;;  %v7045_v0 = vrot.slane %v16484_v52, 2  ;;  %v16500_v24 = vld [vmem:[#allocation22_spill] sm:$0xff] }
 0x220   :  { %10823 = vmatprep.mubr.msk.f32.mxu0 %vm479_vm1, %v7019_v29  ;;  %v3544_v29 = vrot.slane %v3300_v27, 1  ;;  %v3541_v53 = vsel %vm310_vm0, %v3539_v14, %v16474_v39  ;;  %v7034_v45 = vsel %vm1602_vm2, %v7032_v17, %v7033_v34  ;;  %v7039_v1 = vsel %vm1602_vm2, %v7037_v31, %v7038_v22  ;;  %v16488_v33 = vld [vmem:[#allocation20_spill] sm:$0xff] }
 0x221   :  { %v7036_v42 = vsel %vm1602_vm2, %v7033_v34, %v7035_v49  ;;  %v7043_v5 = vrot.slane %v16480_v20, 2  ;;  %v7047_v14 = vrot.slane %v6871_v37, 2  ;;  %v7048_v17 = vrot.slane %v16407_v35, 2  ;;  %v16490_v49 = vld [vmem:[#allocation21_spill] sm:$0xff] }
 0x222   :  { %10408 = vmatmul.mubr.msk.f32.gmra.mrb[44].mxu1 %vm479_vm1, %v3528_v59  ;;  %v9031_v59 = vunpack.c.l.bf16 %v11577_v15  ;;  %v3546_v10 = vsel %vm310_vm0, %v3544_v29, %v3545_v25  ;;  %v3553_v35 = vsel %vm310_vm0, %v16487_v46, %v3552_v21  ;;  %v16489_v62 = vunpack.c.l.bf16 %v16488_v33  ;;  %v16492_v15 = vld [vmem:[#allocation61_spill] sm:$0xff] }
 0x223   :  { %10824 = vmatmul.mubr.msk.f32.gmra.mrb[44].mxu0 %vm479_vm1, %v7021_v26  ;;  %10410 = vmatprep.mubr.msk.f32.mxu1 %vm479_vm1, %v3531_v47  ;;  %v6870_v26 = vunpack.c.l.bf16 %v8747_v9  ;;  %v11578_v9 = vld [vmem:[%s15751_s0 + $0x180] sm:$0xff]   ;;  %v7046_v38 = vsel %vm1602_vm2, %v7043_v5, %v7045_v0  ;;  %v16491_v29 = vunpack.c.l.bf16 %v16490_v49  ;;  %v7049_v31 = vsel %vm1602_vm2, %v7047_v14, %v7048_v17  ;;  %v11579_v20 = vld [vmem:[%s15751_s0 + $0x198] sm:$0xff]  }
 0x224   :  { %10826 = vmatprep.mubr.msk.f32.mxu0 %vm479_vm1, %v7024_v36  ;;  %v3549_v47 = vrot.slane %v9031_v59, 1  ;;  %v3557_v3 = vrot.slane %v16489_v62, 1  ;;  %v6873_v39 = vunpack.c.l.bf16 %v8750_v11  ;;  %v16493_v59 = vunpack.c.h.bf16 %v16492_v15 }
 0x225   :  { %v7042_v36 = vrot.slane %v6870_v26, 2  ;;  %v7050_v63 = vrot.slane %v16491_v29, 2  ;;  %v7058_v37 = vrot.slane %v14708_v44, 2  ;;  %v16501_v21 = vunpack.c.l.bf16 %v16500_v24 }
 0x226   :  { %10411 = vmatmul.mubr.msk.f32.gmra.mrb[46].mxu1 %vm479_vm1, %v3533_v48  ;;  %v3548_v48 = vsel %vm310_vm0, %v3545_v25, %v3547_v7  ;;  %v3551_v8 = vsel %vm310_vm0, %v3549_v47, %v16487_v46  ;;  %v7053_v26 = vrot.slane %v16493_v59, 2  ;;  %v16496_v7 = vld [vmem:[#allocation24_spill] sm:$0xff]  ;;  %v16499_v47 = vld [vmem:[#allocation74_spill] sm:$0xff]  ;;  %v7060_v52 = vrot.slane %v5966_v58, 2  ;;  %v16504_v58 = vld [vmem:[#allocation23_spill] sm:$0xff] }
 0x227   :  { %10827 = vmatmul.mubr.msk.f32.gmra.mrb[46].mxu0 %vm479_vm1, %v7026_v32  ;;  %10413 = vmatprep.mubr.msk.f32.mxu1 %vm479_vm1, %v3536_v57  ;;  %v7041_v32 = vsel %vm1602_vm2, %v7038_v22, %v7040_v43  ;;  %v3554_v57 = vrot.slane %v3306_v54, 1  ;;  %v7044_v34 = vsel %vm1602_vm2, %v7042_v36, %v7043_v5  ;;  %v3312_v22 = vunpack.c.h.bf16 %v8260_v55 }
 0x228   :  { %10829 = vmatprep.mubr.msk.f32.mxu0 %vm479_vm1, %v7029_v18  ;;  %v16485_v18 = vld [vmem:[#allocation17_spill] sm:$0xff]  ;;  %v16495_v55 = vunpack.c.l.bf16 %v16494_v16  ;;  %v16497_v40 = vunpack.c.l.bf16 %v16496_v7  ;;  %v7057_v54 = vrot.slane %v6873_v39, 2  ;;  %v9039_v5 = vunpack.c.l.bf16 %v11579_v20 }
 0x229   :  { %v16486_v27 = vunpack.c.l.bf16 %v16485_v18  ;;  %v3564_v43 = vrot.slane %v3312_v22, 1  ;;  %v3567_v30 = vrot.slane %v16501_v21, 1  ;;  %v7061_v50 = vsel %vm1602_vm2, %v7058_v37, %v7060_v52 }
 0x22a   :  { %10414 = vmatmul.mubr.msk.f32.gmra.mrb[48].mxu1 %vm479_vm1, %v3538_v23  ;;  %v9035_v23 = vunpack.c.l.bf16 %v11578_v9  ;;  %v3562_v2 = vrot.slane %v16495_v55, 1  ;;  %v7055_v6 = vrot.slane %v16497_v40, 2  ;;  %v7059_v28 = vsel %vm1602_vm2, %v7057_v54, %v7058_v37  ;;  %v15404_v37 = vld [vmem:[%s15752_s2] ss:$0 sm:$0xff] }
 0x22b   :  { %10830 = vmatmul.mubr.msk.f32.gmra.mrb[48].mxu0 %vm479_vm1, %v7031_v13  ;;  %10416 = vmatprep.mubr.msk.f32.mxu1 %vm479_vm1, %v3541_v53  ;;  %v3555_v12 = vrot.slane %v16486_v27, 1  ;;  %v6872_v13 = vunpack.c.l.bf16 %v8749_v41  ;;  %v6874_v41 = vunpack.c.l.bf16 %v8751_v61  ;;  %v3569_v0 = vrot.slane %v9039_v5, 1 }
 0x22c   :  { %10832 = vmatprep.mubr.msk.f32.mxu0 %vm479_vm1, %v7034_v45  ;;  %v3559_v53 = vrot.slane %v9035_v23, 1  ;;  %v7056_v44 = vsel %vm1602_vm2, %v7053_v26, %v7055_v6  ;;  %v16505_v46 = vunpack.c.l.bf16 %v16504_v58 }
 0x22d   :  { %v3556_v25 = vsel %vm310_vm0, %v3554_v57, %v3555_v12  ;;  %v7052_v45 = vrot.slane %v6872_v13, 2  ;;  %v16502_v57 = vld [vmem:[#allocation25_spill] sm:$0xff]  ;;  %v7062_v27 = vrot.slane %v6874_v41, 2 }
 0x22e   :  { %10417 = vmatmul.mubr.msk.f32.gmra.mrb[50].mxu1 %vm479_vm1, %v3543_v19  ;;  %v3558_v19 = vsel %vm310_vm0, %v3555_v12, %v3557_v3  ;;  %v3561_v36 = vsel %vm310_vm0, %v3559_v53, %v16499_v47  ;;  %v16503_v12 = vunpack.c.h.bf16 %v14718_v51 }
 0x22f   :  { %10833 = vmatmul.mubr.msk.f32.gmra.mrb[50].mxu0 %vm479_vm1, %v7036_v42  ;;  %10419 = vmatprep.mubr.msk.f32.mxu1 %vm479_vm1, %v3546_v10  ;;  %v7051_v42 = vsel %vm1602_vm2, %v7048_v17, %v7050_v63  ;;  %v16498_v10 = vunpack.c.h.bf16 %v16485_v18  ;;  %v7054_v60 = vsel %vm1602_vm2, %v7052_v45, %v7053_v26  ;;  %v3570_v18 = vrot.slane %v16502_v57, 1 }
 0x230   :  { %10835 = vmatprep.mubr.msk.f32.mxu0 %vm479_vm1, %v7039_v1  ;;  %v7063_v14 = vrot.slane %v16503_v12, 2 }
 0x231   :  { %v3565_v1 = vrot.slane %v16498_v10, 1  ;;  %v3571_v51 = vsel %vm310_vm0, %v3569_v0, %v3570_v18 }
 0x232   :  { %10420 = vmatmul.mubr.msk.f32.gmra.mrb[52].mxu1 %vm479_vm1, %v3548_v48  ;;  %v3563_v48 = vsel %vm310_vm0, %v16499_v47, %v3562_v2  ;;  %v7064_v9 = vsel %vm1602_vm2, %v7062_v27, %v7063_v14 }
 0x233   :  { %10836 = vmatmul.mubr.msk.f32.gmra.mrb[52].mxu0 %vm479_vm1, %v7041_v32  ;;  %10422 = vmatprep.mubr.msk.f32.mxu1 %vm479_vm1, %v3551_v8  ;;  %v3566_v32 = vsel %vm310_vm0, %v3564_v43, %v3565_v1  ;;  %v3568_v17 = vsel %vm310_vm0, %v3565_v1, %v3567_v30  ;;  %v3572_v8 = vrot.slane %v16505_v46, 1 }
 0x234   :  { %10838 = vmatprep.mubr.msk.f32.mxu0 %vm479_vm1, %v7044_v34  ;;  %v7065_v34 = vrot.slane %v5969_v4, 2 }
 0x235   :  { %v3573_v23 = vsel %vm310_vm0, %v3570_v18, %v3572_v8 }
 0x236   :  { %10423 = vmatmul.mubr.msk.f32.gmra.mrb[54].mxu1 %vm479_vm1, %v3553_v35  ;;  %v7066_v13 = vsel %vm1602_vm2, %v7063_v14, %v7065_v34 }
 0x237   :  { %10839 = vmatmul.mubr.msk.f32.gmra.mrb[54].mxu0 %vm479_vm1, %v7046_v38  ;;  %10425 = vmatprep.mubr.msk.f32.mxu1 %vm479_vm1, %v3556_v25 }
 0x238   :  { %10841 = vmatprep.mubr.msk.f32.mxu0 %vm479_vm1, %v7049_v31 }
 0x23a   :  { %10426 = vmatmul.mubr.msk.f32.gmra.mrb[56].mxu1 %vm479_vm1, %v3558_v19 }
 0x23b   :  { %10842 = vmatmul.mubr.msk.f32.gmra.mrb[56].mxu0 %vm479_vm1, %v7051_v42  ;;  %10428 = vmatprep.mubr.msk.f32.mxu1 %vm479_vm1, %v3561_v36 }
 0x23c   :  { %10844 = vmatprep.mubr.msk.f32.mxu0 %vm479_vm1, %v7054_v60 }
 0x23e   :  { %10429 = vmatmul.mubr.msk.f32.gmra.mrb[58].mxu1 %vm479_vm1, %v3563_v48 }
 0x23f   :  { %10845 = vmatmul.mubr.msk.f32.gmra.mrb[58].mxu0 %vm479_vm1, %v7056_v44  ;;  %10431 = vmatprep.mubr.msk.f32.mxu1 %vm479_vm1, %v3566_v32 }
 0x240   :  { %10847 = vmatprep.mubr.msk.f32.mxu0 %vm479_vm1, %v7059_v28 }
 0x242   :  { %10432 = vmatmul.mubr.msk.f32.gmra.mrb[60].mxu1 %vm479_vm1, %v3568_v17 }
 0x243   :  { %10848 = vmatmul.mubr.msk.f32.gmra.mrb[60].mxu0 %vm479_vm1, %v7061_v50  ;;  %10434 = vmatprep.mubr.msk.f32.mxu1 %vm479_vm1, %v3571_v51 }
 0x244   :  { %10850 = vmatprep.mubr.msk.f32.mxu0 %vm479_vm1, %v7064_v9 }
 0x246   :  { %10435 = vmatmul.mubr.msk.f32.gmra.mrb[62].mxu1 %vm479_vm1, %v3573_v23 }
 0x247   :  { %10851 = vmatmul.mubr.msk.f32.gmra.mrb[62].mxu0 %vm479_vm1, %v7066_v13 }
 0x25d   :  { %v10239_v4 = vpop.f32.mrb[0].mxu1 }
 0x25e   :  { %v2743_v56 = vpop.f32.mrb[1].mxu1 }
 0x261   :  { %v10242_v11 = vpop.f32.mrb[2].mxu1 }
 0x262   :  { %v2753_v35 = vpop.f32.mrb[3].mxu1 }
 0x265   :  { %v10245_v38 = vpop.f32.mrb[4].mxu1 }
 0x266   :  { %v2763_v33 = vpop.f32.mrb[5].mxu1 }
 0x269   :  { %v10248_v62 = vpop.f32.mrb[6].mxu1 }
 0x26a   :  { %v2773_v3 = vpop.f32.mrb[7].mxu1 }
 0x26d   :  { %v15353_v49 = vpop.f32.mrb[8].mxu1 }
 0x26e   :  { %v15355_v29 = vpop.f32.mrb[9].mxu1 }
 0x271   :  { %v15357_v63 = vpop.f32.mrb[10].mxu1 }
 0x272   :  { %v15359_v25 = vpop.f32.mrb[11].mxu1 }
 0x275   :  { %v15361_v31 = vpop.f32.mrb[12].mxu1 }
 0x276   :  { %v15363_v22 = vpop.f32.mrb[13].mxu1 }
 0x279   :  { %v15365_v39 = vpop.f32.mrb[14].mxu1 }
 0x27a   :  { %v15367_v53 = vpop.f32.mrb[15].mxu1 }
 0x27d   :  { %v15369_v45 = vpop.f32.mrb[16].mxu1 }
 0x27e   :  { %v15371_v15 = vpop.f32.mrb[17].mxu1 }
 0x281   :  { %v15373_v59 = vpop.f32.mrb[18].mxu1 }
 0x282   :  { %v15375_v26 = vpop.f32.mrb[19].mxu1 }
 0x285   :  { %v15377_v61 = vpop.f32.mrb[20].mxu1 }
 0x286   :  { %v15379_v19 = vpop.f32.mrb[21].mxu1 }
 0x289   :  { %v15381_v42 = vpop.f32.mrb[22].mxu1 }
 0x28a   :  { %v15383_v16 = vpop.f32.mrb[23].mxu1 }
 0x28d   :  { %v15385_v55 = vpop.f32.mrb[24].mxu1 }
 0x28e   :  { %v15387_v2 = vpop.f32.mrb[25].mxu1 }
 0x291   :  { %v15389_v7 = vpop.f32.mrb[26].mxu1 }
 0x292   :  { %v15391_v40 = vpop.f32.mrb[27].mxu1 }
 0x295   :  { %v15393_v6 = vpop.f32.mrb[28].mxu1 }
 0x296   :  { %v15395_v43 = vpop.f32.mrb[29].mxu1 }
 0x299   :  { %v15397_v10 = vpop.f32.mrb[30].mxu1 }
 0x29a   :  { %v15399_v1 = vpop.f32.mrb[31].mxu1 }
 0x29e   :  { %v10759_v54 = vpop.f32.mrb[0].mxu0 }
 0x29f   :  { %v10929_v47 = vadd.f32 %v10759_v54, %v10239_v4  ;;  %v7269_v36 = vpop.f32.mrb[1].mxu0 }
 0x2a0   :  { %v10930_v60 = vadd.f32 %v7269_v36, %v2743_v56 }
 0x2a1   :  { %v7660_v20 = vadd.f32 %v10929_v47, %v15404_v37 }
 0x2a2   :  { %v7659_v5 = vadd.f32 %v10930_v60, %v15404_v37  ;;  %v10762_v41 = vpop.f32.mrb[2].mxu0 }
 0x2a3   :  { %11441 = vtanh.f32 %v7660_v20  ;;  %v10931_v48 = vadd.f32 %v10762_v41, %v10242_v11  ;;  %v7279_v44 = vpop.f32.mrb[3].mxu0 }
 0x2a4   :  { %11443 = vtanh.f32 %v7659_v5  ;;  %v10932_v32 = vadd.f32 %v7279_v44, %v2753_v35 }
 0x2a5   :  { %v7662_v28 = vadd.f32 %v10931_v48, %v15404_v37 }
 0x2a6   :  { %v7661_v24 = vadd.f32 %v10932_v32, %v15404_v37  ;;  %v10765_v21 = vpop.f32.mrb[4].mxu0 }
 0x2a7   :  { %11445 = vtanh.f32 %v7662_v28  ;;  %v10933_v30 = vadd.f32 %v10765_v21, %v10245_v38  ;;  %v7289_v52 = vpop.f32.mrb[5].mxu0 }
 0x2a8   :  { %11447 = vtanh.f32 %v7661_v24  ;;  %v10934_v0 = vadd.f32 %v7289_v52, %v2763_v33 }
 0x2a9   :  { %v7664_v57 = vadd.f32 %v10933_v30, %v15404_v37 }
 0x2aa   :  { %v7663_v18 = vadd.f32 %v10934_v0, %v15404_v37  ;;  %v10768_v27 = vpop.f32.mrb[6].mxu0 }
 0x2ab   :  { %11449 = vtanh.f32 %v7664_v57  ;;  %v10935_v12 = vadd.f32 %v10768_v27, %v10248_v62  ;;  %v7299_v14 = vpop.f32.mrb[7].mxu0 }
 0x2ac   :  { %11451 = vtanh.f32 %v7663_v18  ;;  %v10936_v17 = vadd.f32 %v7299_v14, %v2773_v3 }
 0x2ad   :  { %v11442_v50 = vpop.eup %11441  ;;  %v7666_v58 = vadd.f32 %v10935_v12, %v15404_v37 }
 0x2ae   :  { %v11444_v46 = vpop.eup %11443  ;;  %7789 = vst.msk [vmem:[%s15753_s3 + $0x8] sm:$0xff] %vm7787_vm3, %v11442_v50  ;;  %v7665_v8 = vadd.f32 %v10936_v17, %v15404_v37  ;;  %v10771_v34 = vpop.f32.mrb[8].mxu0 }
 0x2af   :  { %7788 = vst.msk [vmem:[%s15753_s3] sm:$0xff] %vm7787_vm3, %v11444_v46  ;;  %11453 = vtanh.f32 %v7666_v58  ;;  %v10937_v51 = vadd.f32 %v10771_v34, %v15353_v49  ;;  %v7309_v9 = vpop.f32.mrb[9].mxu0 }
 0x2b0   :  { %11455 = vtanh.f32 %v7665_v8  ;;  %v10938_v23 = vadd.f32 %v7309_v9, %v15355_v29 }
 0x2b1   :  { %v11446_v13 = vpop.eup %11445  ;;  %v7668_v4 = vadd.f32 %v10937_v51, %v15404_v37 }
 0x2b2   :  { %v11448_v56 = vpop.eup %11447  ;;  %7791 = vst.msk [vmem:[%s15753_s3 + $0x18] sm:$0xff] %vm7787_vm3, %v11446_v13  ;;  %v7667_v11 = vadd.f32 %v10938_v23, %v15404_v37  ;;  %v10774_v35 = vpop.f32.mrb[10].mxu0 }
 0x2b3   :  { %7790 = vst.msk [vmem:[%s15753_s3 + $0x10] sm:$0xff] %vm7787_vm3, %v11448_v56  ;;  %11457 = vtanh.f32 %v7668_v4  ;;  %v10939_v38 = vadd.f32 %v10774_v35, %v15357_v63  ;;  %v7319_v33 = vpop.f32.mrb[11].mxu0 }
 0x2b4   :  { %11459 = vtanh.f32 %v7667_v11  ;;  %v10940_v62 = vadd.f32 %v7319_v33, %v15359_v25 }
 0x2b5   :  { %v11450_v3 = vpop.eup %11449  ;;  %v7670_v49 = vadd.f32 %v10939_v38, %v15404_v37 }
 0x2b6   :  { %v11452_v29 = vpop.eup %11451  ;;  %7793 = vst.msk [vmem:[%s15753_s3 + $0x28] sm:$0xff] %vm7787_vm3, %v11450_v3  ;;  %v7669_v54 = vadd.f32 %v10940_v62, %v15404_v37  ;;  %v10777_v47 = vpop.f32.mrb[12].mxu0 }
 0x2b7   :  { %7792 = vst.msk [vmem:[%s15753_s3 + $0x20] sm:$0xff] %vm7787_vm3, %v11452_v29  ;;  %11461 = vtanh.f32 %v7670_v49  ;;  %v10941_v63 = vadd.f32 %v10777_v47, %v15361_v31  ;;  %v7329_v25 = vpop.f32.mrb[13].mxu0 }
 0x2b8   :  { %11463 = vtanh.f32 %v7669_v54  ;;  %v10942_v36 = vadd.f32 %v7329_v25, %v15363_v22 }
 0x2b9   :  { %v11454_v60 = vpop.eup %11453  ;;  %v7672_v20 = vadd.f32 %v10941_v63, %v15404_v37 }
 0x2ba   :  { %v11456_v5 = vpop.eup %11455  ;;  %7795 = vst.msk [vmem:[%s15753_s3 + $0x38] sm:$0xff] %vm7787_vm3, %v11454_v60  ;;  %v7671_v41 = vadd.f32 %v10942_v36, %v15404_v37  ;;  %v10780_v48 = vpop.f32.mrb[14].mxu0 }
 0x2bb   :  { %7794 = vst.msk [vmem:[%s15753_s3 + $0x30] sm:$0xff] %vm7787_vm3, %v11456_v5  ;;  %11465 = vtanh.f32 %v7672_v20  ;;  %v10943_v31 = vadd.f32 %v10780_v48, %v15365_v39  ;;  %v7339_v22 = vpop.f32.mrb[15].mxu0 }
 0x2bc   :  { %11467 = vtanh.f32 %v7671_v41  ;;  %v10944_v44 = vadd.f32 %v7339_v22, %v15367_v53 }
 0x2bd   :  { %v11458_v32 = vpop.eup %11457  ;;  %v7674_v28 = vadd.f32 %v10943_v31, %v15404_v37 }
 0x2be   :  { %v11460_v24 = vpop.eup %11459  ;;  %7797 = vst.msk [vmem:[%s15753_s3 + $0x48] sm:$0xff] %vm7787_vm3, %v11458_v32  ;;  %v7673_v21 = vadd.f32 %v10944_v44, %v15404_v37  ;;  %v10783_v30 = vpop.f32.mrb[16].mxu0 }
 0x2bf   :  { %7796 = vst.msk [vmem:[%s15753_s3 + $0x40] sm:$0xff] %vm7787_vm3, %v11460_v24  ;;  %11469 = vtanh.f32 %v7674_v28  ;;  %v10945_v39 = vadd.f32 %v10783_v30, %v15369_v45  ;;  %v7349_v53 = vpop.f32.mrb[17].mxu0 }
 0x2c0   :  { %11471 = vtanh.f32 %v7673_v21  ;;  %v10946_v52 = vadd.f32 %v7349_v53, %v15371_v15 }
 0x2c1   :  { %v11462_v0 = vpop.eup %11461  ;;  %v7676_v57 = vadd.f32 %v10945_v39, %v15404_v37 }
 0x2c2   :  { %v11464_v18 = vpop.eup %11463  ;;  %7799 = vst.msk [vmem:[%s15753_s3 + $0x58] sm:$0xff] %vm7787_vm3, %v11462_v0  ;;  %v7675_v27 = vadd.f32 %v10946_v52, %v15404_v37  ;;  %v10786_v12 = vpop.f32.mrb[18].mxu0 }
 0x2c3   :  { %7798 = vst.msk [vmem:[%s15753_s3 + $0x50] sm:$0xff] %vm7787_vm3, %v11464_v18  ;;  %11473 = vtanh.f32 %v7676_v57  ;;  %v10947_v45 = vadd.f32 %v10786_v12, %v15373_v59  ;;  %v7359_v15 = vpop.f32.mrb[19].mxu0 }
 0x2c4   :  { %11475 = vtanh.f32 %v7675_v27  ;;  %v10948_v14 = vadd.f32 %v7359_v15, %v15375_v26 }
 0x2c5   :  { %v11466_v17 = vpop.eup %11465  ;;  %v7678_v50 = vadd.f32 %v10947_v45, %v15404_v37 }
 0x2c6   :  { %v11468_v58 = vpop.eup %11467  ;;  %7801 = vst.msk [vmem:[%s15753_s3 + $0x68] sm:$0xff] %vm7787_vm3, %v11466_v17  ;;  %v7677_v46 = vadd.f32 %v10948_v14, %v15404_v37  ;;  %v10789_v8 = vpop.f32.mrb[20].mxu0 }
 0x2c7   :  { %7800 = vst.msk [vmem:[%s15753_s3 + $0x60] sm:$0xff] %vm7787_vm3, %v11468_v58  ;;  %11477 = vtanh.f32 %v7678_v50  ;;  %v10949_v59 = vadd.f32 %v10789_v8, %v15377_v61  ;;  %v7369_v26 = vpop.f32.mrb[21].mxu0 }
 0x2c8   :  { %11479 = vtanh.f32 %v7677_v46  ;;  %v10950_v34 = vadd.f32 %v7369_v26, %v15379_v19 }
 0x2c9   :  { %v11470_v51 = vpop.eup %11469  ;;  %v7680_v9 = vadd.f32 %v10949_v59, %v15404_v37 }
 0x2ca   :  { %v11472_v23 = vpop.eup %11471  ;;  %7803 = vst.msk [vmem:[%s15753_s3 + $0x78] sm:$0xff] %vm7787_vm3, %v11470_v51  ;;  %v7679_v13 = vadd.f32 %v10950_v34, %v15404_v37  ;;  %v10792_v4 = vpop.f32.mrb[22].mxu0 }
 0x2cb   :  { %7802 = vst.msk [vmem:[%s15753_s3 + $0x70] sm:$0xff] %vm7787_vm3, %v11472_v23  ;;  %11481 = vtanh.f32 %v7680_v9  ;;  %v10951_v61 = vadd.f32 %v10792_v4, %v15381_v42  ;;  %v7379_v19 = vpop.f32.mrb[23].mxu0 }
 0x2cc   :  { %11483 = vtanh.f32 %v7679_v13  ;;  %v10952_v56 = vadd.f32 %v7379_v19, %v15383_v16 }
 0x2cd   :  { %v11474_v11 = vpop.eup %11473  ;;  %v7682_v35 = vadd.f32 %v10951_v61, %v15404_v37 }
 0x2ce   :  { %v11476_v38 = vpop.eup %11475  ;;  %7805 = vst.msk [vmem:[%s15753_s3 + $0x88] sm:$0xff] %vm7787_vm3, %v11474_v11  ;;  %v7681_v33 = vadd.f32 %v10952_v56, %v15404_v37  ;;  %v10795_v62 = vpop.f32.mrb[24].mxu0 }
 0x2cf   :  { %7804 = vst.msk [vmem:[%s15753_s3 + $0x80] sm:$0xff] %vm7787_vm3, %v11476_v38  ;;  %11485 = vtanh.f32 %v7682_v35  ;;  %v10953_v42 = vadd.f32 %v10795_v62, %v15385_v55  ;;  %v7389_v16 = vpop.f32.mrb[25].mxu0 }
 0x2d0   :  { %11487 = vtanh.f32 %v7681_v33  ;;  %v10954_v3 = vadd.f32 %v7389_v16, %v15387_v2 }
 0x2d1   :  { %v11478_v49 = vpop.eup %11477  ;;  %v7684_v29 = vadd.f32 %v10953_v42, %v15404_v37 }
 0x2d2   :  { %v11480_v54 = vpop.eup %11479  ;;  %7807 = vst.msk [vmem:[%s15753_s3 + $0x98] sm:$0xff] %vm7787_vm3, %v11478_v49  ;;  %v7683_v47 = vadd.f32 %v10954_v3, %v15404_v37  ;;  %v10798_v63 = vpop.f32.mrb[26].mxu0 }
 0x2d3   :  { %7806 = vst.msk [vmem:[%s15753_s3 + $0x90] sm:$0xff] %vm7787_vm3, %v11480_v54  ;;  %11489 = vtanh.f32 %v7684_v29  ;;  %v10955_v55 = vadd.f32 %v10798_v63, %v15389_v7  ;;  %v7399_v2 = vpop.f32.mrb[27].mxu0 }
 0x2d4   :  { %11491 = vtanh.f32 %v7683_v47  ;;  %v10956_v25 = vadd.f32 %v7399_v2, %v15391_v40 }
 0x2d5   :  { %v11482_v36 = vpop.eup %11481  ;;  %v7686_v60 = vadd.f32 %v10955_v55, %v15404_v37 }
 0x2d6   :  { %v11484_v20 = vpop.eup %11483  ;;  %7809 = vst.msk [vmem:[%s15753_s3 + $0xa8] sm:$0xff] %vm7787_vm3, %v11482_v36  ;;  %v7685_v5 = vadd.f32 %v10956_v25, %v15404_v37  ;;  %v10801_v41 = vpop.f32.mrb[28].mxu0 }
 0x2d7   :  { %7808 = vst.msk [vmem:[%s15753_s3 + $0xa0] sm:$0xff] %vm7787_vm3, %v11484_v20  ;;  %11493 = vtanh.f32 %v7686_v60  ;;  %v10957_v7 = vadd.f32 %v10801_v41, %v15393_v6  ;;  %v7409_v40 = vpop.f32.mrb[29].mxu0 }
 0x2d8   :  { %11495 = vtanh.f32 %v7685_v5  ;;  %v10958_v48 = vadd.f32 %v7409_v40, %v15395_v43 }
 0x2d9   :  { %v11486_v31 = vpop.eup %11485  ;;  %v7688_v22 = vadd.f32 %v10957_v7, %v15404_v37 }
 0x2da   :  { %v11488_v44 = vpop.eup %11487  ;;  %7811 = vst.msk [vmem:[%s15753_s3 + $0xb8] sm:$0xff] %vm7787_vm3, %v11486_v31  ;;  %v7687_v32 = vadd.f32 %v10958_v48, %v15404_v37  ;;  %v10804_v28 = vpop.f32.mrb[30].mxu0 }
 0x2db   :  { %7810 = vst.msk [vmem:[%s15753_s3 + $0xb0] sm:$0xff] %vm7787_vm3, %v11488_v44  ;;  %11497 = vtanh.f32 %v7688_v22  ;;  %v10959_v6 = vadd.f32 %v10804_v28, %v15397_v10  ;;  %v7419_v43 = vpop.f32.mrb[31].mxu0 }
 0x2dc   :  { %11499 = vtanh.f32 %v7687_v32  ;;  %v10960_v24 = vadd.f32 %v7419_v43, %v15399_v1 }
 0x2dd   :  { %v11490_v21 = vpop.eup %11489  ;;  %v7690_v30 = vadd.f32 %v10959_v6, %v15404_v37  ;;  %v10391_v52 = vpop.f32.mrb[32].mxu1 }
 0x2de   :  { %v11492_v39 = vpop.eup %11491  ;;  %7813 = vst.msk [vmem:[%s15753_s3 + $0xc8] sm:$0xff] %vm7787_vm3, %v11490_v21  ;;  %v7689_v53 = vadd.f32 %v10960_v24, %v15404_v37  ;;  %v10807_v0 = vpop.f32.mrb[32].mxu0 }
 0x2df   :  { %7812 = vst.msk [vmem:[%s15753_s3 + $0xc0] sm:$0xff] %vm7787_vm3, %v11492_v39  ;;  %11501 = vtanh.f32 %v7690_v30  ;;  %v10961_v10 = vadd.f32 %v10807_v0, %v10391_v52  ;;  %v3936_v1 = vpop.f32.mrb[33].mxu1  ;;  %v7429_v57 = vpop.f32.mrb[33].mxu0 }
 0x2e0   :  { %11503 = vtanh.f32 %v7689_v53  ;;  %v10962_v18 = vadd.f32 %v7429_v57, %v3936_v1 }
 0x2e1   :  { %v11494_v27 = vpop.eup %11493  ;;  %v7692_v12 = vadd.f32 %v10961_v10, %v15404_v37  ;;  %v10394_v14 = vpop.f32.mrb[34].mxu1 }
 0x2e2   :  { %v11496_v45 = vpop.eup %11495  ;;  %7815 = vst.msk [vmem:[%s15753_s3 + $0xd8] sm:$0xff] %vm7787_vm3, %v11494_v27  ;;  %v7691_v15 = vadd.f32 %v10962_v18, %v15404_v37  ;;  %v10810_v17 = vpop.f32.mrb[34].mxu0 }
 0x2e3   :  { %7814 = vst.msk [vmem:[%s15753_s3 + $0xd0] sm:$0xff] %vm7787_vm3, %v11496_v45  ;;  %11505 = vtanh.f32 %v7692_v12  ;;  %v10963_v50 = vadd.f32 %v10810_v17, %v10394_v14  ;;  %v3946_v58 = vpop.f32.mrb[35].mxu1  ;;  %v7439_v46 = vpop.f32.mrb[35].mxu0 }
 0x2e4   :  { %11507 = vtanh.f32 %v7691_v15  ;;  %v10964_v8 = vadd.f32 %v7439_v46, %v3946_v58 }
 0x2e5   :  { %v11498_v59 = vpop.eup %11497  ;;  %v7694_v26 = vadd.f32 %v10963_v50, %v15404_v37  ;;  %v10397_v9 = vpop.f32.mrb[36].mxu1 }
 0x2e6   :  { %v11500_v34 = vpop.eup %11499  ;;  %7817 = vst.msk [vmem:[%s15753_s3 + $0xe8] sm:$0xff] %vm7787_vm3, %v11498_v59  ;;  %v7693_v51 = vadd.f32 %v10964_v8, %v15404_v37  ;;  %v10813_v23 = vpop.f32.mrb[36].mxu0 }
 0x2e7   :  { %7816 = vst.msk [vmem:[%s15753_s3 + $0xe0] sm:$0xff] %vm7787_vm3, %v11500_v34  ;;  %11509 = vtanh.f32 %v7694_v26  ;;  %v10965_v13 = vadd.f32 %v10813_v23, %v10397_v9  ;;  %v3956_v4 = vpop.f32.mrb[37].mxu1  ;;  %v7449_v61 = vpop.f32.mrb[37].mxu0 }
 0x2e8   :  { %11511 = vtanh.f32 %v7693_v51  ;;  %v10966_v19 = vadd.f32 %v7449_v61, %v3956_v4 }
 0x2e9   :  { %v11502_v56 = vpop.eup %11501  ;;  %v7696_v11 = vadd.f32 %v10965_v13, %v15404_v37  ;;  %v10400_v33 = vpop.f32.mrb[38].mxu1 }
 0x2ea   :  { %v11504_v35 = vpop.eup %11503  ;;  %7819 = vst.msk [vmem:[%s15753_s3 + $0xf8] sm:$0xff] %vm7787_vm3, %v11502_v56  ;;  %v7695_v38 = vadd.f32 %v10966_v19, %v15404_v37  ;;  %v10816_v62 = vpop.f32.mrb[38].mxu0 }
 0x2eb   :  { %7818 = vst.msk [vmem:[%s15753_s3 + $0xf0] sm:$0xff] %vm7787_vm3, %v11504_v35  ;;  %11513 = vtanh.f32 %v7696_v11  ;;  %v10967_v42 = vadd.f32 %v10816_v62, %v10400_v33  ;;  %v3966_v16 = vpop.f32.mrb[39].mxu1  ;;  %v7459_v3 = vpop.f32.mrb[39].mxu0 }
 0x2ec   :  { %11515 = vtanh.f32 %v7695_v38  ;;  %v10968_v49 = vadd.f32 %v7459_v3, %v3966_v16 }
 0x2ed   :  { %v11506_v29 = vpop.eup %11505  ;;  %v7698_v54 = vadd.f32 %v10967_v42, %v15404_v37  ;;  %v10403_v55 = vpop.f32.mrb[40].mxu1 }
 0x2ee   :  { %v11508_v47 = vpop.eup %11507  ;;  %7821 = vst.msk [vmem:[%s15753_s3 + $0x108] sm:$0xff] %vm7787_vm3, %v11506_v29  ;;  %v7697_v63 = vadd.f32 %v10968_v49, %v15404_v37  ;;  %v10819_v2 = vpop.f32.mrb[40].mxu0 }
 0x2ef   :  { %7820 = vst.msk [vmem:[%s15753_s3 + $0x100] sm:$0xff] %vm7787_vm3, %v11508_v47  ;;  %11517 = vtanh.f32 %v7698_v54  ;;  %v10969_v25 = vadd.f32 %v10819_v2, %v10403_v55  ;;  %v3976_v36 = vpop.f32.mrb[41].mxu1  ;;  %v7469_v60 = vpop.f32.mrb[41].mxu0 }
 0x2f0   :  { %11519 = vtanh.f32 %v7697_v63  ;;  %v10970_v20 = vadd.f32 %v7469_v60, %v3976_v36 }
 0x2f1   :  { %v11510_v5 = vpop.eup %11509  ;;  %v7700_v41 = vadd.f32 %v10969_v25, %v15404_v37  ;;  %v10406_v48 = vpop.f32.mrb[42].mxu1 }
 0x2f2   :  { %v11512_v7 = vpop.eup %11511  ;;  %7823 = vst.msk [vmem:[%s15753_s3 + $0x118] sm:$0xff] %vm7787_vm3, %v11510_v5  ;;  %v7699_v40 = vadd.f32 %v10970_v20, %v15404_v37  ;;  %v10822_v31 = vpop.f32.mrb[42].mxu0 }
 0x2f3   :  { %7822 = vst.msk [vmem:[%s15753_s3 + $0x110] sm:$0xff] %vm7787_vm3, %v11512_v7  ;;  %11521 = vtanh.f32 %v7700_v41  ;;  %v10971_v22 = vadd.f32 %v10822_v31, %v10406_v48  ;;  %v3986_v44 = vpop.f32.mrb[43].mxu1  ;;  %v7479_v32 = vpop.f32.mrb[43].mxu0 }
 0x2f4   :  { %11523 = vtanh.f32 %v7699_v40  ;;  %v10972_v28 = vadd.f32 %v7479_v32, %v3986_v44 }
 0x2f5   :  { %v11514_v6 = vpop.eup %11513  ;;  %v7702_v43 = vadd.f32 %v10971_v22, %v15404_v37  ;;  %v10409_v30 = vpop.f32.mrb[44].mxu1 }
 0x2f6   :  { %v11516_v24 = vpop.eup %11515  ;;  %7825 = vst.msk [vmem:[%s15753_s3 + $0x128] sm:$0xff] %vm7787_vm3, %v11514_v6  ;;  %v7701_v21 = vadd.f32 %v10972_v28, %v15404_v37  ;;  %v10825_v39 = vpop.f32.mrb[44].mxu0 }
 0x2f7   :  { %7824 = vst.msk [vmem:[%s15753_s3 + $0x120] sm:$0xff] %vm7787_vm3, %v11516_v24  ;;  %11525 = vtanh.f32 %v7702_v43  ;;  %v10973_v53 = vadd.f32 %v10825_v39, %v10409_v30  ;;  %v3996_v52 = vpop.f32.mrb[45].mxu1  ;;  %v7489_v0 = vpop.f32.mrb[45].mxu0 }
 0x2f8   :  { %11527 = vtanh.f32 %v7701_v21  ;;  %v10974_v10 = vadd.f32 %v7489_v0, %v3996_v52 }
 0x2f9   :  { %v11518_v1 = vpop.eup %11517  ;;  %v7704_v57 = vadd.f32 %v10973_v53, %v15404_v37  ;;  %v10412_v12 = vpop.f32.mrb[46].mxu1 }
 0x2fa   :  { %v11520_v18 = vpop.eup %11519  ;;  %7827 = vst.msk [vmem:[%s15753_s3 + $0x138] sm:$0xff] %vm7787_vm3, %v11518_v1  ;;  %v7703_v27 = vadd.f32 %v10974_v10, %v15404_v37  ;;  %v10828_v45 = vpop.f32.mrb[46].mxu0 }
 0x2fb   :  { %7826 = vst.msk [vmem:[%s15753_s3 + $0x130] sm:$0xff] %vm7787_vm3, %v11520_v18  ;;  %11529 = vtanh.f32 %v7704_v57  ;;  %v10975_v15 = vadd.f32 %v10828_v45, %v10412_v12  ;;  %v4006_v14 = vpop.f32.mrb[47].mxu1  ;;  %v7499_v17 = vpop.f32.mrb[47].mxu0 }
 0x2fc   :  { %11531 = vtanh.f32 %v7703_v27  ;;  %v10976_v50 = vadd.f32 %v7499_v17, %v4006_v14 }
 0x2fd   :  { %v11522_v58 = vpop.eup %11521  ;;  %v7706_v46 = vadd.f32 %v10975_v15, %v15404_v37  ;;  %v10415_v26 = vpop.f32.mrb[48].mxu1 }
 0x2fe   :  { %v11524_v8 = vpop.eup %11523  ;;  %7829 = vst.msk [vmem:[%s15753_s3 + $0x148] sm:$0xff] %vm7787_vm3, %v11522_v58  ;;  %v7705_v59 = vadd.f32 %v10976_v50, %v15404_v37  ;;  %v10831_v34 = vpop.f32.mrb[48].mxu0 }
 0x2ff   :  { %7828 = vst.msk [vmem:[%s15753_s3 + $0x140] sm:$0xff] %vm7787_vm3, %v11524_v8  ;;  %11533 = vtanh.f32 %v7706_v46  ;;  %v10977_v51 = vadd.f32 %v10831_v34, %v10415_v26  ;;  %v4016_v9 = vpop.f32.mrb[49].mxu1  ;;  %v7509_v23 = vpop.f32.mrb[49].mxu0 }
 0x300   :  { %11535 = vtanh.f32 %v7705_v59  ;;  %v10978_v13 = vadd.f32 %v7509_v23, %v4016_v9 }
 0x301   :  { %v11526_v4 = vpop.eup %11525  ;;  %v7708_v61 = vadd.f32 %v10977_v51, %v15404_v37  ;;  %v10418_v11 = vpop.f32.mrb[50].mxu1 }
 0x302   :  { %v11528_v19 = vpop.eup %11527  ;;  %7831 = vst.msk [vmem:[%s15753_s3 + $0x158] sm:$0xff] %vm7787_vm3, %v11526_v4  ;;  %v7707_v56 = vadd.f32 %v10978_v13, %v15404_v37  ;;  %v10834_v35 = vpop.f32.mrb[50].mxu0 }
 0x303   :  { %7830 = vst.msk [vmem:[%s15753_s3 + $0x150] sm:$0xff] %vm7787_vm3, %v11528_v19  ;;  %11537 = vtanh.f32 %v7708_v61  ;;  %v10979_v38 = vadd.f32 %v10834_v35, %v10418_v11  ;;  %v4026_v33 = vpop.f32.mrb[51].mxu1  ;;  %v7519_v62 = vpop.f32.mrb[51].mxu0 }
 0x304   :  { %11539 = vtanh.f32 %v7707_v56  ;;  %v10980_v42 = vadd.f32 %v7519_v62, %v4026_v33 }
 0x305   :  { %v11530_v16 = vpop.eup %11529  ;;  %v7710_v3 = vadd.f32 %v10979_v38, %v15404_v37  ;;  %v10421_v54 = vpop.f32.mrb[52].mxu1 }
 0x306   :  { %v11532_v49 = vpop.eup %11531  ;;  %7833 = vst.msk [vmem:[%s15753_s3 + $0x168] sm:$0xff] %vm7787_vm3, %v11530_v16  ;;  %v7709_v29 = vadd.f32 %v10980_v42, %v15404_v37  ;;  %v10837_v47 = vpop.f32.mrb[52].mxu0 }
 0x307   :  { %7832 = vst.msk [vmem:[%s15753_s3 + $0x160] sm:$0xff] %vm7787_vm3, %v11532_v49  ;;  %11541 = vtanh.f32 %v7710_v3  ;;  %v10981_v63 = vadd.f32 %v10837_v47, %v10421_v54  ;;  %v4036_v55 = vpop.f32.mrb[53].mxu1  ;;  %v7529_v2 = vpop.f32.mrb[53].mxu0 }
 0x308   :  { %11543 = vtanh.f32 %v7709_v29  ;;  %v10982_v25 = vadd.f32 %v7529_v2, %v4036_v55 }
 0x309   :  { %v11534_v36 = vpop.eup %11533  ;;  %v7712_v60 = vadd.f32 %v10981_v63, %v15404_v37  ;;  %v10424_v41 = vpop.f32.mrb[54].mxu1 }
 0x30a   :  { %v11536_v20 = vpop.eup %11535  ;;  %7835 = vst.msk [vmem:[%s15753_s3 + $0x178] sm:$0xff] %vm7787_vm3, %v11534_v36  ;;  %v7711_v5 = vadd.f32 %v10982_v25, %v15404_v37  ;;  %v10840_v7 = vpop.f32.mrb[54].mxu0 }
 0x30b   :  { %7834 = vst.msk [vmem:[%s15753_s3 + $0x170] sm:$0xff] %vm7787_vm3, %v11536_v20  ;;  %11545 = vtanh.f32 %v7712_v60  ;;  %v10983_v40 = vadd.f32 %v10840_v7, %v10424_v41  ;;  %v4046_v48 = vpop.f32.mrb[55].mxu1  ;;  %v7539_v31 = vpop.f32.mrb[55].mxu0 }
 0x30c   :  { %11547 = vtanh.f32 %v7711_v5  ;;  %v10984_v22 = vadd.f32 %v7539_v31, %v4046_v48 }
 0x30d   :  { %v11538_v44 = vpop.eup %11537  ;;  %v7714_v32 = vadd.f32 %v10983_v40, %v15404_v37  ;;  %v10427_v43 = vpop.f32.mrb[56].mxu1 }
 0x30e   :  { %v11540_v28 = vpop.eup %11539  ;;  %7837 = vst.msk [vmem:[%s15753_s3 + $0x188] sm:$0xff] %vm7787_vm3, %v11538_v44  ;;  %v7713_v6 = vadd.f32 %v10984_v22, %v15404_v37  ;;  %v10843_v24 = vpop.f32.mrb[56].mxu0 }
 0x30f   :  { %7836 = vst.msk [vmem:[%s15753_s3 + $0x180] sm:$0xff] %vm7787_vm3, %v11540_v28  ;;  %11549 = vtanh.f32 %v7714_v32  ;;  %v10985_v21 = vadd.f32 %v10843_v24, %v10427_v43  ;;  %v4056_v30 = vpop.f32.mrb[57].mxu1  ;;  %v7549_v39 = vpop.f32.mrb[57].mxu0 }
 0x310   :  { %11551 = vtanh.f32 %v7713_v6  ;;  %v10986_v53 = vadd.f32 %v7549_v39, %v4056_v30 }
 0x311   :  { %v11542_v52 = vpop.eup %11541  ;;  %v7716_v0 = vadd.f32 %v10985_v21, %v15404_v37  ;;  %v10430_v57 = vpop.f32.mrb[58].mxu1 }
 0x312   :  { %v11544_v10 = vpop.eup %11543  ;;  %7839 = vst.msk [vmem:[%s15753_s3 + $0x198] sm:$0xff] %vm7787_vm3, %v11542_v52  ;;  %v7715_v1 = vadd.f32 %v10986_v53, %v15404_v37  ;;  %v10846_v18 = vpop.f32.mrb[58].mxu0 }
 0x313   :  { %7838 = vst.msk [vmem:[%s15753_s3 + $0x190] sm:$0xff] %vm7787_vm3, %v11544_v10  ;;  %11553 = vtanh.f32 %v7716_v0  ;;  %v10987_v27 = vadd.f32 %v10846_v18, %v10430_v57  ;;  %v4066_v12 = vpop.f32.mrb[59].mxu1  ;;  %v7559_v45 = vpop.f32.mrb[59].mxu0 }
 0x314   :  { %11555 = vtanh.f32 %v7715_v1  ;;  %v10988_v15 = vadd.f32 %v7559_v45, %v4066_v12 }
 0x315   :  { %v11546_v14 = vpop.eup %11545  ;;  %v7718_v17 = vadd.f32 %v10987_v27, %v15404_v37  ;;  %v10433_v46 = vpop.f32.mrb[60].mxu1 }
 0x316   :  { %v11548_v50 = vpop.eup %11547  ;;  %7841 = vst.msk [vmem:[%s15753_s3 + $0x1a8] sm:$0xff] %vm7787_vm3, %v11546_v14  ;;  %v7717_v58 = vadd.f32 %v10988_v15, %v15404_v37  ;;  %v10849_v8 = vpop.f32.mrb[60].mxu0 }
 0x317   :  { %7840 = vst.msk [vmem:[%s15753_s3 + $0x1a0] sm:$0xff] %vm7787_vm3, %v11548_v50  ;;  %11557 = vtanh.f32 %v7718_v17  ;;  %v10989_v59 = vadd.f32 %v10849_v8, %v10433_v46  ;;  %v4076_v26 = vpop.f32.mrb[61].mxu1  ;;  %v7569_v34 = vpop.f32.mrb[61].mxu0 }
 0x318   :  { %11559 = vtanh.f32 %v7717_v58  ;;  %v10990_v51 = vadd.f32 %v7569_v34, %v4076_v26 }
 0x319   :  { %v11550_v9 = vpop.eup %11549  ;;  %v7720_v23 = vadd.f32 %v10989_v59, %v15404_v37  ;;  %v10436_v61 = vpop.f32.mrb[62].mxu1 }
 0x31a   :  { %v11552_v13 = vpop.eup %11551  ;;  %7843 = vst.msk [vmem:[%s15753_s3 + $0x1b8] sm:$0xff] %vm7787_vm3, %v11550_v9  ;;  %v7719_v4 = vadd.f32 %v10990_v51, %v15404_v37  ;;  %v10852_v19 = vpop.f32.mrb[62].mxu0 }
 0x31b   :  { %7842 = vst.msk [vmem:[%s15753_s3 + $0x1b0] sm:$0xff] %vm7787_vm3, %v11552_v13  ;;  %11561 = vtanh.f32 %v7720_v23  ;;  %v10991_v56 = vadd.f32 %v10852_v19, %v10436_v61  ;;  %v4086_v11 = vpop.f32.mrb[63].mxu1  ;;  %v7579_v35 = vpop.f32.mrb[63].mxu0 }
 0x31c   :  { %11563 = vtanh.f32 %v7719_v4  ;;  %v10992_v38 = vadd.f32 %v7579_v35, %v4086_v11 }
 0x31d   :  { %v11554_v33 = vpop.eup %11553  ;;  %v7722_v62 = vadd.f32 %v10991_v56, %v15404_v37 }
 0x31e   :  { %v11556_v42 = vpop.eup %11555  ;;  %7845 = vst.msk [vmem:[%s15753_s3 + $0x1c8] sm:$0xff] %vm7787_vm3, %v11554_v33  ;;  %v7721_v16 = vadd.f32 %v10992_v38, %v15404_v37 }
 0x31f   :  { %7844 = vst.msk [vmem:[%s15753_s3 + $0x1c0] sm:$0xff] %vm7787_vm3, %v11556_v42  ;;  %11565 = vtanh.f32 %v7722_v62 }
 0x320   :  { %11567 = vtanh.f32 %v7721_v16 }
 0x321   :  { %v11558_v3 = vpop.eup %11557 }
 0x322   :  { %v11560_v49 = vpop.eup %11559  ;;  %7847 = vst.msk [vmem:[%s15753_s3 + $0x1d8] sm:$0xff] %vm7787_vm3, %v11558_v3 }
 0x323   :  { %7846 = vst.msk [vmem:[%s15753_s3 + $0x1d0] sm:$0xff] %vm7787_vm3, %v11560_v49 }
 0x325   :  { %v11562_v37 = vpop.eup %11561 }
 0x326   :  { %v11564_v29 = vpop.eup %11563  ;;  %7849 = vst.msk [vmem:[%s15753_s3 + $0x1e8] sm:$0xff] %vm7787_vm3, %v11562_v37 }
 0x327   :  { %7848 = vst.msk [vmem:[%s15753_s3 + $0x1e0] sm:$0xff] %vm7787_vm3, %v11564_v29 }
 0x329   :  { %v11566_v54 = vpop.eup %11565 }
 0x32a   :  { %v11568_v47 = vpop.eup %11567  ;;  %7851 = vst.msk [vmem:[%s15753_s3 + $0x1f8] sm:$0xff] %vm7787_vm3, %v11566_v54 }
 0x32b   :  { %7850 = vst.msk [vmem:[%s15753_s3 + $0x1f0] sm:$0xff] %vm7787_vm3, %v11568_v47 }

</bundles_post_ra>
